<compile_context>
chip_gen: v5e
topology: v5e:2x2
jax: 0.10.0
libtpu: 0.0.40
codegen_flags: <defaults>
</compile_context>

<pallas_src>
import numpy as np
import jax
import jax.numpy as jnp
from jax.experimental import pallas as pl
from jax.experimental.pallas import tpu as pltpu


# ----------------------------------------------------------------------------
# Fused kernel factory (static shapes closed over).
# ----------------------------------------------------------------------------
def _make_kernel(H, W, Cin, C1, C2, C3, C4, GOUT, RPB):
    assert H % RPB == 0 and H % 2 == 0 and W % 2 == 0 and W % 8 == 0
    NBLK = H // RPB
    h, w = H // 2, W // 2

    def kernel(xpad_ref, xs2d_ref,
               w1_ref, b1_ref, w2_ref, b2_ref, w3_ref, b3_ref,
               wtr_ref, btr_ref, w4g_ref, b4g_ref, wfg_ref, bfg_ref,
               out_ref,
               pad1_ref, pad2_ref, x3_ref, mh_ref, pooled_ref):

        def conv3x3_relu(src_ref, w_ref, b_ref, dst_ref, off):
            # src_ref: (1, H+2, W+2, cin) zero-padded input (borders are zero)
            # w_ref:   (3, 3, cin, cout) HWIO
            # dst_ref: written at [:, off:off+H, off:off+W, :] (relu'd output)
            cin = src_ref.shape[-1]
            cout = w_ref.shape[-1]
            m = RPB * W
            for rb in range(NBLK):
                r0 = rb * RPB
                acc = jnp.zeros((m, cout), jnp.float32) + b_ref[...]
                for dy in range(3):
                    for dx in range(3):
                        patch = src_ref[:, r0 + dy:r0 + dy + RPB, dx:dx + W, :]
                        acc = acc + jnp.dot(patch.reshape(m, cin), w_ref[dy, dx],
                                            preferred_element_type=jnp.float32)
                dst_ref[:, off + r0:off + r0 + RPB, off:off + W, :] = (
                    jnp.maximum(acc, 0.0).reshape(1, RPB, W, cout))

        # Zero the padded scratches once (only the 1-px border must stay zero;
        # the interior is fully overwritten before it is read).
        pad1_ref[...] = jnp.zeros_like(pad1_ref)
        pad2_ref[...] = jnp.zeros_like(pad2_ref)

        # conv1 -> relu, conv2 -> relu, conv3 -> relu
        conv3x3_relu(xpad_ref, w1_ref, b1_ref, pad1_ref, 1)
        conv3x3_relu(pad1_ref, w2_ref, b2_ref, pad2_ref, 1)
        conv3x3_relu(pad2_ref, w3_ref, b3_ref, x3_ref, 0)

        # 2x2 max pool (stride 2): H-pair max, then W-pair max.
        for p in range(h):
            mh_ref[:, p:p + 1, :, :] = jnp.maximum(
                x3_ref[:, 2 * p:2 * p + 1, :, :],
                x3_ref[:, 2 * p + 1:2 * p + 2, :, :])
        for q in range(w):
            pooled_ref[:, :, q:q + 1, :] = jnp.maximum(
                mh_ref[:, :, 2 * q:2 * q + 1, :],
                mh_ref[:, :, 2 * q + 1:2 * q + 2, :])

        # ConvTranspose2d(C3, C4, 2, stride=2) + ReLU, grouped (di, dj, co) lanes.
        pooled2d = pooled_ref[...].reshape(h * w, C3)            # rows = (p, q)
        up = jnp.dot(pooled2d, wtr_ref[...],
                     preferred_element_type=jnp.float32) + btr_ref[...]
        up = jnp.maximum(up, 0.0)                                # (h*w, 4*C4)

        # 1x1 skip conv on the input (space-to-depth grouped) + ReLU.
        skip = jnp.dot(xs2d_ref[...], w4g_ref[...],
                       preferred_element_type=jnp.float32) + b4g_ref[...]
        skip = jnp.maximum(skip, 0.0)                            # (h*w, 4*C4)

        feat = up + skip

        # fc2 per-pixel linear, block-diagonal grouped, lane-dense output.
        out_ref[...] = jnp.dot(feat, wfg_ref[...],
                               preferred_element_type=jnp.float32) + bfg_ref[...]

    return kernel


# ----------------------------------------------------------------------------
# Wrapper: layout plumbing (transposes, padding, grouped weights) in XLA,
# all compute inside one pallas_call.
# ----------------------------------------------------------------------------
def segmentation_forward(x_nchw, params):
    B, Cin, H, W = x_nchw.shape
    assert H % 8 == 0 and W % 8 == 0, "spatial dims must be multiples of 8"

    C1 = params["w1"].shape[-1]       # 32
    C2 = params["w2"].shape[-1]       # 64
    C3 = params["w3"].shape[-1]       # 128
    C4 = params["wt"].shape[1]        # 64
    nout = params["wf"].shape[1]
    GOUT = ((nout + 31) // 32) * 32   # per-group padded fc2 out (4*GOUT lanes)
    h, w = H // 2, W // 2
    RPB = 8                           # conv row-block size (vreg-friendly M)

    # NHWC input, spatially zero-padded (done once, outside the kernel).
    x_nhwc = jnp.transpose(x_nchw, (0, 2, 3, 1))
    x_pad = jnp.pad(x_nhwc, ((0, 0), (1, 1), (1, 1), (0, 0)))
    # Space-to-depth view of the input for the grouped 1x1 skip conv.
    x_s2d = (x_nhwc.reshape(B, h, 2, w, 2, Cin)
             .transpose(0, 1, 3, 2, 4, 5)
             .reshape(B * h * w, 4 * Cin))

    # Grouped / padded weights (built once in XLA, free relative to the kernel).
    wtr = jnp.transpose(params["wt"], (0, 2, 3, 1)).reshape(C3, 4 * C4)
    btr = jnp.tile(params["bt"], 4)[None, :]
    eye4 = jnp.eye(4, dtype=jnp.float32)
    w4g = jnp.kron(eye4, params["w4"])                       # (4*Cin, 4*C4)
    b4g = jnp.tile(params["b4"], 4)[None, :]
    wf_p = jnp.pad(params["wf"], ((0, 0), (0, GOUT - nout)))
    bf_p = jnp.pad(params["bf"], (0, GOUT - nout))
    wfg = jnp.kron(eye4, wf_p)                               # (4*C4, 4*GOUT)
    bfg = jnp.tile(bf_p, 4)[None, :]

    b1 = params["b1"][None, :]
    b2 = params["b2"][None, :]
    b3 = params["b3"][None, :]

    kernel = _make_kernel(H, W, Cin, C1, C2, C3, C4, GOUT, RPB)

    inputs = (x_pad, x_s2d,
              params["w1"], b1, params["w2"], b2, params["w3"], b3,
              wtr, btr, w4g, b4g, wfg, bfg)

    def _whole(a):
        nd = a.ndim
        return pl.BlockSpec(a.shape, lambda b, _nd=nd: (0,) * _nd)

    in_specs = [
        pl.BlockSpec((1, H + 2, W + 2, Cin), lambda b: (b, 0, 0, 0)),  # x_pad
        pl.BlockSpec((h * w, 4 * Cin), lambda b: (b, 0)),              # x_s2d
    ] + [_whole(a) for a in inputs[2:]]

    out2d = pl.pallas_call(
        kernel,
        out_shape=jax.ShapeDtypeStruct((B * h * w, 4 * GOUT), jnp.float32),
        grid=(B,),
        in_specs=in_specs,
        out_specs=pl.BlockSpec((h * w, 4 * GOUT), lambda b: (b, 0)),
        scratch_shapes=[
            pltpu.VMEM((1, H + 2, W + 2, C1), jnp.float32),   # padded conv1 out
            pltpu.VMEM((1, H + 2, W + 2, C2), jnp.float32),   # padded conv2 out
            pltpu.VMEM((1, H, W, C3), jnp.float32),           # conv3 out
            pltpu.VMEM((1, h, W, C3), jnp.float32),           # pool (H-reduced)
            pltpu.VMEM((1, h, w, C3), jnp.float32),           # pooled
        ],
        compiler_params=pltpu.CompilerParams(
            dimension_semantics=("parallel",)),               # megacore over B
    )(*inputs)

    # Undo the grouped (di, dj, channel) lane order -> (B, out_channels, H, W).
    out = (out2d.reshape(B, h, w, 2, 2, GOUT)
           .transpose(0, 1, 3, 2, 4, 5)
           .reshape(B, H, W, GOUT)[..., :nout])
    return jnp.transpose(out, (0, 3, 1, 2))


# ----------------------------------------------------------------------------
# Pure-JAX reference (silent correctness check).
# ----------------------------------------------------------------------------
def segmentation_reference(x_nchw, params):
    P = jax.lax.Precision.HIGHEST
    x = jnp.transpose(x_nchw, (0, 2, 3, 1))

    def conv(a, wgt, b):
        return jax.lax.conv_general_dilated(
            a, wgt, (1, 1), "SAME",
            dimension_numbers=("NHWC", "HWIO", "NHWC"), precision=P) + b

    a = jax.nn.relu(conv(x, params["w1"], params["b1"]))
    a = jax.nn.relu(conv(a, params["w2"], params["b2"]))
    a = jax.nn.relu(conv(a, params["w3"], params["b3"]))
    B, H, W, C = a.shape
    a = a.reshape(B, H // 2, 2, W // 2, 2, C).max(axis=(2, 4))
    # ConvTranspose2d(128, 64, 2, stride=2): weight (Cin, Cout, kh, kw).
    up = jnp.einsum("bpqi,iokl->bpkqlo", a, params["wt"], precision=P)
    up = up.reshape(B, H, W, params["wt"].shape[1]) + params["bt"]
    up = jax.nn.relu(up)
    skip = jax.nn.relu(
        jnp.einsum("bhwc,cd->bhwd", x, params["w4"], precision=P) + params["b4"])
    feat = up + skip
    out = jnp.einsum("bhwc,cn->bhwn", feat, params["wf"], precision=P) + params["bf"]
    return jnp.transpose(out, (0, 3, 1, 2))


def init_params(key, in_channels, out_channels):
    ks = jax.random.split(key, 12)
    n = jax.random.normal
    return {
        "w1": 0.1 * n(ks[0], (3, 3, in_channels, 32), jnp.float32),
        "b1": 0.1 * n(ks[1], (32,), jnp.float32),
        "w2": 0.1 * n(ks[2], (3, 3, 32, 64), jnp.float32),
        "b2": 0.1 * n(ks[3], (64,), jnp.float32),
        "w3": 0.1 * n(ks[4], (3, 3, 64, 128), jnp.float32),
        "b3": 0.1 * n(ks[5], (128,), jnp.float32),
        "wt": 0.1 * n(ks[6], (128, 64, 2, 2), jnp.float32),   # ConvTranspose2d
        "bt": 0.1 * n(ks[7], (64,), jnp.float32),
        "w4": 0.1 * n(ks[8], (in_channels, 64), jnp.float32),  # 1x1 conv
        "b4": 0.1 * n(ks[9], (64,), jnp.float32),
        "wf": 0.1 * n(ks[10], (64, out_channels), jnp.float32),  # fc2
        "bf": 0.1 * n(ks[11], (out_channels,), jnp.float32),
    }


if __name__ == "__main__":
    B, Cin, H, W = 2, 4, 16, 16
    out_channels = 8

    key = jax.random.PRNGKey(0)
    kx, kp = jax.random.split(key)
    x = jax.random.normal(kx, (B, Cin, H, W), jnp.float32)
    params = init_params(kp, Cin, out_channels)

    out = segmentation_forward(x, params)
    out = jax.block_until_ready(out)
    assert out.shape == (B, out_channels, H, W)

    ref = segmentation_reference(x, params)
    ref = jax.block_until_ready(ref)
    np.testing.assert_allclose(np.asarray(out), np.asarray(ref),
                               rtol=2e-3, atol=2e-3)

    print("KERNEL_OK")
</pallas_src>

<mosaic_0001>
module attributes {stable_mosaic.version = 11 : i64} {
  func.func @kernel(%arg0: i32, %arg1: memref<1x18x18x4xf32, #tpu.memory_space<vmem>>, %arg2: memref<64x16xf32, #tpu.memory_space<vmem>>, %arg3: memref<3x3x4x32xf32, #tpu.memory_space<vmem>>, %arg4: memref<1x32xf32, #tpu.memory_space<vmem>>, %arg5: memref<3x3x32x64xf32, #tpu.memory_space<vmem>>, %arg6: memref<1x64xf32, #tpu.memory_space<vmem>>, %arg7: memref<3x3x64x128xf32, #tpu.memory_space<vmem>>, %arg8: memref<1x128xf32, #tpu.memory_space<vmem>>, %arg9: memref<128x256xf32, #tpu.memory_space<vmem>>, %arg10: memref<1x256xf32, #tpu.memory_space<vmem>>, %arg11: memref<16x256xf32, #tpu.memory_space<vmem>>, %arg12: memref<1x256xf32, #tpu.memory_space<vmem>>, %arg13: memref<256x128xf32, #tpu.memory_space<vmem>>, %arg14: memref<1x128xf32, #tpu.memory_space<vmem>>, %arg15: memref<64x128xf32, #tpu.memory_space<vmem>>, %arg16: memref<1x18x18x32xf32, #tpu.memory_space<vmem>>, %arg17: memref<1x18x18x64xf32, #tpu.memory_space<vmem>>, %arg18: memref<1x16x16x128xf32, #tpu.memory_space<vmem>>, %arg19: memref<1x8x16x128xf32, #tpu.memory_space<vmem>>, %arg20: memref<1x8x8x128xf32, #tpu.memory_space<vmem>>) attributes {dimension_semantics = [#tpu.dimension_semantics<parallel>], iteration_bounds = array<i64: 2>, scalar_prefetch = 0 : i64, scratch_operands = 5 : i64, tpu.core_type = #tpu.core_type<tc>, window_params = [{transform_indices = @transform_0, window_bounds = array<i64: 1, 18, 18, 4>}, {transform_indices = @transform_1, window_bounds = array<i64: 64, 16>}, {pipeline_mode = #tpu.pipeline_mode<synchronous>, transform_indices = @transform_2, window_bounds = array<i64: 3, 3, 4, 32>}, {pipeline_mode = #tpu.pipeline_mode<synchronous>, transform_indices = @transform_3, window_bounds = array<i64: 1, 32>}, {pipeline_mode = #tpu.pipeline_mode<synchronous>, transform_indices = @transform_4, window_bounds = array<i64: 3, 3, 32, 64>}, {pipeline_mode = #tpu.pipeline_mode<synchronous>, transform_indices = @transform_5, window_bounds = array<i64: 1, 64>}, {pipeline_mode = #tpu.pipeline_mode<synchronous>, transform_indices = @transform_6, window_bounds = array<i64: 3, 3, 64, 128>}, {pipeline_mode = #tpu.pipeline_mode<synchronous>, transform_indices = @transform_7, window_bounds = array<i64: 1, 128>}, {pipeline_mode = #tpu.pipeline_mode<synchronous>, transform_indices = @transform_8, window_bounds = array<i64: 128, 256>}, {pipeline_mode = #tpu.pipeline_mode<synchronous>, transform_indices = @transform_9, window_bounds = array<i64: 1, 256>}, {pipeline_mode = #tpu.pipeline_mode<synchronous>, transform_indices = @transform_10, window_bounds = array<i64: 16, 256>}, {pipeline_mode = #tpu.pipeline_mode<synchronous>, transform_indices = @transform_11, window_bounds = array<i64: 1, 256>}, {pipeline_mode = #tpu.pipeline_mode<synchronous>, transform_indices = @transform_12, window_bounds = array<i64: 256, 128>}, {pipeline_mode = #tpu.pipeline_mode<synchronous>, transform_indices = @transform_13, window_bounds = array<i64: 1, 128>}, {transform_indices = @transform_14, window_bounds = array<i64: 64, 128>}]} {
    %cst = arith.constant 0.000000e+00 : f32
    %0 = vector.broadcast %cst : f32 to vector<1x18x18x32xf32>
    %c0 = arith.constant 0 : index
    %c0_0 = arith.constant 0 : index
    %c0_1 = arith.constant 0 : index
    %c0_2 = arith.constant 0 : index
    %1 = vector.load %arg16[%c0, %c0_0, %c0_1, %c0_2] : memref<1x18x18x32xf32, #tpu.memory_space<vmem>>, vector<1x18x18x32xf32>
    tpu.vector_store %arg16[%c0, %c0_0, %c0_1, %c0_2], %0 {strides = array<i32>} : memref<1x18x18x32xf32, #tpu.memory_space<vmem>>, vector<1x18x18x32xf32>,
    %cst_3 = arith.constant 0.000000e+00 : f32
    %2 = vector.broadcast %cst_3 : f32 to vector<1x18x18x64xf32>
    %c0_4 = arith.constant 0 : index
    %c0_5 = arith.constant 0 : index
    %c0_6 = arith.constant 0 : index
    %c0_7 = arith.constant 0 : index
    %3 = vector.load %arg17[%c0_4, %c0_5, %c0_6, %c0_7] : memref<1x18x18x64xf32, #tpu.memory_space<vmem>>, vector<1x18x18x64xf32>
    tpu.vector_store %arg17[%c0_4, %c0_5, %c0_6, %c0_7], %2 {strides = array<i32>} : memref<1x18x18x64xf32, #tpu.memory_space<vmem>>, vector<1x18x18x64xf32>,
    %cst_8 = arith.constant 0.000000e+00 : f32
    %4 = vector.broadcast %cst_8 : f32 to vector<128x32xf32>
    %c0_9 = arith.constant 0 : index
    %c0_10 = arith.constant 0 : index
    %5 = vector.load %arg4[%c0_9, %c0_10] : memref<1x32xf32, #tpu.memory_space<vmem>>, vector<1x32xf32>
    %6 = vector.broadcast %5 : vector<1x32xf32> to vector<128x32xf32>
    %7 = arith.addf %4, %6 : vector<128x32xf32>
    %c0_11 = arith.constant 0 : index
    %c0_12 = arith.constant 0 : index
    %c0_13 = arith.constant 0 : index
    %c0_14 = arith.constant 0 : index
    %8 = vector.load %arg1[%c0_11, %c0_12, %c0_13, %c0_14] : memref<1x18x18x4xf32, #tpu.memory_space<vmem>>, vector<1x8x16x4xf32>
    %9 = vector.shape_cast %8 : vector<1x8x16x4xf32> to vector<128x4xf32>
    %c0_15 = arith.constant 0 : index
    %c0_16 = arith.constant 0 : index
    %c0_17 = arith.constant 0 : index
    %c0_18 = arith.constant 0 : index
    %10 = vector.load %arg3[%c0_15, %c0_16, %c0_17, %c0_18] : memref<3x3x4x32xf32, #tpu.memory_space<vmem>>, vector<1x1x4x32xf32>
    %11 = vector.shape_cast %10 : vector<1x1x4x32xf32> to vector<4x32xf32>
    %cst_19 = arith.constant dense<0.000000e+00> : vector<128x32xf32>
    %12 = tpu.matmul %9, %11, %cst_19 {dimension_numbers = #tpu.dot_dimension_numbers<[1], [0], [0], [1], [0, 0, 1, 1], [], []>} : vector<128x4xf32>, vector<4x32xf32>, vector<128x32xf32> -> vector<128x32xf32>
    %13 = arith.addf %7, %12 : vector<128x32xf32>
    %c0_20 = arith.constant 0 : index
    %c0_21 = arith.constant 0 : index
    %c1 = arith.constant 1 : index
    %c0_22 = arith.constant 0 : index
    %14 = vector.load %arg1[%c0_20, %c0_21, %c1, %c0_22] : memref<1x18x18x4xf32, #tpu.memory_space<vmem>>, vector<1x8x16x4xf32>
    %15 = vector.shape_cast %14 : vector<1x8x16x4xf32> to vector<128x4xf32>
    %c0_23 = arith.constant 0 : index
    %c1_24 = arith.constant 1 : index
    %c0_25 = arith.constant 0 : index
    %c0_26 = arith.constant 0 : index
    %16 = vector.load %arg3[%c0_23, %c1_24, %c0_25, %c0_26] : memref<3x3x4x32xf32, #tpu.memory_space<vmem>>, vector<1x1x4x32xf32>
    %17 = vector.shape_cast %16 : vector<1x1x4x32xf32> to vector<4x32xf32>
    %cst_27 = arith.constant dense<0.000000e+00> : vector<128x32xf32>
    %18 = tpu.matmul %15, %17, %cst_27 {dimension_numbers = #tpu.dot_dimension_numbers<[1], [0], [0], [1], [0, 0, 1, 1], [], []>} : vector<128x4xf32>, vector<4x32xf32>, vector<128x32xf32> -> vector<128x32xf32>
    %19 = arith.addf %13, %18 : vector<128x32xf32>
    %c0_28 = arith.constant 0 : index
    %c0_29 = arith.constant 0 : index
    %c2 = arith.constant 2 : index
    %c0_30 = arith.constant 0 : index
    %20 = vector.load %arg1[%c0_28, %c0_29, %c2, %c0_30] : memref<1x18x18x4xf32, #tpu.memory_space<vmem>>, vector<1x8x16x4xf32>
    %21 = vector.shape_cast %20 : vector<1x8x16x4xf32> to vector<128x4xf32>
    %c0_31 = arith.constant 0 : index
    %c2_32 = arith.constant 2 : index
    %c0_33 = arith.constant 0 : index
    %c0_34 = arith.constant 0 : index
    %22 = vector.load %arg3[%c0_31, %c2_32, %c0_33, %c0_34] : memref<3x3x4x32xf32, #tpu.memory_space<vmem>>, vector<1x1x4x32xf32>
    %23 = vector.shape_cast %22 : vector<1x1x4x32xf32> to vector<4x32xf32>
    %cst_35 = arith.constant dense<0.000000e+00> : vector<128x32xf32>
    %24 = tpu.matmul %21, %23, %cst_35 {dimension_numbers = #tpu.dot_dimension_numbers<[1], [0], [0], [1], [0, 0, 1, 1], [], []>} : vector<128x4xf32>, vector<4x32xf32>, vector<128x32xf32> -> vector<128x32xf32>
    %25 = arith.addf %19, %24 : vector<128x32xf32>
    %c0_36 = arith.constant 0 : index
    %c1_37 = arith.constant 1 : index
    %c0_38 = arith.constant 0 : index
    %c0_39 = arith.constant 0 : index
    %26 = vector.load %arg1[%c0_36, %c1_37, %c0_38, %c0_39] : memref<1x18x18x4xf32, #tpu.memory_space<vmem>>, vector<1x8x16x4xf32>
    %27 = vector.shape_cast %26 : vector<1x8x16x4xf32> to vector<128x4xf32>
    %c1_40 = arith.constant 1 : index
    %c0_41 = arith.constant 0 : index
    %c0_42 = arith.constant 0 : index
    %c0_43 = arith.constant 0 : index
    %28 = vector.load %arg3[%c1_40, %c0_41, %c0_42, %c0_43] : memref<3x3x4x32xf32, #tpu.memory_space<vmem>>, vector<1x1x4x32xf32>
    %29 = vector.shape_cast %28 : vector<1x1x4x32xf32> to vector<4x32xf32>
    %cst_44 = arith.constant dense<0.000000e+00> : vector<128x32xf32>
    %30 = tpu.matmul %27, %29, %cst_44 {dimension_numbers = #tpu.dot_dimension_numbers<[1], [0], [0], [1], [0, 0, 1, 1], [], []>} : vector<128x4xf32>, vector<4x32xf32>, vector<128x32xf32> -> vector<128x32xf32>
    %31 = arith.addf %25, %30 : vector<128x32xf32>
    %c0_45 = arith.constant 0 : index
    %c1_46 = arith.constant 1 : index
    %c1_47 = arith.constant 1 : index
    %c0_48 = arith.constant 0 : index
    %32 = vector.load %arg1[%c0_45, %c1_46, %c1_47, %c0_48] : memref<1x18x18x4xf32, #tpu.memory_space<vmem>>, vector<1x8x16x4xf32>
    %33 = vector.shape_cast %32 : vector<1x8x16x4xf32> to vector<128x4xf32>
    %c1_49 = arith.constant 1 : index
    %c1_50 = arith.constant 1 : index
    %c0_51 = arith.constant 0 : index
    %c0_52 = arith.constant 0 : index
    %34 = vector.load %arg3[%c1_49, %c1_50, %c0_51, %c0_52] : memref<3x3x4x32xf32, #tpu.memory_space<vmem>>, vector<1x1x4x32xf32>
    %35 = vector.shape_cast %34 : vector<1x1x4x32xf32> to vector<4x32xf32>
    %cst_53 = arith.constant dense<0.000000e+00> : vector<128x32xf32>
    %36 = tpu.matmul %33, %35, %cst_53 {dimension_numbers = #tpu.dot_dimension_numbers<[1], [0], [0], [1], [0, 0, 1, 1], [], []>} : vector<128x4xf32>, vector<4x32xf32>, vector<128x32xf32> -> vector<128x32xf32>
    %37 = arith.addf %31, %36 : vector<128x32xf32>
    %c0_54 = arith.constant 0 : index
    %c1_55 = arith.constant 1 : index
    %c2_56 = arith.constant 2 : index
    %c0_57 = arith.constant 0 : index
    %38 = vector.load %arg1[%c0_54, %c1_55, %c2_56, %c0_57] : memref<1x18x18x4xf32, #tpu.memory_space<vmem>>, vector<1x8x16x4xf32>
    %39 = vector.shape_cast %38 : vector<1x8x16x4xf32> to vector<128x4xf32>
    %c1_58 = arith.constant 1 : index
    %c2_59 = arith.constant 2 : index
    %c0_60 = arith.constant 0 : index
    %c0_61 = arith.constant 0 : index
    %40 = vector.load %arg3[%c1_58, %c2_59, %c0_60, %c0_61] : memref<3x3x4x32xf32, #tpu.memory_space<vmem>>, vector<1x1x4x32xf32>
    %41 = vector.shape_cast %40 : vector<1x1x4x32xf32> to vector<4x32xf32>
    %cst_62 = arith.constant dense<0.000000e+00> : vector<128x32xf32>
    %42 = tpu.matmul %39, %41, %cst_62 {dimension_numbers = #tpu.dot_dimension_numbers<[1], [0], [0], [1], [0, 0, 1, 1], [], []>} : vector<128x4xf32>, vector<4x32xf32>, vector<128x32xf32> -> vector<128x32xf32>
    %43 = arith.addf %37, %42 : vector<128x32xf32>
    %c0_63 = arith.constant 0 : index
    %c2_64 = arith.constant 2 : index
    %c0_65 = arith.constant 0 : index
    %c0_66 = arith.constant 0 : index
    %44 = vector.load %arg1[%c0_63, %c2_64, %c0_65, %c0_66] : memref<1x18x18x4xf32, #tpu.memory_space<vmem>>, vector<1x8x16x4xf32>
    %45 = vector.shape_cast %44 : vector<1x8x16x4xf32> to vector<128x4xf32>
    %c2_67 = arith.constant 2 : index
    %c0_68 = arith.constant 0 : index
    %c0_69 = arith.constant 0 : index
    %c0_70 = arith.constant 0 : index
    %46 = vector.load %arg3[%c2_67, %c0_68, %c0_69, %c0_70] : memref<3x3x4x32xf32, #tpu.memory_space<vmem>>, vector<1x1x4x32xf32>
    %47 = vector.shape_cast %46 : vector<1x1x4x32xf32> to vector<4x32xf32>
    %cst_71 = arith.constant dense<0.000000e+00> : vector<128x32xf32>
    %48 = tpu.matmul %45, %47, %cst_71 {dimension_numbers = #tpu.dot_dimension_numbers<[1], [0], [0], [1], [0, 0, 1, 1], [], []>} : vector<128x4xf32>, vector<4x32xf32>, vector<128x32xf32> -> vector<128x32xf32>
    %49 = arith.addf %43, %48 : vector<128x32xf32>
    %c0_72 = arith.constant 0 : index
    %c2_73 = arith.constant 2 : index
    %c1_74 = arith.constant 1 : index
    %c0_75 = arith.constant 0 : index
    %50 = vector.load %arg1[%c0_72, %c2_73, %c1_74, %c0_75] : memref<1x18x18x4xf32, #tpu.memory_space<vmem>>, vector<1x8x16x4xf32>
    %51 = vector.shape_cast %50 : vector<1x8x16x4xf32> to vector<128x4xf32>
    %c2_76 = arith.constant 2 : index
    %c1_77 = arith.constant 1 : index
    %c0_78 = arith.constant 0 : index
    %c0_79 = arith.constant 0 : index
    %52 = vector.load %arg3[%c2_76, %c1_77, %c0_78, %c0_79] : memref<3x3x4x32xf32, #tpu.memory_space<vmem>>, vector<1x1x4x32xf32>
    %53 = vector.shape_cast %52 : vector<1x1x4x32xf32> to vector<4x32xf32>
    %cst_80 = arith.constant dense<0.000000e+00> : vector<128x32xf32>
    %54 = tpu.matmul %51, %53, %cst_80 {dimension_numbers = #tpu.dot_dimension_numbers<[1], [0], [0], [1], [0, 0, 1, 1], [], []>} : vector<128x4xf32>, vector<4x32xf32>, vector<128x32xf32> -> vector<128x32xf32>
    %55 = arith.addf %49, %54 : vector<128x32xf32>
    %c0_81 = arith.constant 0 : index
    %c2_82 = arith.constant 2 : index
    %c2_83 = arith.constant 2 : index
    %c0_84 = arith.constant 0 : index
    %56 = vector.load %arg1[%c0_81, %c2_82, %c2_83, %c0_84] : memref<1x18x18x4xf32, #tpu.memory_space<vmem>>, vector<1x8x16x4xf32>
    %57 = vector.shape_cast %56 : vector<1x8x16x4xf32> to vector<128x4xf32>
    %c2_85 = arith.constant 2 : index
    %c2_86 = arith.constant 2 : index
    %c0_87 = arith.constant 0 : index
    %c0_88 = arith.constant 0 : index
    %58 = vector.load %arg3[%c2_85, %c2_86, %c0_87, %c0_88] : memref<3x3x4x32xf32, #tpu.memory_space<vmem>>, vector<1x1x4x32xf32>
    %59 = vector.shape_cast %58 : vector<1x1x4x32xf32> to vector<4x32xf32>
    %cst_89 = arith.constant dense<0.000000e+00> : vector<128x32xf32>
    %60 = tpu.matmul %57, %59, %cst_89 {dimension_numbers = #tpu.dot_dimension_numbers<[1], [0], [0], [1], [0, 0, 1, 1], [], []>} : vector<128x4xf32>, vector<4x32xf32>, vector<128x32xf32> -> vector<128x32xf32>
    %61 = arith.addf %55, %60 : vector<128x32xf32>
    %cst_90 = arith.constant 0.000000e+00 : f32
    %62 = vector.broadcast %cst_90 : f32 to vector<128x32xf32>
    %63 = arith.maximumf %61, %62 : vector<128x32xf32>
    %64 = vector.shape_cast %63 : vector<128x32xf32> to vector<1x8x16x32xf32>
    %c0_91 = arith.constant 0 : index
    %c1_92 = arith.constant 1 : index
    %c1_93 = arith.constant 1 : index
    %c0_94 = arith.constant 0 : index
    %65 = vector.load %arg16[%c0_91, %c1_92, %c1_93, %c0_94] : memref<1x18x18x32xf32, #tpu.memory_space<vmem>>, vector<1x8x16x32xf32>
    tpu.vector_store %arg16[%c0_91, %c1_92, %c1_93, %c0_94], %64 {strides = array<i32>} : memref<1x18x18x32xf32, #tpu.memory_space<vmem>>, vector<1x8x16x32xf32>,
    %cst_95 = arith.constant 0.000000e+00 : f32
    %66 = vector.broadcast %cst_95 : f32 to vector<128x32xf32>
    %c0_96 = arith.constant 0 : index
    %c0_97 = arith.constant 0 : index
    %67 = vector.load %arg4[%c0_96, %c0_97] : memref<1x32xf32, #tpu.memory_space<vmem>>, vector<1x32xf32>
    %68 = vector.broadcast %67 : vector<1x32xf32> to vector<128x32xf32>
    %69 = arith.addf %66, %68 : vector<128x32xf32>
    %c0_98 = arith.constant 0 : index
    %c8 = arith.constant 8 : index
    %c0_99 = arith.constant 0 : index
    %c0_100 = arith.constant 0 : index
    %70 = vector.load %arg1[%c0_98, %c8, %c0_99, %c0_100] : memref<1x18x18x4xf32, #tpu.memory_space<vmem>>, vector<1x8x16x4xf32>
    %71 = vector.shape_cast %70 : vector<1x8x16x4xf32> to vector<128x4xf32>
    %c0_101 = arith.constant 0 : index
    %c0_102 = arith.constant 0 : index
    %c0_103 = arith.constant 0 : index
    %c0_104 = arith.constant 0 : index
    %72 = vector.load %arg3[%c0_101, %c0_102, %c0_103, %c0_104] : memref<3x3x4x32xf32, #tpu.memory_space<vmem>>, vector<1x1x4x32xf32>
    %73 = vector.shape_cast %72 : vector<1x1x4x32xf32> to vector<4x32xf32>
    %cst_105 = arith.constant dense<0.000000e+00> : vector<128x32xf32>
    %74 = tpu.matmul %71, %73, %cst_105 {dimension_numbers = #tpu.dot_dimension_numbers<[1], [0], [0], [1], [0, 0, 1, 1], [], []>} : vector<128x4xf32>, vector<4x32xf32>, vector<128x32xf32> -> vector<128x32xf32>
    %75 = arith.addf %69, %74 : vector<128x32xf32>
    %c0_106 = arith.constant 0 : index
    %c8_107 = arith.constant 8 : index
    %c1_108 = arith.constant 1 : index
    %c0_109 = arith.constant 0 : index
    %76 = vector.load %arg1[%c0_106, %c8_107, %c1_108, %c0_109] : memref<1x18x18x4xf32, #tpu.memory_space<vmem>>, vector<1x8x16x4xf32>
    %77 = vector.shape_cast %76 : vector<1x8x16x4xf32> to vector<128x4xf32>
    %c0_110 = arith.constant 0 : index
    %c1_111 = arith.constant 1 : index
    %c0_112 = arith.constant 0 : index
    %c0_113 = arith.constant 0 : index
    %78 = vector.load %arg3[%c0_110, %c1_111, %c0_112, %c0_113] : memref<3x3x4x32xf32, #tpu.memory_space<vmem>>, vector<1x1x4x32xf32>
    %79 = vector.shape_cast %78 : vector<1x1x4x32xf32> to vector<4x32xf32>
    %cst_114 = arith.constant dense<0.000000e+00> : vector<128x32xf32>
    %80 = tpu.matmul %77, %79, %cst_114 {dimension_numbers = #tpu.dot_dimension_numbers<[1], [0], [0], [1], [0, 0, 1, 1], [], []>} : vector<128x4xf32>, vector<4x32xf32>, vector<128x32xf32> -> vector<128x32xf32>
    %81 = arith.addf %75, %80 : vector<128x32xf32>
    %c0_115 = arith.constant 0 : index
    %c8_116 = arith.constant 8 : index
    %c2_117 = arith.constant 2 : index
    %c0_118 = arith.constant 0 : index
    %82 = vector.load %arg1[%c0_115, %c8_116, %c2_117, %c0_118] : memref<1x18x18x4xf32, #tpu.memory_space<vmem>>, vector<1x8x16x4xf32>
    %83 = vector.shape_cast %82 : vector<1x8x16x4xf32> to vector<128x4xf32>
    %c0_119 = arith.constant 0 : index
    %c2_120 = arith.constant 2 : index
    %c0_121 = arith.constant 0 : index
    %c0_122 = arith.constant 0 : index
    %84 = vector.load %arg3[%c0_119, %c2_120, %c0_121, %c0_122] : memref<3x3x4x32xf32, #tpu.memory_space<vmem>>, vector<1x1x4x32xf32>
    %85 = vector.shape_cast %84 : vector<1x1x4x32xf32> to vector<4x32xf32>
    %cst_123 = arith.constant dense<0.000000e+00> : vector<128x32xf32>
    %86 = tpu.matmul %83, %85, %cst_123 {dimension_numbers = #tpu.dot_dimension_numbers<[1], [0], [0], [1], [0, 0, 1, 1], [], []>} : vector<128x4xf32>, vector<4x32xf32>, vector<128x32xf32> -> vector<128x32xf32>
    %87 = arith.addf %81, %86 : vector<128x32xf32>
    %c0_124 = arith.constant 0 : index
    %c9 = arith.constant 9 : index
    %c0_125 = arith.constant 0 : index
    %c0_126 = arith.constant 0 : index
    %88 = vector.load %arg1[%c0_124, %c9, %c0_125, %c0_126] : memref<1x18x18x4xf32, #tpu.memory_space<vmem>>, vector<1x8x16x4xf32>
    %89 = vector.shape_cast %88 : vector<1x8x16x4xf32> to vector<128x4xf32>
    %c1_127 = arith.constant 1 : index
    %c0_128 = arith.constant 0 : index
    %c0_129 = arith.constant 0 : index
    %c0_130 = arith.constant 0 : index
    %90 = vector.load %arg3[%c1_127, %c0_128, %c0_129, %c0_130] : memref<3x3x4x32xf32, #tpu.memory_space<vmem>>, vector<1x1x4x32xf32>
    %91 = vector.shape_cast %90 : vector<1x1x4x32xf32> to vector<4x32xf32>
    %cst_131 = arith.constant dense<0.000000e+00> : vector<128x32xf32>
    %92 = tpu.matmul %89, %91, %cst_131 {dimension_numbers = #tpu.dot_dimension_numbers<[1], [0], [0], [1], [0, 0, 1, 1], [], []>} : vector<128x4xf32>, vector<4x32xf32>, vector<128x32xf32> -> vector<128x32xf32>
    %93 = arith.addf %87, %92 : vector<128x32xf32>
    %c0_132 = arith.constant 0 : index
    %c9_133 = arith.constant 9 : index
    %c1_134 = arith.constant 1 : index
    %c0_135 = arith.constant 0 : index
    %94 = vector.load %arg1[%c0_132, %c9_133, %c1_134, %c0_135] : memref<1x18x18x4xf32, #tpu.memory_space<vmem>>, vector<1x8x16x4xf32>
    %95 = vector.shape_cast %94 : vector<1x8x16x4xf32> to vector<128x4xf32>
    %c1_136 = arith.constant 1 : index
    %c1_137 = arith.constant 1 : index
    %c0_138 = arith.constant 0 : index
    %c0_139 = arith.constant 0 : index
    %96 = vector.load %arg3[%c1_136, %c1_137, %c0_138, %c0_139] : memref<3x3x4x32xf32, #tpu.memory_space<vmem>>, vector<1x1x4x32xf32>
    %97 = vector.shape_cast %96 : vector<1x1x4x32xf32> to vector<4x32xf32>
    %cst_140 = arith.constant dense<0.000000e+00> : vector<128x32xf32>
    %98 = tpu.matmul %95, %97, %cst_140 {dimension_numbers = #tpu.dot_dimension_numbers<[1], [0], [0], [1], [0, 0, 1, 1], [], []>} : vector<128x4xf32>, vector<4x32xf32>, vector<128x32xf32> -> vector<128x32xf32>
    %99 = arith.addf %93, %98 : vector<128x32xf32>
    %c0_141 = arith.constant 0 : index
    %c9_142 = arith.constant 9 : index
    %c2_143 = arith.constant 2 : index
    %c0_144 = arith.constant 0 : index
    %100 = vector.load %arg1[%c0_141, %c9_142, %c2_143, %c0_144] : memref<1x18x18x4xf32, #tpu.memory_space<vmem>>, vector<1x8x16x4xf32>
    %101 = vector.shape_cast %100 : vector<1x8x16x4xf32> to vector<128x4xf32>
    %c1_145 = arith.constant 1 : index
    %c2_146 = arith.constant 2 : index
    %c0_147 = arith.constant 0 : index
    %c0_148 = arith.constant 0 : index
    %102 = vector.load %arg3[%c1_145, %c2_146, %c0_147, %c0_148] : memref<3x3x4x32xf32, #tpu.memory_space<vmem>>, vector<1x1x4x32xf32>
    %103 = vector.shape_cast %102 : vector<1x1x4x32xf32> to vector<4x32xf32>
    %cst_149 = arith.constant dense<0.000000e+00> : vector<128x32xf32>
    %104 = tpu.matmul %101, %103, %cst_149 {dimension_numbers = #tpu.dot_dimension_numbers<[1], [0], [0], [1], [0, 0, 1, 1], [], []>} : vector<128x4xf32>, vector<4x32xf32>, vector<128x32xf32> -> vector<128x32xf32>
    %105 = arith.addf %99, %104 : vector<128x32xf32>
    %c0_150 = arith.constant 0 : index
    %c10 = arith.constant 10 : index
    %c0_151 = arith.constant 0 : index
    %c0_152 = arith.constant 0 : index
    %106 = vector.load %arg1[%c0_150, %c10, %c0_151, %c0_152] : memref<1x18x18x4xf32, #tpu.memory_space<vmem>>, vector<1x8x16x4xf32>
    %107 = vector.shape_cast %106 : vector<1x8x16x4xf32> to vector<128x4xf32>
    %c2_153 = arith.constant 2 : index
    %c0_154 = arith.constant 0 : index
    %c0_155 = arith.constant 0 : index
    %c0_156 = arith.constant 0 : index
    %108 = vector.load %arg3[%c2_153, %c0_154, %c0_155, %c0_156] : memref<3x3x4x32xf32, #tpu.memory_space<vmem>>, vector<1x1x4x32xf32>
    %109 = vector.shape_cast %108 : vector<1x1x4x32xf32> to vector<4x32xf32>
    %cst_157 = arith.constant dense<0.000000e+00> : vector<128x32xf32>
    %110 = tpu.matmul %107, %109, %cst_157 {dimension_numbers = #tpu.dot_dimension_numbers<[1], [0], [0], [1], [0, 0, 1, 1], [], []>} : vector<128x4xf32>, vector<4x32xf32>, vector<128x32xf32> -> vector<128x32xf32>
    %111 = arith.addf %105, %110 : vector<128x32xf32>
    %c0_158 = arith.constant 0 : index
    %c10_159 = arith.constant 10 : index
    %c1_160 = arith.constant 1 : index
    %c0_161 = arith.constant 0 : index
    %112 = vector.load %arg1[%c0_158, %c10_159, %c1_160, %c0_161] : memref<1x18x18x4xf32, #tpu.memory_space<vmem>>, vector<1x8x16x4xf32>
    %113 = vector.shape_cast %112 : vector<1x8x16x4xf32> to vector<128x4xf32>
    %c2_162 = arith.constant 2 : index
    %c1_163 = arith.constant 1 : index
    %c0_164 = arith.constant 0 : index
    %c0_165 = arith.constant 0 : index
    %114 = vector.load %arg3[%c2_162, %c1_163, %c0_164, %c0_165] : memref<3x3x4x32xf32, #tpu.memory_space<vmem>>, vector<1x1x4x32xf32>
    %115 = vector.shape_cast %114 : vector<1x1x4x32xf32> to vector<4x32xf32>
    %cst_166 = arith.constant dense<0.000000e+00> : vector<128x32xf32>
    %116 = tpu.matmul %113, %115, %cst_166 {dimension_numbers = #tpu.dot_dimension_numbers<[1], [0], [0], [1], [0, 0, 1, 1], [], []>} : vector<128x4xf32>, vector<4x32xf32>, vector<128x32xf32> -> vector<128x32xf32>
    %117 = arith.addf %111, %116 : vector<128x32xf32>
    %c0_167 = arith.constant 0 : index
    %c10_168 = arith.constant 10 : index
    %c2_169 = arith.constant 2 : index
    %c0_170 = arith.constant 0 : index
    %118 = vector.load %arg1[%c0_167, %c10_168, %c2_169, %c0_170] : memref<1x18x18x4xf32, #tpu.memory_space<vmem>>, vector<1x8x16x4xf32>
    %119 = vector.shape_cast %118 : vector<1x8x16x4xf32> to vector<128x4xf32>
    %c2_171 = arith.constant 2 : index
    %c2_172 = arith.constant 2 : index
    %c0_173 = arith.constant 0 : index
    %c0_174 = arith.constant 0 : index
    %120 = vector.load %arg3[%c2_171, %c2_172, %c0_173, %c0_174] : memref<3x3x4x32xf32, #tpu.memory_space<vmem>>, vector<1x1x4x32xf32>
    %121 = vector.shape_cast %120 : vector<1x1x4x32xf32> to vector<4x32xf32>
    %cst_175 = arith.constant dense<0.000000e+00> : vector<128x32xf32>
    %122 = tpu.matmul %119, %121, %cst_175 {dimension_numbers = #tpu.dot_dimension_numbers<[1], [0], [0], [1], [0, 0, 1, 1], [], []>} : vector<128x4xf32>, vector<4x32xf32>, vector<128x32xf32> -> vector<128x32xf32>
    %123 = arith.addf %117, %122 : vector<128x32xf32>
    %cst_176 = arith.constant 0.000000e+00 : f32
    %124 = vector.broadcast %cst_176 : f32 to vector<128x32xf32>
    %125 = arith.maximumf %123, %124 : vector<128x32xf32>
    %126 = vector.shape_cast %125 : vector<128x32xf32> to vector<1x8x16x32xf32>
    %c0_177 = arith.constant 0 : index
    %c9_178 = arith.constant 9 : index
    %c1_179 = arith.constant 1 : index
    %c0_180 = arith.constant 0 : index
    %127 = vector.load %arg16[%c0_177, %c9_178, %c1_179, %c0_180] : memref<1x18x18x32xf32, #tpu.memory_space<vmem>>, vector<1x8x16x32xf32>
    tpu.vector_store %arg16[%c0_177, %c9_178, %c1_179, %c0_180], %126 {strides = array<i32>} : memref<1x18x18x32xf32, #tpu.memory_space<vmem>>, vector<1x8x16x32xf32>,
    %cst_181 = arith.constant 0.000000e+00 : f32
    %128 = vector.broadcast %cst_181 : f32 to vector<128x64xf32>
    %c0_182 = arith.constant 0 : index
    %c0_183 = arith.constant 0 : index
    %129 = vector.load %arg6[%c0_182, %c0_183] : memref<1x64xf32, #tpu.memory_space<vmem>>, vector<1x64xf32>
    %130 = vector.broadcast %129 : vector<1x64xf32> to vector<128x64xf32>
    %131 = arith.addf %128, %130 : vector<128x64xf32>
    %c0_184 = arith.constant 0 : index
    %c0_185 = arith.constant 0 : index
    %c0_186 = arith.constant 0 : index
    %c0_187 = arith.constant 0 : index
    %132 = vector.load %arg16[%c0_184, %c0_185, %c0_186, %c0_187] : memref<1x18x18x32xf32, #tpu.memory_space<vmem>>, vector<1x8x16x32xf32>
    %133 = vector.shape_cast %132 : vector<1x8x16x32xf32> to vector<128x32xf32>
    %c0_188 = arith.constant 0 : index
    %c0_189 = arith.constant 0 : index
    %c0_190 = arith.constant 0 : index
    %c0_191 = arith.constant 0 : index
    %134 = vector.load %arg5[%c0_188, %c0_189, %c0_190, %c0_191] : memref<3x3x32x64xf32, #tpu.memory_space<vmem>>, vector<1x1x32x64xf32>
    %135 = vector.shape_cast %134 : vector<1x1x32x64xf32> to vector<32x64xf32>
    %cst_192 = arith.constant dense<0.000000e+00> : vector<128x64xf32>
    %136 = tpu.matmul %133, %135, %cst_192 {dimension_numbers = #tpu.dot_dimension_numbers<[1], [0], [0], [1], [0, 0, 1, 1], [], []>} : vector<128x32xf32>, vector<32x64xf32>, vector<128x64xf32> -> vector<128x64xf32>
    %137 = arith.addf %131, %136 : vector<128x64xf32>
    %c0_193 = arith.constant 0 : index
    %c0_194 = arith.constant 0 : index
    %c1_195 = arith.constant 1 : index
    %c0_196 = arith.constant 0 : index
    %138 = vector.load %arg16[%c0_193, %c0_194, %c1_195, %c0_196] : memref<1x18x18x32xf32, #tpu.memory_space<vmem>>, vector<1x8x16x32xf32>
    %139 = vector.shape_cast %138 : vector<1x8x16x32xf32> to vector<128x32xf32>
    %c0_197 = arith.constant 0 : index
    %c1_198 = arith.constant 1 : index
    %c0_199 = arith.constant 0 : index
    %c0_200 = arith.constant 0 : index
    %140 = vector.load %arg5[%c0_197, %c1_198, %c0_199, %c0_200] : memref<3x3x32x64xf32, #tpu.memory_space<vmem>>, vector<1x1x32x64xf32>
    %141 = vector.shape_cast %140 : vector<1x1x32x64xf32> to vector<32x64xf32>
    %cst_201 = arith.constant dense<0.000000e+00> : vector<128x64xf32>
    %142 = tpu.matmul %139, %141, %cst_201 {dimension_numbers = #tpu.dot_dimension_numbers<[1], [0], [0], [1], [0, 0, 1, 1], [], []>} : vector<128x32xf32>, vector<32x64xf32>, vector<128x64xf32> -> vector<128x64xf32>
    %143 = arith.addf %137, %142 : vector<128x64xf32>
    %c0_202 = arith.constant 0 : index
    %c0_203 = arith.constant 0 : index
    %c2_204 = arith.constant 2 : index
    %c0_205 = arith.constant 0 : index
    %144 = vector.load %arg16[%c0_202, %c0_203, %c2_204, %c0_205] : memref<1x18x18x32xf32, #tpu.memory_space<vmem>>, vector<1x8x16x32xf32>
    %145 = vector.shape_cast %144 : vector<1x8x16x32xf32> to vector<128x32xf32>
    %c0_206 = arith.constant 0 : index
    %c2_207 = arith.constant 2 : index
    %c0_208 = arith.constant 0 : index
    %c0_209 = arith.constant 0 : index
    %146 = vector.load %arg5[%c0_206, %c2_207, %c0_208, %c0_209] : memref<3x3x32x64xf32, #tpu.memory_space<vmem>>, vector<1x1x32x64xf32>
    %147 = vector.shape_cast %146 : vector<1x1x32x64xf32> to vector<32x64xf32>
    %cst_210 = arith.constant dense<0.000000e+00> : vector<128x64xf32>
    %148 = tpu.matmul %145, %147, %cst_210 {dimension_numbers = #tpu.dot_dimension_numbers<[1], [0], [0], [1], [0, 0, 1, 1], [], []>} : vector<128x32xf32>, vector<32x64xf32>, vector<128x64xf32> -> vector<128x64xf32>
    %149 = arith.addf %143, %148 : vector<128x64xf32>
    %c0_211 = arith.constant 0 : index
    %c1_212 = arith.constant 1 : index
    %c0_213 = arith.constant 0 : index
    %c0_214 = arith.constant 0 : index
    %150 = vector.load %arg16[%c0_211, %c1_212, %c0_213, %c0_214] : memref<1x18x18x32xf32, #tpu.memory_space<vmem>>, vector<1x8x16x32xf32>
    %151 = vector.shape_cast %150 : vector<1x8x16x32xf32> to vector<128x32xf32>
    %c1_215 = arith.constant 1 : index
    %c0_216 = arith.constant 0 : index
    %c0_217 = arith.constant 0 : index
    %c0_218 = arith.constant 0 : index
    %152 = vector.load %arg5[%c1_215, %c0_216, %c0_217, %c0_218] : memref<3x3x32x64xf32, #tpu.memory_space<vmem>>, vector<1x1x32x64xf32>
    %153 = vector.shape_cast %152 : vector<1x1x32x64xf32> to vector<32x64xf32>
    %cst_219 = arith.constant dense<0.000000e+00> : vector<128x64xf32>
    %154 = tpu.matmul %151, %153, %cst_219 {dimension_numbers = #tpu.dot_dimension_numbers<[1], [0], [0], [1], [0, 0, 1, 1], [], []>} : vector<128x32xf32>, vector<32x64xf32>, vector<128x64xf32> -> vector<128x64xf32>
    %155 = arith.addf %149, %154 : vector<128x64xf32>
    %c0_220 = arith.constant 0 : index
    %c1_221 = arith.constant 1 : index
    %c1_222 = arith.constant 1 : index
    %c0_223 = arith.constant 0 : index
    %156 = vector.load %arg16[%c0_220, %c1_221, %c1_222, %c0_223] : memref<1x18x18x32xf32, #tpu.memory_space<vmem>>, vector<1x8x16x32xf32>
    %157 = vector.shape_cast %156 : vector<1x8x16x32xf32> to vector<128x32xf32>
    %c1_224 = arith.constant 1 : index
    %c1_225 = arith.constant 1 : index
    %c0_226 = arith.constant 0 : index
    %c0_227 = arith.constant 0 : index
    %158 = vector.load %arg5[%c1_224, %c1_225, %c0_226, %c0_227] : memref<3x3x32x64xf32, #tpu.memory_space<vmem>>, vector<1x1x32x64xf32>
    %159 = vector.shape_cast %158 : vector<1x1x32x64xf32> to vector<32x64xf32>
    %cst_228 = arith.constant dense<0.000000e+00> : vector<128x64xf32>
    %160 = tpu.matmul %157, %159, %cst_228 {dimension_numbers = #tpu.dot_dimension_numbers<[1], [0], [0], [1], [0, 0, 1, 1], [], []>} : vector<128x32xf32>, vector<32x64xf32>, vector<128x64xf32> -> vector<128x64xf32>
    %161 = arith.addf %155, %160 : vector<128x64xf32>
    %c0_229 = arith.constant 0 : index
    %c1_230 = arith.constant 1 : index
    %c2_231 = arith.constant 2 : index
    %c0_232 = arith.constant 0 : index
    %162 = vector.load %arg16[%c0_229, %c1_230, %c2_231, %c0_232] : memref<1x18x18x32xf32, #tpu.memory_space<vmem>>, vector<1x8x16x32xf32>
    %163 = vector.shape_cast %162 : vector<1x8x16x32xf32> to vector<128x32xf32>
    %c1_233 = arith.constant 1 : index
    %c2_234 = arith.constant 2 : index
    %c0_235 = arith.constant 0 : index
    %c0_236 = arith.constant 0 : index
    %164 = vector.load %arg5[%c1_233, %c2_234, %c0_235, %c0_236] : memref<3x3x32x64xf32, #tpu.memory_space<vmem>>, vector<1x1x32x64xf32>
    %165 = vector.shape_cast %164 : vector<1x1x32x64xf32> to vector<32x64xf32>
    %cst_237 = arith.constant dense<0.000000e+00> : vector<128x64xf32>
    %166 = tpu.matmul %163, %165, %cst_237 {dimension_numbers = #tpu.dot_dimension_numbers<[1], [0], [0], [1], [0, 0, 1, 1], [], []>} : vector<128x32xf32>, vector<32x64xf32>, vector<128x64xf32> -> vector<128x64xf32>
    %167 = arith.addf %161, %166 : vector<128x64xf32>
    %c0_238 = arith.constant 0 : index
    %c2_239 = arith.constant 2 : index
    %c0_240 = arith.constant 0 : index
    %c0_241 = arith.constant 0 : index
    %168 = vector.load %arg16[%c0_238, %c2_239, %c0_240, %c0_241] : memref<1x18x18x32xf32, #tpu.memory_space<vmem>>, vector<1x8x16x32xf32>
    %169 = vector.shape_cast %168 : vector<1x8x16x32xf32> to vector<128x32xf32>
    %c2_242 = arith.constant 2 : index
    %c0_243 = arith.constant 0 : index
    %c0_244 = arith.constant 0 : index
    %c0_245 = arith.constant 0 : index
    %170 = vector.load %arg5[%c2_242, %c0_243, %c0_244, %c0_245] : memref<3x3x32x64xf32, #tpu.memory_space<vmem>>, vector<1x1x32x64xf32>
    %171 = vector.shape_cast %170 : vector<1x1x32x64xf32> to vector<32x64xf32>
    %cst_246 = arith.constant dense<0.000000e+00> : vector<128x64xf32>
    %172 = tpu.matmul %169, %171, %cst_246 {dimension_numbers = #tpu.dot_dimension_numbers<[1], [0], [0], [1], [0, 0, 1, 1], [], []>} : vector<128x32xf32>, vector<32x64xf32>, vector<128x64xf32> -> vector<128x64xf32>
    %173 = arith.addf %167, %172 : vector<128x64xf32>
    %c0_247 = arith.constant 0 : index
    %c2_248 = arith.constant 2 : index
    %c1_249 = arith.constant 1 : index
    %c0_250 = arith.constant 0 : index
    %174 = vector.load %arg16[%c0_247, %c2_248, %c1_249, %c0_250] : memref<1x18x18x32xf32, #tpu.memory_space<vmem>>, vector<1x8x16x32xf32>
    %175 = vector.shape_cast %174 : vector<1x8x16x32xf32> to vector<128x32xf32>
    %c2_251 = arith.constant 2 : index
    %c1_252 = arith.constant 1 : index
    %c0_253 = arith.constant 0 : index
    %c0_254 = arith.constant 0 : index
    %176 = vector.load %arg5[%c2_251, %c1_252, %c0_253, %c0_254] : memref<3x3x32x64xf32, #tpu.memory_space<vmem>>, vector<1x1x32x64xf32>
    %177 = vector.shape_cast %176 : vector<1x1x32x64xf32> to vector<32x64xf32>
    %cst_255 = arith.constant dense<0.000000e+00> : vector<128x64xf32>
    %178 = tpu.matmul %175, %177, %cst_255 {dimension_numbers = #tpu.dot_dimension_numbers<[1], [0], [0], [1], [0, 0, 1, 1], [], []>} : vector<128x32xf32>, vector<32x64xf32>, vector<128x64xf32> -> vector<128x64xf32>
    %179 = arith.addf %173, %178 : vector<128x64xf32>
    %c0_256 = arith.constant 0 : index
    %c2_257 = arith.constant 2 : index
    %c2_258 = arith.constant 2 : index
    %c0_259 = arith.constant 0 : index
    %180 = vector.load %arg16[%c0_256, %c2_257, %c2_258, %c0_259] : memref<1x18x18x32xf32, #tpu.memory_space<vmem>>, vector<1x8x16x32xf32>
    %181 = vector.shape_cast %180 : vector<1x8x16x32xf32> to vector<128x32xf32>
    %c2_260 = arith.constant 2 : index
    %c2_261 = arith.constant 2 : index
    %c0_262 = arith.constant 0 : index
    %c0_263 = arith.constant 0 : index
    %182 = vector.load %arg5[%c2_260, %c2_261, %c0_262, %c0_263] : memref<3x3x32x64xf32, #tpu.memory_space<vmem>>, vector<1x1x32x64xf32>
    %183 = vector.shape_cast %182 : vector<1x1x32x64xf32> to vector<32x64xf32>
    %cst_264 = arith.constant dense<0.000000e+00> : vector<128x64xf32>
    %184 = tpu.matmul %181, %183, %cst_264 {dimension_numbers = #tpu.dot_dimension_numbers<[1], [0], [0], [1], [0, 0, 1, 1], [], []>} : vector<128x32xf32>, vector<32x64xf32>, vector<128x64xf32> -> vector<128x64xf32>
    %185 = arith.addf %179, %184 : vector<128x64xf32>
    %cst_265 = arith.constant 0.000000e+00 : f32
    %186 = vector.broadcast %cst_265 : f32 to vector<128x64xf32>
    %187 = arith.maximumf %185, %186 : vector<128x64xf32>
    %188 = vector.shape_cast %187 : vector<128x64xf32> to vector<1x8x16x64xf32>
    %c0_266 = arith.constant 0 : index
    %c1_267 = arith.constant 1 : index
    %c1_268 = arith.constant 1 : index
    %c0_269 = arith.constant 0 : index
    %189 = vector.load %arg17[%c0_266, %c1_267, %c1_268, %c0_269] : memref<1x18x18x64xf32, #tpu.memory_space<vmem>>, vector<1x8x16x64xf32>
    tpu.vector_store %arg17[%c0_266, %c1_267, %c1_268, %c0_269], %188 {strides = array<i32>} : memref<1x18x18x64xf32, #tpu.memory_space<vmem>>, vector<1x8x16x64xf32>,
    %cst_270 = arith.constant 0.000000e+00 : f32
    %190 = vector.broadcast %cst_270 : f32 to vector<128x64xf32>
    %c0_271 = arith.constant 0 : index
    %c0_272 = arith.constant 0 : index
    %191 = vector.load %arg6[%c0_271, %c0_272] : memref<1x64xf32, #tpu.memory_space<vmem>>, vector<1x64xf32>
    %192 = vector.broadcast %191 : vector<1x64xf32> to vector<128x64xf32>
    %193 = arith.addf %190, %192 : vector<128x64xf32>
    %c0_273 = arith.constant 0 : index
    %c8_274 = arith.constant 8 : index
    %c0_275 = arith.constant 0 : index
    %c0_276 = arith.constant 0 : index
    %194 = vector.load %arg16[%c0_273, %c8_274, %c0_275, %c0_276] : memref<1x18x18x32xf32, #tpu.memory_space<vmem>>, vector<1x8x16x32xf32>
    %195 = vector.shape_cast %194 : vector<1x8x16x32xf32> to vector<128x32xf32>
    %c0_277 = arith.constant 0 : index
    %c0_278 = arith.constant 0 : index
    %c0_279 = arith.constant 0 : index
    %c0_280 = arith.constant 0 : index
    %196 = vector.load %arg5[%c0_277, %c0_278, %c0_279, %c0_280] : memref<3x3x32x64xf32, #tpu.memory_space<vmem>>, vector<1x1x32x64xf32>
    %197 = vector.shape_cast %196 : vector<1x1x32x64xf32> to vector<32x64xf32>
    %cst_281 = arith.constant dense<0.000000e+00> : vector<128x64xf32>
    %198 = tpu.matmul %195, %197, %cst_281 {dimension_numbers = #tpu.dot_dimension_numbers<[1], [0], [0], [1], [0, 0, 1, 1], [], []>} : vector<128x32xf32>, vector<32x64xf32>, vector<128x64xf32> -> vector<128x64xf32>
    %199 = arith.addf %193, %198 : vector<128x64xf32>
    %c0_282 = arith.constant 0 : index
    %c8_283 = arith.constant 8 : index
    %c1_284 = arith.constant 1 : index
    %c0_285 = arith.constant 0 : index
    %200 = vector.load %arg16[%c0_282, %c8_283, %c1_284, %c0_285] : memref<1x18x18x32xf32, #tpu.memory_space<vmem>>, vector<1x8x16x32xf32>
    %201 = vector.shape_cast %200 : vector<1x8x16x32xf32> to vector<128x32xf32>
    %c0_286 = arith.constant 0 : index
    %c1_287 = arith.constant 1 : index
    %c0_288 = arith.constant 0 : index
    %c0_289 = arith.constant 0 : index
    %202 = vector.load %arg5[%c0_286, %c1_287, %c0_288, %c0_289] : memref<3x3x32x64xf32, #tpu.memory_space<vmem>>, vector<1x1x32x64xf32>
    %203 = vector.shape_cast %202 : vector<1x1x32x64xf32> to vector<32x64xf32>
    %cst_290 = arith.constant dense<0.000000e+00> : vector<128x64xf32>
    %204 = tpu.matmul %201, %203, %cst_290 {dimension_numbers = #tpu.dot_dimension_numbers<[1], [0], [0], [1], [0, 0, 1, 1], [], []>} : vector<128x32xf32>, vector<32x64xf32>, vector<128x64xf32> -> vector<128x64xf32>
    %205 = arith.addf %199, %204 : vector<128x64xf32>
    %c0_291 = arith.constant 0 : index
    %c8_292 = arith.constant 8 : index
    %c2_293 = arith.constant 2 : index
    %c0_294 = arith.constant 0 : index
    %206 = vector.load %arg16[%c0_291, %c8_292, %c2_293, %c0_294] : memref<1x18x18x32xf32, #tpu.memory_space<vmem>>, vector<1x8x16x32xf32>
    %207 = vector.shape_cast %206 : vector<1x8x16x32xf32> to vector<128x32xf32>
    %c0_295 = arith.constant 0 : index
    %c2_296 = arith.constant 2 : index
    %c0_297 = arith.constant 0 : index
    %c0_298 = arith.constant 0 : index
    %208 = vector.load %arg5[%c0_295, %c2_296, %c0_297, %c0_298] : memref<3x3x32x64xf32, #tpu.memory_space<vmem>>, vector<1x1x32x64xf32>
    %209 = vector.shape_cast %208 : vector<1x1x32x64xf32> to vector<32x64xf32>
    %cst_299 = arith.constant dense<0.000000e+00> : vector<128x64xf32>
    %210 = tpu.matmul %207, %209, %cst_299 {dimension_numbers = #tpu.dot_dimension_numbers<[1], [0], [0], [1], [0, 0, 1, 1], [], []>} : vector<128x32xf32>, vector<32x64xf32>, vector<128x64xf32> -> vector<128x64xf32>
    %211 = arith.addf %205, %210 : vector<128x64xf32>
    %c0_300 = arith.constant 0 : index
    %c9_301 = arith.constant 9 : index
    %c0_302 = arith.constant 0 : index
    %c0_303 = arith.constant 0 : index
    %212 = vector.load %arg16[%c0_300, %c9_301, %c0_302, %c0_303] : memref<1x18x18x32xf32, #tpu.memory_space<vmem>>, vector<1x8x16x32xf32>
    %213 = vector.shape_cast %212 : vector<1x8x16x32xf32> to vector<128x32xf32>
    %c1_304 = arith.constant 1 : index
    %c0_305 = arith.constant 0 : index
    %c0_306 = arith.constant 0 : index
    %c0_307 = arith.constant 0 : index
    %214 = vector.load %arg5[%c1_304, %c0_305, %c0_306, %c0_307] : memref<3x3x32x64xf32, #tpu.memory_space<vmem>>, vector<1x1x32x64xf32>
    %215 = vector.shape_cast %214 : vector<1x1x32x64xf32> to vector<32x64xf32>
    %cst_308 = arith.constant dense<0.000000e+00> : vector<128x64xf32>
    %216 = tpu.matmul %213, %215, %cst_308 {dimension_numbers = #tpu.dot_dimension_numbers<[1], [0], [0], [1], [0, 0, 1, 1], [], []>} : vector<128x32xf32>, vector<32x64xf32>, vector<128x64xf32> -> vector<128x64xf32>
    %217 = arith.addf %211, %216 : vector<128x64xf32>
    %c0_309 = arith.constant 0 : index
    %c9_310 = arith.constant 9 : index
    %c1_311 = arith.constant 1 : index
    %c0_312 = arith.constant 0 : index
    %218 = vector.load %arg16[%c0_309, %c9_310, %c1_311, %c0_312] : memref<1x18x18x32xf32, #tpu.memory_space<vmem>>, vector<1x8x16x32xf32>
    %219 = vector.shape_cast %218 : vector<1x8x16x32xf32> to vector<128x32xf32>
    %c1_313 = arith.constant 1 : index
    %c1_314 = arith.constant 1 : index
    %c0_315 = arith.constant 0 : index
    %c0_316 = arith.constant 0 : index
    %220 = vector.load %arg5[%c1_313, %c1_314, %c0_315, %c0_316] : memref<3x3x32x64xf32, #tpu.memory_space<vmem>>, vector<1x1x32x64xf32>
    %221 = vector.shape_cast %220 : vector<1x1x32x64xf32> to vector<32x64xf32>
    %cst_317 = arith.constant dense<0.000000e+00> : vector<128x64xf32>
    %222 = tpu.matmul %219, %221, %cst_317 {dimension_numbers = #tpu.dot_dimension_numbers<[1], [0], [0], [1], [0, 0, 1, 1], [], []>} : vector<128x32xf32>, vector<32x64xf32>, vector<128x64xf32> -> vector<128x64xf32>
    %223 = arith.addf %217, %222 : vector<128x64xf32>
    %c0_318 = arith.constant 0 : index
    %c9_319 = arith.constant 9 : index
    %c2_320 = arith.constant 2 : index
    %c0_321 = arith.constant 0 : index
    %224 = vector.load %arg16[%c0_318, %c9_319, %c2_320, %c0_321] : memref<1x18x18x32xf32, #tpu.memory_space<vmem>>, vector<1x8x16x32xf32>
    %225 = vector.shape_cast %224 : vector<1x8x16x32xf32> to vector<128x32xf32>
    %c1_322 = arith.constant 1 : index
    %c2_323 = arith.constant 2 : index
    %c0_324 = arith.constant 0 : index
    %c0_325 = arith.constant 0 : index
    %226 = vector.load %arg5[%c1_322, %c2_323, %c0_324, %c0_325] : memref<3x3x32x64xf32, #tpu.memory_space<vmem>>, vector<1x1x32x64xf32>
    %227 = vector.shape_cast %226 : vector<1x1x32x64xf32> to vector<32x64xf32>
    %cst_326 = arith.constant dense<0.000000e+00> : vector<128x64xf32>
    %228 = tpu.matmul %225, %227, %cst_326 {dimension_numbers = #tpu.dot_dimension_numbers<[1], [0], [0], [1], [0, 0, 1, 1], [], []>} : vector<128x32xf32>, vector<32x64xf32>, vector<128x64xf32> -> vector<128x64xf32>
    %229 = arith.addf %223, %228 : vector<128x64xf32>
    %c0_327 = arith.constant 0 : index
    %c10_328 = arith.constant 10 : index
    %c0_329 = arith.constant 0 : index
    %c0_330 = arith.constant 0 : index
    %230 = vector.load %arg16[%c0_327, %c10_328, %c0_329, %c0_330] : memref<1x18x18x32xf32, #tpu.memory_space<vmem>>, vector<1x8x16x32xf32>
    %231 = vector.shape_cast %230 : vector<1x8x16x32xf32> to vector<128x32xf32>
    %c2_331 = arith.constant 2 : index
    %c0_332 = arith.constant 0 : index
    %c0_333 = arith.constant 0 : index
    %c0_334 = arith.constant 0 : index
    %232 = vector.load %arg5[%c2_331, %c0_332, %c0_333, %c0_334] : memref<3x3x32x64xf32, #tpu.memory_space<vmem>>, vector<1x1x32x64xf32>
    %233 = vector.shape_cast %232 : vector<1x1x32x64xf32> to vector<32x64xf32>
    %cst_335 = arith.constant dense<0.000000e+00> : vector<128x64xf32>
    %234 = tpu.matmul %231, %233, %cst_335 {dimension_numbers = #tpu.dot_dimension_numbers<[1], [0], [0], [1], [0, 0, 1, 1], [], []>} : vector<128x32xf32>, vector<32x64xf32>, vector<128x64xf32> -> vector<128x64xf32>
    %235 = arith.addf %229, %234 : vector<128x64xf32>
    %c0_336 = arith.constant 0 : index
    %c10_337 = arith.constant 10 : index
    %c1_338 = arith.constant 1 : index
    %c0_339 = arith.constant 0 : index
    %236 = vector.load %arg16[%c0_336, %c10_337, %c1_338, %c0_339] : memref<1x18x18x32xf32, #tpu.memory_space<vmem>>, vector<1x8x16x32xf32>
    %237 = vector.shape_cast %236 : vector<1x8x16x32xf32> to vector<128x32xf32>
    %c2_340 = arith.constant 2 : index
    %c1_341 = arith.constant 1 : index
    %c0_342 = arith.constant 0 : index
    %c0_343 = arith.constant 0 : index
    %238 = vector.load %arg5[%c2_340, %c1_341, %c0_342, %c0_343] : memref<3x3x32x64xf32, #tpu.memory_space<vmem>>, vector<1x1x32x64xf32>
    %239 = vector.shape_cast %238 : vector<1x1x32x64xf32> to vector<32x64xf32>
    %cst_344 = arith.constant dense<0.000000e+00> : vector<128x64xf32>
    %240 = tpu.matmul %237, %239, %cst_344 {dimension_numbers = #tpu.dot_dimension_numbers<[1], [0], [0], [1], [0, 0, 1, 1], [], []>} : vector<128x32xf32>, vector<32x64xf32>, vector<128x64xf32> -> vector<128x64xf32>
    %241 = arith.addf %235, %240 : vector<128x64xf32>
    %c0_345 = arith.constant 0 : index
    %c10_346 = arith.constant 10 : index
    %c2_347 = arith.constant 2 : index
    %c0_348 = arith.constant 0 : index
    %242 = vector.load %arg16[%c0_345, %c10_346, %c2_347, %c0_348] : memref<1x18x18x32xf32, #tpu.memory_space<vmem>>, vector<1x8x16x32xf32>
    %243 = vector.shape_cast %242 : vector<1x8x16x32xf32> to vector<128x32xf32>
    %c2_349 = arith.constant 2 : index
    %c2_350 = arith.constant 2 : index
    %c0_351 = arith.constant 0 : index
    %c0_352 = arith.constant 0 : index
    %244 = vector.load %arg5[%c2_349, %c2_350, %c0_351, %c0_352] : memref<3x3x32x64xf32, #tpu.memory_space<vmem>>, vector<1x1x32x64xf32>
    %245 = vector.shape_cast %244 : vector<1x1x32x64xf32> to vector<32x64xf32>
    %cst_353 = arith.constant dense<0.000000e+00> : vector<128x64xf32>
    %246 = tpu.matmul %243, %245, %cst_353 {dimension_numbers = #tpu.dot_dimension_numbers<[1], [0], [0], [1], [0, 0, 1, 1], [], []>} : vector<128x32xf32>, vector<32x64xf32>, vector<128x64xf32> -> vector<128x64xf32>
    %247 = arith.addf %241, %246 : vector<128x64xf32>
    %cst_354 = arith.constant 0.000000e+00 : f32
    %248 = vector.broadcast %cst_354 : f32 to vector<128x64xf32>
    %249 = arith.maximumf %247, %248 : vector<128x64xf32>
    %250 = vector.shape_cast %249 : vector<128x64xf32> to vector<1x8x16x64xf32>
    %c0_355 = arith.constant 0 : index
    %c9_356 = arith.constant 9 : index
    %c1_357 = arith.constant 1 : index
    %c0_358 = arith.constant 0 : index
    %251 = vector.load %arg17[%c0_355, %c9_356, %c1_357, %c0_358] : memref<1x18x18x64xf32, #tpu.memory_space<vmem>>, vector<1x8x16x64xf32>
    tpu.vector_store %arg17[%c0_355, %c9_356, %c1_357, %c0_358], %250 {strides = array<i32>} : memref<1x18x18x64xf32, #tpu.memory_space<vmem>>, vector<1x8x16x64xf32>,
    %cst_359 = arith.constant 0.000000e+00 : f32
    %252 = vector.broadcast %cst_359 : f32 to vector<128x128xf32>
    %c0_360 = arith.constant 0 : index
    %c0_361 = arith.constant 0 : index
    %253 = vector.load %arg8[%c0_360, %c0_361] : memref<1x128xf32, #tpu.memory_space<vmem>>, vector<1x128xf32>
    %254 = vector.broadcast %253 : vector<1x128xf32> to vector<128x128xf32>
    %255 = arith.addf %252, %254 : vector<128x128xf32>
    %c0_362 = arith.constant 0 : index
    %c0_363 = arith.constant 0 : index
    %c0_364 = arith.constant 0 : index
    %c0_365 = arith.constant 0 : index
    %256 = vector.load %arg17[%c0_362, %c0_363, %c0_364, %c0_365] : memref<1x18x18x64xf32, #tpu.memory_space<vmem>>, vector<1x8x16x64xf32>
    %257 = vector.shape_cast %256 : vector<1x8x16x64xf32> to vector<128x64xf32>
    %c0_366 = arith.constant 0 : index
    %c0_367 = arith.constant 0 : index
    %c0_368 = arith.constant 0 : index
    %c0_369 = arith.constant 0 : index
    %258 = vector.load %arg7[%c0_366, %c0_367, %c0_368, %c0_369] : memref<3x3x64x128xf32, #tpu.memory_space<vmem>>, vector<1x1x64x128xf32>
    %259 = vector.shape_cast %258 : vector<1x1x64x128xf32> to vector<64x128xf32>
    %cst_370 = arith.constant dense<0.000000e+00> : vector<128x128xf32>
    %260 = tpu.matmul %257, %259, %cst_370 {dimension_numbers = #tpu.dot_dimension_numbers<[1], [0], [0], [1], [0, 0, 1, 1], [], []>} : vector<128x64xf32>, vector<64x128xf32>, vector<128x128xf32> -> vector<128x128xf32>
    %261 = arith.addf %255, %260 : vector<128x128xf32>
    %c0_371 = arith.constant 0 : index
    %c0_372 = arith.constant 0 : index
    %c1_373 = arith.constant 1 : index
    %c0_374 = arith.constant 0 : index
    %262 = vector.load %arg17[%c0_371, %c0_372, %c1_373, %c0_374] : memref<1x18x18x64xf32, #tpu.memory_space<vmem>>, vector<1x8x16x64xf32>
    %263 = vector.shape_cast %262 : vector<1x8x16x64xf32> to vector<128x64xf32>
    %c0_375 = arith.constant 0 : index
    %c1_376 = arith.constant 1 : index
    %c0_377 = arith.constant 0 : index
    %c0_378 = arith.constant 0 : index
    %264 = vector.load %arg7[%c0_375, %c1_376, %c0_377, %c0_378] : memref<3x3x64x128xf32, #tpu.memory_space<vmem>>, vector<1x1x64x128xf32>
    %265 = vector.shape_cast %264 : vector<1x1x64x128xf32> to vector<64x128xf32>
    %cst_379 = arith.constant dense<0.000000e+00> : vector<128x128xf32>
    %266 = tpu.matmul %263, %265, %cst_379 {dimension_numbers = #tpu.dot_dimension_numbers<[1], [0], [0], [1], [0, 0, 1, 1], [], []>} : vector<128x64xf32>, vector<64x128xf32>, vector<128x128xf32> -> vector<128x128xf32>
    %267 = arith.addf %261, %266 : vector<128x128xf32>
    %c0_380 = arith.constant 0 : index
    %c0_381 = arith.constant 0 : index
    %c2_382 = arith.constant 2 : index
    %c0_383 = arith.constant 0 : index
    %268 = vector.load %arg17[%c0_380, %c0_381, %c2_382, %c0_383] : memref<1x18x18x64xf32, #tpu.memory_space<vmem>>, vector<1x8x16x64xf32>
    %269 = vector.shape_cast %268 : vector<1x8x16x64xf32> to vector<128x64xf32>
    %c0_384 = arith.constant 0 : index
    %c2_385 = arith.constant 2 : index
    %c0_386 = arith.constant 0 : index
    %c0_387 = arith.constant 0 : index
    %270 = vector.load %arg7[%c0_384, %c2_385, %c0_386, %c0_387] : memref<3x3x64x128xf32, #tpu.memory_space<vmem>>, vector<1x1x64x128xf32>
    %271 = vector.shape_cast %270 : vector<1x1x64x128xf32> to vector<64x128xf32>
    %cst_388 = arith.constant dense<0.000000e+00> : vector<128x128xf32>
    %272 = tpu.matmul %269, %271, %cst_388 {dimension_numbers = #tpu.dot_dimension_numbers<[1], [0], [0], [1], [0, 0, 1, 1], [], []>} : vector<128x64xf32>, vector<64x128xf32>, vector<128x128xf32> -> vector<128x128xf32>
    %273 = arith.addf %267, %272 : vector<128x128xf32>
    %c0_389 = arith.constant 0 : index
    %c1_390 = arith.constant 1 : index
    %c0_391 = arith.constant 0 : index
    %c0_392 = arith.constant 0 : index
    %274 = vector.load %arg17[%c0_389, %c1_390, %c0_391, %c0_392] : memref<1x18x18x64xf32, #tpu.memory_space<vmem>>, vector<1x8x16x64xf32>
    %275 = vector.shape_cast %274 : vector<1x8x16x64xf32> to vector<128x64xf32>
    %c1_393 = arith.constant 1 : index
    %c0_394 = arith.constant 0 : index
    %c0_395 = arith.constant 0 : index
    %c0_396 = arith.constant 0 : index
    %276 = vector.load %arg7[%c1_393, %c0_394, %c0_395, %c0_396] : memref<3x3x64x128xf32, #tpu.memory_space<vmem>>, vector<1x1x64x128xf32>
    %277 = vector.shape_cast %276 : vector<1x1x64x128xf32> to vector<64x128xf32>
    %cst_397 = arith.constant dense<0.000000e+00> : vector<128x128xf32>
    %278 = tpu.matmul %275, %277, %cst_397 {dimension_numbers = #tpu.dot_dimension_numbers<[1], [0], [0], [1], [0, 0, 1, 1], [], []>} : vector<128x64xf32>, vector<64x128xf32>, vector<128x128xf32> -> vector<128x128xf32>
    %279 = arith.addf %273, %278 : vector<128x128xf32>
    %c0_398 = arith.constant 0 : index
    %c1_399 = arith.constant 1 : index
    %c1_400 = arith.constant 1 : index
    %c0_401 = arith.constant 0 : index
    %280 = vector.load %arg17[%c0_398, %c1_399, %c1_400, %c0_401] : memref<1x18x18x64xf32, #tpu.memory_space<vmem>>, vector<1x8x16x64xf32>
    %281 = vector.shape_cast %280 : vector<1x8x16x64xf32> to vector<128x64xf32>
    %c1_402 = arith.constant 1 : index
    %c1_403 = arith.constant 1 : index
    %c0_404 = arith.constant 0 : index
    %c0_405 = arith.constant 0 : index
    %282 = vector.load %arg7[%c1_402, %c1_403, %c0_404, %c0_405] : memref<3x3x64x128xf32, #tpu.memory_space<vmem>>, vector<1x1x64x128xf32>
    %283 = vector.shape_cast %282 : vector<1x1x64x128xf32> to vector<64x128xf32>
    %cst_406 = arith.constant dense<0.000000e+00> : vector<128x128xf32>
    %284 = tpu.matmul %281, %283, %cst_406 {dimension_numbers = #tpu.dot_dimension_numbers<[1], [0], [0], [1], [0, 0, 1, 1], [], []>} : vector<128x64xf32>, vector<64x128xf32>, vector<128x128xf32> -> vector<128x128xf32>
    %285 = arith.addf %279, %284 : vector<128x128xf32>
    %c0_407 = arith.constant 0 : index
    %c1_408 = arith.constant 1 : index
    %c2_409 = arith.constant 2 : index
    %c0_410 = arith.constant 0 : index
    %286 = vector.load %arg17[%c0_407, %c1_408, %c2_409, %c0_410] : memref<1x18x18x64xf32, #tpu.memory_space<vmem>>, vector<1x8x16x64xf32>
    %287 = vector.shape_cast %286 : vector<1x8x16x64xf32> to vector<128x64xf32>
    %c1_411 = arith.constant 1 : index
    %c2_412 = arith.constant 2 : index
    %c0_413 = arith.constant 0 : index
    %c0_414 = arith.constant 0 : index
    %288 = vector.load %arg7[%c1_411, %c2_412, %c0_413, %c0_414] : memref<3x3x64x128xf32, #tpu.memory_space<vmem>>, vector<1x1x64x128xf32>
    %289 = vector.shape_cast %288 : vector<1x1x64x128xf32> to vector<64x128xf32>
    %cst_415 = arith.constant dense<0.000000e+00> : vector<128x128xf32>
    %290 = tpu.matmul %287, %289, %cst_415 {dimension_numbers = #tpu.dot_dimension_numbers<[1], [0], [0], [1], [0, 0, 1, 1], [], []>} : vector<128x64xf32>, vector<64x128xf32>, vector<128x128xf32> -> vector<128x128xf32>
    %291 = arith.addf %285, %290 : vector<128x128xf32>
    %c0_416 = arith.constant 0 : index
    %c2_417 = arith.constant 2 : index
    %c0_418 = arith.constant 0 : index
    %c0_419 = arith.constant 0 : index
    %292 = vector.load %arg17[%c0_416, %c2_417, %c0_418, %c0_419] : memref<1x18x18x64xf32, #tpu.memory_space<vmem>>, vector<1x8x16x64xf32>
    %293 = vector.shape_cast %292 : vector<1x8x16x64xf32> to vector<128x64xf32>
    %c2_420 = arith.constant 2 : index
    %c0_421 = arith.constant 0 : index
    %c0_422 = arith.constant 0 : index
    %c0_423 = arith.constant 0 : index
    %294 = vector.load %arg7[%c2_420, %c0_421, %c0_422, %c0_423] : memref<3x3x64x128xf32, #tpu.memory_space<vmem>>, vector<1x1x64x128xf32>
    %295 = vector.shape_cast %294 : vector<1x1x64x128xf32> to vector<64x128xf32>
    %cst_424 = arith.constant dense<0.000000e+00> : vector<128x128xf32>
    %296 = tpu.matmul %293, %295, %cst_424 {dimension_numbers = #tpu.dot_dimension_numbers<[1], [0], [0], [1], [0, 0, 1, 1], [], []>} : vector<128x64xf32>, vector<64x128xf32>, vector<128x128xf32> -> vector<128x128xf32>
    %297 = arith.addf %291, %296 : vector<128x128xf32>
    %c0_425 = arith.constant 0 : index
    %c2_426 = arith.constant 2 : index
    %c1_427 = arith.constant 1 : index
    %c0_428 = arith.constant 0 : index
    %298 = vector.load %arg17[%c0_425, %c2_426, %c1_427, %c0_428] : memref<1x18x18x64xf32, #tpu.memory_space<vmem>>, vector<1x8x16x64xf32>
    %299 = vector.shape_cast %298 : vector<1x8x16x64xf32> to vector<128x64xf32>
    %c2_429 = arith.constant 2 : index
    %c1_430 = arith.constant 1 : index
    %c0_431 = arith.constant 0 : index
    %c0_432 = arith.constant 0 : index
    %300 = vector.load %arg7[%c2_429, %c1_430, %c0_431, %c0_432] : memref<3x3x64x128xf32, #tpu.memory_space<vmem>>, vector<1x1x64x128xf32>
    %301 = vector.shape_cast %300 : vector<1x1x64x128xf32> to vector<64x128xf32>
    %cst_433 = arith.constant dense<0.000000e+00> : vector<128x128xf32>
    %302 = tpu.matmul %299, %301, %cst_433 {dimension_numbers = #tpu.dot_dimension_numbers<[1], [0], [0], [1], [0, 0, 1, 1], [], []>} : vector<128x64xf32>, vector<64x128xf32>, vector<128x128xf32> -> vector<128x128xf32>
    %303 = arith.addf %297, %302 : vector<128x128xf32>
    %c0_434 = arith.constant 0 : index
    %c2_435 = arith.constant 2 : index
    %c2_436 = arith.constant 2 : index
    %c0_437 = arith.constant 0 : index
    %304 = vector.load %arg17[%c0_434, %c2_435, %c2_436, %c0_437] : memref<1x18x18x64xf32, #tpu.memory_space<vmem>>, vector<1x8x16x64xf32>
    %305 = vector.shape_cast %304 : vector<1x8x16x64xf32> to vector<128x64xf32>
    %c2_438 = arith.constant 2 : index
    %c2_439 = arith.constant 2 : index
    %c0_440 = arith.constant 0 : index
    %c0_441 = arith.constant 0 : index
    %306 = vector.load %arg7[%c2_438, %c2_439, %c0_440, %c0_441] : memref<3x3x64x128xf32, #tpu.memory_space<vmem>>, vector<1x1x64x128xf32>
    %307 = vector.shape_cast %306 : vector<1x1x64x128xf32> to vector<64x128xf32>
    %cst_442 = arith.constant dense<0.000000e+00> : vector<128x128xf32>
    %308 = tpu.matmul %305, %307, %cst_442 {dimension_numbers = #tpu.dot_dimension_numbers<[1], [0], [0], [1], [0, 0, 1, 1], [], []>} : vector<128x64xf32>, vector<64x128xf32>, vector<128x128xf32> -> vector<128x128xf32>
    %309 = arith.addf %303, %308 : vector<128x128xf32>
    %cst_443 = arith.constant 0.000000e+00 : f32
    %310 = vector.broadcast %cst_443 : f32 to vector<128x128xf32>
    %311 = arith.maximumf %309, %310 : vector<128x128xf32>
    %312 = vector.shape_cast %311 : vector<128x128xf32> to vector<1x8x16x128xf32>
    %c0_444 = arith.constant 0 : index
    %c0_445 = arith.constant 0 : index
    %c0_446 = arith.constant 0 : index
    %c0_447 = arith.constant 0 : index
    %313 = vector.load %arg18[%c0_444, %c0_445, %c0_446, %c0_447] : memref<1x16x16x128xf32, #tpu.memory_space<vmem>>, vector<1x8x16x128xf32>
    tpu.vector_store %arg18[%c0_444, %c0_445, %c0_446, %c0_447], %312 {strides = array<i32>} : memref<1x16x16x128xf32, #tpu.memory_space<vmem>>, vector<1x8x16x128xf32>,
    %cst_448 = arith.constant 0.000000e+00 : f32
    %314 = vector.broadcast %cst_448 : f32 to vector<128x128xf32>
    %c0_449 = arith.constant 0 : index
    %c0_450 = arith.constant 0 : index
    %315 = vector.load %arg8[%c0_449, %c0_450] : memref<1x128xf32, #tpu.memory_space<vmem>>, vector<1x128xf32>
    %316 = vector.broadcast %315 : vector<1x128xf32> to vector<128x128xf32>
    %317 = arith.addf %314, %316 : vector<128x128xf32>
    %c0_451 = arith.constant 0 : index
    %c8_452 = arith.constant 8 : index
    %c0_453 = arith.constant 0 : index
    %c0_454 = arith.constant 0 : index
    %318 = vector.load %arg17[%c0_451, %c8_452, %c0_453, %c0_454] : memref<1x18x18x64xf32, #tpu.memory_space<vmem>>, vector<1x8x16x64xf32>
    %319 = vector.shape_cast %318 : vector<1x8x16x64xf32> to vector<128x64xf32>
    %c0_455 = arith.constant 0 : index
    %c0_456 = arith.constant 0 : index
    %c0_457 = arith.constant 0 : index
    %c0_458 = arith.constant 0 : index
    %320 = vector.load %arg7[%c0_455, %c0_456, %c0_457, %c0_458] : memref<3x3x64x128xf32, #tpu.memory_space<vmem>>, vector<1x1x64x128xf32>
    %321 = vector.shape_cast %320 : vector<1x1x64x128xf32> to vector<64x128xf32>
    %cst_459 = arith.constant dense<0.000000e+00> : vector<128x128xf32>
    %322 = tpu.matmul %319, %321, %cst_459 {dimension_numbers = #tpu.dot_dimension_numbers<[1], [0], [0], [1], [0, 0, 1, 1], [], []>} : vector<128x64xf32>, vector<64x128xf32>, vector<128x128xf32> -> vector<128x128xf32>
    %323 = arith.addf %317, %322 : vector<128x128xf32>
    %c0_460 = arith.constant 0 : index
    %c8_461 = arith.constant 8 : index
    %c1_462 = arith.constant 1 : index
    %c0_463 = arith.constant 0 : index
    %324 = vector.load %arg17[%c0_460, %c8_461, %c1_462, %c0_463] : memref<1x18x18x64xf32, #tpu.memory_space<vmem>>, vector<1x8x16x64xf32>
    %325 = vector.shape_cast %324 : vector<1x8x16x64xf32> to vector<128x64xf32>
    %c0_464 = arith.constant 0 : index
    %c1_465 = arith.constant 1 : index
    %c0_466 = arith.constant 0 : index
    %c0_467 = arith.constant 0 : index
    %326 = vector.load %arg7[%c0_464, %c1_465, %c0_466, %c0_467] : memref<3x3x64x128xf32, #tpu.memory_space<vmem>>, vector<1x1x64x128xf32>
    %327 = vector.shape_cast %326 : vector<1x1x64x128xf32> to vector<64x128xf32>
    %cst_468 = arith.constant dense<0.000000e+00> : vector<128x128xf32>
    %328 = tpu.matmul %325, %327, %cst_468 {dimension_numbers = #tpu.dot_dimension_numbers<[1], [0], [0], [1], [0, 0, 1, 1], [], []>} : vector<128x64xf32>, vector<64x128xf32>, vector<128x128xf32> -> vector<128x128xf32>
    %329 = arith.addf %323, %328 : vector<128x128xf32>
    %c0_469 = arith.constant 0 : index
    %c8_470 = arith.constant 8 : index
    %c2_471 = arith.constant 2 : index
    %c0_472 = arith.constant 0 : index
    %330 = vector.load %arg17[%c0_469, %c8_470, %c2_471, %c0_472] : memref<1x18x18x64xf32, #tpu.memory_space<vmem>>, vector<1x8x16x64xf32>
    %331 = vector.shape_cast %330 : vector<1x8x16x64xf32> to vector<128x64xf32>
    %c0_473 = arith.constant 0 : index
    %c2_474 = arith.constant 2 : index
    %c0_475 = arith.constant 0 : index
    %c0_476 = arith.constant 0 : index
    %332 = vector.load %arg7[%c0_473, %c2_474, %c0_475, %c0_476] : memref<3x3x64x128xf32, #tpu.memory_space<vmem>>, vector<1x1x64x128xf32>
    %333 = vector.shape_cast %332 : vector<1x1x64x128xf32> to vector<64x128xf32>
    %cst_477 = arith.constant dense<0.000000e+00> : vector<128x128xf32>
    %334 = tpu.matmul %331, %333, %cst_477 {dimension_numbers = #tpu.dot_dimension_numbers<[1], [0], [0], [1], [0, 0, 1, 1], [], []>} : vector<128x64xf32>, vector<64x128xf32>, vector<128x128xf32> -> vector<128x128xf32>
    %335 = arith.addf %329, %334 : vector<128x128xf32>
    %c0_478 = arith.constant 0 : index
    %c9_479 = arith.constant 9 : index
    %c0_480 = arith.constant 0 : index
    %c0_481 = arith.constant 0 : index
    %336 = vector.load %arg17[%c0_478, %c9_479, %c0_480, %c0_481] : memref<1x18x18x64xf32, #tpu.memory_space<vmem>>, vector<1x8x16x64xf32>
    %337 = vector.shape_cast %336 : vector<1x8x16x64xf32> to vector<128x64xf32>
    %c1_482 = arith.constant 1 : index
    %c0_483 = arith.constant 0 : index
    %c0_484 = arith.constant 0 : index
    %c0_485 = arith.constant 0 : index
    %338 = vector.load %arg7[%c1_482, %c0_483, %c0_484, %c0_485] : memref<3x3x64x128xf32, #tpu.memory_space<vmem>>, vector<1x1x64x128xf32>
    %339 = vector.shape_cast %338 : vector<1x1x64x128xf32> to vector<64x128xf32>
    %cst_486 = arith.constant dense<0.000000e+00> : vector<128x128xf32>
    %340 = tpu.matmul %337, %339, %cst_486 {dimension_numbers = #tpu.dot_dimension_numbers<[1], [0], [0], [1], [0, 0, 1, 1], [], []>} : vector<128x64xf32>, vector<64x128xf32>, vector<128x128xf32> -> vector<128x128xf32>
    %341 = arith.addf %335, %340 : vector<128x128xf32>
    %c0_487 = arith.constant 0 : index
    %c9_488 = arith.constant 9 : index
    %c1_489 = arith.constant 1 : index
    %c0_490 = arith.constant 0 : index
    %342 = vector.load %arg17[%c0_487, %c9_488, %c1_489, %c0_490] : memref<1x18x18x64xf32, #tpu.memory_space<vmem>>, vector<1x8x16x64xf32>
    %343 = vector.shape_cast %342 : vector<1x8x16x64xf32> to vector<128x64xf32>
    %c1_491 = arith.constant 1 : index
    %c1_492 = arith.constant 1 : index
    %c0_493 = arith.constant 0 : index
    %c0_494 = arith.constant 0 : index
    %344 = vector.load %arg7[%c1_491, %c1_492, %c0_493, %c0_494] : memref<3x3x64x128xf32, #tpu.memory_space<vmem>>, vector<1x1x64x128xf32>
    %345 = vector.shape_cast %344 : vector<1x1x64x128xf32> to vector<64x128xf32>
    %cst_495 = arith.constant dense<0.000000e+00> : vector<128x128xf32>
    %346 = tpu.matmul %343, %345, %cst_495 {dimension_numbers = #tpu.dot_dimension_numbers<[1], [0], [0], [1], [0, 0, 1, 1], [], []>} : vector<128x64xf32>, vector<64x128xf32>, vector<128x128xf32> -> vector<128x128xf32>
    %347 = arith.addf %341, %346 : vector<128x128xf32>
    %c0_496 = arith.constant 0 : index
    %c9_497 = arith.constant 9 : index
    %c2_498 = arith.constant 2 : index
    %c0_499 = arith.constant 0 : index
    %348 = vector.load %arg17[%c0_496, %c9_497, %c2_498, %c0_499] : memref<1x18x18x64xf32, #tpu.memory_space<vmem>>, vector<1x8x16x64xf32>
    %349 = vector.shape_cast %348 : vector<1x8x16x64xf32> to vector<128x64xf32>
    %c1_500 = arith.constant 1 : index
    %c2_501 = arith.constant 2 : index
    %c0_502 = arith.constant 0 : index
    %c0_503 = arith.constant 0 : index
    %350 = vector.load %arg7[%c1_500, %c2_501, %c0_502, %c0_503] : memref<3x3x64x128xf32, #tpu.memory_space<vmem>>, vector<1x1x64x128xf32>
    %351 = vector.shape_cast %350 : vector<1x1x64x128xf32> to vector<64x128xf32>
    %cst_504 = arith.constant dense<0.000000e+00> : vector<128x128xf32>
    %352 = tpu.matmul %349, %351, %cst_504 {dimension_numbers = #tpu.dot_dimension_numbers<[1], [0], [0], [1], [0, 0, 1, 1], [], []>} : vector<128x64xf32>, vector<64x128xf32>, vector<128x128xf32> -> vector<128x128xf32>
    %353 = arith.addf %347, %352 : vector<128x128xf32>
    %c0_505 = arith.constant 0 : index
    %c10_506 = arith.constant 10 : index
    %c0_507 = arith.constant 0 : index
    %c0_508 = arith.constant 0 : index
    %354 = vector.load %arg17[%c0_505, %c10_506, %c0_507, %c0_508] : memref<1x18x18x64xf32, #tpu.memory_space<vmem>>, vector<1x8x16x64xf32>
    %355 = vector.shape_cast %354 : vector<1x8x16x64xf32> to vector<128x64xf32>
    %c2_509 = arith.constant 2 : index
    %c0_510 = arith.constant 0 : index
    %c0_511 = arith.constant 0 : index
    %c0_512 = arith.constant 0 : index
    %356 = vector.load %arg7[%c2_509, %c0_510, %c0_511, %c0_512] : memref<3x3x64x128xf32, #tpu.memory_space<vmem>>, vector<1x1x64x128xf32>
    %357 = vector.shape_cast %356 : vector<1x1x64x128xf32> to vector<64x128xf32>
    %cst_513 = arith.constant dense<0.000000e+00> : vector<128x128xf32>
    %358 = tpu.matmul %355, %357, %cst_513 {dimension_numbers = #tpu.dot_dimension_numbers<[1], [0], [0], [1], [0, 0, 1, 1], [], []>} : vector<128x64xf32>, vector<64x128xf32>, vector<128x128xf32> -> vector<128x128xf32>
    %359 = arith.addf %353, %358 : vector<128x128xf32>
    %c0_514 = arith.constant 0 : index
    %c10_515 = arith.constant 10 : index
    %c1_516 = arith.constant 1 : index
    %c0_517 = arith.constant 0 : index
    %360 = vector.load %arg17[%c0_514, %c10_515, %c1_516, %c0_517] : memref<1x18x18x64xf32, #tpu.memory_space<vmem>>, vector<1x8x16x64xf32>
    %361 = vector.shape_cast %360 : vector<1x8x16x64xf32> to vector<128x64xf32>
    %c2_518 = arith.constant 2 : index
    %c1_519 = arith.constant 1 : index
    %c0_520 = arith.constant 0 : index
    %c0_521 = arith.constant 0 : index
    %362 = vector.load %arg7[%c2_518, %c1_519, %c0_520, %c0_521] : memref<3x3x64x128xf32, #tpu.memory_space<vmem>>, vector<1x1x64x128xf32>
    %363 = vector.shape_cast %362 : vector<1x1x64x128xf32> to vector<64x128xf32>
    %cst_522 = arith.constant dense<0.000000e+00> : vector<128x128xf32>
    %364 = tpu.matmul %361, %363, %cst_522 {dimension_numbers = #tpu.dot_dimension_numbers<[1], [0], [0], [1], [0, 0, 1, 1], [], []>} : vector<128x64xf32>, vector<64x128xf32>, vector<128x128xf32> -> vector<128x128xf32>
    %365 = arith.addf %359, %364 : vector<128x128xf32>
    %c0_523 = arith.constant 0 : index
    %c10_524 = arith.constant 10 : index
    %c2_525 = arith.constant 2 : index
    %c0_526 = arith.constant 0 : index
    %366 = vector.load %arg17[%c0_523, %c10_524, %c2_525, %c0_526] : memref<1x18x18x64xf32, #tpu.memory_space<vmem>>, vector<1x8x16x64xf32>
    %367 = vector.shape_cast %366 : vector<1x8x16x64xf32> to vector<128x64xf32>
    %c2_527 = arith.constant 2 : index
    %c2_528 = arith.constant 2 : index
    %c0_529 = arith.constant 0 : index
    %c0_530 = arith.constant 0 : index
    %368 = vector.load %arg7[%c2_527, %c2_528, %c0_529, %c0_530] : memref<3x3x64x128xf32, #tpu.memory_space<vmem>>, vector<1x1x64x128xf32>
    %369 = vector.shape_cast %368 : vector<1x1x64x128xf32> to vector<64x128xf32>
    %cst_531 = arith.constant dense<0.000000e+00> : vector<128x128xf32>
    %370 = tpu.matmul %367, %369, %cst_531 {dimension_numbers = #tpu.dot_dimension_numbers<[1], [0], [0], [1], [0, 0, 1, 1], [], []>} : vector<128x64xf32>, vector<64x128xf32>, vector<128x128xf32> -> vector<128x128xf32>
    %371 = arith.addf %365, %370 : vector<128x128xf32>
    %cst_532 = arith.constant 0.000000e+00 : f32
    %372 = vector.broadcast %cst_532 : f32 to vector<128x128xf32>
    %373 = arith.maximumf %371, %372 : vector<128x128xf32>
    %374 = vector.shape_cast %373 : vector<128x128xf32> to vector<1x8x16x128xf32>
    %c0_533 = arith.constant 0 : index
    %c8_534 = arith.constant 8 : index
    %c0_535 = arith.constant 0 : index
    %c0_536 = arith.constant 0 : index
    %375 = vector.load %arg18[%c0_533, %c8_534, %c0_535, %c0_536] : memref<1x16x16x128xf32, #tpu.memory_space<vmem>>, vector<1x8x16x128xf32>
    tpu.vector_store %arg18[%c0_533, %c8_534, %c0_535, %c0_536], %374 {strides = array<i32>} : memref<1x16x16x128xf32, #tpu.memory_space<vmem>>, vector<1x8x16x128xf32>,
    %c0_537 = arith.constant 0 : index
    %c0_538 = arith.constant 0 : index
    %c0_539 = arith.constant 0 : index
    %c0_540 = arith.constant 0 : index
    %376 = vector.load %arg18[%c0_537, %c0_538, %c0_539, %c0_540] : memref<1x16x16x128xf32, #tpu.memory_space<vmem>>, vector<1x1x16x128xf32>
    %c0_541 = arith.constant 0 : index
    %c1_542 = arith.constant 1 : index
    %c0_543 = arith.constant 0 : index
    %c0_544 = arith.constant 0 : index
    %377 = vector.load %arg18[%c0_541, %c1_542, %c0_543, %c0_544] : memref<1x16x16x128xf32, #tpu.memory_space<vmem>>, vector<1x1x16x128xf32>
    %378 = arith.maximumf %376, %377 : vector<1x1x16x128xf32>
    %c0_545 = arith.constant 0 : index
    %c0_546 = arith.constant 0 : index
    %c0_547 = arith.constant 0 : index
    %c0_548 = arith.constant 0 : index
    %379 = vector.load %arg19[%c0_545, %c0_546, %c0_547, %c0_548] : memref<1x8x16x128xf32, #tpu.memory_space<vmem>>, vector<1x1x16x128xf32>
    tpu.vector_store %arg19[%c0_545, %c0_546, %c0_547, %c0_548], %378 {strides = array<i32>} : memref<1x8x16x128xf32, #tpu.memory_space<vmem>>, vector<1x1x16x128xf32>,
    %c0_549 = arith.constant 0 : index
    %c2_550 = arith.constant 2 : index
    %c0_551 = arith.constant 0 : index
    %c0_552 = arith.constant 0 : index
    %380 = vector.load %arg18[%c0_549, %c2_550, %c0_551, %c0_552] : memref<1x16x16x128xf32, #tpu.memory_space<vmem>>, vector<1x1x16x128xf32>
    %c0_553 = arith.constant 0 : index
    %c3 = arith.constant 3 : index
    %c0_554 = arith.constant 0 : index
    %c0_555 = arith.constant 0 : index
    %381 = vector.load %arg18[%c0_553, %c3, %c0_554, %c0_555] : memref<1x16x16x128xf32, #tpu.memory_space<vmem>>, vector<1x1x16x128xf32>
    %382 = arith.maximumf %380, %381 : vector<1x1x16x128xf32>
    %c0_556 = arith.constant 0 : index
    %c1_557 = arith.constant 1 : index
    %c0_558 = arith.constant 0 : index
    %c0_559 = arith.constant 0 : index
    %383 = vector.load %arg19[%c0_556, %c1_557, %c0_558, %c0_559] : memref<1x8x16x128xf32, #tpu.memory_space<vmem>>, vector<1x1x16x128xf32>
    tpu.vector_store %arg19[%c0_556, %c1_557, %c0_558, %c0_559], %382 {strides = array<i32>} : memref<1x8x16x128xf32, #tpu.memory_space<vmem>>, vector<1x1x16x128xf32>,
    %c0_560 = arith.constant 0 : index
    %c4 = arith.constant 4 : index
    %c0_561 = arith.constant 0 : index
    %c0_562 = arith.constant 0 : index
    %384 = vector.load %arg18[%c0_560, %c4, %c0_561, %c0_562] : memref<1x16x16x128xf32, #tpu.memory_space<vmem>>, vector<1x1x16x128xf32>
    %c0_563 = arith.constant 0 : index
    %c5 = arith.constant 5 : index
    %c0_564 = arith.constant 0 : index
    %c0_565 = arith.constant 0 : index
    %385 = vector.load %arg18[%c0_563, %c5, %c0_564, %c0_565] : memref<1x16x16x128xf32, #tpu.memory_space<vmem>>, vector<1x1x16x128xf32>
    %386 = arith.maximumf %384, %385 : vector<1x1x16x128xf32>
    %c0_566 = arith.constant 0 : index
    %c2_567 = arith.constant 2 : index
    %c0_568 = arith.constant 0 : index
    %c0_569 = arith.constant 0 : index
    %387 = vector.load %arg19[%c0_566, %c2_567, %c0_568, %c0_569] : memref<1x8x16x128xf32, #tpu.memory_space<vmem>>, vector<1x1x16x128xf32>
    tpu.vector_store %arg19[%c0_566, %c2_567, %c0_568, %c0_569], %386 {strides = array<i32>} : memref<1x8x16x128xf32, #tpu.memory_space<vmem>>, vector<1x1x16x128xf32>,
    %c0_570 = arith.constant 0 : index
    %c6 = arith.constant 6 : index
    %c0_571 = arith.constant 0 : index
    %c0_572 = arith.constant 0 : index
    %388 = vector.load %arg18[%c0_570, %c6, %c0_571, %c0_572] : memref<1x16x16x128xf32, #tpu.memory_space<vmem>>, vector<1x1x16x128xf32>
    %c0_573 = arith.constant 0 : index
    %c7 = arith.constant 7 : index
    %c0_574 = arith.constant 0 : index
    %c0_575 = arith.constant 0 : index
    %389 = vector.load %arg18[%c0_573, %c7, %c0_574, %c0_575] : memref<1x16x16x128xf32, #tpu.memory_space<vmem>>, vector<1x1x16x128xf32>
    %390 = arith.maximumf %388, %389 : vector<1x1x16x128xf32>
    %c0_576 = arith.constant 0 : index
    %c3_577 = arith.constant 3 : index
    %c0_578 = arith.constant 0 : index
    %c0_579 = arith.constant 0 : index
    %391 = vector.load %arg19[%c0_576, %c3_577, %c0_578, %c0_579] : memref<1x8x16x128xf32, #tpu.memory_space<vmem>>, vector<1x1x16x128xf32>
    tpu.vector_store %arg19[%c0_576, %c3_577, %c0_578, %c0_579], %390 {strides = array<i32>} : memref<1x8x16x128xf32, #tpu.memory_space<vmem>>, vector<1x1x16x128xf32>,
    %c0_580 = arith.constant 0 : index
    %c8_581 = arith.constant 8 : index
    %c0_582 = arith.constant 0 : index
    %c0_583 = arith.constant 0 : index
    %392 = vector.load %arg18[%c0_580, %c8_581, %c0_582, %c0_583] : memref<1x16x16x128xf32, #tpu.memory_space<vmem>>, vector<1x1x16x128xf32>
    %c0_584 = arith.constant 0 : index
    %c9_585 = arith.constant 9 : index
    %c0_586 = arith.constant 0 : index
    %c0_587 = arith.constant 0 : index
    %393 = vector.load %arg18[%c0_584, %c9_585, %c0_586, %c0_587] : memref<1x16x16x128xf32, #tpu.memory_space<vmem>>, vector<1x1x16x128xf32>
    %394 = arith.maximumf %392, %393 : vector<1x1x16x128xf32>
    %c0_588 = arith.constant 0 : index
    %c4_589 = arith.constant 4 : index
    %c0_590 = arith.constant 0 : index
    %c0_591 = arith.constant 0 : index
    %395 = vector.load %arg19[%c0_588, %c4_589, %c0_590, %c0_591] : memref<1x8x16x128xf32, #tpu.memory_space<vmem>>, vector<1x1x16x128xf32>
    tpu.vector_store %arg19[%c0_588, %c4_589, %c0_590, %c0_591], %394 {strides = array<i32>} : memref<1x8x16x128xf32, #tpu.memory_space<vmem>>, vector<1x1x16x128xf32>,
    %c0_592 = arith.constant 0 : index
    %c10_593 = arith.constant 10 : index
    %c0_594 = arith.constant 0 : index
    %c0_595 = arith.constant 0 : index
    %396 = vector.load %arg18[%c0_592, %c10_593, %c0_594, %c0_595] : memref<1x16x16x128xf32, #tpu.memory_space<vmem>>, vector<1x1x16x128xf32>
    %c0_596 = arith.constant 0 : index
    %c11 = arith.constant 11 : index
    %c0_597 = arith.constant 0 : index
    %c0_598 = arith.constant 0 : index
    %397 = vector.load %arg18[%c0_596, %c11, %c0_597, %c0_598] : memref<1x16x16x128xf32, #tpu.memory_space<vmem>>, vector<1x1x16x128xf32>
    %398 = arith.maximumf %396, %397 : vector<1x1x16x128xf32>
    %c0_599 = arith.constant 0 : index
    %c5_600 = arith.constant 5 : index
    %c0_601 = arith.constant 0 : index
    %c0_602 = arith.constant 0 : index
    %399 = vector.load %arg19[%c0_599, %c5_600, %c0_601, %c0_602] : memref<1x8x16x128xf32, #tpu.memory_space<vmem>>, vector<1x1x16x128xf32>
    tpu.vector_store %arg19[%c0_599, %c5_600, %c0_601, %c0_602], %398 {strides = array<i32>} : memref<1x8x16x128xf32, #tpu.memory_space<vmem>>, vector<1x1x16x128xf32>,
    %c0_603 = arith.constant 0 : index
    %c12 = arith.constant 12 : index
    %c0_604 = arith.constant 0 : index
    %c0_605 = arith.constant 0 : index
    %400 = vector.load %arg18[%c0_603, %c12, %c0_604, %c0_605] : memref<1x16x16x128xf32, #tpu.memory_space<vmem>>, vector<1x1x16x128xf32>
    %c0_606 = arith.constant 0 : index
    %c13 = arith.constant 13 : index
    %c0_607 = arith.constant 0 : index
    %c0_608 = arith.constant 0 : index
    %401 = vector.load %arg18[%c0_606, %c13, %c0_607, %c0_608] : memref<1x16x16x128xf32, #tpu.memory_space<vmem>>, vector<1x1x16x128xf32>
    %402 = arith.maximumf %400, %401 : vector<1x1x16x128xf32>
    %c0_609 = arith.constant 0 : index
    %c6_610 = arith.constant 6 : index
    %c0_611 = arith.constant 0 : index
    %c0_612 = arith.constant 0 : index
    %403 = vector.load %arg19[%c0_609, %c6_610, %c0_611, %c0_612] : memref<1x8x16x128xf32, #tpu.memory_space<vmem>>, vector<1x1x16x128xf32>
    tpu.vector_store %arg19[%c0_609, %c6_610, %c0_611, %c0_612], %402 {strides = array<i32>} : memref<1x8x16x128xf32, #tpu.memory_space<vmem>>, vector<1x1x16x128xf32>,
    %c0_613 = arith.constant 0 : index
    %c14 = arith.constant 14 : index
    %c0_614 = arith.constant 0 : index
    %c0_615 = arith.constant 0 : index
    %404 = vector.load %arg18[%c0_613, %c14, %c0_614, %c0_615] : memref<1x16x16x128xf32, #tpu.memory_space<vmem>>, vector<1x1x16x128xf32>
    %c0_616 = arith.constant 0 : index
    %c15 = arith.constant 15 : index
    %c0_617 = arith.constant 0 : index
    %c0_618 = arith.constant 0 : index
    %405 = vector.load %arg18[%c0_616, %c15, %c0_617, %c0_618] : memref<1x16x16x128xf32, #tpu.memory_space<vmem>>, vector<1x1x16x128xf32>
    %406 = arith.maximumf %404, %405 : vector<1x1x16x128xf32>
    %c0_619 = arith.constant 0 : index
    %c7_620 = arith.constant 7 : index
    %c0_621 = arith.constant 0 : index
    %c0_622 = arith.constant 0 : index
    %407 = vector.load %arg19[%c0_619, %c7_620, %c0_621, %c0_622] : memref<1x8x16x128xf32, #tpu.memory_space<vmem>>, vector<1x1x16x128xf32>
    tpu.vector_store %arg19[%c0_619, %c7_620, %c0_621, %c0_622], %406 {strides = array<i32>} : memref<1x8x16x128xf32, #tpu.memory_space<vmem>>, vector<1x1x16x128xf32>,
    %c0_623 = arith.constant 0 : index
    %c0_624 = arith.constant 0 : index
    %c0_625 = arith.constant 0 : index
    %c0_626 = arith.constant 0 : index
    %408 = vector.load %arg19[%c0_623, %c0_624, %c0_625, %c0_626] : memref<1x8x16x128xf32, #tpu.memory_space<vmem>>, vector<1x8x1x128xf32>
    %c0_627 = arith.constant 0 : index
    %c0_628 = arith.constant 0 : index
    %c1_629 = arith.constant 1 : index
    %c0_630 = arith.constant 0 : index
    %409 = vector.load %arg19[%c0_627, %c0_628, %c1_629, %c0_630] : memref<1x8x16x128xf32, #tpu.memory_space<vmem>>, vector<1x8x1x128xf32>
    %410 = arith.maximumf %408, %409 : vector<1x8x1x128xf32>
    %c0_631 = arith.constant 0 : index
    %c0_632 = arith.constant 0 : index
    %c0_633 = arith.constant 0 : index
    %c0_634 = arith.constant 0 : index
    %411 = vector.load %arg20[%c0_631, %c0_632, %c0_633, %c0_634] : memref<1x8x8x128xf32, #tpu.memory_space<vmem>>, vector<1x8x1x128xf32>
    tpu.vector_store %arg20[%c0_631, %c0_632, %c0_633, %c0_634], %410 {strides = array<i32>} : memref<1x8x8x128xf32, #tpu.memory_space<vmem>>, vector<1x8x1x128xf32>,
    %c0_635 = arith.constant 0 : index
    %c0_636 = arith.constant 0 : index
    %c2_637 = arith.constant 2 : index
    %c0_638 = arith.constant 0 : index
    %412 = vector.load %arg19[%c0_635, %c0_636, %c2_637, %c0_638] : memref<1x8x16x128xf32, #tpu.memory_space<vmem>>, vector<1x8x1x128xf32>
    %c0_639 = arith.constant 0 : index
    %c0_640 = arith.constant 0 : index
    %c3_641 = arith.constant 3 : index
    %c0_642 = arith.constant 0 : index
    %413 = vector.load %arg19[%c0_639, %c0_640, %c3_641, %c0_642] : memref<1x8x16x128xf32, #tpu.memory_space<vmem>>, vector<1x8x1x128xf32>
    %414 = arith.maximumf %412, %413 : vector<1x8x1x128xf32>
    %c0_643 = arith.constant 0 : index
    %c0_644 = arith.constant 0 : index
    %c1_645 = arith.constant 1 : index
    %c0_646 = arith.constant 0 : index
    %415 = vector.load %arg20[%c0_643, %c0_644, %c1_645, %c0_646] : memref<1x8x8x128xf32, #tpu.memory_space<vmem>>, vector<1x8x1x128xf32>
    tpu.vector_store %arg20[%c0_643, %c0_644, %c1_645, %c0_646], %414 {strides = array<i32>} : memref<1x8x8x128xf32, #tpu.memory_space<vmem>>, vector<1x8x1x128xf32>,
    %c0_647 = arith.constant 0 : index
    %c0_648 = arith.constant 0 : index
    %c4_649 = arith.constant 4 : index
    %c0_650 = arith.constant 0 : index
    %416 = vector.load %arg19[%c0_647, %c0_648, %c4_649, %c0_650] : memref<1x8x16x128xf32, #tpu.memory_space<vmem>>, vector<1x8x1x128xf32>
    %c0_651 = arith.constant 0 : index
    %c0_652 = arith.constant 0 : index
    %c5_653 = arith.constant 5 : index
    %c0_654 = arith.constant 0 : index
    %417 = vector.load %arg19[%c0_651, %c0_652, %c5_653, %c0_654] : memref<1x8x16x128xf32, #tpu.memory_space<vmem>>, vector<1x8x1x128xf32>
    %418 = arith.maximumf %416, %417 : vector<1x8x1x128xf32>
    %c0_655 = arith.constant 0 : index
    %c0_656 = arith.constant 0 : index
    %c2_657 = arith.constant 2 : index
    %c0_658 = arith.constant 0 : index
    %419 = vector.load %arg20[%c0_655, %c0_656, %c2_657, %c0_658] : memref<1x8x8x128xf32, #tpu.memory_space<vmem>>, vector<1x8x1x128xf32>
    tpu.vector_store %arg20[%c0_655, %c0_656, %c2_657, %c0_658], %418 {strides = array<i32>} : memref<1x8x8x128xf32, #tpu.memory_space<vmem>>, vector<1x8x1x128xf32>,
    %c0_659 = arith.constant 0 : index
    %c0_660 = arith.constant 0 : index
    %c6_661 = arith.constant 6 : index
    %c0_662 = arith.constant 0 : index
    %420 = vector.load %arg19[%c0_659, %c0_660, %c6_661, %c0_662] : memref<1x8x16x128xf32, #tpu.memory_space<vmem>>, vector<1x8x1x128xf32>
    %c0_663 = arith.constant 0 : index
    %c0_664 = arith.constant 0 : index
    %c7_665 = arith.constant 7 : index
    %c0_666 = arith.constant 0 : index
    %421 = vector.load %arg19[%c0_663, %c0_664, %c7_665, %c0_666] : memref<1x8x16x128xf32, #tpu.memory_space<vmem>>, vector<1x8x1x128xf32>
    %422 = arith.maximumf %420, %421 : vector<1x8x1x128xf32>
    %c0_667 = arith.constant 0 : index
    %c0_668 = arith.constant 0 : index
    %c3_669 = arith.constant 3 : index
    %c0_670 = arith.constant 0 : index
    %423 = vector.load %arg20[%c0_667, %c0_668, %c3_669, %c0_670] : memref<1x8x8x128xf32, #tpu.memory_space<vmem>>, vector<1x8x1x128xf32>
    tpu.vector_store %arg20[%c0_667, %c0_668, %c3_669, %c0_670], %422 {strides = array<i32>} : memref<1x8x8x128xf32, #tpu.memory_space<vmem>>, vector<1x8x1x128xf32>,
    %c0_671 = arith.constant 0 : index
    %c0_672 = arith.constant 0 : index
    %c8_673 = arith.constant 8 : index
    %c0_674 = arith.constant 0 : index
    %424 = vector.load %arg19[%c0_671, %c0_672, %c8_673, %c0_674] : memref<1x8x16x128xf32, #tpu.memory_space<vmem>>, vector<1x8x1x128xf32>
    %c0_675 = arith.constant 0 : index
    %c0_676 = arith.constant 0 : index
    %c9_677 = arith.constant 9 : index
    %c0_678 = arith.constant 0 : index
    %425 = vector.load %arg19[%c0_675, %c0_676, %c9_677, %c0_678] : memref<1x8x16x128xf32, #tpu.memory_space<vmem>>, vector<1x8x1x128xf32>
    %426 = arith.maximumf %424, %425 : vector<1x8x1x128xf32>
    %c0_679 = arith.constant 0 : index
    %c0_680 = arith.constant 0 : index
    %c4_681 = arith.constant 4 : index
    %c0_682 = arith.constant 0 : index
    %427 = vector.load %arg20[%c0_679, %c0_680, %c4_681, %c0_682] : memref<1x8x8x128xf32, #tpu.memory_space<vmem>>, vector<1x8x1x128xf32>
    tpu.vector_store %arg20[%c0_679, %c0_680, %c4_681, %c0_682], %426 {strides = array<i32>} : memref<1x8x8x128xf32, #tpu.memory_space<vmem>>, vector<1x8x1x128xf32>,
    %c0_683 = arith.constant 0 : index
    %c0_684 = arith.constant 0 : index
    %c10_685 = arith.constant 10 : index
    %c0_686 = arith.constant 0 : index
    %428 = vector.load %arg19[%c0_683, %c0_684, %c10_685, %c0_686] : memref<1x8x16x128xf32, #tpu.memory_space<vmem>>, vector<1x8x1x128xf32>
    %c0_687 = arith.constant 0 : index
    %c0_688 = arith.constant 0 : index
    %c11_689 = arith.constant 11 : index
    %c0_690 = arith.constant 0 : index
    %429 = vector.load %arg19[%c0_687, %c0_688, %c11_689, %c0_690] : memref<1x8x16x128xf32, #tpu.memory_space<vmem>>, vector<1x8x1x128xf32>
    %430 = arith.maximumf %428, %429 : vector<1x8x1x128xf32>
    %c0_691 = arith.constant 0 : index
    %c0_692 = arith.constant 0 : index
    %c5_693 = arith.constant 5 : index
    %c0_694 = arith.constant 0 : index
    %431 = vector.load %arg20[%c0_691, %c0_692, %c5_693, %c0_694] : memref<1x8x8x128xf32, #tpu.memory_space<vmem>>, vector<1x8x1x128xf32>
    tpu.vector_store %arg20[%c0_691, %c0_692, %c5_693, %c0_694], %430 {strides = array<i32>} : memref<1x8x8x128xf32, #tpu.memory_space<vmem>>, vector<1x8x1x128xf32>,
    %c0_695 = arith.constant 0 : index
    %c0_696 = arith.constant 0 : index
    %c12_697 = arith.constant 12 : index
    %c0_698 = arith.constant 0 : index
    %432 = vector.load %arg19[%c0_695, %c0_696, %c12_697, %c0_698] : memref<1x8x16x128xf32, #tpu.memory_space<vmem>>, vector<1x8x1x128xf32>
    %c0_699 = arith.constant 0 : index
    %c0_700 = arith.constant 0 : index
    %c13_701 = arith.constant 13 : index
    %c0_702 = arith.constant 0 : index
    %433 = vector.load %arg19[%c0_699, %c0_700, %c13_701, %c0_702] : memref<1x8x16x128xf32, #tpu.memory_space<vmem>>, vector<1x8x1x128xf32>
    %434 = arith.maximumf %432, %433 : vector<1x8x1x128xf32>
    %c0_703 = arith.constant 0 : index
    %c0_704 = arith.constant 0 : index
    %c6_705 = arith.constant 6 : index
    %c0_706 = arith.constant 0 : index
    %435 = vector.load %arg20[%c0_703, %c0_704, %c6_705, %c0_706] : memref<1x8x8x128xf32, #tpu.memory_space<vmem>>, vector<1x8x1x128xf32>
    tpu.vector_store %arg20[%c0_703, %c0_704, %c6_705, %c0_706], %434 {strides = array<i32>} : memref<1x8x8x128xf32, #tpu.memory_space<vmem>>, vector<1x8x1x128xf32>,
    %c0_707 = arith.constant 0 : index
    %c0_708 = arith.constant 0 : index
    %c14_709 = arith.constant 14 : index
    %c0_710 = arith.constant 0 : index
    %436 = vector.load %arg19[%c0_707, %c0_708, %c14_709, %c0_710] : memref<1x8x16x128xf32, #tpu.memory_space<vmem>>, vector<1x8x1x128xf32>
    %c0_711 = arith.constant 0 : index
    %c0_712 = arith.constant 0 : index
    %c15_713 = arith.constant 15 : index
    %c0_714 = arith.constant 0 : index
    %437 = vector.load %arg19[%c0_711, %c0_712, %c15_713, %c0_714] : memref<1x8x16x128xf32, #tpu.memory_space<vmem>>, vector<1x8x1x128xf32>
    %438 = arith.maximumf %436, %437 : vector<1x8x1x128xf32>
    %c0_715 = arith.constant 0 : index
    %c0_716 = arith.constant 0 : index
    %c7_717 = arith.constant 7 : index
    %c0_718 = arith.constant 0 : index
    %439 = vector.load %arg20[%c0_715, %c0_716, %c7_717, %c0_718] : memref<1x8x8x128xf32, #tpu.memory_space<vmem>>, vector<1x8x1x128xf32>
    tpu.vector_store %arg20[%c0_715, %c0_716, %c7_717, %c0_718], %438 {strides = array<i32>} : memref<1x8x8x128xf32, #tpu.memory_space<vmem>>, vector<1x8x1x128xf32>,
    %c0_719 = arith.constant 0 : index
    %c0_720 = arith.constant 0 : index
    %c0_721 = arith.constant 0 : index
    %c0_722 = arith.constant 0 : index
    %440 = vector.load %arg20[%c0_719, %c0_720, %c0_721, %c0_722] : memref<1x8x8x128xf32, #tpu.memory_space<vmem>>, vector<1x8x8x128xf32>
    %441 = vector.shape_cast %440 : vector<1x8x8x128xf32> to vector<64x128xf32>
    %c0_723 = arith.constant 0 : index
    %c0_724 = arith.constant 0 : index
    %442 = vector.load %arg9[%c0_723, %c0_724] : memref<128x256xf32, #tpu.memory_space<vmem>>, vector<128x256xf32>
    %cst_725 = arith.constant dense<0.000000e+00> : vector<64x256xf32>
    %443 = tpu.matmul %441, %442, %cst_725 {dimension_numbers = #tpu.dot_dimension_numbers<[1], [0], [0], [1], [0, 0, 1, 1], [], []>} : vector<64x128xf32>, vector<128x256xf32>, vector<64x256xf32> -> vector<64x256xf32>
    %c0_726 = arith.constant 0 : index
    %c0_727 = arith.constant 0 : index
    %444 = vector.load %arg10[%c0_726, %c0_727] : memref<1x256xf32, #tpu.memory_space<vmem>>, vector<1x256xf32>
    %445 = vector.broadcast %444 : vector<1x256xf32> to vector<64x256xf32>
    %446 = arith.addf %443, %445 : vector<64x256xf32>
    %cst_728 = arith.constant 0.000000e+00 : f32
    %447 = vector.broadcast %cst_728 : f32 to vector<64x256xf32>
    %448 = arith.maximumf %446, %447 : vector<64x256xf32>
    %c0_729 = arith.constant 0 : index
    %c0_730 = arith.constant 0 : index
    %449 = vector.load %arg2[%c0_729, %c0_730] : memref<64x16xf32, #tpu.memory_space<vmem>>, vector<64x16xf32>
    %c0_731 = arith.constant 0 : index
    %c0_732 = arith.constant 0 : index
    %450 = vector.load %arg11[%c0_731, %c0_732] : memref<16x256xf32, #tpu.memory_space<vmem>>, vector<16x256xf32>
    %cst_733 = arith.constant dense<0.000000e+00> : vector<64x256xf32>
    %451 = tpu.matmul %449, %450, %cst_733 {dimension_numbers = #tpu.dot_dimension_numbers<[1], [0], [0], [1], [0, 0, 1, 1], [], []>} : vector<64x16xf32>, vector<16x256xf32>, vector<64x256xf32> -> vector<64x256xf32>
    %c0_734 = arith.constant 0 : index
    %c0_735 = arith.constant 0 : index
    %452 = vector.load %arg12[%c0_734, %c0_735] : memref<1x256xf32, #tpu.memory_space<vmem>>, vector<1x256xf32>
    %453 = vector.broadcast %452 : vector<1x256xf32> to vector<64x256xf32>
    %454 = arith.addf %451, %453 : vector<64x256xf32>
    %cst_736 = arith.constant 0.000000e+00 : f32
    %455 = vector.broadcast %cst_736 : f32 to vector<64x256xf32>
    %456 = arith.maximumf %454, %455 : vector<64x256xf32>
    %457 = arith.addf %448, %456 : vector<64x256xf32>
    %c0_737 = arith.constant 0 : index
    %c0_738 = arith.constant 0 : index
    %458 = vector.load %arg13[%c0_737, %c0_738] : memref<256x128xf32, #tpu.memory_space<vmem>>, vector<256x128xf32>
    %cst_739 = arith.constant dense<0.000000e+00> : vector<64x128xf32>
    %459 = tpu.matmul %457, %458, %cst_739 {dimension_numbers = #tpu.dot_dimension_numbers<[1], [0], [0], [1], [0, 0, 1, 1], [], []>} : vector<64x256xf32>, vector<256x128xf32>, vector<64x128xf32> -> vector<64x128xf32>
    %c0_740 = arith.constant 0 : index
    %c0_741 = arith.constant 0 : index
    %460 = vector.load %arg14[%c0_740, %c0_741] : memref<1x128xf32, #tpu.memory_space<vmem>>, vector<1x128xf32>
    %461 = vector.broadcast %460 : vector<1x128xf32> to vector<64x128xf32>
    %462 = arith.addf %459, %461 : vector<64x128xf32>
    %c0_742 = arith.constant 0 : index
    %c0_743 = arith.constant 0 : index
    %463 = vector.load %arg15[%c0_742, %c0_743] : memref<64x128xf32, #tpu.memory_space<vmem>>, vector<64x128xf32>
    tpu.vector_store %arg15[%c0_742, %c0_743], %462 {strides = array<i32>} : memref<64x128xf32, #tpu.memory_space<vmem>>, vector<64x128xf32>,
    return
  }
  func.func @transform_0(%arg0: i32) -> (i32, i32, i32, i32) {
    %c0_i32 = arith.constant 0 : i32
    %c0_i32_0 = arith.constant 0 : i32
    %c0_i32_1 = arith.constant 0 : i32
    %c0_i32_2 = arith.constant 0 : i32
    return %arg0, %c0_i32, %c0_i32_0, %c0_i32_1 : i32, i32, i32, i32
  }
  func.func @transform_1(%arg0: i32) -> (i32, i32) {
    %c0_i32 = arith.constant 0 : i32
    %c0_i32_0 = arith.constant 0 : i32
    return %arg0, %c0_i32 : i32, i32
  }
  func.func @transform_2(%arg0: i32) -> (i32, i32, i32, i32) {
    %c0_i32 = arith.constant 0 : i32
    %c0_i32_0 = arith.constant 0 : i32
    %c0_i32_1 = arith.constant 0 : i32
    %c0_i32_2 = arith.constant 0 : i32
    %c0_i32_3 = arith.constant 0 : i32
    return %c0_i32, %c0_i32_0, %c0_i32_1, %c0_i32_2 : i32, i32, i32, i32
  }
  func.func @transform_3(%arg0: i32) -> (i32, i32) {
    %c0_i32 = arith.constant 0 : i32
    %c0_i32_0 = arith.constant 0 : i32
    %c0_i32_1 = arith.constant 0 : i32
    return %c0_i32, %c0_i32_0 : i32, i32
  }
  func.func @transform_4(%arg0: i32) -> (i32, i32, i32, i32) {
    %c0_i32 = arith.constant 0 : i32
    %c0_i32_0 = arith.constant 0 : i32
    %c0_i32_1 = arith.constant 0 : i32
    %c0_i32_2 = arith.constant 0 : i32
    %c0_i32_3 = arith.constant 0 : i32
    return %c0_i32, %c0_i32_0, %c0_i32_1, %c0_i32_2 : i32, i32, i32, i32
  }
  func.func @transform_5(%arg0: i32) -> (i32, i32) {
    %c0_i32 = arith.constant 0 : i32
    %c0_i32_0 = arith.constant 0 : i32
    %c0_i32_1 = arith.constant 0 : i32
    return %c0_i32, %c0_i32_0 : i32, i32
  }
  func.func @transform_6(%arg0: i32) -> (i32, i32, i32, i32) {
    %c0_i32 = arith.constant 0 : i32
    %c0_i32_0 = arith.constant 0 : i32
    %c0_i32_1 = arith.constant 0 : i32
    %c0_i32_2 = arith.constant 0 : i32
    %c0_i32_3 = arith.constant 0 : i32
    return %c0_i32, %c0_i32_0, %c0_i32_1, %c0_i32_2 : i32, i32, i32, i32
  }
  func.func @transform_7(%arg0: i32) -> (i32, i32) {
    %c0_i32 = arith.constant 0 : i32
    %c0_i32_0 = arith.constant 0 : i32
    %c0_i32_1 = arith.constant 0 : i32
    return %c0_i32, %c0_i32_0 : i32, i32
  }
  func.func @transform_8(%arg0: i32) -> (i32, i32) {
    %c0_i32 = arith.constant 0 : i32
    %c0_i32_0 = arith.constant 0 : i32
    %c0_i32_1 = arith.constant 0 : i32
    return %c0_i32, %c0_i32_0 : i32, i32
  }
  func.func @transform_9(%arg0: i32) -> (i32, i32) {
    %c0_i32 = arith.constant 0 : i32
    %c0_i32_0 = arith.constant 0 : i32
    %c0_i32_1 = arith.constant 0 : i32
    return %c0_i32, %c0_i32_0 : i32, i32
  }
  func.func @transform_10(%arg0: i32) -> (i32, i32) {
    %c0_i32 = arith.constant 0 : i32
    %c0_i32_0 = arith.constant 0 : i32
    %c0_i32_1 = arith.constant 0 : i32
    return %c0_i32, %c0_i32_0 : i32, i32
  }
  func.func @transform_11(%arg0: i32) -> (i32, i32) {
    %c0_i32 = arith.constant 0 : i32
    %c0_i32_0 = arith.constant 0 : i32
    %c0_i32_1 = arith.constant 0 : i32
    return %c0_i32, %c0_i32_0 : i32, i32
  }
  func.func @transform_12(%arg0: i32) -> (i32, i32) {
    %c0_i32 = arith.constant 0 : i32
    %c0_i32_0 = arith.constant 0 : i32
    %c0_i32_1 = arith.constant 0 : i32
    return %c0_i32, %c0_i32_0 : i32, i32
  }
  func.func @transform_13(%arg0: i32) -> (i32, i32) {
    %c0_i32 = arith.constant 0 : i32
    %c0_i32_0 = arith.constant 0 : i32
    %c0_i32_1 = arith.constant 0 : i32
    return %c0_i32, %c0_i32_0 : i32, i32
  }
  func.func @transform_14(%arg0: i32) -> (i32, i32) {
    %c0_i32 = arith.constant 0 : i32
    %c0_i32_0 = arith.constant 0 : i32
    return %arg0, %c0_i32 : i32, i32
  }
}

</mosaic_0001>

<bundles_post_ra>
// kernel: tpu_custom_call.1
= control target key start
LH: loop header
LB: loop body
LE: loop exit
PB: predicated region body
PF: predicated region fallthrough
CT: control target
= control target key end

     0   :  { %s16878_s0 = inlined_call_operand.vmem [shape: f32[2,18,18,4], index: 0, kind: input, shape index: {}]   ;;  %s16879_s1 = inlined_call_operand.vmem [shape: f32[128,16], index: 1, kind: input, shape index: {}]   ;;  %s16880_s2 = inlined_call_operand.vmem [shape: f32[3,3,4,32], index: 2, kind: input, shape index: {}]   ;;  %s16881_s3 = inlined_call_operand.vmem [shape: f32[1,32], index: 3, kind: input, shape index: {}]   ;;  %s16882_s4 = inlined_call_operand.vmem [shape: f32[3,3,32,64], index: 4, kind: input, shape index: {}]   ;;  %s16883_s5 = inlined_call_operand.vmem [shape: f32[1,64], index: 5, kind: input, shape index: {}]   ;;  %s16884_s6 = inlined_call_operand.vmem [shape: f32[3,3,64,128], index: 6, kind: input, shape index: {}]   ;;  %s16885_s7 = inlined_call_operand.vmem [shape: f32[1,128], index: 7, kind: input, shape index: {}]   ;;  %s16886_s8 = inlined_call_operand.hbm [shape: f32[128,256], index: 8, kind: input, shape index: {}]   ;;  %s16887_s9 = inlined_call_operand.vmem [shape: f32[1,256], index: 9, kind: input, shape index: {}]   ;;  %s16888_s10 = inlined_call_operand.vmem [shape: f32[16,256], index: 10, kind: input, shape index: {}]   ;;  %s16889_s11 = inlined_call_operand.vmem [shape: f32[1,256], index: 11, kind: input, shape index: {}]   ;;  %s16890_s12 = inlined_call_operand.hbm [shape: f32[256,128], index: 12, kind: input, shape index: {}]   ;;  %s16891_s13 = inlined_call_operand.vmem [shape: f32[1,128], index: 13, kind: input, shape index: {}]   ;;  %s16892_s14 = inlined_call_operand.hbm [shape: f32[128,128], index: 14, kind: output, shape index: {}]  }
   0x1   :  { %16963 = sst [smem:[#allocation65_spill]] %s16886_s8 }
   0x2   :  { %19 = vsyncpa [#allocation8], 0 }
   0x3   :  { %20 = vsyncpa [#allocation11], 0 }
   0x4   :  { %21 = vsyncpa [#allocation9], 0 }
   0x5   :  { %23 = vsyncpa [#allocation9 + $0x1], 0  ;;  %s11572_s29 = smov 0   ;;  %s11574_s30 = smov 0  }
   0x6   :  { %s11576_s15 = smov 0   ;;  %s11578_s16 = smov 0  }
   0x7 LB: > { %16964 = sst [smem:[#allocation16_spill]] %s11474_s29  ;;  %s11593_s17 = sadd.s32 4294967295, %s11486_s16   ;;  %s11486_s16 = sphi %s11578_s16, %s17226_s16   ;;  %s11482_s15 = sphi %s11576_s15, %s17228_s15   ;;  %s11478_s30 = sphi %s11574_s30, %s17230_s30   ;;  %s11474_s29 = sphi %s11572_s29, %s17229_s29  }
   0x8   : > { %16965 = sst [smem:[#allocation17_spill]] %s11482_s15  ;;  %s9897_s18 = sadd.s32 4294967294, %s11486_s16  }
   0x9   : > { %s11597_s19 = sadd.s32 1, %s11486_s16   ;;  %s340_s20 = sadd.s32 1, %s11482_s15 }
   0xa   : > { %16966 = sst [smem:[#allocation18_spill]] %s11597_s19  ;;  %s337_s21 = ssub.s32 %s11486_s16, %s11597_s19 }
   0xb   : > { %p350_p0 = scmp.ne.s32.totalorder %s11482_s15, %s11478_s30  ;;  %p338_p1 = scmp.eq.s32.totalorder %s337_s21, 0 }
   0xc   : > { %p351_p2 = scmp.eq.s32.totalorder %s11593_s17, 1  ;;  %p356_p3 = scmp.ne.s32.totalorder %s11478_s30, %s11474_s29 }
   0xd   : > { %p357_p4 = scmp.eq.s32.totalorder %s9897_s18, 1  ;;  %p9898_p7 = scmp.ge.s32.totalorder %s11486_s16, 1 }
   0xe   : > { %s11608_s22 = scalar_select %p338_p1, %s11482_s15, %s340_s20  }
   0xf   : > { %p11610_p5 = por %p351_p2, %p350_p0  ;;  %p11614_p6 = por %p357_p4, %p356_p3 }
  0x10   : > { %16967 = sst [smem:[#allocation19_spill]] %s11608_s22  ;;  %p364_p8 = scmp.lt.s32.totalorder %s11486_s16, 3 }
  0x11   : > { %s16969_s24 = scalar_select %p11614_p6, 1, 0 }
  0x12   : > { %p11285_p9 = scmp.eq.s32.totalorder %s11593_s17, 0  ;;  %p11621_p10 = pnand %p9898_p7, %p364_p8 }
  0x13   : > { %16970 = sst [smem:[#allocation20_spill]] %s16969_s24  ;;  %s11488_s18 = smov [#allocation7]  }
  0x14   : > { %s16972_s8 = sld [smem:[#allocation65_spill]]  ;;  %p11274_p11 = pneg %p11621_p10 }
  0x15   : > { %s395_s20 = sshll.u32 %s11488_s18, 4  ;;  %s416_s15 = sshll.u32 %s16890_s12, 4  ;;  %s396_s20 = int_to_ptr.vmem [resolvable:$true] %s395_s20  ;;  %s417_s15 = int_to_ptr.hbm [resolvable:$true] %s416_s15 }
  0x16   : > { %p11275_p12 = pnand %p11285_p9, %p11274_p11  ;;  %s11489_s19 = smov 256  }
  0x17   : > { %s11490_s24 = smov 16   ;;  %s11491_s29 = smov [#allocation10]  }
  0x18   : > { %s418_s26 = sshll.u32 %s11491_s29, 4  ;;  %s11492_s27 = smov 128   ;;  %s419_s26 = int_to_ptr.vmem [resolvable:$true] %s418_s26 }
  0x19   : > { %454 = sbr.rel (%p11621_p10) target bundleno = 2284 (0x8ec), region = 76 }
  0x1a   : > { %s393_s28 = sshll.u32 %s16972_s8, 4  ;;  %s11493_s8 = smov 8   ;;  %s394_s28 = int_to_ptr.hbm [resolvable:$true] %s393_s28 }
  0x1b   : > { %11277 = dma.hbm_to_vmem [thread:$0]  (!%p11275_p12), %s394_s28, 4096, %s396_s20, [#allocation8], %s11489_s19, %s11489_s19, %s11490_s24  }
  0x1c   : > { %11280 = dma.hbm_to_vmem [thread:$0]  (!%p11275_p12), %s417_s15, 4096, %s419_s26, [#allocation11], %s11492_s27, %s11492_s27, %s11493_s8  }
  0x1e   : > { %11461 = dma.done.wait (%p11285_p9), [#allocation8], 4096  }
  0x1f   : > { %11463 = vsyncadd (%p11285_p9), [#allocation8], 4294963200 }
  0x20   : > { %11465 = dma.done.wait (%p11285_p9), [#allocation11], 4096  }
  0x21   : > { %11467 = vsyncadd (%p11285_p9), [#allocation11], 4294963200  ;;  %p511_p13 = scmp.lt.s32.totalorder %s11593_s17, 1  ;;  %vm706_vm0 = vcmask 1043456   ;;  %v656_v0 = vld [vmem:[%s16880_s2] sm:$0xf] }
  0x22   : > { %v9926_v1 = vld [vmem:[%s16880_s2 + $0x4] sm:$0xf]  ;;  %vm657_vm1 = vcmask 31744   ;;  %9909 = vmatpush.msk.msra.mxu0 %vm706_vm0, %v656_v0  ;;  %11261 = vmatpush.msk.msra.mxu2 %vm706_vm0, %v656_v0  ;;  %v10012_v6 = vld [vmem:[%s16880_s2 + $0x10] sm:$0xf]  ;;  %vm523_vm2 = vcmask 261120  }
  0x23   : > { %s512_s29 = scalar_select %p511_p13, %s11593_s17, 1  ;;  %9927 = vmatpush.msk.msra.mxu1 %vm706_vm0, %v9926_v1  ;;  %11262 = vmatpush.msk.msra.mxu3 %vm706_vm0, %v9926_v1  ;;  %v10046_v7 = vld [vmem:[%s16880_s2 + $0x14] sm:$0xf]  ;;  %v9944_v8 = vld [vmem:[%s16880_s2 + $0x8] sm:$0xf]  ;;  %vm526_vm3 = vcmask 254976  }
  0x24   : > { %10013 = vmatpush.msk.msrb.mxu0 %vm706_vm0, %v10012_v6  ;;  %9945 = vmatpush.msk.msrb.mxu2 %vm706_vm0, %v9944_v8  ;;  %v9978_v11 = vld [vmem:[%s16880_s2 + $0xc] sm:$0xf]  ;;  %v10080_v31 = vld [vmem:[%s16880_s2 + $0x18] sm:$0xf]  ;;  %v10114_v35 = vld [vmem:[%s16880_s2 + $0x1c] sm:$0xf] }
  0x25   : > { %s11263_s8 = smul.u32 432, %s512_s29  ;;  %10047 = vmatpush.msk.msrb.mxu1 %vm706_vm0, %v10046_v7  ;;  %9979 = vmatpush.msk.msrb.mxu3 %vm706_vm0, %v9978_v11  ;;  %v10148_v39 = vld [vmem:[%s16880_s2 + $0x20] sm:$0xf]  ;;  %vm579_vm4 = vcmask 523264   ;;  %vm582_vm5 = vcmask 517120   ;;  %s9907_s28 = sshll.u32 %s11593_s17, 3 }
  0x26   : > { %v2048_v40 = vld [vmem:[%s16880_s2] sm:$0xf]  ;;  %p517_p0 = scmp.lt.s32.totalorder %s9907_s28, 15  ;;  %vm9520_vm6 = vcmask 130048   ;;  %s508_s15 = sand.u32 1, %s11478_s30  }
  0x27   : > { %s11650_s22 = scalar_lea.vmem %s16878_s0, %s11263_s8  ;;  %v11934_v57 = vld [vmem:[%s16881_s3] ss:$0 sm:$0xff]  ;;  %s9905_s25 = sshll.u32 %s508_s15, 6 }
  0x28   : > { %v640_v2 = vld [vmem:[%s11650_s22] sm:$0xff]  ;;  %v11662_v3 = vld [vmem:[%s11650_s22 + $0x90] sm:$0xff]  ;;  %v641_v9 = vld [vmem:[%s11650_s22 + $0x8] sm:$0xff]  ;;  %s17232_s28 = smov (!%p517_p0, %s9907_s28), 15  ;;  %s9786_s29 = scalar_lea.sflag [#allocation9], %s508_s15 }
  0x29   : > { %v791_v4 = vld [vmem:[%s11650_s22 + $0x1] sm:$0xff]  ;;  %v11666_v5 = vld [vmem:[%s11650_s22 + $0x91] sm:$0xff]  ;;  %9910 = vmatmul.msk.f32.vlgmr.msra.gmra.mxu0 %vm657_vm1, %v640_v2  ;;  %9922 = vmatmul.msk.f32.vlgmr.msra.gmra.mxu2 %vm657_vm1, %v11662_v3  ;;  %v792_v12 = vld [vmem:[%s11650_s22 + $0x9] sm:$0xff]  ;;  %s9908_s18 = sshll.u32 %s17232_s28, 3  ;;  %s16834_s28 = scalar_lea.vmem [#allocation12], %s9905_s25 }
  0x2a   : > { %9928 = vmatmul.msk.f32.vlgmr.msra.gmra.mxu1 %vm657_vm1, %v791_v4  ;;  %9940 = vmatmul.msk.f32.vlgmr.msra.gmra.mxu3 %vm657_vm1, %v11666_v5  ;;  %v11689_v10 = vld [vmem:[%s11650_s22 + $0x98] sm:$0xff]  ;;  %v11708_v15 = vld [vmem:[%s11650_s22 + $0xa8] sm:$0xff]  ;;  %v643_v18 = vld [vmem:[%s11650_s22 + $0x20] sm:$0xff]  ;;  %s16732_s26 = scalar_lea.vmem %s16879_s1, %s9908_s18  ;;  %s11260_s18 = sshll.u32 %s11593_s17, 6 }
  0x2b   : > { %v11697_v13 = vld [vmem:[%s11650_s22 + $0x99] sm:$0xff]  ;;  %v11714_v17 = vld [vmem:[%s11650_s22 + $0xa9] sm:$0xff]  ;;  %v11728_v20 = vld [vmem:[%s11650_s22 + $0x21] sm:$0xff]  ;;  %10081 = vmatpush.msk.msra.mxu2 %vm706_vm0, %v10080_v31  ;;  %10115 = vmatpush.msk.msra.mxu3 %vm706_vm0, %v10114_v35  ;;  %s9798_s27 = sshll.u32 %s16834_s28, 4  ;;  %s11436_s25 = scalar_lea.hbm %s16892_s14, 128  ;;  %s9799_s27 = int_to_ptr.vmem [resolvable:$true] %s9798_s27 }
  0x2c   : > { %v642_v14 = vld [vmem:[%s11650_s22 + $0x18] sm:$0xff]  ;;  %v11725_v19 = vld [vmem:[%s11650_s22 + $0xb0] sm:$0xff]  ;;  %v941_v23 = vld [vmem:[%s11650_s22 + $0x2] sm:$0xff]  ;;  %10149 = vmatpush.msk.msra.mxu0 %vm706_vm0, %v10148_v39  ;;  %10182 = vmatpush.msk.msra.mxu1 %vm706_vm0, %v2048_v40 }
  0x2d   : > { %v11711_v16 = vld [vmem:[%s11650_s22 + $0x19] sm:$0xff]  ;;  %v11731_v21 = vld [vmem:[%s11650_s22 + $0xb1] sm:$0xff]  ;;  %v11767_v28 = vld [vmem:[%s11650_s22 + $0x48] sm:$0xff] }
  0x2e   : > { %v11741_v22 = vld [vmem:[%s11650_s22 + $0x30] sm:$0xff]  ;;  %v11754_v25 = vld [vmem:[%s11650_s22 + $0x38] sm:$0xff]  ;;  %v944_v33 = vld [vmem:[%s11650_s22 + $0x22] sm:$0xff] }
  0x2f   : > { %v11745_v24 = vld [vmem:[%s11650_s22 + $0x31] sm:$0xff]  ;;  %v11758_v27 = vld [vmem:[%s11650_s22 + $0x39] sm:$0xff]  ;;  %v11771_v30 = vld [vmem:[%s11650_s22 + $0x49] sm:$0xff] }
  0x30   : > { %v942_v26 = vld [vmem:[%s11650_s22 + $0xa] sm:$0xff]  ;;  %v943_v29 = vld [vmem:[%s11650_s22 + $0x1a] sm:$0xff]  ;;  %v11806_v37 = vld [vmem:[%s11650_s22 + $0x32] sm:$0xff] }
  0x31   : > { %9911 = vmatmul.msk.f32.gmra.mxu0 %vm657_vm1, %v641_v9  ;;  %9923 = vmatmul.msk.f32.gmra.mxu2 %vm657_vm1, %v11689_v10  ;;  %v11785_v32 = vld [vmem:[%s11650_s22 + $0x50] sm:$0xff]  ;;  %v11803_v36 = vld [vmem:[%s11650_s22 + $0x60] sm:$0xff]  ;;  %v11828_v41 = vld [vmem:[%s11650_s22 + $0x68] sm:$0xff] }
  0x32   : > { %9929 = vmatmul.msk.f32.gmra.mxu1 %vm657_vm1, %v792_v12  ;;  %9941 = vmatmul.msk.f32.gmra.mxu3 %vm657_vm1, %v11697_v13  ;;  %v11789_v34 = vld [vmem:[%s11650_s22 + $0x51] sm:$0xff]  ;;  %v11809_v38 = vld [vmem:[%s11650_s22 + $0x61] sm:$0xff]  ;;  %v11834_v43 = vld [vmem:[%s11650_s22 + $0x69] sm:$0xff] }
  0x33   : > { %v11831_v42 = vld [vmem:[%s11650_s22 + $0x3a] sm:$0xff]  ;;  %v11848_v45 = vld [vmem:[%s11650_s22 + $0x4a] sm:$0xff]  ;;  %v11865_v48 = vld [vmem:[%s11650_s22 + $0x52] sm:$0xff] }
  0x34   : > { %v11845_v44 = vld [vmem:[%s11650_s22 + $0x78] sm:$0xff]  ;;  %v11862_v47 = vld [vmem:[%s11650_s22 + $0x80] sm:$0xff]  ;;  %v11889_v51 = vld [vmem:[%s11650_s22 + $0x6a] sm:$0xff] }
  0x35   : > { %v11851_v46 = vld [vmem:[%s11650_s22 + $0x79] sm:$0xff]  ;;  %v11868_v49 = vld [vmem:[%s11650_s22 + $0x81] sm:$0xff]  ;;  %v11952_v7 = vld [vmem:[%s11650_s22 + $0xaa] sm:$0xff] }
  0x36   : > { %v11879_v50 = vld [vmem:[%s11650_s22 + $0x62] sm:$0xff]  ;;  %v11899_v52 = vld [vmem:[%s11650_s22 + $0x7a] sm:$0xff]  ;;  %v11921_v55 = vld [vmem:[%s11650_s22 + $0x92] sm:$0xff] }
  0x37   : > { %v11910_v53 = vld [vmem:[%s11650_s22 + $0x82] sm:$0xff]  ;;  %v11938_v62 = vld [vmem:[%s11650_s22 + $0x9a] sm:$0xff] }
  0x38   : > { %v11957_v11 = vld [vmem:[%s11650_s22 + $0xc0] sm:$0xff] }
  0x39   : > { %9912 = vmatmul.msk.f32.gmra.mxu0 %vm657_vm1, %v642_v14  ;;  %9924 = vmatmul.msk.f32.gmra.mxu2 %vm657_vm1, %v11708_v15 }
  0x3a   : > { %9930 = vmatmul.msk.f32.gmra.mxu1 %vm657_vm1, %v11711_v16  ;;  %9942 = vmatmul.msk.f32.gmra.mxu3 %vm657_vm1, %v11714_v17 }
  0x41   : > { %9913 = vmatmul.msk.f32.gmra.mxu0 %vm657_vm1, %v643_v18  ;;  %9925 = vmatmul.msk.f32.gmra.mxu2 %vm657_vm1, %v11725_v19 }
  0x42   : > { %9931 = vmatmul.msk.f32.gmra.mxu1 %vm657_vm1, %v11728_v20  ;;  %9943 = vmatmul.msk.f32.gmra.mxu3 %vm657_vm1, %v11731_v21 }
  0x49   : > { %9914 = vmatmul.msk.f32.gmra.mxu0 %vm657_vm1, %v11741_v22  ;;  %9946 = vmatmul.msk.f32.vlgmr.msrb.gmra.mxu2 %vm657_vm1, %v941_v23 }
  0x4a   : > { %9932 = vmatmul.msk.f32.gmra.mxu1 %vm657_vm1, %v11745_v24  ;;  %9980 = vmatmul.msk.f32.vlgmr.msrb.gmra.mxu3 %vm657_vm1, %v642_v14 }
  0x51   : > { %9915 = vmatmul.msk.f32.gmra.mxu0 %vm657_vm1, %v11754_v25  ;;  %9947 = vmatmul.msk.f32.gmra.mxu2 %vm657_vm1, %v942_v26 }
  0x52   : > { %9933 = vmatmul.msk.f32.gmra.mxu1 %vm657_vm1, %v11758_v27  ;;  %9981 = vmatmul.msk.f32.gmra.mxu3 %vm657_vm1, %v643_v18 }
  0x59   : > { %9916 = vmatmul.msk.f32.gmra.mxu0 %vm657_vm1, %v11767_v28  ;;  %9948 = vmatmul.msk.f32.gmra.mxu2 %vm657_vm1, %v943_v29 }
  0x5a   : > { %9934 = vmatmul.msk.f32.gmra.mxu1 %vm657_vm1, %v11771_v30  ;;  %9982 = vmatmul.msk.f32.gmra.mxu3 %vm657_vm1, %v11741_v22 }
  0x61   : > { %9917 = vmatmul.msk.f32.gmra.mxu0 %vm657_vm1, %v11785_v32  ;;  %9949 = vmatmul.msk.f32.gmra.mxu2 %vm657_vm1, %v944_v33 }
  0x62   : > { %9935 = vmatmul.msk.f32.gmra.mxu1 %vm657_vm1, %v11789_v34  ;;  %9983 = vmatmul.msk.f32.gmra.mxu3 %vm657_vm1, %v11754_v25 }
  0x69   : > { %9918 = vmatmul.msk.f32.gmra.mxu0 %vm657_vm1, %v11803_v36  ;;  %9950 = vmatmul.msk.f32.gmra.mxu2 %vm657_vm1, %v11806_v37 }
  0x6a   : > { %9936 = vmatmul.msk.f32.gmra.mxu1 %vm657_vm1, %v11809_v38  ;;  %9984 = vmatmul.msk.f32.gmra.mxu3 %vm657_vm1, %v11767_v28 }
  0x71   : > { %9919 = vmatmul.msk.f32.gmra.mxu0 %vm657_vm1, %v11828_v41  ;;  %9951 = vmatmul.msk.f32.gmra.mxu2 %vm657_vm1, %v11831_v42 }
  0x72   : > { %9937 = vmatmul.msk.f32.gmra.mxu1 %vm657_vm1, %v11834_v43  ;;  %9985 = vmatmul.msk.f32.gmra.mxu3 %vm657_vm1, %v11785_v32 }
  0x79   : > { %9920 = vmatmul.msk.f32.gmra.mxu0 %vm657_vm1, %v11845_v44  ;;  %9952 = vmatmul.msk.f32.gmra.mxu2 %vm657_vm1, %v11848_v45 }
  0x7a   : > { %9938 = vmatmul.msk.f32.gmra.mxu1 %vm657_vm1, %v11851_v46  ;;  %9986 = vmatmul.msk.f32.gmra.mxu3 %vm657_vm1, %v11803_v36 }
  0x81   : > { %9921 = vmatmul.msk.f32.gmra.mxu0 %vm657_vm1, %v11862_v47  ;;  %9953 = vmatmul.msk.f32.gmra.mxu2 %vm657_vm1, %v11865_v48 }
  0x82   : > { %9939 = vmatmul.msk.f32.gmra.mxu1 %vm657_vm1, %v11868_v49  ;;  %9987 = vmatmul.msk.f32.gmra.mxu3 %vm657_vm1, %v11828_v41 }
  0x89   : > { %9954 = vmatmul.msk.f32.gmra.mxu2 %vm657_vm1, %v11879_v50  ;;  %10014 = vmatmul.msk.f32.vlgmr.msrb.gmra.mxu0 %vm657_vm1, %v11711_v16 }
  0x8a   : > { %9988 = vmatmul.msk.f32.gmra.mxu3 %vm657_vm1, %v11845_v44  ;;  %10048 = vmatmul.msk.f32.vlgmr.msrb.gmra.mxu1 %vm657_vm1, %v943_v29  ;;  %v11974_v29 = vld [vmem:[%s11650_s22 + $0xc8] sm:$0xff] }
  0x91   : > { %9955 = vmatmul.msk.f32.gmra.mxu2 %vm657_vm1, %v11889_v51  ;;  %10015 = vmatmul.msk.f32.gmra.mxu0 %vm657_vm1, %v11728_v20  ;;  %v11969_v20 = vld [vmem:[%s11650_s22 + $0xb2] sm:$0xff] }
  0x92   : > { %9989 = vmatmul.msk.f32.gmra.mxu3 %vm657_vm1, %v11862_v47  ;;  %10049 = vmatmul.msk.f32.gmra.mxu1 %vm657_vm1, %v944_v33 }
  0x99   : > { %9956 = vmatmul.msk.f32.gmra.mxu2 %vm657_vm1, %v11899_v52  ;;  %10016 = vmatmul.msk.f32.gmra.mxu0 %vm657_vm1, %v11745_v24 }
  0x9a   : > { %9990 = vmatmul.msk.f32.gmra.mxu3 %vm657_vm1, %v11662_v3  ;;  %10050 = vmatmul.msk.f32.gmra.mxu1 %vm657_vm1, %v11806_v37 }
  0xa1   : > { %9957 = vmatmul.msk.f32.gmra.mxu2 %vm657_vm1, %v11910_v53  ;;  %10017 = vmatmul.msk.f32.gmra.mxu0 %vm657_vm1, %v11758_v27 }
  0xa2   : > { %9991 = vmatmul.msk.f32.gmra.mxu3 %vm657_vm1, %v11689_v10  ;;  %10051 = vmatmul.msk.f32.gmra.mxu1 %vm657_vm1, %v11831_v42 }
  0xa6   : > { %v727_v54 = vpop.f32.mrf.mxu0 }
  0xa7   : > { %v877_v56 = vpop.f32.mrf.mxu1  ;;  %v775_v40 = vadd.f32 %v11934_v57, %v727_v54 }
  0xa9   : > { %9958 = vmatmul.msk.f32.gmra.mxu2 %vm657_vm1, %v11921_v55  ;;  %10018 = vmatmul.msk.f32.gmra.mxu0 %vm657_vm1, %v11771_v30 }
  0xaa   : > { %9992 = vmatmul.msk.f32.gmra.mxu3 %vm657_vm1, %v11708_v15  ;;  %10052 = vmatmul.msk.f32.gmra.mxu1 %vm657_vm1, %v11848_v45 }
  0xac   : > { %v763_v58 = vpop.f32.mrf.mxu2 }
  0xad   : > { %v787_v59 = vadd.f32 %v11934_v57, %v763_v58  ;;  %v913_v60 = vpop.f32.mrf.mxu3 }
  0xae   : > { %v730_v61 = vpop.f32.mrf.mxu0 }
  0xaf   : > { %v11940_v63 = vadd.f32 %v913_v60, %v787_v59  ;;  %v880_v0 = vpop.f32.mrf.mxu1  ;;  %v925_v60 = vadd.f32 %v877_v56, %v775_v40 }
  0xb1   : > { %9959 = vmatmul.msk.f32.gmra.mxu2 %vm657_vm1, %v11938_v62  ;;  %10019 = vmatmul.msk.f32.gmra.mxu0 %vm657_vm1, %v11789_v34 }
  0xb2   : > { %9993 = vmatmul.msk.f32.gmra.mxu3 %vm657_vm1, %v11725_v19  ;;  %10053 = vmatmul.msk.f32.gmra.mxu1 %vm657_vm1, %v11865_v48 }
  0xb4   : > { %v766_v1 = vpop.f32.mrf.mxu2 }
  0xb5   : > { %v788_v2 = vadd.f32 %v11934_v57, %v766_v1  ;;  %v916_v4 = vpop.f32.mrf.mxu3 }
  0xb6   : > { %v733_v6 = vpop.f32.mrf.mxu0 }
  0xb7   : > { %v11954_v8 = vadd.f32 %v916_v4, %v788_v2  ;;  %v883_v9 = vpop.f32.mrf.mxu1 }
  0xb9   : > { %9960 = vmatmul.msk.f32.gmra.mxu2 %vm657_vm1, %v11952_v7  ;;  %10020 = vmatmul.msk.f32.gmra.mxu0 %vm657_vm1, %v11809_v38 }
  0xba   : > { %9994 = vmatmul.msk.f32.gmra.mxu3 %vm657_vm1, %v11957_v11  ;;  %10054 = vmatmul.msk.f32.gmra.mxu1 %vm657_vm1, %v11879_v50 }
  0xbc   : > { %v769_v12 = vpop.f32.mrf.mxu2 }
  0xbd   : > { %v789_v14 = vadd.f32 %v11934_v57, %v769_v12  ;;  %v919_v16 = vpop.f32.mrf.mxu3  ;;  %v776_v12 = vadd.f32 %v11934_v57, %v730_v61 }
  0xbe   : > { %v736_v18 = vpop.f32.mrf.mxu0 }
  0xbf   : > { %v11971_v23 = vadd.f32 %v919_v16, %v789_v14  ;;  %v886_v26 = vpop.f32.mrf.mxu1 }
  0xc1   : > { %9961 = vmatmul.msk.f32.gmra.mxu2 %vm657_vm1, %v11969_v20  ;;  %10021 = vmatmul.msk.f32.gmra.mxu0 %vm657_vm1, %v11834_v43 }
  0xc2   : > { %9995 = vmatmul.msk.f32.gmra.mxu3 %vm657_vm1, %v11974_v29  ;;  %10055 = vmatmul.msk.f32.gmra.mxu1 %vm657_vm1, %v11889_v51 }
  0xc4   : > { %v772_v31 = vpop.f32.mrf.mxu2 }
  0xc5   : > { %v790_v33 = vadd.f32 %v11934_v57, %v772_v31  ;;  %v922_v35 = vpop.f32.mrf.mxu3 }
  0xc6   : > { %v739_v39 = vpop.f32.mrf.mxu0 }
  0xc7   : > { %v11986_v58 = vadd.f32 %v922_v35, %v790_v33  ;;  %v889_v59 = vpop.f32.mrf.mxu1  ;;  %v777_v33 = vadd.f32 %v11934_v57, %v733_v6 }
  0xc9   : > { %10022 = vmatmul.msk.f32.gmra.mxu0 %vm657_vm1, %v11851_v46  ;;  %10082 = vmatmul.msk.f32.vlgmr.msra.gmra.mxu2 %vm657_vm1, %v11741_v22  ;;  %v926_v22 = vadd.f32 %v880_v0, %v776_v12 }
  0xca   : > { %10056 = vmatmul.msk.f32.gmra.mxu1 %vm657_vm1, %v11899_v52  ;;  %10116 = vmatmul.msk.f32.vlgmr.msra.gmra.mxu3 %vm657_vm1, %v11745_v24 }
  0xcc   : > { %v1027_v1 = vpop.f32.mrf.mxu2 }
  0xcd   : > { %v1075_v2 = vadd.f32 %v1027_v1, %v925_v60  ;;  %v1178_v4 = vpop.f32.mrf.mxu3  ;;  %v778_v1 = vadd.f32 %v11934_v57, %v736_v18 }
  0xce   : > { %v742_v54 = vpop.f32.mrf.mxu0 }
  0xcf   : > { %v11997_v14 = vadd.f32 %v1178_v4, %v1075_v2  ;;  %v892_v16 = vpop.f32.mrf.mxu1 }
  0xd1   : > { %10023 = vmatmul.msk.f32.gmra.mxu0 %vm657_vm1, %v11868_v49  ;;  %10083 = vmatmul.msk.f32.gmra.mxu2 %vm657_vm1, %v11754_v25  ;;  %v927_v25 = vadd.f32 %v883_v9, %v777_v33  ;;  %v928_v9 = vadd.f32 %v886_v26, %v778_v1  ;;  %v10317_v26 = vld [vmem:[%s16880_s2 + $0x10] sm:$0xf] }
  0xd2   : > { %10057 = vmatmul.msk.f32.gmra.mxu1 %vm657_vm1, %v11910_v53  ;;  %10117 = vmatmul.msk.f32.gmra.mxu3 %vm657_vm1, %v11758_v27 }
  0xd3   : > { %10318 = vmatpush.msk.msrb.mxu1 %vm706_vm0, %v10317_v26  ;;  %v12090_v26 = vld [vmem:[%s11650_s22 + $0xc9] sm:$0xff] }
  0xd4   : > { %v1030_v24 = vpop.f32.mrf.mxu2 }
  0xd5   : > { %v1076_v56 = vadd.f32 %v1030_v24, %v926_v22  ;;  %v1181_v31 = vpop.f32.mrf.mxu3  ;;  %v779_v24 = vadd.f32 %v11934_v57, %v739_v39 }
  0xd6   : > { %v745_v61 = vpop.f32.mrf.mxu0 }
  0xd7   : > { %v12008_v35 = vadd.f32 %v1181_v31, %v1076_v56  ;;  %v12010_v40 = vpop.f32.mrf.mxu1  ;;  %v929_v39 = vadd.f32 %v889_v59, %v779_v24 }
  0xd9   : > { %10024 = vmatmul.msk.f32.gmra.mxu0 %vm657_vm1, %v11666_v5  ;;  %10084 = vmatmul.msk.f32.gmra.mxu2 %vm657_vm1, %v11767_v28  ;;  %v10215_v28 = vld [vmem:[%s16880_s2 + $0x4] sm:$0xf] }
  0xda   : > { %10058 = vmatmul.msk.f32.gmra.mxu1 %vm657_vm1, %v11921_v55  ;;  %10118 = vmatmul.msk.f32.gmra.mxu3 %vm657_vm1, %v11771_v30  ;;  %v10249_v30 = vld [vmem:[%s16880_s2 + $0x8] sm:$0xf] }
  0xdb   : > { %10216 = vmatpush.msk.msrb.mxu2 %vm706_vm0, %v10215_v28  ;;  %10250 = vmatpush.msk.msrb.mxu3 %vm706_vm0, %v10249_v30 }
  0xdc   : > { %v1033_v27 = vpop.f32.mrf.mxu2 }
  0xdd   : > { %v1077_v0 = vadd.f32 %v1033_v27, %v927_v25  ;;  %v1184_v6 = vpop.f32.mrf.mxu3 }
  0xde   : > { %v748_v60 = vpop.f32.mrf.mxu0 }
  0xdf   : > { %v12021_v2 = vadd.f32 %v1184_v6, %v1077_v0  ;;  %v12023_v4 = vpop.f32.mrf.mxu1 }
  0xe1   : > { %10025 = vmatmul.msk.f32.gmra.mxu0 %vm657_vm1, %v11697_v13  ;;  %10085 = vmatmul.msk.f32.gmra.mxu2 %vm657_vm1, %v11785_v32 }
  0xe2   : > { %10059 = vmatmul.msk.f32.gmra.mxu1 %vm657_vm1, %v11938_v62  ;;  %10119 = vmatmul.msk.f32.gmra.mxu3 %vm657_vm1, %v11789_v34  ;;  %v10283_v34 = vld [vmem:[%s16880_s2 + $0xc] sm:$0xf] }
  0xe3   : > { %10284 = vmatpush.msk.msrb.mxu0 %vm706_vm0, %v10283_v34 }
  0xe4   : > { %v1036_v32 = vpop.f32.mrf.mxu2 }
  0xe5   : > { %v1078_v18 = vadd.f32 %v1036_v32, %v928_v9  ;;  %v1187_v12 = vpop.f32.mrf.mxu3  ;;  %v12072_v9 = vld [vmem:[%s11650_s22 + $0xc1] sm:$0xff]  ;;  %v781_v32 = vadd.f32 %v11934_v57, %v745_v61 }
  0xe6   : > { %v751_v22 = vpop.f32.mrf.mxu0 }
  0xe7   : > { %v12042_v56 = vadd.f32 %v1187_v12, %v1078_v18  ;;  %v901_v31 = vpop.f32.mrf.mxu1  ;;  %v12078_v12 = vld [vmem:[%s11650_s22 + $0xc2] sm:$0xff] }
  0xe9   : > { %10026 = vmatmul.msk.f32.gmra.mxu0 %vm657_vm1, %v11714_v17  ;;  %10086 = vmatmul.msk.f32.gmra.mxu2 %vm657_vm1, %v11803_v36 }
  0xea   : > { %10060 = vmatmul.msk.f32.gmra.mxu1 %vm657_vm1, %v11952_v7  ;;  %10120 = vmatmul.msk.f32.gmra.mxu3 %vm657_vm1, %v11809_v38  ;;  %v780_v38 = vadd.f32 %v11934_v57, %v742_v54 }
  0xec   : > { %v1039_v36 = vpop.f32.mrf.mxu2  ;;  %v930_v59 = vadd.f32 %v892_v16, %v780_v38 }
  0xed   : > { %v1079_v33 = vadd.f32 %v1039_v36, %v929_v39  ;;  %v1190_v25 = vpop.f32.mrf.mxu3  ;;  %v782_v39 = vadd.f32 %v11934_v57, %v748_v60 }
  0xee   : > { %v754_v27 = vpop.f32.mrf.mxu0 }
  0xef   : > { %v12061_v0 = vadd.f32 %v1190_v25, %v1079_v33  ;;  %v904_v6 = vpop.f32.mrf.mxu1 }
  0xf1   : > { %10027 = vmatmul.msk.f32.gmra.mxu0 %vm657_vm1, %v11731_v21  ;;  %10087 = vmatmul.msk.f32.gmra.mxu2 %vm657_vm1, %v11828_v41 }
  0xf2   : > { %10061 = vmatmul.msk.f32.gmra.mxu1 %vm657_vm1, %v11969_v20  ;;  %10121 = vmatmul.msk.f32.gmra.mxu3 %vm657_vm1, %v11834_v43  ;;  %v931_v43 = vadd.f32 %v12010_v40, %v781_v32  ;;  %v784_v32 = vadd.f32 %v11934_v57, %v754_v27 }
  0xf4   : > { %v1042_v1 = vpop.f32.mrf.mxu2 }
  0xf5   : > { %v1080_v28 = vadd.f32 %v1042_v1, %v930_v59  ;;  %v1193_v54 = vpop.f32.mrf.mxu3  ;;  %v783_v59 = vadd.f32 %v11934_v57, %v751_v22 }
  0xf6   : > { %v757_v30 = vpop.f32.mrf.mxu0 }
  0xf7   : > { %v12075_v18 = vadd.f32 %v1193_v54, %v1080_v28  ;;  %v907_v41 = vpop.f32.mrf.mxu1 }
  0xf9   : > { %10028 = vmatmul.msk.f32.gmra.mxu0 %vm657_vm1, %v12072_v9  ;;  %10088 = vmatmul.msk.f32.gmra.mxu2 %vm657_vm1, %v11845_v44  ;;  %v12096_v44 = vld [vmem:[%s11650_s22 + $0xca] sm:$0xff] }
  0xfa   : > { %10062 = vmatmul.msk.f32.gmra.mxu1 %vm657_vm1, %v12078_v12  ;;  %10122 = vmatmul.msk.f32.gmra.mxu3 %vm657_vm1, %v11851_v46  ;;  %v932_v46 = vadd.f32 %v12023_v4, %v782_v39 }
  0xfc   : > { %v1045_v16 = vpop.f32.mrf.mxu2 }
  0xfd   : > { %v1081_v61 = vadd.f32 %v1045_v16, %v931_v43  ;;  %v1196_v24 = vpop.f32.mrf.mxu3 }
  0xfe   : > { %v760_v34 = vpop.f32.mrf.mxu0 }
  0xff   : > { %v12093_v36 = vadd.f32 %v1196_v24, %v1081_v61  ;;  %v910_v33 = vpop.f32.mrf.mxu1  ;;  %v785_v61 = vadd.f32 %v11934_v57, %v757_v30 }
 0x101   : > { %10029 = vmatmul.msk.f32.gmra.mxu0 %vm657_vm1, %v12090_v26  ;;  %10089 = vmatmul.msk.f32.gmra.mxu2 %vm657_vm1, %v11862_v47  ;;  %v933_v47 = vadd.f32 %v901_v31, %v783_v59 }
 0x102   : > { %10063 = vmatmul.msk.f32.gmra.mxu1 %vm657_vm1, %v12096_v44  ;;  %10123 = vmatmul.msk.f32.gmra.mxu3 %vm657_vm1, %v11868_v49 }
 0x104   : > { %v1048_v40 = vpop.f32.mrf.mxu2 }
 0x105   : > { %v1082_v60 = vadd.f32 %v1048_v40, %v932_v46  ;;  %v1199_v25 = vpop.f32.mrf.mxu3  ;;  %v786_v40 = vadd.f32 %v11934_v57, %v760_v34 }
 0x106   : > { %v12107_v38 = vpop.f32.mrf.mxu0 }
 0x107   : > { %v12110_v1 = vadd.f32 %v1199_v25, %v1082_v60  ;;  %v12112_v28 = vpop.f32.mrf.mxu1 }
 0x109   : > { %10090 = vmatmul.msk.f32.gmra.mxu2 %vm657_vm1, %v11662_v3  ;;  %10150 = vmatmul.msk.f32.vlgmr.msra.gmra.mxu0 %vm657_vm1, %v11806_v37 }
 0x10a   : > { %10124 = vmatmul.msk.f32.gmra.mxu3 %vm657_vm1, %v11666_v5  ;;  %10183 = vmatmul.msk.f32.vlgmr.msra.gmra.mxu1 %vm657_vm1, %v11957_v11  ;;  %v934_v5 = vadd.f32 %v904_v6, %v784_v32 }
 0x10c   : > { %v1051_v49 = vpop.f32.mrf.mxu2 }
 0x10d   : > { %v1083_v4 = vadd.f32 %v1051_v49, %v933_v47  ;;  %v1202_v22 = vpop.f32.mrf.mxu3 }
 0x10e   : > { %v12122_v54 = vpop.f32.mrf.mxu0 }
 0x10f   : > { %v12125_v43 = vadd.f32 %v1202_v22, %v1083_v4  ;;  %v12127_v3 = vpop.f32.mrf.mxu1  ;;  %v12198_v22 = vld [vmem:[%s11650_s22 + $0xf8] sm:$0xff] }
 0x111   : > { %10091 = vmatmul.msk.f32.gmra.mxu2 %vm657_vm1, %v11689_v10  ;;  %10151 = vmatmul.msk.f32.gmra.mxu0 %vm657_vm1, %v11831_v42  ;;  %v12145_v42 = vld [vmem:[%s11650_s22 + $0xd8] sm:$0xff] }
 0x112   : > { %10125 = vmatmul.msk.f32.gmra.mxu3 %vm657_vm1, %v11697_v13  ;;  %10184 = vmatmul.msk.f32.gmra.mxu1 %vm657_vm1, %v11974_v29  ;;  %v935_v13 = vadd.f32 %v907_v41, %v785_v61 }
 0x114   : > { %v1054_v37 = vpop.f32.mrf.mxu2 }
 0x115   : > { %v1084_v31 = vadd.f32 %v1054_v37, %v934_v5  ;;  %v1205_v27 = vpop.f32.mrf.mxu3 }
 0x116   : > { %v12137_v16 = vpop.f32.mrf.mxu0 }
 0x117   : > { %v12140_v24 = vadd.f32 %v1205_v27, %v1084_v31  ;;  %v12142_v10 = vpop.f32.mrf.mxu1  ;;  %v12216_v31 = vld [vmem:[%s11650_s22 + $0xd9] sm:$0xff] }
 0x119   : > { %10092 = vmatmul.msk.f32.gmra.mxu2 %vm657_vm1, %v11708_v15  ;;  %10152 = vmatmul.msk.f32.gmra.mxu0 %vm657_vm1, %v11848_v45  ;;  %v12163_v45 = vld [vmem:[%s11650_s22 + $0xe0] sm:$0xff] }
 0x11a   : > { %10126 = vmatmul.msk.f32.gmra.mxu3 %vm657_vm1, %v11714_v17  ;;  %10185 = vmatmul.msk.f32.gmra.mxu1 %vm657_vm1, %v12145_v42  ;;  %v936_v17 = vadd.f32 %v910_v33, %v786_v40 }
 0x11c   : > { %v1057_v6 = vpop.f32.mrf.mxu2 }
 0x11d   : > { %v1085_v30 = vadd.f32 %v1057_v6, %v935_v13  ;;  %v1208_v39 = vpop.f32.mrf.mxu3 }
 0x11e   : > { %v12155_v46 = vpop.f32.mrf.mxu0 }
 0x11f   : > { %v12158_v60 = vadd.f32 %v1208_v39, %v1085_v30  ;;  %v12160_v15 = vpop.f32.mrf.mxu1  ;;  %v12237_v39 = vld [vmem:[%s11650_s22 + $0xe1] sm:$0xff] }
 0x121   : > { %16973 = vst [vmem:[#allocation21_spill] sm:$0xff] %v12158_v60  ;;  %10093 = vmatmul.msk.f32.gmra.mxu2 %vm657_vm1, %v11725_v19  ;;  %10153 = vmatmul.msk.f32.gmra.mxu0 %vm657_vm1, %v11865_v48  ;;  %v12180_v19 = vld [vmem:[%s11650_s22 + $0xf0] sm:$0xff] }
 0x122   : > { %10127 = vmatmul.msk.f32.gmra.mxu3 %vm657_vm1, %v11731_v21  ;;  %10186 = vmatmul.msk.f32.gmra.mxu1 %vm657_vm1, %v12163_v45 }
 0x124   : > { %v1060_v57 = vpop.f32.mrf.mxu2 }
 0x125   : > { %v1086_v41 = vadd.f32 %v1060_v57, %v936_v17  ;;  %v1211_v34 = vpop.f32.mrf.mxu3 }
 0x126   : > { %v12173_v25 = vpop.f32.mrf.mxu0 }
 0x127   : > { %v12175_v59 = vadd.f32 %v1211_v34, %v1086_v41  ;;  %v12177_v47 = vpop.f32.mrf.mxu1 }
 0x129   : > { %16974 = vst [vmem:[#allocation22_spill] sm:$0xff] %v12175_v59  ;;  %10094 = vmatmul.msk.f32.gmra.mxu2 %vm657_vm1, %v11957_v11  ;;  %10154 = vmatmul.msk.f32.gmra.mxu0 %vm657_vm1, %v11879_v50  ;;  %v12354_v59 = vld [vmem:[%s11650_s22 + $0xf2] sm:$0xff] }
 0x12a   : > { %10128 = vmatmul.msk.f32.gmra.mxu3 %vm657_vm1, %v12072_v9  ;;  %10187 = vmatmul.msk.f32.gmra.mxu1 %vm657_vm1, %v12180_v19  ;;  %16990 = vst [vmem:[#allocation38_spill] sm:$0xff] %v12354_v59 }
 0x12c   : > { %v1063_v21 = vpop.f32.mrf.mxu2 }
 0x12d   : > { %v1087_v48 = vadd.f32 %v1063_v21, %v11940_v63  ;;  %v1214_v33 = vpop.f32.mrf.mxu3  ;;  %v12258_v21 = vld [vmem:[%s11650_s22 + $0x120] sm:$0xff] }
 0x12e   : > { %v12191_v49 = vpop.f32.mrf.mxu0 }
 0x12f   : > { %v12193_v4 = vadd.f32 %v1214_v33, %v1087_v48  ;;  %v12195_v11 = vpop.f32.mrf.mxu1 }
 0x131   : > { %16975 = vst [vmem:[#allocation23_spill] sm:$0xff] %v12193_v4  ;;  %10095 = vmatmul.msk.f32.gmra.mxu2 %vm657_vm1, %v11974_v29  ;;  %10155 = vmatmul.msk.f32.gmra.mxu0 %vm657_vm1, %v11889_v51  ;;  %v12219_v51 = vld [vmem:[%s11650_s22 + $0x108] sm:$0xff]  ;;  %v12346_v4 = vld [vmem:[%s11650_s22 + $0xf1] sm:$0xff] }
 0x132   : > { %10129 = vmatmul.msk.f32.gmra.mxu3 %vm657_vm1, %v12090_v26  ;;  %10188 = vmatmul.msk.f32.gmra.mxu1 %vm657_vm1, %v12198_v22 }
 0x134   : > { %v1066_v50 = vpop.f32.mrf.mxu2 }
 0x135   : > { %v1088_v63 = vadd.f32 %v1066_v50, %v11954_v8  ;;  %v1217_v32 = vpop.f32.mrf.mxu3 }
 0x136   : > { %v12209_v5 = vpop.f32.mrf.mxu0 }
 0x137   : > { %v12211_v37 = vadd.f32 %v1217_v32, %v1088_v63  ;;  %v12213_v29 = vpop.f32.mrf.mxu1 }
 0x139   : > { %16976 = vst [vmem:[#allocation24_spill] sm:$0xff] %v12211_v37  ;;  %10096 = vmatmul.msk.f32.gmra.mxu2 %vm657_vm1, %v12145_v42  ;;  %10156 = vmatmul.msk.f32.gmra.mxu0 %vm657_vm1, %v11899_v52  ;;  %v12240_v52 = vld [vmem:[%s11650_s22 + $0x110] sm:$0xff] }
 0x13a   : > { %10130 = vmatmul.msk.f32.gmra.mxu3 %vm657_vm1, %v12216_v31  ;;  %10189 = vmatmul.msk.f32.gmra.mxu1 %vm657_vm1, %v12219_v51 }
 0x13c   : > { %v1069_v8 = vpop.f32.mrf.mxu2 }
 0x13d   : > { %v1089_v27 = vadd.f32 %v1069_v8, %v11971_v23  ;;  %v1220_v61 = vpop.f32.mrf.mxu3  ;;  %v12299_v8 = vld [vmem:[%s11650_s22 + $0xda] sm:$0xff] }
 0x13e   : > { %v12230_v13 = vpop.f32.mrf.mxu0  ;;  %16982 = vst [vmem:[#allocation30_spill] sm:$0xff] %v12299_v8 }
 0x13f   : > { %v12232_v6 = vadd.f32 %v1220_v61, %v1089_v27  ;;  %v12234_v30 = vpop.f32.mrf.mxu1 }
 0x141   : > { %16977 = vst [vmem:[#allocation25_spill] sm:$0xff] %v12232_v6  ;;  %10097 = vmatmul.msk.f32.gmra.mxu2 %vm657_vm1, %v12163_v45  ;;  %10157 = vmatmul.msk.f32.gmra.mxu0 %vm657_vm1, %v11910_v53 }
 0x142   : > { %10131 = vmatmul.msk.f32.gmra.mxu3 %vm657_vm1, %v12237_v39  ;;  %10190 = vmatmul.msk.f32.gmra.mxu1 %vm657_vm1, %v12240_v52 }
 0x144   : > { %v1072_v23 = vpop.f32.mrf.mxu2 }
 0x145   : > { %v1090_v40 = vadd.f32 %v1072_v23, %v11986_v58  ;;  %v1223_v17 = vpop.f32.mrf.mxu3 }
 0x146   : > { %v12251_v57 = vpop.f32.mrf.mxu0 }
 0x147   : > { %v12253_v41 = vadd.f32 %v1223_v17, %v1090_v40  ;;  %v12255_v34 = vpop.f32.mrf.mxu1  ;;  %v12321_v40 = vld [vmem:[%s11650_s22 + $0xe2] sm:$0xff]  ;;  %v10351_v17 = vld [vmem:[%s16880_s2 + $0x14] sm:$0xf] }
 0x148   : > { %16986 = vst [vmem:[#allocation34_spill] sm:$0xff] %v12321_v40  ;;  %10352 = vmatpush.msk.msra.mxu2 %vm706_vm0, %v10351_v17  ;;  %v10453_v17 = vld [vmem:[%s16880_s2 + $0x20] sm:$0xf] }
 0x149   : > { %16978 = vst [vmem:[#allocation26_spill] sm:$0xff] %v12253_v41  ;;  %10158 = vmatmul.msk.f32.gmra.mxu0 %vm657_vm1, %v11921_v55  ;;  %10217 = vmatmul.msk.f32.vlgmr.msrb.gmra.mxu2 %vm657_vm1, %v12072_v9  ;;  %v12277_v55 = vld [vmem:[%s11650_s22 + $0x128] sm:$0xff]  ;;  %v10385_v41 = vld [vmem:[%s16880_s2 + $0x18] sm:$0xf] }
 0x14a   : > { %10191 = vmatmul.msk.f32.gmra.mxu1 %vm657_vm1, %v12258_v21  ;;  %10251 = vmatmul.msk.f32.vlgmr.msrb.gmra.mxu3 %vm657_vm1, %v12078_v12 }
 0x14b   : > { %10386 = vmatpush.msk.msra.mxu3 %vm706_vm0, %v10385_v41  ;;  %v10419_v41 = vld [vmem:[%s16880_s2 + $0x1c] sm:$0xf]  ;;  %10454 = vmatpush.msk.msra.mxu1 %vm706_vm0, %v10453_v17 }
 0x14c   : > { %v12268_v53 = vpop.f32.mrf.mxu2  ;;  %10420 = vmatpush.msk.msra.mxu0 %vm706_vm0, %v10419_v41 }
 0x14d   : > { %v12270_v58 = vpop.f32.mrf.mxu3 }
 0x14e   : > { %v12272_v48 = vpop.f32.mrf.mxu0 }
 0x14f   : > { %v12274_v33 = vpop.f32.mrf.mxu1 }
 0x151   : > { %10159 = vmatmul.msk.f32.gmra.mxu0 %vm657_vm1, %v11938_v62  ;;  %10218 = vmatmul.msk.f32.gmra.mxu2 %vm657_vm1, %v12090_v26  ;;  %v12296_v62 = vld [vmem:[%s11650_s22 + $0x138] sm:$0xff] }
 0x152   : > { %10192 = vmatmul.msk.f32.gmra.mxu1 %vm657_vm1, %v12277_v55  ;;  %10252 = vmatmul.msk.f32.gmra.mxu3 %vm657_vm1, %v12096_v44  ;;  %16981 = vst [vmem:[#allocation29_spill] sm:$0xff] %v12296_v62 }
 0x154   : > { %v12287_v9 = vpop.f32.mrf.mxu2 }
 0x155   : > { %v12289_v50 = vpop.f32.mrf.mxu3 }
 0x156   : > { %v12291_v63 = vpop.f32.mrf.mxu0 }
 0x157   : > { %16979 = vst [vmem:[#allocation27_spill] sm:$0xff] %v12291_v63  ;;  %v12293_v32 = vpop.f32.mrf.mxu1  ;;  %v12401_v63 = vld [vmem:[%s11650_s22 + $0xfa] sm:$0xff] }
 0x158   : > { %16980 = vst [vmem:[#allocation28_spill] sm:$0xff] %v12293_v32  ;;  %v12398_v32 = vld [vmem:[%s11650_s22 + $0x158] sm:$0xff] }
 0x159   : > { %10160 = vmatmul.msk.f32.gmra.mxu0 %vm657_vm1, %v11952_v7  ;;  %10219 = vmatmul.msk.f32.gmra.mxu2 %vm657_vm1, %v12216_v31  ;;  %v12318_v7 = vld [vmem:[%s11650_s22 + $0x140] sm:$0xff]  ;;  %16993 = vst [vmem:[#allocation41_spill] sm:$0xff] %v12398_v32 }
 0x15a   : > { %10193 = vmatmul.msk.f32.gmra.mxu1 %vm657_vm1, %v12296_v62  ;;  %10253 = vmatmul.msk.f32.gmra.mxu3 %vm657_vm1, %v12299_v8  ;;  %16985 = vst [vmem:[#allocation33_spill] sm:$0xff] %v12318_v7  ;;  %v12486_v62 = vld [vmem:[%s11650_s22 + $0x112] sm:$0xff] }
 0x15b   : > { %16994 = vst [vmem:[#allocation42_spill] sm:$0xff] %v12401_v63 }
 0x15c   : > { %v12309_v26 = vpop.f32.mrf.mxu2  ;;  %17002 = vst [vmem:[#allocation50_spill] sm:$0xff] %v12486_v62 }
 0x15d   : > { %v12311_v27 = vpop.f32.mrf.mxu3 }
 0x15e   : > { %v12313_v61 = vpop.f32.mrf.mxu0 }
 0x15f   : > { %16983 = vst [vmem:[#allocation31_spill] sm:$0xff] %v12313_v61  ;;  %v12315_v23 = vpop.f32.mrf.mxu1  ;;  %v12351_v61 = vld [vmem:[%s11650_s22 + $0x150] sm:$0xff] }
 0x160   : > { %16984 = vst [vmem:[#allocation32_spill] sm:$0xff] %v12315_v23 }
 0x161   : > { %10161 = vmatmul.msk.f32.gmra.mxu0 %vm657_vm1, %v11969_v20  ;;  %10220 = vmatmul.msk.f32.gmra.mxu2 %vm657_vm1, %v12237_v39  ;;  %16989 = vst [vmem:[#allocation37_spill] sm:$0xff] %v12351_v61 }
 0x162   : > { %10194 = vmatmul.msk.f32.gmra.mxu1 %vm657_vm1, %v12318_v7  ;;  %10254 = vmatmul.msk.f32.gmra.mxu3 %vm657_vm1, %v12321_v40  ;;  %v16920_v7 = vmov 0.0  }
 0x163   : > { %528 = vst.msk [vmem:[#allocation2 + $0x18] sm:$0xff] %vm523_vm2, %v16920_v7 }
 0x164   : > { %v12339_v20 = vpop.f32.mrf.mxu2  ;;  %529 = vst.msk [vmem:[#allocation2 + $0x20] sm:$0xff] %vm523_vm2, %v16920_v7 }
 0x165   : > { %v12341_v6 = vpop.f32.mrf.mxu3  ;;  %524 = vst.msk [vmem:[#allocation2] sm:$0xff] %vm523_vm2, %v16920_v7 }
 0x166   : > { %v12343_v37 = vpop.f32.mrf.mxu0  ;;  %525 = vst.msk [vmem:[#allocation2 + $0x8] sm:$0xff] %vm523_vm2, %v16920_v7 }
 0x167   : > { %16987 = vst [vmem:[#allocation35_spill] sm:$0xff] %v12343_v37  ;;  %v12348_v23 = vpop.f32.mrf.mxu1 }
 0x168   : > { %16988 = vst [vmem:[#allocation36_spill] sm:$0xff] %v12348_v23 }
 0x169   : > { %10162 = vmatmul.msk.f32.gmra.mxu0 %vm657_vm1, %v12078_v12  ;;  %10221 = vmatmul.msk.f32.gmra.mxu2 %vm657_vm1, %v12346_v4  ;;  %531 = vst.msk [vmem:[#allocation2 + $0x30] sm:$0xff] %vm523_vm2, %v16920_v7 }
 0x16a   : > { %10195 = vmatmul.msk.f32.gmra.mxu1 %vm657_vm1, %v12351_v61  ;;  %10255 = vmatmul.msk.f32.gmra.mxu3 %vm657_vm1, %v12354_v59  ;;  %532 = vst.msk [vmem:[#allocation2 + $0x38] sm:$0xff] %vm523_vm2, %v16920_v7  ;;  %v12391_v59 = vld [vmem:[%s11650_s22 + $0xf9] sm:$0xff] }
 0x16b   : > { %534 = vst.msk [vmem:[#allocation2 + $0x48] sm:$0xff] %vm523_vm2, %v16920_v7 }
 0x16c   : > { %v12372_v12 = vpop.f32.mrf.mxu2  ;;  %535 = vst.msk [vmem:[#allocation2 + $0x50] sm:$0xff] %vm523_vm2, %v16920_v7 }
 0x16d   : > { %v12382_v23 = vpop.f32.mrf.mxu3  ;;  %537 = vst.msk [vmem:[#allocation2 + $0x60] sm:$0xff] %vm523_vm2, %v16920_v7 }
 0x16e   : > { %v12388_v37 = vpop.f32.mrf.mxu0  ;;  %538 = vst.msk [vmem:[#allocation2 + $0x68] sm:$0xff] %vm523_vm2, %v16920_v7 }
 0x16f   : > { %16991 = vst [vmem:[#allocation39_spill] sm:$0xff] %v12388_v37  ;;  %v12395_v61 = vpop.f32.mrf.mxu1 }
 0x170   : > { %16992 = vst [vmem:[#allocation40_spill] sm:$0xff] %v12395_v61  ;;  %v12432_v61 = vld [vmem:[%s11650_s22 + $0x109] sm:$0xff] }
 0x171   : > { %10163 = vmatmul.msk.f32.gmra.mxu0 %vm657_vm1, %v12096_v44  ;;  %10222 = vmatmul.msk.f32.gmra.mxu2 %vm657_vm1, %v12391_v59  ;;  %540 = vst.msk [vmem:[#allocation2 + $0x78] sm:$0xff] %vm523_vm2, %v16920_v7 }
 0x172   : > { %10196 = vmatmul.msk.f32.gmra.mxu1 %vm657_vm1, %v12398_v32  ;;  %10256 = vmatmul.msk.f32.gmra.mxu3 %vm657_vm1, %v12401_v63  ;;  %541 = vst.msk [vmem:[#allocation2 + $0x80] sm:$0xff] %vm523_vm2, %v16920_v7  ;;  %v12439_v63 = vld [vmem:[%s11650_s22 + $0x168] sm:$0xff] }
 0x173   : > { %543 = vst.msk [vmem:[#allocation2 + $0x90] sm:$0xff] %vm523_vm2, %v16920_v7  ;;  %v12442_v32 = vld [vmem:[%s11650_s22 + $0x10a] sm:$0xff] }
 0x174   : > { %v12421_v44 = vpop.f32.mrf.mxu2  ;;  %544 = vst.msk [vmem:[#allocation2 + $0x98] sm:$0xff] %vm523_vm2, %v16920_v7 }
 0x175   : > { %v12425_v41 = vpop.f32.mrf.mxu3  ;;  %546 = vst.msk [vmem:[#allocation2 + $0xa8] sm:$0xff] %vm523_vm2, %v16920_v7 }
 0x176   : > { %v12429_v17 = vpop.f32.mrf.mxu0  ;;  %16997 = vst [vmem:[#allocation45_spill] sm:$0xff] %v12439_v63 }
 0x177   : > { %16995 = vst [vmem:[#allocation43_spill] sm:$0xff] %v12429_v17  ;;  %v12436_v37 = vpop.f32.mrf.mxu1 }
 0x178   : > { %16996 = vst [vmem:[#allocation44_spill] sm:$0xff] %v12436_v37  ;;  %v1376_v37 = vadd.f32 %v12107_v38, %v11997_v14 }
 0x179   : > { %16998 = vst [vmem:[#allocation46_spill] sm:$0xff] %v12442_v32  ;;  %10164 = vmatmul.msk.f32.gmra.mxu0 %vm657_vm1, %v12299_v8  ;;  %10223 = vmatmul.msk.f32.gmra.mxu2 %vm657_vm1, %v12432_v61  ;;  %v12483_v8 = vld [vmem:[%s11650_s22 + $0x170] sm:$0xff] }
 0x17a   : > { %547 = vst.msk [vmem:[#allocation2 + $0xb0] sm:$0xff] %vm523_vm2, %v16920_v7  ;;  %10197 = vmatmul.msk.f32.gmra.mxu1 %vm657_vm1, %v12439_v63  ;;  %10257 = vmatmul.msk.f32.gmra.mxu3 %vm657_vm1, %v12442_v32  ;;  %v12475_v63 = vld [vmem:[%s11650_s22 + $0x111] sm:$0xff]  ;;  %v1526_v14 = vadd.f32 %v12112_v28, %v1376_v37  ;;  %v1377_v28 = vadd.f32 %v12122_v54, %v12008_v35  ;;  %v12521_v35 = vld [vmem:[%s11650_s22 + $0x121] sm:$0xff] }
 0x17b   : > { %549 = vst.msk [vmem:[#allocation2 + $0xc0] sm:$0xff] %vm523_vm2, %v16920_v7 }
 0x17c   : > { %550 = vst.msk [vmem:[#allocation2 + $0xc8] sm:$0xff] %vm523_vm2, %v16920_v7  ;;  %v12464_v17 = vpop.f32.mrf.mxu2  ;;  %v1527_v54 = vadd.f32 %v12127_v3, %v1377_v28  ;;  %v1378_v3 = vadd.f32 %v12137_v16, %v12021_v2  ;;  %v12568_v16 = vld [vmem:[%s11650_s22 + $0x12a] sm:$0xff] }
 0x17d   : > { %552 = vst.msk [vmem:[#allocation2 + $0xd8] sm:$0xff] %vm523_vm2, %v16920_v7  ;;  %v12468_v60 = vpop.f32.mrf.mxu3 }
 0x17e   : > { %553 = vst.msk [vmem:[#allocation2 + $0xe0] sm:$0xff] %vm523_vm2, %v16920_v7  ;;  %v12472_v32 = vpop.f32.mrf.mxu0 }
 0x17f   : > { %555 = vst.msk [vmem:[#allocation2 + $0xf0] sm:$0xff] %vm523_vm2, %v16920_v7  ;;  %v12480_v38 = vpop.f32.mrf.mxu1 }
 0x180   : > { %556 = vst.msk [vmem:[#allocation2 + $0xf8] sm:$0xff] %vm523_vm2, %v16920_v7 }
 0x181   : > { %16999 = vst [vmem:[#allocation47_spill] sm:$0xff] %v12472_v32  ;;  %v1677_v32 = vadd.f32 %v12268_v53, %v1526_v14  ;;  %10165 = vmatmul.msk.f32.gmra.mxu0 %vm657_vm1, %v12321_v40  ;;  %10224 = vmatmul.msk.f32.gmra.mxu2 %vm657_vm1, %v12475_v63 }
 0x182   : > { %558 = vst.msk [vmem:[#allocation2 + $0x108] sm:$0xff] %vm523_vm2, %v16920_v7  ;;  %10198 = vmatmul.msk.f32.gmra.mxu1 %vm657_vm1, %v12483_v8  ;;  %10258 = vmatmul.msk.f32.gmra.mxu3 %vm657_vm1, %v12486_v62 }
 0x183   : > { %17000 = vst [vmem:[#allocation48_spill] sm:$0xff] %v12480_v38  ;;  %v1827_v53 = vadd.f32 %v12270_v58, %v1677_v32  ;;  %v12529_v58 = vld [vmem:[%s11650_s22 + $0x122] sm:$0xff]  ;;  %v1678_v32 = vadd.f32 %v12287_v9, %v1527_v54 }
 0x184   : > { %17001 = vst [vmem:[#allocation49_spill] sm:$0xff] %v12483_v8  ;;  %v12509_v37 = vpop.f32.mrf.mxu2 }
 0x185   : > { %559 = vst.msk [vmem:[#allocation2 + $0x110] sm:$0xff] %vm523_vm2, %v16920_v7  ;;  %v12514_v14 = vpop.f32.mrf.mxu3  ;;  %v1828_v9 = vadd.f32 %v12289_v50, %v1678_v32  ;;  %v1528_v50 = vadd.f32 %v12142_v10, %v1378_v3  ;;  %v1379_v10 = vadd.f32 %v12155_v46, %v12042_v56  ;;  %v12601_v32 = vld [vmem:[%s11650_s22 + $0x139] sm:$0xff] }
 0x186   : > { %561 = vst.msk [vmem:[#allocation2 + $0x120] sm:$0xff] %vm523_vm2, %v16920_v7  ;;  %v1929_v38 = vpop.f32.mrf.mxu0  ;;  %v12609_v3 = vld [vmem:[%s11650_s22 + $0x13a] sm:$0xff] }
 0x187   : > { %562 = vst.msk [vmem:[#allocation2 + $0x128] sm:$0xff] %vm523_vm2, %v16920_v7  ;;  %v1977_v62 = vadd.f32 %v1929_v38, %v1827_v53  ;;  %v12526_v8 = vpop.f32.mrf.mxu1  ;;  %v1679_v53 = vadd.f32 %v12309_v26, %v1528_v50  ;;  %v1529_v56 = vadd.f32 %v12160_v15, %v1379_v10  ;;  %v1380_v15 = vadd.f32 %v12173_v25, %v12061_v0  ;;  %v12642_v25 = vld [vmem:[%s11650_s22 + $0x141] sm:$0xff] }
 0x188   : > { %564 = vst.msk [vmem:[#allocation2 + $0x138] sm:$0xff] %vm523_vm2, %v16920_v7 }
 0x189   : > { %565 = vst.msk [vmem:[#allocation2 + $0x140] sm:$0xff] %vm523_vm2, %v16920_v7  ;;  %v1993_v40 = vmax.f32 %v1977_v62, 0.0  ;;  %10225 = vmatmul.msk.f32.gmra.mxu2 %vm657_vm1, %v12521_v35  ;;  %10285 = vmatmul.msk.f32.vlgmr.msrb.gmra.mxu0 %vm657_vm1, %v12145_v42  ;;  %v1829_v54 = vadd.f32 %v12311_v27, %v1679_v53  ;;  %v1680_v27 = vadd.f32 %v12339_v20, %v1529_v56 }
 0x18a   : > { %567 = vst.msk [vmem:[#allocation2 + $0x150] sm:$0xff] %vm523_vm2, %v16920_v7  ;;  %10259 = vmatmul.msk.f32.gmra.mxu3 %vm657_vm1, %v12529_v58  ;;  %10319 = vmatmul.msk.f32.vlgmr.msrb.gmra.mxu1 %vm657_vm1, %v12216_v31  ;;  %v12561_v31 = vld [vmem:[%s11650_s22 + $0x129] sm:$0xff] }
 0x18b   : > { %568 = vst.msk [vmem:[#allocation2 + $0x158] sm:$0xff] %vm523_vm2, %v16920_v7 }
 0x18c   : > { %570 = vst.msk [vmem:[#allocation2 + $0x168] sm:$0xff] %vm523_vm2, %v16920_v7  ;;  %v12551_v42 = vpop.f32.mrf.mxu2 }
 0x18d   : > { %571 = vst.msk [vmem:[#allocation2 + $0x170] sm:$0xff] %vm523_vm2, %v16920_v7  ;;  %v12554_v62 = vpop.f32.mrf.mxu3 }
 0x18e   : > { %573 = vst.msk [vmem:[#allocation2 + $0x180] sm:$0xff] %vm523_vm2, %v16920_v7  ;;  %v1932_v38 = vpop.f32.mrf.mxu0 }
 0x18f   : > { %574 = vst.msk [vmem:[#allocation2 + $0x188] sm:$0xff] %vm523_vm2, %v16920_v7  ;;  %v12565_v2 = vpop.f32.mrf.mxu1 }
 0x190   : > { %576 = vst.msk [vmem:[#allocation2 + $0x198] sm:$0xff] %vm523_vm2, %v16920_v7 }
 0x191   : > { %2010 = vst.msk [vmem:[#allocation2 + $0x19] sm:$0xff] %vm523_vm2, %v1993_v40  ;;  %v1978_v40 = vadd.f32 %v1932_v38, %v1828_v9  ;;  %10226 = vmatmul.msk.f32.gmra.mxu2 %vm657_vm1, %v12561_v31  ;;  %10286 = vmatmul.msk.f32.gmra.mxu0 %vm657_vm1, %v12163_v45 }
 0x192   : > { %577 = vst.msk [vmem:[#allocation2 + $0x1a0] sm:$0xff] %vm523_vm2, %v16920_v7  ;;  %10260 = vmatmul.msk.f32.gmra.mxu3 %vm657_vm1, %v12568_v16  ;;  %10320 = vmatmul.msk.f32.gmra.mxu1 %vm657_vm1, %v12237_v39 }
 0x193   : > { %530 = vst.msk [vmem:[#allocation2 + $0x28] sm:$0x3] %vm526_vm3, %v16920_v7  ;;  %v1994_v28 = vmax.f32 %v1978_v40, 0.0  ;;  %v1830_v40 = vadd.f32 %v12341_v6, %v1680_v27  ;;  %v12650_v6 = vld [vmem:[%s11650_s22 + $0x142] sm:$0xff] }
 0x194   : > { %527 = vst.msk [vmem:[#allocation2 + $0x10] sm:$0x3] %vm526_vm3, %v16920_v7  ;;  %v12591_v45 = vpop.f32.mrf.mxu2 }
 0x195   : > { %17003 = vst [vmem:[#allocation51_spill] sm:$0xff] %v12561_v31  ;;  %v12595_v26 = vpop.f32.mrf.mxu3 }
 0x196   : > { %533 = vst.msk [vmem:[#allocation2 + $0x40] sm:$0x3] %vm526_vm3, %v16920_v7  ;;  %v1935_v39 = vpop.f32.mrf.mxu0 }
 0x197   : > { %536 = vst.msk [vmem:[#allocation2 + $0x58] sm:$0x3] %vm526_vm3, %v16920_v7  ;;  %v12606_v46 = vpop.f32.mrf.mxu1  ;;  %v1979_v9 = vadd.f32 %v1935_v39, %v1829_v54 }
 0x198   : > { %539 = vst.msk [vmem:[#allocation2 + $0x70] sm:$0x3] %vm526_vm3, %v16920_v7 }
 0x199   : > { %542 = vst.msk [vmem:[#allocation2 + $0x88] sm:$0x3] %vm526_vm3, %v16920_v7  ;;  %10227 = vmatmul.msk.f32.gmra.mxu2 %vm657_vm1, %v12601_v32  ;;  %10287 = vmatmul.msk.f32.gmra.mxu0 %vm657_vm1, %v12180_v19  ;;  %v1995_v20 = vmax.f32 %v1979_v9, 0.0 }
 0x19a   : > { %2011 = vst.msk [vmem:[#allocation2 + $0x21] sm:$0xff] %vm523_vm2, %v1994_v28  ;;  %10261 = vmatmul.msk.f32.gmra.mxu3 %vm657_vm1, %v12609_v3  ;;  %10321 = vmatmul.msk.f32.gmra.mxu1 %vm657_vm1, %v12346_v4  ;;  %v1530_v28 = vadd.f32 %v12177_v47, %v1380_v15  ;;  %v1381_v47 = vadd.f32 %v12191_v49, %v12075_v18  ;;  %v12671_v15 = vld [vmem:[%s11650_s22 + $0x151] sm:$0xff] }
 0x19b   : > { %545 = vst.msk [vmem:[#allocation2 + $0xa0] sm:$0x3] %vm526_vm3, %v16920_v7 }
 0x19c   : > { %548 = vst.msk [vmem:[#allocation2 + $0xb8] sm:$0x3] %vm526_vm3, %v16920_v7  ;;  %v12632_v38 = vpop.f32.mrf.mxu2  ;;  %v1681_v54 = vadd.f32 %v12372_v12, %v1530_v28  ;;  %v12677_v28 = vld [vmem:[%s11650_s22 + $0x152] sm:$0xff] }
 0x19d   : > { %551 = vst.msk [vmem:[#allocation2 + $0xd0] sm:$0x3] %vm526_vm3, %v16920_v7  ;;  %v12637_v50 = vpop.f32.mrf.mxu3 }
 0x19e   : > { %17004 = vst [vmem:[#allocation52_spill] sm:$0xff] %v12601_v32  ;;  %v1938_v0 = vpop.f32.mrf.mxu0  ;;  %v1831_v56 = vadd.f32 %v12382_v23, %v1681_v54 }
 0x19f   : > { %554 = vst.msk [vmem:[#allocation2 + $0xe8] sm:$0x3] %vm526_vm3, %v16920_v7  ;;  %v1980_v53 = vadd.f32 %v1938_v0, %v1830_v40  ;;  %v12647_v10 = vpop.f32.mrf.mxu1 }
 0x1a0   : > { %557 = vst.msk [vmem:[#allocation2 + $0x100] sm:$0x3] %vm526_vm3, %v16920_v7 }
 0x1a1   : > { %560 = vst.msk [vmem:[#allocation2 + $0x118] sm:$0x3] %vm526_vm3, %v16920_v7  ;;  %v1996_v39 = vmax.f32 %v1980_v53, 0.0  ;;  %10228 = vmatmul.msk.f32.gmra.mxu2 %vm657_vm1, %v12642_v25  ;;  %10288 = vmatmul.msk.f32.gmra.mxu0 %vm657_vm1, %v12198_v22 }
 0x1a2   : > { %563 = vst.msk [vmem:[#allocation2 + $0x130] sm:$0x3] %vm526_vm3, %v16920_v7  ;;  %10262 = vmatmul.msk.f32.gmra.mxu3 %vm657_vm1, %v12650_v6  ;;  %10322 = vmatmul.msk.f32.gmra.mxu1 %vm657_vm1, %v12391_v59 }
 0x1a3   : > { %566 = vst.msk [vmem:[#allocation2 + $0x148] sm:$0x3] %vm526_vm3, %v16920_v7 }
 0x1a4   : > { %569 = vst.msk [vmem:[#allocation2 + $0x160] sm:$0x3] %vm526_vm3, %v16920_v7  ;;  %v12665_v12 = vpop.f32.mrf.mxu2 }
 0x1a5   : > { %572 = vst.msk [vmem:[#allocation2 + $0x178] sm:$0x3] %vm526_vm3, %v16920_v7  ;;  %v12668_v9 = vpop.f32.mrf.mxu3 }
 0x1a6   : > { %575 = vst.msk [vmem:[#allocation2 + $0x190] sm:$0x3] %vm526_vm3, %v16920_v7  ;;  %v1941_v27 = vpop.f32.mrf.mxu0 }
 0x1a7   : > { %578 = vst.msk [vmem:[#allocation2 + $0x1a8] sm:$0x3] %vm526_vm3, %v16920_v7  ;;  %v1981_v40 = vadd.f32 %v1941_v27, %v1831_v56  ;;  %v12674_v0 = vpop.f32.mrf.mxu1 }
 0x1a8   : > { %2012 = vst.msk [vmem:[#allocation2 + $0x31] sm:$0xff] %vm523_vm2, %v1995_v20  ;;  %v1531_v20 = vadd.f32 %v12195_v11, %v1381_v47  ;;  %v1382_v11 = vadd.f32 %v12209_v5, %v12093_v36 }
 0x1a9   : > { %2013 = vst.msk [vmem:[#allocation2 + $0x39] sm:$0xff] %vm523_vm2, %v1996_v39  ;;  %v1997_v49 = vmax.f32 %v1981_v40, 0.0  ;;  %10229 = vmatmul.msk.f32.gmra.mxu2 %vm657_vm1, %v12671_v15  ;;  %10289 = vmatmul.msk.f32.gmra.mxu0 %vm657_vm1, %v12219_v51  ;;  %v12697_v39 = vld [vmem:[%s11650_s22 + $0x159] sm:$0xff] }
 0x1aa   : > { %v1682_v18 = vadd.f32 %v12421_v44, %v1531_v20  ;;  %10263 = vmatmul.msk.f32.gmra.mxu3 %vm657_vm1, %v12677_v28  ;;  %10323 = vmatmul.msk.f32.gmra.mxu1 %vm657_vm1, %v12432_v61  ;;  %v1532_v47 = vadd.f32 %v12213_v29, %v1382_v11  ;;  %v12703_v20 = vld [vmem:[%s11650_s22 + $0x15a] sm:$0xff]  ;;  %v1383_v29 = vadd.f32 %v12230_v13, %v12110_v1 }
 0x1ab   : > { %2014 = vst.msk [vmem:[#allocation2 + $0x49] sm:$0xff] %vm523_vm2, %v1997_v49  ;;  %v12723_v49 = vld [vmem:[%s11650_s22 + $0x169] sm:$0xff] }
 0x1ac   : > { %v12691_v23 = vpop.f32.mrf.mxu2  ;;  %v1832_v44 = vadd.f32 %v12425_v41, %v1682_v18  ;;  %v1683_v36 = vadd.f32 %v12464_v17, %v1532_v47  ;;  %v1533_v11 = vadd.f32 %v12234_v30, %v1383_v29  ;;  %v12729_v47 = vld [vmem:[%s11650_s22 + $0x16a] sm:$0xff] }
 0x1ad   : > { %v12694_v53 = vpop.f32.mrf.mxu3 }
 0x1ae   : > { %v1944_v54 = vpop.f32.mrf.mxu0  ;;  %v1833_v17 = vadd.f32 %v12468_v60, %v1683_v36  ;;  %v1684_v1 = vadd.f32 %v12509_v37, %v1533_v11  ;;  %v1384_v60 = vadd.f32 %v12251_v57, %v12125_v43  ;;  %v12755_v11 = vld [vmem:[%s11650_s22 + $0x172] sm:$0xff] }
 0x1af   : > { %v1982_v56 = vadd.f32 %v1944_v54, %v1832_v44  ;;  %v12700_v27 = vpop.f32.mrf.mxu1 }
 0x1b0   : > { %v1834_v37 = vadd.f32 %v12514_v14, %v1684_v1  ;;  %v1534_v29 = vadd.f32 %v12255_v34, %v1384_v60  ;;  %v1385_v34 = vadd.f32 %v12272_v48, %v12140_v24  ;;  %v12778_v60 = vld [vmem:[%s16881_s3] ss:$0 sm:$0xff] }
 0x1b1   : > { %v1998_v5 = vmax.f32 %v1982_v56, 0.0  ;;  %10230 = vmatmul.msk.f32.gmra.mxu2 %vm657_vm1, %v12697_v39  ;;  %10290 = vmatmul.msk.f32.gmra.mxu0 %vm657_vm1, %v12240_v52 }
 0x1b2   : > { %10264 = vmatmul.msk.f32.gmra.mxu3 %vm657_vm1, %v12703_v20  ;;  %10324 = vmatmul.msk.f32.gmra.mxu1 %vm657_vm1, %v12475_v63  ;;  %v1685_v43 = vadd.f32 %v12551_v42, %v1534_v29  ;;  %v17005_v29 = vld [vmem:[#allocation29_spill] sm:$0xff] }
 0x1b3   : > { %2015 = vst.msk [vmem:[#allocation2 + $0x51] sm:$0xff] %vm523_vm2, %v1998_v5  ;;  %v12749_v5 = vld [vmem:[%s11650_s22 + $0x171] sm:$0xff] }
 0x1b4   : > { %v12717_v41 = vpop.f32.mrf.mxu2  ;;  %v1835_v42 = vadd.f32 %v12554_v62, %v1685_v43  ;;  %v17006_v62 = vld [vmem:[#allocation30_spill] sm:$0xff] }
 0x1b5   : > { %v12720_v40 = vpop.f32.mrf.mxu3 }
 0x1b6   : > { %v1947_v18 = vpop.f32.mrf.mxu0 }
 0x1b7   : > { %v1983_v44 = vadd.f32 %v1947_v18, %v1833_v17  ;;  %v12726_v54 = vpop.f32.mrf.mxu1 }
 0x1b9   : > { %v1999_v13 = vmax.f32 %v1983_v44, 0.0  ;;  %10231 = vmatmul.msk.f32.gmra.mxu2 %vm657_vm1, %v12723_v49  ;;  %10291 = vmatmul.msk.f32.gmra.mxu0 %vm657_vm1, %v12258_v21 }
 0x1ba   : > { %10265 = vmatmul.msk.f32.gmra.mxu3 %vm657_vm1, %v12729_v47  ;;  %10325 = vmatmul.msk.f32.gmra.mxu1 %vm657_vm1, %v12521_v35 }
 0x1bb   : > { %2016 = vst.msk [vmem:[#allocation2 + $0x61] sm:$0xff] %vm523_vm2, %v1999_v13  ;;  %v1535_v13 = vadd.f32 %v12274_v33, %v1385_v34  ;;  %v17007_v33 = vld [vmem:[#allocation21_spill] sm:$0xff] }
 0x1bc   : > { %v12743_v30 = vpop.f32.mrf.mxu2 }
 0x1bd   : > { %v12746_v56 = vpop.f32.mrf.mxu3  ;;  %v1686_v24 = vadd.f32 %v12591_v45, %v1535_v13 }
 0x1be   : > { %v1950_v36 = vpop.f32.mrf.mxu0 }
 0x1bf   : > { %v1984_v17 = vadd.f32 %v1950_v36, %v1834_v37  ;;  %v12752_v18 = vpop.f32.mrf.mxu1  ;;  %v1836_v34 = vadd.f32 %v12595_v26, %v1686_v24  ;;  %v17012_v26 = vld [vmem:[#allocation22_spill] sm:$0xff]  ;;  %v17013_v24 = vld [vmem:[#allocation31_spill] sm:$0xff] }
 0x1c1   : > { %v2000_v57 = vmax.f32 %v1984_v17, 0.0  ;;  %10232 = vmatmul.msk.f32.gmra.mxu2 %vm657_vm1, %v12749_v5  ;;  %10292 = vmatmul.msk.f32.gmra.mxu0 %vm657_vm1, %v12277_v55  ;;  %v17008_v17 = vld [vmem:[#allocation27_spill] sm:$0xff] }
 0x1c2   : > { %10266 = vmatmul.msk.f32.gmra.mxu3 %vm657_vm1, %v12755_v11  ;;  %10326 = vmatmul.msk.f32.gmra.mxu1 %vm657_vm1, %v12561_v31  ;;  %v1386_v43 = vadd.f32 %v17008_v17, %v17007_v33  ;;  %v17010_v31 = vld [vmem:[#allocation33_spill] sm:$0xff] }
 0x1c3   : > { %2017 = vst.msk [vmem:[#allocation2 + $0x69] sm:$0xff] %vm523_vm2, %v2000_v57  ;;  %v2165_v57 = vadd.f32 %v12778_v60, %v12526_v8  ;;  %v17011_v8 = vld [vmem:[#allocation34_spill] sm:$0xff] }
 0x1c4   : > { %v12769_v14 = vpop.f32.mrf.mxu2 }
 0x1c5   : > { %v12772_v44 = vpop.f32.mrf.mxu3 }
 0x1c6   : > { %v1953_v1 = vpop.f32.mrf.mxu0 }
 0x1c7   : > { %v1985_v37 = vadd.f32 %v1953_v1, %v1835_v42  ;;  %v12780_v36 = vpop.f32.mrf.mxu1 }
 0x1c9   : > { %v2001_v48 = vmax.f32 %v1985_v37, 0.0  ;;  %10293 = vmatmul.msk.f32.gmra.mxu0 %vm657_vm1, %v17005_v29  ;;  %10353 = vmatmul.msk.f32.vlgmr.msra.gmra.mxu2 %vm657_vm1, %v17006_v62  ;;  %v17009_v37 = vld [vmem:[#allocation28_spill] sm:$0xff] }
 0x1ca   : > { %10327 = vmatmul.msk.f32.gmra.mxu1 %vm657_vm1, %v12601_v32  ;;  %10387 = vmatmul.msk.f32.vlgmr.msra.gmra.mxu3 %vm657_vm1, %v12180_v19  ;;  %v1536_v62 = vadd.f32 %v17009_v37, %v1386_v43  ;;  %v2166_v43 = vadd.f32 %v12778_v60, %v12565_v2  ;;  %v17016_v2 = vld [vmem:[#allocation38_spill] sm:$0xff] }
 0x1cb   : > { %2018 = vst.msk [vmem:[#allocation2 + $0x79] sm:$0xff] %vm523_vm2, %v2001_v48  ;;  %v1387_v48 = vadd.f32 %v17013_v24, %v17012_v26  ;;  %v17015_v26 = vld [vmem:[#allocation37_spill] sm:$0xff]  ;;  %v2167_v24 = vadd.f32 %v12778_v60, %v12606_v46  ;;  %v17021_v46 = vld [vmem:[#allocation42_spill] sm:$0xff] }
 0x1cc   : > { %v2266_v45 = vpop.f32.mrf.mxu2  ;;  %v1687_v33 = vadd.f32 %v12632_v38, %v1536_v62 }
 0x1cd   : > { %v2314_v42 = vadd.f32 %v2266_v45, %v2165_v57  ;;  %v2415_v1 = vpop.f32.mrf.mxu3 }
 0x1ce   : > { %v1956_v13 = vpop.f32.mrf.mxu0  ;;  %v1837_v38 = vadd.f32 %v12637_v50, %v1687_v33  ;;  %v17017_v50 = vld [vmem:[#allocation23_spill] sm:$0xff] }
 0x1cf   : > { %v12798_v7 = vadd.f32 %v2415_v1, %v2314_v42  ;;  %v1986_v32 = vadd.f32 %v1956_v13, %v1836_v34  ;;  %v12800_v19 = vpop.f32.mrf.mxu1  ;;  %v17014_v42 = vld [vmem:[#allocation32_spill] sm:$0xff]  ;;  %v17018_v33 = vld [vmem:[#allocation35_spill] sm:$0xff] }
 0x1d0   : > { %v1537_v1 = vadd.f32 %v17014_v42, %v1387_v48 }
 0x1d1   : > { %v2002_v17 = vmax.f32 %v1986_v32, 0.0  ;;  %10294 = vmatmul.msk.f32.gmra.mxu0 %vm657_vm1, %v17010_v31  ;;  %10354 = vmatmul.msk.f32.gmra.mxu2 %vm657_vm1, %v17011_v8 }
 0x1d2   : > { %10328 = vmatmul.msk.f32.gmra.mxu1 %vm657_vm1, %v12642_v25  ;;  %10388 = vmatmul.msk.f32.gmra.mxu3 %vm657_vm1, %v12198_v22  ;;  %v1688_v62 = vadd.f32 %v12665_v12, %v1537_v1 }
 0x1d3   : > { %2019 = vst.msk [vmem:[#allocation2 + $0x81] sm:$0xff] %vm523_vm2, %v2002_v17  ;;  %v1388_v17 = vadd.f32 %v17018_v33, %v17017_v50  ;;  %v17020_v50 = vld [vmem:[#allocation41_spill] sm:$0xff]  ;;  %v2168_v33 = vadd.f32 %v12778_v60, %v12647_v10 }
 0x1d4   : > { %v2269_v32 = vpop.f32.mrf.mxu2  ;;  %v1838_v48 = vadd.f32 %v12668_v9, %v1688_v62  ;;  %v17022_v9 = vld [vmem:[#allocation24_spill] sm:$0xff]  ;;  %v17023_v62 = vld [vmem:[#allocation39_spill] sm:$0xff] }
 0x1d5   : > { %v2315_v57 = vadd.f32 %v2269_v32, %v2166_v43  ;;  %v2418_v45 = vpop.f32.mrf.mxu3 }
 0x1d6   : > { %v1959_v34 = vpop.f32.mrf.mxu0 }
 0x1d7   : > { %v12818_v13 = vadd.f32 %v2418_v45, %v2315_v57  ;;  %v1987_v37 = vadd.f32 %v1959_v34, %v1837_v38  ;;  %v12820_v22 = vpop.f32.mrf.mxu1  ;;  %v17019_v57 = vld [vmem:[#allocation36_spill] sm:$0xff] }
 0x1d8   : > { %v1538_v45 = vadd.f32 %v17019_v57, %v1388_v17 }
 0x1d9   : > { %v2003_v8 = vmax.f32 %v1987_v37, 0.0  ;;  %10295 = vmatmul.msk.f32.gmra.mxu0 %vm657_vm1, %v17015_v26  ;;  %10355 = vmatmul.msk.f32.gmra.mxu2 %vm657_vm1, %v17016_v2 }
 0x1da   : > { %10329 = vmatmul.msk.f32.gmra.mxu1 %vm657_vm1, %v12671_v15  ;;  %10389 = vmatmul.msk.f32.gmra.mxu3 %vm657_vm1, %v12219_v51  ;;  %v1689_v1 = vadd.f32 %v12691_v23, %v1538_v45  ;;  %v3432_v23 = vld [vmem:[%s16882_s4 + $0x18] sm:$0xff] }
 0x1db   : > { %2020 = vst.msk [vmem:[#allocation2 + $0x91] sm:$0xff] %vm523_vm2, %v2003_v8  ;;  %v1389_v8 = vadd.f32 %v17023_v62, %v17022_v9  ;;  %3493 = vmatpush.msrb.mxu2 %v3432_v23  ;;  %v17025_v9 = vld [vmem:[#allocation45_spill] sm:$0xff]  ;;  %v17026_v62 = vld [vmem:[#allocation46_spill] sm:$0xff]  ;;  %v2169_v23 = vadd.f32 %v12778_v60, %v12674_v0 }
 0x1dc   : > { %v2272_v12 = vpop.f32.mrf.mxu2 }
 0x1dd   : > { %v2316_v43 = vadd.f32 %v2272_v12, %v2167_v24  ;;  %v2421_v32 = vpop.f32.mrf.mxu3  ;;  %v10490_v24 = vld [vmem:[%s16882_s4 + $0x38] sm:$0xff] }
 0x1de   : > { %v1962_v38 = vpop.f32.mrf.mxu0  ;;  %3643 = vmatpush.msrb.mxu3 %v10490_v24 }
 0x1df   : > { %v12838_v34 = vadd.f32 %v2421_v32, %v2316_v43  ;;  %v1988_v42 = vadd.f32 %v1962_v38, %v1838_v48  ;;  %v12840_v51 = vpop.f32.mrf.mxu1  ;;  %v17024_v32 = vld [vmem:[#allocation40_spill] sm:$0xff] }
 0x1e0   : > { %v1539_v10 = vadd.f32 %v17024_v32, %v1389_v8  ;;  %v17028_v8 = vld [vmem:[#allocation43_spill] sm:$0xff] }
 0x1e1   : > { %v2004_v37 = vmax.f32 %v1988_v42, 0.0  ;;  %10296 = vmatmul.msk.f32.gmra.mxu0 %vm657_vm1, %v17020_v50  ;;  %10356 = vmatmul.msk.f32.gmra.mxu2 %vm657_vm1, %v17021_v46 }
 0x1e2   : > { %10330 = vmatmul.msk.f32.gmra.mxu1 %vm657_vm1, %v12697_v39  ;;  %10390 = vmatmul.msk.f32.gmra.mxu3 %vm657_vm1, %v12240_v52  ;;  %v1839_v52 = vadd.f32 %v12694_v53, %v1689_v1  ;;  %v1690_v42 = vadd.f32 %v12717_v41, %v1539_v10  ;;  %v10510_v53 = vld [vmem:[%s16882_s4 + $0x58] sm:$0xff]  ;;  %v17027_v1 = vld [vmem:[#allocation25_spill] sm:$0xff] }
 0x1e3   : > { %2021 = vst.msk [vmem:[#allocation2 + $0x99] sm:$0xff] %vm523_vm2, %v2004_v37  ;;  %v10530_v41 = vld [vmem:[%s16882_s4 + $0x78] sm:$0xff]  ;;  %3793 = vmatpush.msrb.mxu0 %v10510_v53  ;;  %v17031_v53 = vld [vmem:[#allocation50_spill] sm:$0xff] }
 0x1e4   : > { %v2275_v17 = vpop.f32.mrf.mxu2  ;;  %3943 = vmatpush.msrb.mxu1 %v10530_v41 }
 0x1e5   : > { %v2317_v12 = vadd.f32 %v2275_v17, %v2168_v33  ;;  %v2424_v48 = vpop.f32.mrf.mxu3  ;;  %v1390_v33 = vadd.f32 %v17028_v8, %v17027_v1 }
 0x1e6   : > { %v1965_v43 = vpop.f32.mrf.mxu0 }
 0x1e7   : > { %v12864_v38 = vadd.f32 %v2424_v48, %v2317_v12  ;;  %v1989_v57 = vadd.f32 %v1965_v43, %v1839_v52  ;;  %v12866_v45 = vpop.f32.mrf.mxu1  ;;  %v17029_v48 = vld [vmem:[#allocation44_spill] sm:$0xff] }
 0x1e8   : > { %v1540_v43 = vadd.f32 %v17029_v48, %v1390_v33 }
 0x1e9   : > { %v2005_v37 = vmax.f32 %v1989_v57, 0.0  ;;  %10297 = vmatmul.msk.f32.gmra.mxu0 %vm657_vm1, %v17025_v9  ;;  %10357 = vmatmul.msk.f32.gmra.mxu2 %vm657_vm1, %v17026_v62 }
 0x1ea   : > { %10331 = vmatmul.msk.f32.gmra.mxu1 %vm657_vm1, %v12723_v49  ;;  %10391 = vmatmul.msk.f32.gmra.mxu3 %vm657_vm1, %v12258_v21  ;;  %v1840_v21 = vadd.f32 %v12720_v40, %v1690_v42  ;;  %v1691_v0 = vadd.f32 %v12743_v30, %v1540_v43  ;;  %v17032_v40 = vld [vmem:[#allocation26_spill] sm:$0xff]  ;;  %v17033_v42 = vld [vmem:[#allocation47_spill] sm:$0xff]  ;;  %v2170_v30 = vadd.f32 %v12778_v60, %v12700_v27 }
 0x1eb   : > { %2022 = vst.msk [vmem:[#allocation2 + $0xa9] sm:$0xff] %vm523_vm2, %v2005_v37  ;;  %v17030_v37 = vld [vmem:[#allocation49_spill] sm:$0xff]  ;;  %v1391_v41 = vadd.f32 %v17033_v42, %v17032_v40 }
 0x1ec   : > { %v2278_v17 = vpop.f32.mrf.mxu2  ;;  %v1841_v33 = vadd.f32 %v12746_v56, %v1691_v0  ;;  %v2171_v56 = vadd.f32 %v12778_v60, %v12726_v54  ;;  %v3431_v54 = vld [vmem:[%s16882_s4 + $0x10] sm:$0xff] }
 0x1ed   : > { %v2318_v24 = vadd.f32 %v2278_v17, %v2169_v23  ;;  %v2427_v52 = vpop.f32.mrf.mxu3  ;;  %3494 = vmatpush.msrb.mxu2 %v3431_v54 }
 0x1ee   : > { %v1968_v12 = vpop.f32.mrf.mxu0 }
 0x1ef   : > { %v12890_v32 = vadd.f32 %v2427_v52, %v2318_v24  ;;  %v1990_v10 = vadd.f32 %v1968_v12, %v1840_v21  ;;  %v12892_v57 = vpop.f32.mrf.mxu1  ;;  %v12910_v24 = vld [vmem:[%s11650_s22 + $0x180] sm:$0xff]  ;;  %v17034_v52 = vld [vmem:[#allocation48_spill] sm:$0xff] }
 0x1f0   : > { %v1541_v12 = vadd.f32 %v17034_v52, %v1391_v41 }
 0x1f1   : > { %v2006_v1 = vmax.f32 %v1990_v10, 0.0  ;;  %10298 = vmatmul.msk.f32.gmra.mxu0 %vm657_vm1, %v17030_v37  ;;  %10358 = vmatmul.msk.f32.gmra.mxu2 %vm657_vm1, %v17031_v53  ;;  %v12918_v10 = vld [vmem:[%s11650_s22 + $0x181] sm:$0xff] }
 0x1f2   : > { %10332 = vmatmul.msk.f32.gmra.mxu1 %vm657_vm1, %v12749_v5  ;;  %10392 = vmatmul.msk.f32.gmra.mxu3 %vm657_vm1, %v12277_v55  ;;  %v1692_v27 = vadd.f32 %v12769_v14, %v1541_v12 }
 0x1f3   : > { %2023 = vst.msk [vmem:[#allocation2 + $0xb1] sm:$0xff] %vm523_vm2, %v2006_v1 }
 0x1f4   : > { %v2281_v8 = vpop.f32.mrf.mxu2  ;;  %v1842_v0 = vadd.f32 %v12772_v44, %v1692_v27  ;;  %v10489_v44 = vld [vmem:[%s16882_s4 + $0x30] sm:$0xff] }
 0x1f5   : > { %v2319_v23 = vadd.f32 %v2281_v8, %v2170_v30  ;;  %v2430_v17 = vpop.f32.mrf.mxu3  ;;  %v12934_v30 = vld [vmem:[%s11650_s22 + $0x188] sm:$0xff]  ;;  %3644 = vmatpush.msrb.mxu3 %v10489_v44 }
 0x1f6   : > { %v1971_v21 = vpop.f32.mrf.mxu0 }
 0x1f7   : > { %v12913_v48 = vadd.f32 %v2430_v17, %v2319_v23  ;;  %v1991_v55 = vadd.f32 %v1971_v21, %v1841_v33  ;;  %v12915_v43 = vpop.f32.mrf.mxu1  ;;  %v12941_v17 = vld [vmem:[%s11650_s22 + $0x189] sm:$0xff]  ;;  %v2172_v21 = vadd.f32 %v12778_v60, %v12752_v18 }
 0x1f8   : > { %v10529_v18 = vld [vmem:[%s16882_s4 + $0x70] sm:$0xff] }
 0x1f9   : > { %v2007_v1 = vmax.f32 %v1991_v55, 0.0  ;;  %10299 = vmatmul.msk.f32.gmra.mxu0 %vm657_vm1, %v12910_v24  ;;  %10359 = vmatmul.msk.f32.gmra.mxu2 %vm657_vm1, %v12529_v58 }
 0x1fa   : > { %10333 = vmatmul.msk.f32.gmra.mxu1 %vm657_vm1, %v12918_v10  ;;  %10393 = vmatmul.msk.f32.gmra.mxu3 %vm657_vm1, %v17005_v29 }
 0x1fb   : > { %2024 = vst.msk [vmem:[#allocation2 + $0xc1] sm:$0xff] %vm523_vm2, %v2007_v1  ;;  %3944 = vmatpush.msrb.mxu1 %v10529_v18 }
 0x1fc   : > { %v2284_v14 = vpop.f32.mrf.mxu2 }
 0x1fd   : > { %v2320_v40 = vadd.f32 %v2284_v14, %v2171_v56  ;;  %v2433_v42 = vpop.f32.mrf.mxu3  ;;  %v2173_v14 = vadd.f32 %v12778_v60, %v12780_v36  ;;  %v2174_v36 = vadd.f32 %v12778_v60, %v12800_v19 }
 0x1fe   : > { %v1974_v41 = vpop.f32.mrf.mxu0 }
 0x1ff   : > { %v12936_v8 = vadd.f32 %v2433_v42, %v2320_v40  ;;  %v1992_v33 = vadd.f32 %v1974_v41, %v1842_v0  ;;  %v12938_v23 = vpop.f32.mrf.mxu1 }
 0x201   : > { %v2008_v29 = vmax.f32 %v1992_v33, 0.0  ;;  %10300 = vmatmul.msk.f32.gmra.mxu0 %vm657_vm1, %v12934_v30  ;;  %10360 = vmatmul.msk.f32.gmra.mxu2 %vm657_vm1, %v12568_v16 }
 0x202   : > { %10334 = vmatmul.msk.f32.gmra.mxu1 %vm657_vm1, %v12941_v17  ;;  %10394 = vmatmul.msk.f32.gmra.mxu3 %vm657_vm1, %v17010_v31  ;;  %v10509_v31 = vld [vmem:[%s16882_s4 + $0x50] sm:$0xff] }
 0x203   : > { %2025 = vst.msk [vmem:[#allocation2 + $0xc9] sm:$0xff] %vm523_vm2, %v2008_v29  ;;  %3794 = vmatpush.msrb.mxu0 %v10509_v31 }
 0x204   : > { %v2287_v52 = vpop.f32.mrf.mxu2 }
 0x205   : > { %v2321_v12 = vadd.f32 %v2287_v52, %v2172_v21  ;;  %v2436_v55 = vpop.f32.mrf.mxu3 }
 0x206   : > { %v12960_v27 = vpop.f32.mrf.mxu0 }
 0x207   : > { %v12962_v1 = vadd.f32 %v2436_v55, %v2321_v12  ;;  %v12964_v56 = vpop.f32.mrf.mxu1 }
 0x209   : > { %10361 = vmatmul.msk.f32.gmra.mxu2 %vm657_vm1, %v12609_v3  ;;  %10421 = vmatmul.msk.f32.vlgmr.msra.gmra.mxu0 %vm657_vm1, %v12346_v4 }
 0x20a   : > { %10395 = vmatmul.msk.f32.gmra.mxu3 %vm657_vm1, %v17015_v26  ;;  %10455 = vmatmul.msk.f32.vlgmr.msra.gmra.mxu1 %vm657_vm1, %v17016_v2 }
 0x20c   : > { %v2290_v4 = vpop.f32.mrf.mxu2 }
 0x20d   : > { %v2322_v0 = vadd.f32 %v2290_v4, %v2173_v14  ;;  %v2439_v40 = vpop.f32.mrf.mxu3  ;;  %v10508_v4 = vld [vmem:[%s16882_s4 + $0x48] sm:$0xff] }
 0x20e   : > { %v12982_v26 = vpop.f32.mrf.mxu0  ;;  %3795 = vmatpush.msrb.mxu0 %v10508_v4 }
 0x20f   : > { %v12984_v42 = vadd.f32 %v2439_v40, %v2322_v0  ;;  %v12986_v2 = vpop.f32.mrf.mxu1  ;;  %v10528_v0 = vld [vmem:[%s16882_s4 + $0x68] sm:$0xff] }
 0x210   : > { %3945 = vmatpush.msrb.mxu1 %v10528_v0  ;;  %v10384_v0 = vld [vmem:[%s11650_s22 + $0x1a0] sm:$0xff] }
 0x211   : > { %10362 = vmatmul.msk.f32.gmra.mxu2 %vm657_vm1, %v12650_v6  ;;  %10422 = vmatmul.msk.f32.gmra.mxu0 %vm657_vm1, %v12391_v59  ;;  %v2175_v59 = vadd.f32 %v12778_v60, %v12820_v22  ;;  %v10488_v22 = vld [vmem:[%s16882_s4 + $0x28] sm:$0xff] }
 0x212   : > { %10396 = vmatmul.msk.f32.gmra.mxu3 %vm657_vm1, %v17020_v50  ;;  %10456 = vmatmul.msk.f32.gmra.mxu1 %vm657_vm1, %v17021_v46 }
 0x213   : > { %3645 = vmatpush.msrb.mxu3 %v10488_v22 }
 0x214   : > { %v2293_v41 = vpop.f32.mrf.mxu2 }
 0x215   : > { %v2323_v33 = vadd.f32 %v2293_v41, %v2174_v36  ;;  %v2442_v29 = vpop.f32.mrf.mxu3 }
 0x216   : > { %v12998_v54 = vpop.f32.mrf.mxu0 }
 0x217   : > { %v13000_v44 = vadd.f32 %v2442_v29, %v2323_v33  ;;  %v13002_v21 = vpop.f32.mrf.mxu1  ;;  %v2178_v29 = vadd.f32 %v12778_v60, %v12892_v57  ;;  %v2179_v57 = vadd.f32 %v12778_v60, %v12915_v43 }
 0x219   : > { %10363 = vmatmul.msk.f32.gmra.mxu2 %vm657_vm1, %v12677_v28  ;;  %10423 = vmatmul.msk.f32.gmra.mxu0 %vm657_vm1, %v12432_v61  ;;  %v3430_v61 = vld [vmem:[%s16882_s4 + $0x8] sm:$0xff] }
 0x21a   : > { %10397 = vmatmul.msk.f32.gmra.mxu3 %vm657_vm1, %v17025_v9  ;;  %10457 = vmatmul.msk.f32.gmra.mxu1 %vm657_vm1, %v17026_v62  ;;  %v2176_v9 = vadd.f32 %v12778_v60, %v12840_v51  ;;  %v3429_v51 = vld [vmem:[%s16882_s4] sm:$0xff] }
 0x21b   : > { %3495 = vmatpush.msrb.mxu2 %v3430_v61  ;;  %v13083_v61 = vld [vmem:[%s11650_s22 + $0x182] sm:$0xff] }
 0x21c   : > { %v2296_v19 = vpop.f32.mrf.mxu2 }
 0x21d   : > { %v2324_v50 = vadd.f32 %v2296_v19, %v2175_v59  ;;  %v2445_v46 = vpop.f32.mrf.mxu3  ;;  %3496 = vmatpush.msrb.mxu2 %v3429_v51 }
 0x21e   : > { %v13014_v52 = vpop.f32.mrf.mxu0 }
 0x21f   : > { %v13016_v12 = vadd.f32 %v2445_v46, %v2324_v50  ;;  %v13018_v55 = vpop.f32.mrf.mxu1 }
 0x221   : > { %10364 = vmatmul.msk.f32.gmra.mxu2 %vm657_vm1, %v12703_v20  ;;  %10424 = vmatmul.msk.f32.gmra.mxu0 %vm657_vm1, %v12475_v63 }
 0x222   : > { %10398 = vmatmul.msk.f32.gmra.mxu3 %vm657_vm1, %v17030_v37  ;;  %10458 = vmatmul.msk.f32.gmra.mxu1 %vm657_vm1, %v17031_v53  ;;  %v10487_v53 = vld [vmem:[%s16882_s4 + $0x20] sm:$0xff] }
 0x223   : > { %3646 = vmatpush.msrb.mxu3 %v10487_v53  ;;  %v13102_v53 = vld [vmem:[%s11650_s22 + $0x18a] sm:$0xff] }
 0x224   : > { %v2299_v63 = vpop.f32.mrf.mxu2 }
 0x225   : > { %v2325_v62 = vadd.f32 %v2299_v63, %v2176_v9  ;;  %v2448_v31 = vpop.f32.mrf.mxu3 }
 0x226   : > { %v13036_v18 = vpop.f32.mrf.mxu0 }
 0x227   : > { %v13038_v14 = vadd.f32 %v2448_v31, %v2325_v62  ;;  %v13040_v37 = vpop.f32.mrf.mxu1 }
 0x229   : > { %10365 = vmatmul.msk.f32.gmra.mxu2 %vm657_vm1, %v12729_v47  ;;  %10425 = vmatmul.msk.f32.gmra.mxu0 %vm657_vm1, %v12521_v35  ;;  %v2177_v35 = vadd.f32 %v12778_v60, %v12866_v45  ;;  %v17036_v45 = vld [vmem:[#allocation51_spill] sm:$0xff] }
 0x22a   : > { %10399 = vmatmul.msk.f32.gmra.mxu3 %vm657_vm1, %v12910_v24  ;;  %10459 = vmatmul.msk.f32.gmra.mxu1 %vm657_vm1, %v12529_v58 }
 0x22c   : > { %v2302_v40 = vpop.f32.mrf.mxu2 }
 0x22d   : > { %v2326_v24 = vadd.f32 %v2302_v40, %v2177_v35  ;;  %v2451_v36 = vpop.f32.mrf.mxu3 }
 0x22e   : > { %v13064_v58 = vpop.f32.mrf.mxu0 }
 0x22f   : > { %v13066_v41 = vadd.f32 %v2451_v36, %v2326_v24  ;;  %v13068_v33 = vpop.f32.mrf.mxu1 }
 0x231   : > { %17035 = vst [vmem:[#allocation29_spill] sm:$0xff] %v13066_v41  ;;  %10366 = vmatmul.msk.f32.gmra.mxu2 %vm657_vm1, %v12755_v11  ;;  %10426 = vmatmul.msk.f32.gmra.mxu0 %vm657_vm1, %v17036_v45  ;;  %v3413_v45 = vld [vmem:[#allocation2] sm:$0xff] }
 0x232   : > { %10400 = vmatmul.msk.f32.gmra.mxu3 %vm657_vm1, %v12934_v30  ;;  %10460 = vmatmul.msk.f32.gmra.mxu1 %vm657_vm1, %v12568_v16  ;;  %v10383_v30 = vld [vmem:[%s11650_s22 + $0x198] sm:$0xff] }
 0x233   : > { %v17038_v16 = vld [vmem:[#allocation52_spill] sm:$0xff] }
 0x234   : > { %v2305_v59 = vpop.f32.mrf.mxu2 }
 0x235   : > { %v2327_v19 = vadd.f32 %v2305_v59, %v2178_v29  ;;  %v2454_v50 = vpop.f32.mrf.mxu3 }
 0x236   : > { %v13080_v46 = vpop.f32.mrf.mxu0 }
 0x237   : > { %v13085_v22 = vadd.f32 %v2454_v50, %v2327_v19  ;;  %v13087_v9 = vpop.f32.mrf.mxu1  ;;  %v3562_v19 = vld [vmem:[#allocation2 + $0x1] sm:$0xff] }
 0x238   : > { %v3414_v50 = vld [vmem:[#allocation2 + $0x8] sm:$0xff] }
 0x239   : > { %17037 = vst [vmem:[#allocation30_spill] sm:$0xff] %v13085_v22  ;;  %10367 = vmatmul.msk.f32.gmra.mxu2 %vm657_vm1, %v13083_v61  ;;  %10427 = vmatmul.msk.f32.gmra.mxu0 %vm657_vm1, %v17038_v16  ;;  %v10451_v22 = vld [vmem:[%s11650_s22 + $0x19a] sm:$0xff] }
 0x23a   : > { %10401 = vmatmul.msk.f32.gmra.mxu3 %vm657_vm1, %v10383_v30  ;;  %10461 = vmatmul.msk.f32.gmra.mxu1 %vm657_vm1, %v12609_v3  ;;  %v2180_v3 = vadd.f32 %v12778_v60, %v12938_v23  ;;  %v3563_v30 = vld [vmem:[#allocation2 + $0x9] sm:$0xff] }
 0x23c   : > { %v2308_v63 = vpop.f32.mrf.mxu2 }
 0x23d   : > { %v2328_v62 = vadd.f32 %v2308_v63, %v2179_v57  ;;  %v2457_v31 = vpop.f32.mrf.mxu3 }
 0x23e   : > { %v13099_v51 = vpop.f32.mrf.mxu0 }
 0x23f   : > { %v13104_v4 = vadd.f32 %v2457_v31, %v2328_v62  ;;  %v13106_v35 = vpop.f32.mrf.mxu1  ;;  %v13158_v31 = vld [vmem:[#allocation2 + $0x18] sm:$0xff] }
 0x241   : > { %17039 = vst [vmem:[#allocation21_spill] sm:$0xff] %v13104_v4  ;;  %10368 = vmatmul.msk.f32.gmra.mxu2 %vm657_vm1, %v13102_v53  ;;  %10428 = vmatmul.msk.f32.gmra.mxu0 %vm657_vm1, %v12642_v25  ;;  %v10507_v25 = vld [vmem:[%s16882_s4 + $0x40] sm:$0xff] }
 0x242   : > { %10402 = vmatmul.msk.f32.gmra.mxu3 %vm657_vm1, %v10384_v0  ;;  %10462 = vmatmul.msk.f32.gmra.mxu1 %vm657_vm1, %v12650_v6  ;;  %v10527_v6 = vld [vmem:[%s16882_s4 + $0x60] sm:$0xff] }
 0x243   : > { %3796 = vmatpush.msrb.mxu0 %v10507_v25  ;;  %3946 = vmatpush.msrb.mxu1 %v10527_v6  ;;  %v13204_v6 = vld [vmem:[#allocation2 + $0x30] sm:$0xff]  ;;  %v13236_v4 = vld [vmem:[#allocation2 + $0x39] sm:$0xff] }
 0x244   : > { %v2311_v43 = vpop.f32.mrf.mxu2  ;;  %17048 = vst [vmem:[#allocation38_spill] sm:$0xff] %v13236_v4 }
 0x245   : > { %v2329_v40 = vadd.f32 %v2311_v43, %v2180_v3  ;;  %v2460_v24 = vpop.f32.mrf.mxu3 }
 0x246   : > { %v13118_v36 = vpop.f32.mrf.mxu0 }
 0x247   : > { %v13120_v29 = vadd.f32 %v2460_v24, %v2329_v40  ;;  %v13122_v59 = vpop.f32.mrf.mxu1  ;;  %v10550_v40 = vld [vmem:[%s16882_s4 + $0x98] sm:$0xff] }
 0x248   : > { %v10570_v24 = vld [vmem:[%s16882_s4 + $0xb8] sm:$0xff]  ;;  %4093 = vmatpush.msra.mxu2 %v10550_v40 }
 0x249   : > { %17040 = vst [vmem:[#allocation27_spill] sm:$0xff] %v13120_v29  ;;  %10429 = vmatmul.msk.f32.gmra.mxu0 %vm657_vm1, %v12671_v15  ;;  %10471 = vmatmul.msk.f32.vlgmr.msrb.gmra.mxu2 %vm523_vm2, %v3413_v45  ;;  %v10610_v40 = vld [vmem:[%s16882_s4 + $0xf8] sm:$0xff] }
 0x24a   : > { %10463 = vmatmul.msk.f32.gmra.mxu1 %vm657_vm1, %v12677_v28  ;;  %10491 = vmatmul.msk.f32.vlgmr.msrb.gmra.mxu3 %vm523_vm2, %v3562_v19  ;;  %v13230_v29 = vld [vmem:[#allocation2 + $0x38] sm:$0xff] }
 0x24b   : > { %4243 = vmatpush.msra.mxu3 %v10570_v24  ;;  %4544 = vmatpush.msra.mxu1 %v10610_v40 }
 0x24c   : > { %v13136_v60 = vpop.f32.mrf.mxu2 }
 0x24d   : > { %v13138_v15 = vpop.f32.mrf.mxu3 }
 0x24e   : > { %v13140_v23 = vpop.f32.mrf.mxu0 }
 0x24f   : > { %v13142_v28 = vpop.f32.mrf.mxu1 }
 0x251   : > { %10430 = vmatmul.msk.f32.gmra.mxu0 %vm657_vm1, %v12697_v39  ;;  %10472 = vmatmul.msk.f32.gmra.mxu2 %vm523_vm2, %v3414_v50  ;;  %v13164_v39 = vld [vmem:[#allocation2 + $0x19] sm:$0xff] }
 0x252   : > { %10464 = vmatmul.msk.f32.gmra.mxu1 %vm657_vm1, %v12703_v20  ;;  %10492 = vmatmul.msk.f32.gmra.mxu3 %vm523_vm2, %v3563_v30 }
 0x254   : > { %v13150_v16 = vpop.f32.mrf.mxu2 }
 0x255   : > { %v13152_v57 = vpop.f32.mrf.mxu3 }
 0x256   : > { %v13154_v63 = vpop.f32.mrf.mxu0 }
 0x257   : > { %v13156_v62 = vpop.f32.mrf.mxu1 }
 0x259   : > { %10431 = vmatmul.msk.f32.gmra.mxu0 %vm657_vm1, %v12723_v49  ;;  %10473 = vmatmul.msk.f32.gmra.mxu2 %vm523_vm2, %v13158_v31  ;;  %v13178_v49 = vld [vmem:[#allocation2 + $0x20] sm:$0xff] }
 0x25a   : > { %10465 = vmatmul.msk.f32.gmra.mxu1 %vm657_vm1, %v12729_v47  ;;  %10493 = vmatmul.msk.f32.gmra.mxu3 %vm523_vm2, %v13164_v39  ;;  %v13184_v47 = vld [vmem:[#allocation2 + $0x21] sm:$0xff] }
 0x25c   : > { %v13170_v20 = vpop.f32.mrf.mxu2 }
 0x25d   : > { %v13172_v0 = vpop.f32.mrf.mxu3 }
 0x25e   : > { %v13174_v3 = vpop.f32.mrf.mxu0 }
 0x25f   : > { %17041 = vst [vmem:[#allocation28_spill] sm:$0xff] %v13174_v3  ;;  %v13176_v43 = vpop.f32.mrf.mxu1  ;;  %v13275_v3 = vld [vmem:[#allocation2 + $0x50] sm:$0xff] }
 0x260   : > { %17042 = vst [vmem:[#allocation33_spill] sm:$0xff] %v13176_v43  ;;  %v10452_v43 = vld [vmem:[%s11650_s22 + $0x1a2] sm:$0xff] }
 0x261   : > { %10432 = vmatmul.msk.f32.gmra.mxu0 %vm657_vm1, %v12749_v5  ;;  %10474 = vmatmul.msk.f32.gmra.mxu2 %vm523_vm2, %v13178_v49 }
 0x262   : > { %10466 = vmatmul.msk.f32.gmra.mxu1 %vm657_vm1, %v12755_v11  ;;  %10494 = vmatmul.msk.f32.gmra.mxu3 %vm523_vm2, %v13184_v47  ;;  %v13210_v11 = vld [vmem:[#allocation2 + $0x31] sm:$0xff] }
 0x263   : > { %17045 = vst [vmem:[#allocation31_spill] sm:$0xff] %v13210_v11 }
 0x264   : > { %v13196_v5 = vpop.f32.mrf.mxu2 }
 0x265   : > { %v13198_v45 = vpop.f32.mrf.mxu3 }
 0x266   : > { %v13200_v19 = vpop.f32.mrf.mxu0 }
 0x267   : > { %17043 = vst [vmem:[#allocation34_spill] sm:$0xff] %v13200_v19  ;;  %v13202_v25 = vpop.f32.mrf.mxu1 }
 0x268   : > { %17044 = vst [vmem:[#allocation22_spill] sm:$0xff] %v13202_v25  ;;  %v13252_v25 = vld [vmem:[#allocation2 + $0x48] sm:$0xff] }
 0x269   : > { %10433 = vmatmul.msk.f32.gmra.mxu0 %vm657_vm1, %v12918_v10  ;;  %10475 = vmatmul.msk.f32.gmra.mxu2 %vm523_vm2, %v13204_v6  ;;  %v10590_v10 = vld [vmem:[%s16882_s4 + $0xd8] sm:$0xff] }
 0x26a   : > { %10467 = vmatmul.msk.f32.gmra.mxu1 %vm657_vm1, %v13083_v61  ;;  %10495 = vmatmul.msk.f32.gmra.mxu3 %vm523_vm2, %v13210_v11 }
 0x26b   : > { %4394 = vmatpush.msra.mxu0 %v10590_v10 }
 0x26c   : > { %v13216_v50 = vpop.f32.mrf.mxu2 }
 0x26d   : > { %v13218_v30 = vpop.f32.mrf.mxu3 }
 0x26e   : > { %v13226_v24 = vpop.f32.mrf.mxu0 }
 0x26f   : > { %17046 = vst [vmem:[#allocation32_spill] sm:$0xff] %v13226_v24  ;;  %v13228_v61 = vpop.f32.mrf.mxu1  ;;  %v10417_v24 = vld [vmem:[%s11650_s22 + $0x199] sm:$0xff] }
 0x270   : > { %17047 = vst [vmem:[#allocation37_spill] sm:$0xff] %v13228_v61 }
 0x271   : > { %10434 = vmatmul.msk.f32.gmra.mxu0 %vm657_vm1, %v12941_v17  ;;  %10476 = vmatmul.msk.f32.gmra.mxu2 %vm523_vm2, %v13230_v29 }
 0x272   : > { %10468 = vmatmul.msk.f32.gmra.mxu1 %vm657_vm1, %v13102_v53  ;;  %10496 = vmatmul.msk.f32.gmra.mxu3 %vm523_vm2, %v13236_v4  ;;  %v13257_v53 = vld [vmem:[#allocation2 + $0x49] sm:$0xff] }
 0x273   : > { %17051 = vst [vmem:[#allocation36_spill] sm:$0xff] %v13257_v53 }
 0x274   : > { %v13242_v10 = vpop.f32.mrf.mxu2 }
 0x275   : > { %v13244_v40 = vpop.f32.mrf.mxu3 }
 0x276   : > { %v13246_v61 = vpop.f32.mrf.mxu0 }
 0x277   : > { %17049 = vst [vmem:[#allocation23_spill] sm:$0xff] %v13246_v61  ;;  %v13249_v17 = vpop.f32.mrf.mxu1  ;;  %v2613_v61 = vadd.f32 %v12960_v27, %v12798_v7  ;;  %v13281_v7 = vld [vmem:[#allocation2 + $0x51] sm:$0xff]  ;;  %v2614_v27 = vadd.f32 %v12982_v26, %v12818_v13 }
 0x278   : > { %17050 = vst [vmem:[#allocation35_spill] sm:$0xff] %v13249_v17 }
 0x279   : > { %10435 = vmatmul.msk.f32.gmra.mxu0 %vm657_vm1, %v10417_v24  ;;  %10477 = vmatmul.msk.f32.gmra.mxu2 %vm523_vm2, %v13252_v25  ;;  %v10418_v24 = vld [vmem:[%s11650_s22 + $0x1a1] sm:$0xff]  ;;  %v2762_v41 = vadd.f32 %v12964_v56, %v2613_v61  ;;  %17054 = vst [vmem:[#allocation24_spill] sm:$0xff] %v13281_v7  ;;  %v2763_v13 = vadd.f32 %v12986_v2, %v2614_v27 }
 0x27a   : > { %10469 = vmatmul.msk.f32.gmra.mxu1 %vm657_vm1, %v10451_v22  ;;  %10497 = vmatmul.msk.f32.gmra.mxu3 %vm523_vm2, %v13257_v53  ;;  %v13305_v53 = vld [vmem:[#allocation2 + $0x61] sm:$0xff]  ;;  %v2615_v2 = vadd.f32 %v12998_v54, %v12838_v34 }
 0x27b   : > { %v2911_v22 = vadd.f32 %v13136_v60, %v2762_v41  ;;  %v10549_v60 = vld [vmem:[%s16882_s4 + $0x90] sm:$0xff] }
 0x27c   : > { %v13264_v4 = vpop.f32.mrf.mxu2  ;;  %4094 = vmatpush.msra.mxu2 %v10549_v60  ;;  %v2764_v34 = vadd.f32 %v13002_v21, %v2615_v2  ;;  %v2616_v21 = vadd.f32 %v13014_v52, %v12864_v38 }
 0x27d   : > { %v13266_v17 = vpop.f32.mrf.mxu3  ;;  %v3061_v61 = vadd.f32 %v13138_v15, %v2911_v22  ;;  %v2912_v15 = vadd.f32 %v13150_v16, %v2763_v13 }
 0x27e   : > { %v13268_v19 = vpop.f32.mrf.mxu0  ;;  %v2913_v13 = vadd.f32 %v13170_v20, %v2764_v34 }
 0x27f   : > { %17052 = vst [vmem:[#allocation41_spill] sm:$0xff] %v13268_v19  ;;  %v13272_v11 = vpop.f32.mrf.mxu1  ;;  %v3062_v16 = vadd.f32 %v13152_v57, %v2912_v15  ;;  %v13332_v15 = vld [vmem:[#allocation2 + $0x69] sm:$0xff] }
 0x280   : > { %17053 = vst [vmem:[#allocation42_spill] sm:$0xff] %v13272_v11  ;;  %v3712_v11 = vld [vmem:[#allocation2 + $0x2] sm:$0xff]  ;;  %v3063_v20 = vadd.f32 %v13172_v0, %v2913_v13  ;;  %v13355_v0 = vld [vmem:[#allocation2 + $0x79] sm:$0xff] }
 0x281   : > { %10436 = vmatmul.msk.f32.gmra.mxu0 %vm657_vm1, %v10418_v24  ;;  %10478 = vmatmul.msk.f32.gmra.mxu2 %vm523_vm2, %v13275_v3 }
 0x282   : > { %10470 = vmatmul.msk.f32.gmra.mxu1 %vm657_vm1, %v10452_v43  ;;  %10498 = vmatmul.msk.f32.gmra.mxu3 %vm523_vm2, %v13281_v7  ;;  %v10569_v43 = vld [vmem:[%s16882_s4 + $0xb0] sm:$0xff]  ;;  %v13300_v7 = vld [vmem:[#allocation2 + $0x60] sm:$0xff] }
 0x283   : > { %4244 = vmatpush.msra.mxu3 %v10569_v43  ;;  %v3713_v43 = vld [vmem:[#allocation2 + $0xa] sm:$0xff] }
 0x284   : > { %v13288_v56 = vpop.f32.mrf.mxu2 }
 0x285   : > { %v13291_v41 = vpop.f32.mrf.mxu3 }
 0x286   : > { %v3162_v24 = vpop.f32.mrf.mxu0 }
 0x287   : > { %v3210_v26 = vadd.f32 %v3162_v24, %v3061_v61  ;;  %v3311_v19 = vpop.f32.mrf.mxu1  ;;  %v13327_v24 = vld [vmem:[#allocation2 + $0x68] sm:$0xff] }
 0x289   : > { %v3359_v22 = vadd.f32 %v3311_v19, %v3210_v26  ;;  %10479 = vmatmul.msk.f32.gmra.mxu2 %vm523_vm2, %v13300_v7  ;;  %10511 = vmatmul.msk.f32.vlgmr.msrb.gmra.mxu0 %vm523_vm2, %v3712_v11  ;;  %v10589_v11 = vld [vmem:[%s16882_s4 + $0xd0] sm:$0xff] }
 0x28a   : > { %10499 = vmatmul.msk.f32.gmra.mxu3 %vm523_vm2, %v13305_v53  ;;  %10531 = vmatmul.msk.f32.vlgmr.msrb.gmra.mxu1 %vm523_vm2, %v13158_v31  ;;  %v10609_v31 = vld [vmem:[%s16882_s4 + $0xf0] sm:$0xff] }
 0x28b   : > { %v3375_v27 = vmax.f32 %v3359_v22, 0.0  ;;  %4395 = vmatpush.msra.mxu0 %v10589_v11  ;;  %4545 = vmatpush.msra.mxu1 %v10609_v31  ;;  %v2765_v11 = vadd.f32 %v13018_v55, %v2616_v21  ;;  %v2617_v55 = vadd.f32 %v13036_v18, %v12890_v32 }
 0x28c   : > { %v13314_v61 = vpop.f32.mrf.mxu2 }
 0x28d   : > { %3392 = vst.msk [vmem:[#allocation2 + $0xd9] sm:$0xff] %vm523_vm2, %v3375_v27  ;;  %v13318_v19 = vpop.f32.mrf.mxu3  ;;  %v2914_v38 = vadd.f32 %v13196_v5, %v2765_v11 }
 0x28e   : > { %v3165_v60 = vpop.f32.mrf.mxu0 }
 0x28f   : > { %v3211_v54 = vadd.f32 %v3165_v60, %v3062_v16  ;;  %v3314_v57 = vpop.f32.mrf.mxu1 }
 0x291   : > { %v3360_v26 = vadd.f32 %v3314_v57, %v3211_v54  ;;  %10480 = vmatmul.msk.f32.gmra.mxu2 %vm523_vm2, %v13327_v24  ;;  %10512 = vmatmul.msk.f32.gmra.mxu0 %vm523_vm2, %v3713_v43  ;;  %v13348_v43 = vld [vmem:[#allocation2 + $0x78] sm:$0xff]  ;;  %v3064_v54 = vadd.f32 %v13198_v45, %v2914_v38  ;;  %v13379_v45 = vld [vmem:[#allocation2 + $0x81] sm:$0xff] }
 0x292   : > { %10500 = vmatmul.msk.f32.gmra.mxu3 %vm523_vm2, %v13332_v15  ;;  %10532 = vmatmul.msk.f32.gmra.mxu1 %vm523_vm2, %v13178_v49  ;;  %v13350_v49 = vld [vmem:[#allocation2 + $0x1a] sm:$0xff]  ;;  %v10548_v38 = vld [vmem:[%s16882_s4 + $0x88] sm:$0xff] }
 0x293   : > { %v3376_v22 = vmax.f32 %v3360_v26, 0.0  ;;  %v2766_v26 = vadd.f32 %v13040_v37, %v2617_v55  ;;  %v2618_v37 = vadd.f32 %v13064_v58, %v12913_v48  ;;  %4095 = vmatpush.msra.mxu2 %v10548_v38 }
 0x294   : > { %v13341_v2 = vpop.f32.mrf.mxu2 }
 0x295   : > { %3393 = vst.msk [vmem:[#allocation2 + $0xe1] sm:$0xff] %vm523_vm2, %v3376_v22  ;;  %v13345_v27 = vpop.f32.mrf.mxu3  ;;  %v2915_v32 = vadd.f32 %v13216_v50, %v2766_v26  ;;  %v2767_v48 = vadd.f32 %v13068_v33, %v2618_v37  ;;  %v2619_v33 = vadd.f32 %v13080_v46, %v12936_v8  ;;  %v10588_v8 = vld [vmem:[%s16882_s4 + $0xc8] sm:$0xff] }
 0x296   : > { %v3168_v16 = vpop.f32.mrf.mxu0  ;;  %v10608_v46 = vld [vmem:[%s16882_s4 + $0xe8] sm:$0xff]  ;;  %4396 = vmatpush.msra.mxu0 %v10588_v8 }
 0x297   : > { %v3212_v31 = vadd.f32 %v3168_v16, %v3063_v20  ;;  %v3317_v60 = vpop.f32.mrf.mxu1  ;;  %v13372_v20 = vld [vmem:[#allocation2 + $0x80] sm:$0xff]  ;;  %4546 = vmatpush.msra.mxu1 %v10608_v46  ;;  %v2768_v38 = vadd.f32 %v13087_v9, %v2619_v33  ;;  %v2620_v9 = vadd.f32 %v13099_v51, %v12962_v1  ;;  %v13462_v46 = vld [vmem:[#allocation2 + $0xa8] sm:$0xff] }
 0x298   : > { %v13374_v16 = vld [vmem:[#allocation2 + $0x22] sm:$0xff] }
 0x299   : > { %v3361_v52 = vadd.f32 %v3317_v60, %v3212_v31  ;;  %10481 = vmatmul.msk.f32.gmra.mxu2 %vm523_vm2, %v13348_v43  ;;  %10513 = vmatmul.msk.f32.gmra.mxu0 %vm523_vm2, %v13350_v49  ;;  %v3065_v31 = vadd.f32 %v13218_v30, %v2915_v32  ;;  %v13402_v30 = vld [vmem:[#allocation2 + $0x90] sm:$0xff]  ;;  %v10547_v32 = vld [vmem:[%s16882_s4 + $0x80] sm:$0xff] }
 0x29a   : > { %10501 = vmatmul.msk.f32.gmra.mxu3 %vm523_vm2, %v13355_v0  ;;  %10533 = vmatmul.msk.f32.gmra.mxu1 %vm523_vm2, %v13204_v6 }
 0x29b   : > { %v3377_v34 = vmax.f32 %v3361_v52, 0.0  ;;  %v10568_v52 = vld [vmem:[%s16882_s4 + $0xa8] sm:$0xff]  ;;  %4096 = vmatpush.msra.mxu2 %v10547_v32 }
 0x29c   : > { %v13365_v5 = vpop.f32.mrf.mxu2  ;;  %4245 = vmatpush.msra.mxu3 %v10568_v52 }
 0x29d   : > { %3394 = vst.msk [vmem:[#allocation2 + $0xf1] sm:$0xff] %vm523_vm2, %v3377_v34  ;;  %v13369_v57 = vpop.f32.mrf.mxu3 }
 0x29e   : > { %v3171_v13 = vpop.f32.mrf.mxu0 }
 0x29f   : > { %v3213_v21 = vadd.f32 %v3171_v13, %v3064_v54  ;;  %v3320_v22 = vpop.f32.mrf.mxu1  ;;  %v13404_v54 = vld [vmem:[#allocation2 + $0x32] sm:$0xff]  ;;  %v2916_v13 = vadd.f32 %v13242_v10, %v2767_v48  ;;  %v13440_v48 = vld [vmem:[#allocation2 + $0x3a] sm:$0xff] }
 0x2a1   : > { %v3362_v18 = vadd.f32 %v3320_v22, %v3213_v21  ;;  %10482 = vmatmul.msk.f32.gmra.mxu2 %vm523_vm2, %v13372_v20  ;;  %10514 = vmatmul.msk.f32.gmra.mxu0 %vm523_vm2, %v13374_v16  ;;  %v13409_v21 = vld [vmem:[#allocation2 + $0x91] sm:$0xff]  ;;  %v3066_v37 = vadd.f32 %v13244_v40, %v2916_v13  ;;  %v13445_v13 = vld [vmem:[#allocation2 + $0x99] sm:$0xff] }
 0x2a2   : > { %10502 = vmatmul.msk.f32.gmra.mxu3 %vm523_vm2, %v13379_v45  ;;  %10534 = vmatmul.msk.f32.gmra.mxu1 %vm523_vm2, %v13230_v29 }
 0x2a3   : > { %v3378_v11 = vmax.f32 %v3362_v18, 0.0  ;;  %v10567_v18 = vld [vmem:[%s16882_s4 + $0xa0] sm:$0xff] }
 0x2a4   : > { %v13389_v50 = vpop.f32.mrf.mxu2  ;;  %4246 = vmatpush.msra.mxu3 %v10567_v18  ;;  %v2769_v18 = vadd.f32 %v13106_v35, %v2620_v9  ;;  %v2621_v35 = vadd.f32 %v13118_v36, %v12984_v42 }
 0x2a5   : > { %3395 = vst.msk [vmem:[#allocation2 + $0xf9] sm:$0xff] %vm523_vm2, %v3378_v11  ;;  %v13393_v60 = vpop.f32.mrf.mxu3 }
 0x2a6   : > { %v3174_v55 = vpop.f32.mrf.mxu0  ;;  %v2918_v1 = vadd.f32 %v13288_v56, %v2769_v18 }
 0x2a7   : > { %v3214_v58 = vadd.f32 %v3174_v55, %v3065_v31  ;;  %v3323_v34 = vpop.f32.mrf.mxu1  ;;  %v13438_v55 = vld [vmem:[#allocation2 + $0x98] sm:$0xff] }
 0x2a9   : > { %v3363_v26 = vadd.f32 %v3323_v34, %v3214_v58  ;;  %10483 = vmatmul.msk.f32.gmra.mxu2 %vm523_vm2, %v13402_v30  ;;  %10515 = vmatmul.msk.f32.gmra.mxu0 %vm523_vm2, %v13404_v54  ;;  %v2917_v58 = vadd.f32 %v13264_v4, %v2768_v38 }
 0x2aa   : > { %10503 = vmatmul.msk.f32.gmra.mxu3 %vm523_vm2, %v13409_v21  ;;  %10535 = vmatmul.msk.f32.gmra.mxu1 %vm523_vm2, %v13252_v25 }
 0x2ab   : > { %v3379_v22 = vmax.f32 %v3363_v26, 0.0  ;;  %v3067_v33 = vadd.f32 %v13266_v17, %v2917_v58  ;;  %v13469_v17 = vld [vmem:[#allocation2 + $0xa9] sm:$0xff] }
 0x2ac   : > { %v13419_v10 = vpop.f32.mrf.mxu2 }
 0x2ad   : > { %3396 = vst.msk [vmem:[#allocation2 + $0x109] sm:$0xff] %vm523_vm2, %v3379_v22  ;;  %v13429_v11 = vpop.f32.mrf.mxu3 }
 0x2ae   : > { %v3177_v31 = vpop.f32.mrf.mxu0 }
 0x2af   : > { %v3215_v40 = vadd.f32 %v3177_v31, %v3066_v37  ;;  %v3326_v52 = vpop.f32.mrf.mxu1  ;;  %v13464_v31 = vld [vmem:[#allocation2 + $0x4a] sm:$0xff] }
 0x2b1   : > { %v3364_v34 = vadd.f32 %v3326_v52, %v3215_v40  ;;  %10484 = vmatmul.msk.f32.gmra.mxu2 %vm523_vm2, %v13438_v55  ;;  %10516 = vmatmul.msk.f32.gmra.mxu0 %vm523_vm2, %v13440_v48  ;;  %v3068_v40 = vadd.f32 %v13291_v41, %v2918_v1  ;;  %v13493_v41 = vld [vmem:[#allocation2 + $0xb1] sm:$0xff] }
 0x2b2   : > { %10504 = vmatmul.msk.f32.gmra.mxu3 %vm523_vm2, %v13445_v13  ;;  %10536 = vmatmul.msk.f32.gmra.mxu1 %vm523_vm2, %v13275_v3 }
 0x2b3   : > { %v3380_v26 = vmax.f32 %v3364_v34, 0.0  ;;  %v2770_v34 = vadd.f32 %v13122_v59, %v2621_v35  ;;  %v2622_v59 = vadd.f32 %v13140_v23, %v13000_v44  ;;  %v2623_v44 = vadd.f32 %v13154_v63, %v13016_v12  ;;  %v10607_v12 = vld [vmem:[%s16882_s4 + $0xe0] sm:$0xff] }
 0x2b4   : > { %v13455_v4 = vpop.f32.mrf.mxu2  ;;  %4547 = vmatpush.msra.mxu1 %v10607_v12 }
 0x2b5   : > { %3397 = vst.msk [vmem:[#allocation2 + $0x111] sm:$0xff] %vm523_vm2, %v3380_v26  ;;  %v13459_v22 = vpop.f32.mrf.mxu3  ;;  %v2919_v42 = vadd.f32 %v13314_v61, %v2770_v34 }
 0x2b6   : > { %v3180_v32 = vpop.f32.mrf.mxu0 }
 0x2b7   : > { %v3216_v37 = vadd.f32 %v3180_v32, %v3067_v33  ;;  %v3329_v8 = vpop.f32.mrf.mxu1  ;;  %v13486_v33 = vld [vmem:[#allocation2 + $0xb0] sm:$0xff] }
 0x2b8   : > { %v13488_v32 = vld [vmem:[#allocation2 + $0x52] sm:$0xff] }
 0x2b9   : > { %v3365_v51 = vadd.f32 %v3329_v8, %v3216_v37  ;;  %10485 = vmatmul.msk.f32.gmra.mxu2 %vm523_vm2, %v13462_v46  ;;  %10517 = vmatmul.msk.f32.gmra.mxu0 %vm523_vm2, %v13464_v31  ;;  %v3069_v37 = vadd.f32 %v13318_v19, %v2919_v42 }
 0x2ba   : > { %10505 = vmatmul.msk.f32.gmra.mxu3 %vm523_vm2, %v13469_v17  ;;  %10537 = vmatmul.msk.f32.gmra.mxu1 %vm523_vm2, %v13300_v7 }
 0x2bb   : > { %v3381_v38 = vmax.f32 %v3365_v51, 0.0  ;;  %v2771_v51 = vadd.f32 %v13142_v28, %v2622_v59  ;;  %v13526_v28 = vld [vmem:[%s16883_s5] ss:$0 sm:$0xff]  ;;  %v13540_v59 = vld [vmem:[#allocation2 + $0x6a] sm:$0xff] }
 0x2bc   : > { %v13479_v56 = vpop.f32.mrf.mxu2 }
 0x2bd   : > { %3398 = vst.msk [vmem:[#allocation2 + $0x121] sm:$0xff] %vm523_vm2, %v3381_v38  ;;  %v13483_v52 = vpop.f32.mrf.mxu3 }
 0x2be   : > { %v3183_v58 = vpop.f32.mrf.mxu0 }
 0x2bf   : > { %v3217_v9 = vadd.f32 %v3183_v58, %v3068_v40  ;;  %v3332_v26 = vpop.f32.mrf.mxu1  ;;  %v13510_v40 = vld [vmem:[#allocation2 + $0x62] sm:$0xff]  ;;  %v2920_v58 = vadd.f32 %v13341_v2, %v2771_v51 }
 0x2c1   : > { %v3366_v36 = vadd.f32 %v3332_v26, %v3217_v9  ;;  %10486 = vmatmul.msk.f32.gmra.mxu2 %vm523_vm2, %v13486_v33  ;;  %10518 = vmatmul.msk.f32.gmra.mxu0 %vm523_vm2, %v13488_v32  ;;  %v3070_v2 = vadd.f32 %v13345_v27, %v2920_v58  ;;  %v2772_v26 = vadd.f32 %v13156_v62, %v2623_v44  ;;  %v17055_v62 = vld [vmem:[#allocation28_spill] sm:$0xff] }
 0x2c2   : > { %10506 = vmatmul.msk.f32.gmra.mxu3 %vm523_vm2, %v13493_v41  ;;  %10538 = vmatmul.msk.f32.gmra.mxu1 %vm523_vm2, %v13327_v24 }
 0x2c3   : > { %v3382_v18 = vmax.f32 %v3366_v36, 0.0 }
 0x2c4   : > { %v13503_v61 = vpop.f32.mrf.mxu2 }
 0x2c5   : > { %3399 = vst.msk [vmem:[#allocation2 + $0x129] sm:$0xff] %vm523_vm2, %v3382_v18  ;;  %v13507_v8 = vpop.f32.mrf.mxu3  ;;  %v2921_v18 = vadd.f32 %v13365_v5, %v2772_v26 }
 0x2c6   : > { %v3186_v1 = vpop.f32.mrf.mxu0 }
 0x2c7   : > { %v3218_v35 = vadd.f32 %v3186_v1, %v3069_v37  ;;  %v3335_v38 = vpop.f32.mrf.mxu1  ;;  %v2624_v1 = vadd.f32 %v17055_v62, %v13038_v14  ;;  %v3071_v5 = vadd.f32 %v13369_v57, %v2921_v18  ;;  %v17057_v57 = vld [vmem:[#allocation31_spill] sm:$0xff] }
 0x2c9   : > { %v3367_v34 = vadd.f32 %v3335_v38, %v3218_v35  ;;  %10519 = vmatmul.msk.f32.gmra.mxu0 %vm523_vm2, %v13510_v40  ;;  %10551 = vmatmul.msk.f32.vlgmr.msra.gmra.mxu2 %vm523_vm2, %v13164_v39 }
 0x2ca   : > { %10539 = vmatmul.msk.f32.gmra.mxu1 %vm523_vm2, %v13348_v43  ;;  %10571 = vmatmul.msk.f32.vlgmr.msra.gmra.mxu3 %vm523_vm2, %v13350_v49  ;;  %v10587_v49 = vld [vmem:[%s16882_s4 + $0xc0] sm:$0xff] }
 0x2cb   : > { %v3383_v23 = vmax.f32 %v3367_v34, 0.0  ;;  %4397 = vmatpush.msra.mxu0 %v10587_v49  ;;  %v17059_v49 = vld [vmem:[#allocation34_spill] sm:$0xff] }
 0x2cc   : > { %v3498_v19 = vpop.f32.mrf.mxu2 }
 0x2cd   : > { %3400 = vst.msk [vmem:[#allocation2 + $0x139] sm:$0xff] %vm523_vm2, %v3383_v23  ;;  %v3546_v39 = vadd.f32 %v13526_v28, %v3498_v19  ;;  %v3648_v9 = vpop.f32.mrf.mxu3 }
 0x2ce   : > { %v3189_v63 = vpop.f32.mrf.mxu0 }
 0x2cf   : > { %v13538_v42 = vadd.f32 %v3648_v9, %v3546_v39  ;;  %v3219_v27 = vadd.f32 %v3189_v63, %v3070_v2  ;;  %v3338_v36 = vpop.f32.mrf.mxu1  ;;  %v17058_v9 = vld [vmem:[#allocation29_spill] sm:$0xff] }
 0x2d0   : > { %v2625_v12 = vadd.f32 %v17059_v49, %v17058_v9  ;;  %v10630_v9 = vld [vmem:[%s16882_s4 + $0x118] sm:$0xff] }
 0x2d1   : > { %v3368_v37 = vadd.f32 %v3338_v36, %v3219_v27  ;;  %10520 = vmatmul.msk.f32.gmra.mxu0 %vm523_vm2, %v13540_v59  ;;  %10552 = vmatmul.msk.f32.gmra.mxu2 %vm523_vm2, %v13184_v47  ;;  %v17056_v47 = vld [vmem:[#allocation33_spill] sm:$0xff]  ;;  %v4821_v49 = vld [vmem:[%s16882_s4 + $0x18] sm:$0xff] }
 0x2d2   : > { %10540 = vmatmul.msk.f32.gmra.mxu1 %vm523_vm2, %v13372_v20  ;;  %10572 = vmatmul.msk.f32.gmra.mxu3 %vm523_vm2, %v13374_v16  ;;  %v2773_v44 = vadd.f32 %v17056_v47, %v2624_v1  ;;  %v13559_v16 = vld [vmem:[#allocation2 + $0x7a] sm:$0xff] }
 0x2d3   : > { %v3384_v51 = vmax.f32 %v3368_v37, 0.0  ;;  %v17060_v37 = vld [vmem:[#allocation22_spill] sm:$0xff]  ;;  %v17063_v47 = vld [vmem:[#allocation32_spill] sm:$0xff]  ;;  %4694 = vmatpush.msrb.mxu2 %v10630_v9  ;;  %4882 = vmatpush.msrb.mxu3 %v4821_v49 }
 0x2d4   : > { %v3501_v35 = vpop.f32.mrf.mxu2  ;;  %v2922_v14 = vadd.f32 %v13389_v50, %v2773_v44  ;;  %v2774_v62 = vadd.f32 %v17060_v37, %v2625_v12 }
 0x2d5   : > { %3401 = vst.msk [vmem:[#allocation2 + $0x141] sm:$0xff] %vm523_vm2, %v3384_v51  ;;  %v3547_v38 = vadd.f32 %v13526_v28, %v3501_v35  ;;  %v3651_v58 = vpop.f32.mrf.mxu3 }
 0x2d6   : > { %v3192_v34 = vpop.f32.mrf.mxu0  ;;  %v3072_v50 = vadd.f32 %v13393_v60, %v2922_v14  ;;  %v17061_v60 = vld [vmem:[#allocation38_spill] sm:$0xff] }
 0x2d7   : > { %v13557_v23 = vadd.f32 %v3651_v58, %v3547_v38  ;;  %v3220_v19 = vadd.f32 %v3192_v34, %v3071_v5  ;;  %v3341_v2 = vpop.f32.mrf.mxu1  ;;  %v13578_v5 = vld [vmem:[#allocation2 + $0x82] sm:$0xff]  ;;  %v2923_v38 = vadd.f32 %v13419_v10, %v2774_v62  ;;  %v17065_v62 = vld [vmem:[#allocation36_spill] sm:$0xff] }
 0x2d8   : > { %v17062_v34 = vld [vmem:[#allocation30_spill] sm:$0xff] }
 0x2d9   : > { %v3369_v39 = vadd.f32 %v3341_v2, %v3220_v19  ;;  %10521 = vmatmul.msk.f32.gmra.mxu0 %vm523_vm2, %v13559_v16  ;;  %10553 = vmatmul.msk.f32.gmra.mxu2 %vm523_vm2, %v17057_v57  ;;  %v2626_v44 = vadd.f32 %v17063_v47, %v17062_v34  ;;  %v3073_v10 = vadd.f32 %v13429_v11, %v2923_v38  ;;  %v17067_v38 = vld [vmem:[#allocation23_spill] sm:$0xff] }
 0x2da   : > { %10541 = vmatmul.msk.f32.gmra.mxu1 %vm523_vm2, %v13402_v30  ;;  %10573 = vmatmul.msk.f32.gmra.mxu3 %vm523_vm2, %v13404_v54 }
 0x2db   : > { %v3385_v63 = vmax.f32 %v3369_v39, 0.0 }
 0x2dc   : > { %v3504_v26 = vpop.f32.mrf.mxu2 }
 0x2dd   : > { %3402 = vst.msk [vmem:[#allocation2 + $0x151] sm:$0xff] %vm523_vm2, %v3385_v63  ;;  %v3548_v27 = vadd.f32 %v13526_v28, %v3504_v26  ;;  %v3654_v36 = vpop.f32.mrf.mxu3  ;;  %v17064_v63 = vld [vmem:[#allocation37_spill] sm:$0xff] }
 0x2de   : > { %v3195_v18 = vpop.f32.mrf.mxu0  ;;  %v2775_v26 = vadd.f32 %v17064_v63, %v2626_v44  ;;  %v13628_v63 = vld [vmem:[#allocation2 + $0x9a] sm:$0xff] }
 0x2df   : > { %v13576_v1 = vadd.f32 %v3654_v36, %v3548_v27  ;;  %v3221_v51 = vadd.f32 %v3195_v18, %v3072_v50  ;;  %v3344_v35 = vpop.f32.mrf.mxu1  ;;  %v13603_v36 = vld [vmem:[#allocation2 + $0x92] sm:$0xff] }
 0x2e0   : > { %v2924_v18 = vadd.f32 %v13455_v4, %v2775_v26  ;;  %v10686_v4 = vld [vmem:[%s16882_s4 + $0x58] sm:$0xff] }
 0x2e1   : > { %v3370_v58 = vadd.f32 %v3344_v35, %v3221_v51  ;;  %10522 = vmatmul.msk.f32.gmra.mxu0 %vm523_vm2, %v13578_v5  ;;  %10554 = vmatmul.msk.f32.gmra.mxu2 %vm523_vm2, %v17061_v60  ;;  %v10666_v51 = vld [vmem:[%s16882_s4 + $0x38] sm:$0xff]  ;;  %v17066_v35 = vld [vmem:[#allocation21_spill] sm:$0xff] }
 0x2e2   : > { %10542 = vmatmul.msk.f32.gmra.mxu1 %vm523_vm2, %v13438_v55  ;;  %10574 = vmatmul.msk.f32.gmra.mxu3 %vm523_vm2, %v13440_v48  ;;  %v3074_v44 = vadd.f32 %v13459_v22, %v2924_v18  ;;  %v17069_v22 = vld [vmem:[#allocation24_spill] sm:$0xff]  ;;  %v17071_v18 = vld [vmem:[#allocation41_spill] sm:$0xff] }
 0x2e3   : > { %v3386_v19 = vmax.f32 %v3370_v58, 0.0  ;;  %v2627_v58 = vadd.f32 %v17067_v38, %v17066_v35  ;;  %5031 = vmatpush.msrb.mxu0 %v10666_v51  ;;  %5180 = vmatpush.msrb.mxu1 %v10686_v4 }
 0x2e4   : > { %v3507_v2 = vpop.f32.mrf.mxu2 }
 0x2e5   : > { %3403 = vst.msk [vmem:[#allocation2 + $0x159] sm:$0xff] %vm523_vm2, %v3386_v19  ;;  %v3549_v14 = vadd.f32 %v13526_v28, %v3507_v2  ;;  %v3657_v39 = vpop.f32.mrf.mxu3 }
 0x2e6   : > { %v3198_v12 = vpop.f32.mrf.mxu0 }
 0x2e7   : > { %v13601_v50 = vadd.f32 %v3657_v39, %v3549_v14  ;;  %v3222_v11 = vadd.f32 %v3198_v12, %v3073_v10  ;;  %v3347_v27 = vpop.f32.mrf.mxu1  ;;  %v17068_v14 = vld [vmem:[#allocation35_spill] sm:$0xff] }
 0x2e8   : > { %v2776_v39 = vadd.f32 %v17068_v14, %v2627_v58 }
 0x2e9   : > { %v3371_v37 = vadd.f32 %v3347_v27, %v3222_v11  ;;  %10523 = vmatmul.msk.f32.gmra.mxu0 %vm523_vm2, %v13603_v36  ;;  %10555 = vmatmul.msk.f32.gmra.mxu2 %vm523_vm2, %v17065_v62  ;;  %v17070_v27 = vld [vmem:[#allocation27_spill] sm:$0xff] }
 0x2ea   : > { %10543 = vmatmul.msk.f32.gmra.mxu1 %vm523_vm2, %v13462_v46  ;;  %10575 = vmatmul.msk.f32.gmra.mxu3 %vm523_vm2, %v13464_v31  ;;  %v2925_v26 = vadd.f32 %v13479_v56, %v2776_v39 }
 0x2eb   : > { %v3387_v34 = vmax.f32 %v3371_v37, 0.0  ;;  %v2628_v37 = vadd.f32 %v17071_v18, %v17070_v27 }
 0x2ec   : > { %v3510_v47 = vpop.f32.mrf.mxu2  ;;  %v3075_v56 = vadd.f32 %v13483_v52, %v2925_v26  ;;  %v13652_v52 = vld [vmem:[#allocation2 + $0xc0] sm:$0xff] }
 0x2ed   : > { %3404 = vst.msk [vmem:[#allocation2 + $0x169] sm:$0xff] %vm523_vm2, %v3387_v34  ;;  %v3550_v19 = vadd.f32 %v13526_v28, %v3510_v47  ;;  %v3660_v2 = vpop.f32.mrf.mxu3  ;;  %v17072_v34 = vld [vmem:[#allocation42_spill] sm:$0xff] }
 0x2ee   : > { %v3201_v10 = vpop.f32.mrf.mxu0  ;;  %v2777_v47 = vadd.f32 %v17072_v34, %v2628_v37 }
 0x2ef   : > { %v13626_v9 = vadd.f32 %v3660_v2, %v3550_v19  ;;  %v3223_v49 = vadd.f32 %v3201_v10, %v3074_v44  ;;  %v3350_v12 = vpop.f32.mrf.mxu1  ;;  %v13647_v10 = vld [vmem:[#allocation2 + $0xaa] sm:$0xff] }
 0x2f0   : > { %v2926_v14 = vadd.f32 %v13503_v61, %v2777_v47 }
 0x2f1   : > { %v3372_v11 = vadd.f32 %v3350_v12, %v3223_v49  ;;  %10524 = vmatmul.msk.f32.gmra.mxu0 %vm523_vm2, %v13628_v63  ;;  %10556 = vmatmul.msk.f32.gmra.mxu2 %vm523_vm2, %v17069_v22 }
 0x2f2   : > { %10544 = vmatmul.msk.f32.gmra.mxu1 %vm523_vm2, %v13486_v33  ;;  %10576 = vmatmul.msk.f32.gmra.mxu3 %vm523_vm2, %v13488_v32  ;;  %v3076_v26 = vadd.f32 %v13507_v8, %v2926_v14  ;;  %v10629_v8 = vld [vmem:[%s16882_s4 + $0x110] sm:$0xff] }
 0x2f3   : > { %v3388_v51 = vmax.f32 %v3372_v11, 0.0  ;;  %4695 = vmatpush.msrb.mxu2 %v10629_v8 }
 0x2f4   : > { %v3513_v4 = vpop.f32.mrf.mxu2 }
 0x2f5   : > { %3405 = vst.msk [vmem:[#allocation2 + $0x171] sm:$0xff] %vm523_vm2, %v3388_v51  ;;  %v3551_v35 = vadd.f32 %v13526_v28, %v3513_v4  ;;  %v3663_v38 = vpop.f32.mrf.mxu3  ;;  %v13665_v4 = vld [vmem:[#allocation2 + $0xb2] sm:$0xff] }
 0x2f6   : > { %v3204_v58 = vpop.f32.mrf.mxu0 }
 0x2f7   : > { %v13645_v44 = vadd.f32 %v3663_v38, %v3551_v35  ;;  %v3224_v19 = vadd.f32 %v3204_v58, %v3075_v56  ;;  %v3353_v2 = vpop.f32.mrf.mxu1  ;;  %v13669_v35 = vld [vmem:[#allocation2 + $0xc8] sm:$0xff]  ;;  %v4820_v38 = vld [vmem:[%s16882_s4 + $0x10] sm:$0xff] }
 0x2f8   : > { %4883 = vmatpush.msrb.mxu3 %v4820_v38 }
 0x2f9   : > { %v3373_v39 = vadd.f32 %v3353_v2, %v3224_v19  ;;  %10525 = vmatmul.msk.f32.gmra.mxu0 %vm523_vm2, %v13647_v10  ;;  %10557 = vmatmul.msk.f32.gmra.mxu2 %vm523_vm2, %v13305_v53 }
 0x2fa   : > { %10545 = vmatmul.msk.f32.gmra.mxu1 %vm523_vm2, %v13652_v52  ;;  %10577 = vmatmul.msk.f32.gmra.mxu3 %vm523_vm2, %v13510_v40 }
 0x2fb   : > { %v3389_v49 = vmax.f32 %v3373_v39, 0.0 }
 0x2fc   : > { %v3516_v12 = vpop.f32.mrf.mxu2 }
 0x2fd   : > { %3406 = vst.msk [vmem:[#allocation2 + $0x181] sm:$0xff] %vm523_vm2, %v3389_v49  ;;  %v3552_v61 = vadd.f32 %v13526_v28, %v3516_v12  ;;  %v3666_v11 = vpop.f32.mrf.mxu3  ;;  %v10665_v49 = vld [vmem:[%s16882_s4 + $0x30] sm:$0xff] }
 0x2fe   : > { %v3207_v27 = vpop.f32.mrf.mxu0  ;;  %v10685_v12 = vld [vmem:[%s16882_s4 + $0x50] sm:$0xff]  ;;  %5032 = vmatpush.msrb.mxu0 %v10665_v49 }
 0x2ff   : > { %v13663_v18 = vadd.f32 %v3666_v11, %v3552_v61  ;;  %v3225_v37 = vadd.f32 %v3207_v27, %v3076_v26  ;;  %v3356_v51 = vpop.f32.mrf.mxu1  ;;  %5181 = vmatpush.msrb.mxu1 %v10685_v12 }
 0x301   : > { %v3374_v56 = vadd.f32 %v3356_v51, %v3225_v37  ;;  %10526 = vmatmul.msk.f32.gmra.mxu0 %vm523_vm2, %v13665_v4  ;;  %10558 = vmatmul.msk.f32.gmra.mxu2 %vm523_vm2, %v13332_v15 }
 0x302   : > { %10546 = vmatmul.msk.f32.gmra.mxu1 %vm523_vm2, %v13669_v35  ;;  %10578 = vmatmul.msk.f32.gmra.mxu3 %vm523_vm2, %v13540_v59 }
 0x303   : > { %v3390_v58 = vmax.f32 %v3374_v56, 0.0 }
 0x304   : > { %v3519_v34 = vpop.f32.mrf.mxu2 }
 0x305   : > { %3407 = vst.msk [vmem:[#allocation2 + $0x189] sm:$0xff] %vm523_vm2, %v3390_v58  ;;  %v3553_v47 = vadd.f32 %v13526_v28, %v3519_v34  ;;  %v3669_v19 = vpop.f32.mrf.mxu3 }
 0x306   : > { %v13685_v2 = vpop.f32.mrf.mxu0 }
 0x307   : > { %v13687_v14 = vadd.f32 %v3669_v19, %v3553_v47  ;;  %v13689_v39 = vpop.f32.mrf.mxu1 }
 0x309   : > { %10559 = vmatmul.msk.f32.gmra.mxu2 %vm523_vm2, %v13355_v0  ;;  %10591 = vmatmul.msk.f32.vlgmr.msra.gmra.mxu0 %vm523_vm2, %v13204_v6 }
 0x30a   : > { %10579 = vmatmul.msk.f32.gmra.mxu3 %vm523_vm2, %v13559_v16  ;;  %10611 = vmatmul.msk.f32.vlgmr.msra.gmra.mxu1 %vm523_vm2, %v17057_v57 }
 0x30c   : > { %v3522_v26 = vpop.f32.mrf.mxu2 }
 0x30d   : > { %v3554_v61 = vadd.f32 %v13526_v28, %v3522_v26  ;;  %v3672_v6 = vpop.f32.mrf.mxu3 }
 0x30e   : > { %v13706_v11 = vpop.f32.mrf.mxu0 }
 0x30f   : > { %v13708_v27 = vadd.f32 %v3672_v6, %v3554_v61  ;;  %v13710_v37 = vpop.f32.mrf.mxu1 }
 0x311   : > { %10560 = vmatmul.msk.f32.gmra.mxu2 %vm523_vm2, %v13379_v45  ;;  %10592 = vmatmul.msk.f32.gmra.mxu0 %vm523_vm2, %v13230_v29 }
 0x312   : > { %10580 = vmatmul.msk.f32.gmra.mxu3 %vm523_vm2, %v13578_v5  ;;  %10612 = vmatmul.msk.f32.gmra.mxu1 %vm523_vm2, %v17061_v60 }
 0x314   : > { %v3525_v57 = vpop.f32.mrf.mxu2 }
 0x315   : > { %v3555_v51 = vadd.f32 %v13526_v28, %v3525_v57  ;;  %v3675_v56 = vpop.f32.mrf.mxu3 }
 0x316   : > { %v13721_v8 = vpop.f32.mrf.mxu0 }
 0x317   : > { %v13723_v38 = vadd.f32 %v3675_v56, %v3555_v51  ;;  %v13725_v58 = vpop.f32.mrf.mxu1  ;;  %v4818_v51 = vld [vmem:[%s16882_s4] sm:$0xff]  ;;  %v10664_v56 = vld [vmem:[%s16882_s4 + $0x28] sm:$0xff] }
 0x318   : > { %5033 = vmatpush.msrb.mxu0 %v10664_v56 }
 0x319   : > { %10561 = vmatmul.msk.f32.gmra.mxu2 %vm523_vm2, %v13409_v21  ;;  %10593 = vmatmul.msk.f32.gmra.mxu0 %vm523_vm2, %v13252_v25  ;;  %v10628_v25 = vld [vmem:[%s16882_s4 + $0x108] sm:$0xff] }
 0x31a   : > { %10581 = vmatmul.msk.f32.gmra.mxu3 %vm523_vm2, %v13603_v36  ;;  %10613 = vmatmul.msk.f32.gmra.mxu1 %vm523_vm2, %v17065_v62  ;;  %v4819_v62 = vld [vmem:[%s16882_s4 + $0x8] sm:$0xff] }
 0x31b   : > { %4696 = vmatpush.msrb.mxu2 %v10628_v25  ;;  %4884 = vmatpush.msrb.mxu3 %v4819_v62 }
 0x31c   : > { %v3528_v29 = vpop.f32.mrf.mxu2 }
 0x31d   : > { %v3556_v60 = vadd.f32 %v13526_v28, %v3528_v29  ;;  %v3678_v34 = vpop.f32.mrf.mxu3  ;;  %4885 = vmatpush.msrb.mxu3 %v4818_v51 }
 0x31e   : > { %v13736_v47 = vpop.f32.mrf.mxu0 }
 0x31f   : > { %v13738_v19 = vadd.f32 %v3678_v34, %v3556_v60  ;;  %v13740_v49 = vpop.f32.mrf.mxu1 }
 0x321   : > { %10562 = vmatmul.msk.f32.gmra.mxu2 %vm523_vm2, %v13445_v13  ;;  %10594 = vmatmul.msk.f32.gmra.mxu0 %vm523_vm2, %v13275_v3 }
 0x322   : > { %10582 = vmatmul.msk.f32.gmra.mxu3 %vm523_vm2, %v13628_v63  ;;  %10614 = vmatmul.msk.f32.gmra.mxu1 %vm523_vm2, %v17069_v22  ;;  %v10627_v22 = vld [vmem:[%s16882_s4 + $0x100] sm:$0xff] }
 0x323   : > { %4697 = vmatpush.msrb.mxu2 %v10627_v22 }
 0x324   : > { %v3531_v12 = vpop.f32.mrf.mxu2 }
 0x325   : > { %v3557_v26 = vadd.f32 %v13526_v28, %v3531_v12  ;;  %v3681_v3 = vpop.f32.mrf.mxu3 }
 0x326   : > { %v13757_v61 = vpop.f32.mrf.mxu0 }
 0x327   : > { %v13759_v6 = vadd.f32 %v3681_v3, %v3557_v26  ;;  %v13761_v57 = vpop.f32.mrf.mxu1 }
 0x329   : > { %10563 = vmatmul.msk.f32.gmra.mxu2 %vm523_vm2, %v13469_v17  ;;  %10595 = vmatmul.msk.f32.gmra.mxu0 %vm523_vm2, %v13300_v7  ;;  %v10684_v7 = vld [vmem:[%s16882_s4 + $0x48] sm:$0xff] }
 0x32a   : > { %10583 = vmatmul.msk.f32.gmra.mxu3 %vm523_vm2, %v13647_v10  ;;  %10615 = vmatmul.msk.f32.gmra.mxu1 %vm523_vm2, %v13305_v53 }
 0x32b   : > { %5182 = vmatpush.msrb.mxu1 %v10684_v7  ;;  %v13805_v7 = vld [vmem:[#allocation2 + $0xc1] sm:$0xff] }
 0x32c   : > { %v3534_v29 = vpop.f32.mrf.mxu2 }
 0x32d   : > { %v3558_v60 = vadd.f32 %v13526_v28, %v3534_v29  ;;  %v3684_v34 = vpop.f32.mrf.mxu3 }
 0x32e   : > { %v13784_v25 = vpop.f32.mrf.mxu0 }
 0x32f   : > { %v13786_v62 = vadd.f32 %v3684_v34, %v3558_v60  ;;  %v13788_v53 = vpop.f32.mrf.mxu1 }
 0x331   : > { %17073 = vst [vmem:[#allocation39_spill] sm:$0xff] %v13786_v62  ;;  %10564 = vmatmul.msk.f32.gmra.mxu2 %vm523_vm2, %v13493_v41  ;;  %10596 = vmatmul.msk.f32.gmra.mxu0 %vm523_vm2, %v13327_v24  ;;  %v13809_v24 = vld [vmem:[#allocation2 + $0xc2] sm:$0xff] }
 0x332   : > { %10584 = vmatmul.msk.f32.gmra.mxu3 %vm523_vm2, %v13665_v4  ;;  %10616 = vmatmul.msk.f32.gmra.mxu1 %vm523_vm2, %v13332_v15 }
 0x334   : > { %v3537_v12 = vpop.f32.mrf.mxu2 }
 0x335   : > { %v3559_v26 = vadd.f32 %v13526_v28, %v3537_v12  ;;  %v3687_v3 = vpop.f32.mrf.mxu3 }
 0x336   : > { %v13799_v22 = vpop.f32.mrf.mxu0 }
 0x337   : > { %v13801_v51 = vadd.f32 %v3687_v3, %v3559_v26  ;;  %v13803_v56 = vpop.f32.mrf.mxu1  ;;  %v13824_v3 = vld [vmem:[#allocation2 + $0xc9] sm:$0xff] }
 0x339   : > { %17074 = vst [vmem:[#allocation40_spill] sm:$0xff] %v13801_v51  ;;  %10565 = vmatmul.msk.f32.gmra.mxu2 %vm523_vm2, %v13805_v7  ;;  %10597 = vmatmul.msk.f32.gmra.mxu0 %vm523_vm2, %v13348_v43  ;;  %v13828_v43 = vld [vmem:[#allocation2 + $0xca] sm:$0xff] }
 0x33a   : > { %10585 = vmatmul.msk.f32.gmra.mxu3 %vm523_vm2, %v13809_v24  ;;  %10617 = vmatmul.msk.f32.gmra.mxu1 %vm523_vm2, %v13355_v0 }
 0x33c   : > { %v3540_v15 = vpop.f32.mrf.mxu2 }
 0x33d   : > { %v3560_v29 = vadd.f32 %v13526_v28, %v3540_v15  ;;  %v3690_v60 = vpop.f32.mrf.mxu3 }
 0x33e   : > { %v13818_v34 = vpop.f32.mrf.mxu0 }
 0x33f   : > { %v13820_v12 = vadd.f32 %v3690_v60, %v3560_v29  ;;  %v13822_v26 = vpop.f32.mrf.mxu1 }
 0x341   : > { %17075 = vst [vmem:[#allocation45_spill] sm:$0xff] %v13820_v12  ;;  %10566 = vmatmul.msk.f32.gmra.mxu2 %vm523_vm2, %v13824_v3  ;;  %10598 = vmatmul.msk.f32.gmra.mxu0 %vm523_vm2, %v13372_v20  ;;  %v3846_v12 = vadd.f32 %v13685_v2, %v13538_v42  ;;  %v10663_v20 = vld [vmem:[%s16882_s4 + $0x20] sm:$0xff] }
 0x342   : > { %10586 = vmatmul.msk.f32.gmra.mxu3 %vm523_vm2, %v13828_v43  ;;  %10618 = vmatmul.msk.f32.gmra.mxu1 %vm523_vm2, %v13379_v45  ;;  %v10683_v45 = vld [vmem:[%s16882_s4 + $0x40] sm:$0xff] }
 0x343   : > { %5034 = vmatpush.msrb.mxu0 %v10663_v20  ;;  %5183 = vmatpush.msrb.mxu1 %v10683_v45  ;;  %v3848_v20 = vadd.f32 %v13721_v8, %v13576_v1 }
 0x344   : > { %v3543_v0 = vpop.f32.mrf.mxu2 }
 0x345   : > { %v3561_v15 = vadd.f32 %v13526_v28, %v3543_v0  ;;  %v3693_v29 = vpop.f32.mrf.mxu3  ;;  %v3996_v28 = vadd.f32 %v13689_v39, %v3846_v12 }
 0x346   : > { %v13837_v60 = vpop.f32.mrf.mxu0 }
 0x347   : > { %v13841_v51 = vadd.f32 %v3693_v29, %v3561_v15  ;;  %v13843_v62 = vpop.f32.mrf.mxu1 }
 0x349   : > { %10599 = vmatmul.msk.f32.gmra.mxu0 %vm523_vm2, %v13402_v30  ;;  %10631 = vmatmul.msk.f32.vlgmr.msrb.gmra.mxu2 %vm523_vm2, %v13404_v54 }
 0x34a   : > { %10619 = vmatmul.msk.f32.gmra.mxu1 %vm523_vm2, %v13409_v21  ;;  %10647 = vmatmul.msk.f32.vlgmr.msrb.gmra.mxu3 %vm523_vm2, %v13652_v52  ;;  %v3847_v21 = vadd.f32 %v13706_v11, %v13557_v23 }
 0x34c   : > { %v4098_v30 = vpop.f32.mrf.mxu2  ;;  %v3997_v39 = vadd.f32 %v13710_v37, %v3847_v21  ;;  %v3850_v21 = vadd.f32 %v13757_v61, %v13626_v9  ;;  %v10746_v9 = vld [vmem:[%s16882_s4 + $0xb8] sm:$0xff] }
 0x34d   : > { %v4146_v54 = vadd.f32 %v4098_v30, %v3996_v28  ;;  %v4248_v42 = vpop.f32.mrf.mxu3  ;;  %v10766_v61 = vld [vmem:[%s16882_s4 + $0xd8] sm:$0xff]  ;;  %5627 = vmatpush.msra.mxu0 %v10746_v9  ;;  %v13996_v9 = vld [vmem:[#allocation2 + $0xe1] sm:$0xff] }
 0x34e   : > { %v13860_v2 = vpop.f32.mrf.mxu0  ;;  %5777 = vmatpush.msra.mxu1 %v10766_v61  ;;  %v10705_v61 = vld [vmem:[%s16882_s4 + $0x70] sm:$0xff] }
 0x34f   : > { %v13864_v0 = vadd.f32 %v4248_v42, %v4146_v54  ;;  %v13866_v15 = vpop.f32.mrf.mxu1 }
 0x351   : > { %10600 = vmatmul.msk.f32.gmra.mxu0 %vm523_vm2, %v13438_v55  ;;  %10632 = vmatmul.msk.f32.gmra.mxu2 %vm523_vm2, %v13440_v48  ;;  %v13889_v48 = vld [vmem:[#allocation2 + $0xd8] sm:$0xff] }
 0x352   : > { %10620 = vmatmul.msk.f32.gmra.mxu1 %vm523_vm2, %v13445_v13  ;;  %10648 = vmatmul.msk.f32.gmra.mxu3 %vm523_vm2, %v13669_v35  ;;  %v3998_v13 = vadd.f32 %v13725_v58, %v3848_v20  ;;  %v10706_v58 = vld [vmem:[%s16882_s4 + $0x78] sm:$0xff]  ;;  %v3851_v20 = vadd.f32 %v13784_v25, %v13645_v44 }
 0x353   : > { %5329 = vmatpush.msra.mxu2 %v10706_v58 }
 0x354   : > { %v4101_v12 = vpop.f32.mrf.mxu2  ;;  %v4001_v44 = vadd.f32 %v13788_v53, %v3851_v20  ;;  %v13979_v53 = vld [vmem:[#allocation2 + $0x108] sm:$0xff] }
 0x355   : > { %v4147_v23 = vadd.f32 %v4101_v12, %v3997_v39  ;;  %v4251_v11 = vpop.f32.mrf.mxu3  ;;  %5330 = vmatpush.msra.mxu2 %v10705_v61 }
 0x356   : > { %v13877_v29 = vpop.f32.mrf.mxu0 }
 0x357   : > { %v13881_v55 = vadd.f32 %v4251_v11, %v4147_v23  ;;  %v13883_v45 = vpop.f32.mrf.mxu1 }
 0x359   : > { %10601 = vmatmul.msk.f32.gmra.mxu0 %vm523_vm2, %v13462_v46  ;;  %10633 = vmatmul.msk.f32.gmra.mxu2 %vm523_vm2, %v13464_v31  ;;  %v3849_v46 = vadd.f32 %v13736_v47, %v13601_v50  ;;  %v10726_v50 = vld [vmem:[%s16882_s4 + $0x98] sm:$0xff] }
 0x35a   : > { %10621 = vmatmul.msk.f32.gmra.mxu1 %vm523_vm2, %v13469_v17  ;;  %10649 = vmatmul.msk.f32.gmra.mxu3 %vm523_vm2, %v13889_v48  ;;  %v13908_v17 = vld [vmem:[#allocation2 + $0xe0] sm:$0xff] }
 0x35b   : > { %5478 = vmatpush.msra.mxu3 %v10726_v50  ;;  %v13975_v50 = vld [vmem:[#allocation2 + $0xd9] sm:$0xff] }
 0x35c   : > { %v4104_v1 = vpop.f32.mrf.mxu2 }
 0x35d   : > { %v4148_v37 = vadd.f32 %v4104_v1, %v3998_v13  ;;  %v4254_v8 = vpop.f32.mrf.mxu3 }
 0x35e   : > { %v13896_v28 = vpop.f32.mrf.mxu0 }
 0x35f   : > { %v13900_v30 = vadd.f32 %v4254_v8, %v4148_v37  ;;  %v13902_v31 = vpop.f32.mrf.mxu1 }
 0x361   : > { %10602 = vmatmul.msk.f32.gmra.mxu0 %vm523_vm2, %v13486_v33  ;;  %10634 = vmatmul.msk.f32.gmra.mxu2 %vm523_vm2, %v13488_v32  ;;  %v3999_v33 = vadd.f32 %v13740_v49, %v3849_v46  ;;  %v13933_v49 = vld [vmem:[#allocation2 + $0xf0] sm:$0xff] }
 0x362   : > { %10622 = vmatmul.msk.f32.gmra.mxu1 %vm523_vm2, %v13493_v41  ;;  %10650 = vmatmul.msk.f32.gmra.mxu3 %vm523_vm2, %v13908_v17 }
 0x364   : > { %v4107_v32 = vpop.f32.mrf.mxu2 }
 0x365   : > { %v4149_v47 = vadd.f32 %v4107_v32, %v3999_v33  ;;  %v4257_v54 = vpop.f32.mrf.mxu3 }
 0x366   : > { %v13921_v42 = vpop.f32.mrf.mxu0 }
 0x367   : > { %v13925_v41 = vadd.f32 %v4257_v54, %v4149_v47  ;;  %v13927_v39 = vpop.f32.mrf.mxu1  ;;  %v3853_v54 = vadd.f32 %v13818_v34, %v13687_v14  ;;  %v10725_v14 = vld [vmem:[%s16882_s4 + $0x90] sm:$0xff] }
 0x368   : > { %5479 = vmatpush.msra.mxu3 %v10725_v14 }
 0x369   : > { %10603 = vmatmul.msk.f32.gmra.mxu0 %vm523_vm2, %v13652_v52  ;;  %10635 = vmatmul.msk.f32.gmra.mxu2 %vm523_vm2, %v13510_v40  ;;  %v4000_v52 = vadd.f32 %v13761_v57, %v3850_v21  ;;  %v13958_v57 = vld [vmem:[#allocation2 + $0xf8] sm:$0xff]  ;;  %v4003_v34 = vadd.f32 %v13822_v26, %v3853_v54  ;;  %v14022_v26 = vld [vmem:[#allocation2 + $0x120] sm:$0xff] }
 0x36a   : > { %10623 = vmatmul.msk.f32.gmra.mxu1 %vm523_vm2, %v13805_v7  ;;  %10651 = vmatmul.msk.f32.gmra.mxu3 %vm523_vm2, %v13933_v49 }
 0x36c   : > { %v4110_v40 = vpop.f32.mrf.mxu2 }
 0x36d   : > { %v4150_v12 = vadd.f32 %v4110_v40, %v4000_v52  ;;  %v4260_v23 = vpop.f32.mrf.mxu3 }
 0x36e   : > { %v13946_v11 = vpop.f32.mrf.mxu0 }
 0x36f   : > { %v13950_v13 = vadd.f32 %v4260_v23, %v4150_v12  ;;  %v13952_v1 = vpop.f32.mrf.mxu1  ;;  %v3854_v23 = vadd.f32 %v13837_v60, %v13708_v27  ;;  %v10745_v27 = vld [vmem:[%s16882_s4 + $0xb0] sm:$0xff] }
 0x370   : > { %v10765_v60 = vld [vmem:[%s16882_s4 + $0xd0] sm:$0xff]  ;;  %5628 = vmatpush.msra.mxu0 %v10745_v27 }
 0x371   : > { %10604 = vmatmul.msk.f32.gmra.mxu0 %vm523_vm2, %v13669_v35  ;;  %10636 = vmatmul.msk.f32.gmra.mxu2 %vm523_vm2, %v13540_v59  ;;  %v3852_v35 = vadd.f32 %v13799_v22, %v13663_v18 }
 0x372   : > { %10624 = vmatmul.msk.f32.gmra.mxu1 %vm523_vm2, %v13824_v3  ;;  %10652 = vmatmul.msk.f32.gmra.mxu3 %vm523_vm2, %v13958_v57 }
 0x373   : > { %v4002_v18 = vadd.f32 %v13803_v56, %v3852_v35  ;;  %v14000_v56 = vld [vmem:[#allocation2 + $0x110] sm:$0xff]  ;;  %5778 = vmatpush.msra.mxu1 %v10765_v60 }
 0x374   : > { %v4113_v25 = vpop.f32.mrf.mxu2 }
 0x375   : > { %v4151_v37 = vadd.f32 %v4113_v25, %v4001_v44  ;;  %v4263_v8 = vpop.f32.mrf.mxu3 }
 0x376   : > { %v13965_v46 = vpop.f32.mrf.mxu0 }
 0x377   : > { %v13969_v58 = vadd.f32 %v4263_v8, %v4151_v37  ;;  %v13971_v59 = vpop.f32.mrf.mxu1 }
 0x379   : > { %10605 = vmatmul.msk.f32.gmra.mxu0 %vm523_vm2, %v13889_v48  ;;  %10637 = vmatmul.msk.f32.gmra.mxu2 %vm523_vm2, %v13559_v16 }
 0x37a   : > { %10625 = vmatmul.msk.f32.gmra.mxu1 %vm523_vm2, %v13975_v50  ;;  %10653 = vmatmul.msk.f32.gmra.mxu3 %vm523_vm2, %v13979_v53 }
 0x37c   : > { %v4116_v22 = vpop.f32.mrf.mxu2 }
 0x37d   : > { %v4152_v33 = vadd.f32 %v4116_v22, %v4002_v18  ;;  %v4266_v32 = vpop.f32.mrf.mxu3  ;;  %v3855_v18 = vadd.f32 %v13860_v2, %v13723_v38 }
 0x37e   : > { %v13986_v47 = vpop.f32.mrf.mxu0 }
 0x37f   : > { %v13990_v21 = vadd.f32 %v4266_v32, %v4152_v33  ;;  %v13992_v16 = vpop.f32.mrf.mxu1  ;;  %v4005_v38 = vadd.f32 %v13866_v15, %v3855_v18  ;;  %v14068_v15 = vld [vmem:[#allocation2 + $0xda] sm:$0xff] }
 0x381   : > { %10606 = vmatmul.msk.f32.gmra.mxu0 %vm523_vm2, %v13908_v17  ;;  %10638 = vmatmul.msk.f32.gmra.mxu2 %vm523_vm2, %v13578_v5 }
 0x382   : > { %10626 = vmatmul.msk.f32.gmra.mxu1 %vm523_vm2, %v13996_v9  ;;  %10654 = vmatmul.msk.f32.gmra.mxu3 %vm523_vm2, %v14000_v56 }
 0x384   : > { %v4119_v5 = vpop.f32.mrf.mxu2 }
 0x385   : > { %v4153_v52 = vadd.f32 %v4119_v5, %v4003_v34  ;;  %v4269_v40 = vpop.f32.mrf.mxu3 }
 0x386   : > { %v4399_v12 = vpop.f32.mrf.mxu0 }
 0x387   : > { %v14015_v20 = vadd.f32 %v4269_v40, %v4153_v52  ;;  %v4447_v44 = vadd.f32 %v4399_v12, %v13864_v0  ;;  %v4549_v25 = vpop.f32.mrf.mxu1  ;;  %v14064_v40 = vld [vmem:[#allocation2 + $0x138] sm:$0xff] }
 0x389   : > { %v14018_v37 = vadd.f32 %v4549_v25, %v4447_v44  ;;  %10639 = vmatmul.msk.f32.gmra.mxu2 %vm523_vm2, %v13603_v36  ;;  %10667 = vmatmul.msk.f32.vlgmr.msrb.gmra.mxu0 %vm523_vm2, %v13805_v7  ;;  %v4004_v36 = vadd.f32 %v13843_v62, %v3854_v23  ;;  %v14046_v62 = vld [vmem:[#allocation2 + $0x128] sm:$0xff] }
 0x38a   : > { %10655 = vmatmul.msk.f32.gmra.mxu3 %vm523_vm2, %v14022_v26  ;;  %10687 = vmatmul.msk.f32.vlgmr.msrb.gmra.mxu1 %vm523_vm2, %v13809_v24 }
 0x38c   : > { %v4122_v0 = vpop.f32.mrf.mxu2 }
 0x38d   : > { %v4154_v7 = vadd.f32 %v4122_v0, %v4004_v36  ;;  %v4272_v8 = vpop.f32.mrf.mxu3  ;;  %v14084_v36 = vld [vmem:[#allocation2 + $0x140] sm:$0xff] }
 0x38e   : > { %v4402_v35 = vpop.f32.mrf.mxu0 }
 0x38f   : > { %v14039_v22 = vadd.f32 %v4272_v8, %v4154_v7  ;;  %v4448_v33 = vadd.f32 %v4402_v35, %v13881_v55  ;;  %v4552_v32 = vpop.f32.mrf.mxu1  ;;  %v17076_v35 = vld [vmem:[#allocation39_spill] sm:$0xff] }
 0x390   : > { %v3858_v18 = vadd.f32 %v13921_v42, %v17076_v35  ;;  %v10703_v42 = vld [vmem:[%s16882_s4 + $0x60] sm:$0xff] }
 0x391   : > { %v14042_v54 = vadd.f32 %v4552_v32, %v4448_v33  ;;  %10640 = vmatmul.msk.f32.gmra.mxu2 %vm523_vm2, %v13628_v63  ;;  %10668 = vmatmul.msk.f32.gmra.mxu0 %vm523_vm2, %v13824_v3  ;;  %v3856_v63 = vadd.f32 %v13877_v29, %v13738_v19 }
 0x392   : > { %10656 = vmatmul.msk.f32.gmra.mxu3 %vm523_vm2, %v14046_v62  ;;  %10688 = vmatmul.msk.f32.gmra.mxu1 %vm523_vm2, %v13828_v43 }
 0x393   : > { %v4006_v19 = vadd.f32 %v13883_v45, %v3856_v63  ;;  %v14088_v45 = vld [vmem:[#allocation2 + $0xe2] sm:$0xff]  ;;  %v4008_v63 = vadd.f32 %v13927_v39, %v3858_v18  ;;  %v17078_v39 = vld [vmem:[#allocation40_spill] sm:$0xff] }
 0x394   : > { %v4125_v2 = vpop.f32.mrf.mxu2 }
 0x395   : > { %v4155_v55 = vadd.f32 %v4125_v2, %v4005_v38  ;;  %v4275_v61 = vpop.f32.mrf.mxu3  ;;  %v14106_v2 = vld [vmem:[#allocation2 + $0xf1] sm:$0xff] }
 0x396   : > { %v4405_v14 = vpop.f32.mrf.mxu0 }
 0x397   : > { %v14057_v34 = vadd.f32 %v4275_v61, %v4155_v55  ;;  %v4449_v5 = vadd.f32 %v4405_v14, %v13900_v30  ;;  %v4555_v3 = vpop.f32.mrf.mxu1  ;;  %v14108_v55 = vld [vmem:[#allocation2 + $0xf2] sm:$0xff]  ;;  %v10764_v14 = vld [vmem:[%s16882_s4 + $0xc8] sm:$0xff] }
 0x398   : > { %5779 = vmatpush.msra.mxu1 %v10764_v14 }
 0x399   : > { %v14060_v52 = vadd.f32 %v4555_v3, %v4449_v5  ;;  %10641 = vmatmul.msk.f32.gmra.mxu2 %vm523_vm2, %v13647_v10  ;;  %10669 = vmatmul.msk.f32.gmra.mxu0 %vm523_vm2, %v13975_v50  ;;  %v3857_v10 = vadd.f32 %v13896_v28, %v13759_v6  ;;  %v10704_v6 = vld [vmem:[%s16882_s4 + $0x68] sm:$0xff]  ;;  %v17077_v5 = vmov 0.0  }
 0x39a   : > { %10657 = vmatmul.msk.f32.gmra.mxu3 %vm523_vm2, %v14064_v40  ;;  %10689 = vmatmul.msk.f32.gmra.mxu1 %vm523_vm2, %v14068_v15  ;;  %584 = vst.msk [vmem:[#allocation3 + $0x18] sm:$0xff] %vm579_vm4, %v17077_v5 }
 0x39b   : > { %v4007_v28 = vadd.f32 %v13902_v31, %v3857_v10  ;;  %5331 = vmatpush.msra.mxu2 %v10704_v6  ;;  %v14114_v31 = vld [vmem:[#allocation2 + $0x150] sm:$0xff]  ;;  %585 = vst.msk [vmem:[#allocation3 + $0x20] sm:$0xff] %vm579_vm4, %v17077_v5 }
 0x39c   : > { %v4128_v29 = vpop.f32.mrf.mxu2  ;;  %580 = vst.msk [vmem:[#allocation3] sm:$0xff] %vm579_vm4, %v17077_v5 }
 0x39d   : > { %v4156_v30 = vadd.f32 %v4128_v29, %v4006_v19  ;;  %v4278_v12 = vpop.f32.mrf.mxu3  ;;  %5332 = vmatpush.msra.mxu2 %v10703_v42  ;;  %581 = vst.msk [vmem:[#allocation3 + $0x8] sm:$0xff] %vm579_vm4, %v17077_v5  ;;  %v14196_v42 = vld [vmem:[#allocation2 + $0x168] sm:$0xff] }
 0x39e   : > { %v4408_v23 = vpop.f32.mrf.mxu0  ;;  %587 = vst.msk [vmem:[#allocation3 + $0x30] sm:$0xff] %vm579_vm4, %v17077_v5 }
 0x39f   : > { %v14077_v44 = vadd.f32 %v4278_v12, %v4156_v30  ;;  %v4450_v25 = vadd.f32 %v4408_v23, %v13925_v41  ;;  %v4558_v27 = vpop.f32.mrf.mxu1  ;;  %v3859_v12 = vadd.f32 %v13946_v11, %v17078_v39  ;;  %588 = vst.msk [vmem:[#allocation3 + $0x38] sm:$0xff] %vm579_vm4, %v17077_v5  ;;  %v14162_v11 = vld [vmem:[#allocation2 + $0xfa] sm:$0xff] }
 0x3a0   : > { %590 = vst.msk [vmem:[#allocation3 + $0x48] sm:$0xff] %vm579_vm4, %v17077_v5 }
 0x3a1   : > { %v14080_v60 = vadd.f32 %v4558_v27, %v4450_v25  ;;  %10642 = vmatmul.msk.f32.gmra.mxu2 %vm523_vm2, %v13665_v4  ;;  %10670 = vmatmul.msk.f32.gmra.mxu0 %vm523_vm2, %v13996_v9  ;;  %v10724_v4 = vld [vmem:[%s16882_s4 + $0x88] sm:$0xff]  ;;  %v14150_v27 = vld [vmem:[#allocation2 + $0xf9] sm:$0xff]  ;;  %591 = vst.msk [vmem:[#allocation3 + $0x50] sm:$0xff] %vm579_vm4, %v17077_v5 }
 0x3a2   : > { %10658 = vmatmul.msk.f32.gmra.mxu3 %vm523_vm2, %v14084_v36  ;;  %10690 = vmatmul.msk.f32.gmra.mxu1 %vm523_vm2, %v14088_v45  ;;  %593 = vst.msk [vmem:[#allocation3 + $0x60] sm:$0xff] %vm579_vm4, %v17077_v5 }
 0x3a3   : > { %5480 = vmatpush.msra.mxu3 %v10724_v4  ;;  %v14158_v4 = vld [vmem:[#allocation2 + $0x158] sm:$0xff]  ;;  %594 = vst.msk [vmem:[#allocation3 + $0x68] sm:$0xff] %vm579_vm4, %v17077_v5 }
 0x3a4   : > { %v4131_v41 = vpop.f32.mrf.mxu2  ;;  %596 = vst.msk [vmem:[#allocation3 + $0x78] sm:$0xff] %vm579_vm4, %v17077_v5 }
 0x3a5   : > { %v4157_v0 = vadd.f32 %v4131_v41, %v4007_v28  ;;  %v4281_v7 = vpop.f32.mrf.mxu3  ;;  %597 = vst.msk [vmem:[#allocation3 + $0x80] sm:$0xff] %vm579_vm4, %v17077_v5 }
 0x3a6   : > { %v4411_v8 = vpop.f32.mrf.mxu0  ;;  %599 = vst.msk [vmem:[#allocation3 + $0x90] sm:$0xff] %vm579_vm4, %v17077_v5 }
 0x3a7   : > { %v14103_v33 = vadd.f32 %v4281_v7, %v4157_v0  ;;  %v4451_v32 = vadd.f32 %v4411_v8, %v13950_v13  ;;  %v4561_v38 = vpop.f32.mrf.mxu1  ;;  %v10723_v13 = vld [vmem:[%s16882_s4 + $0x80] sm:$0xff]  ;;  %600 = vst.msk [vmem:[#allocation3 + $0x98] sm:$0xff] %vm579_vm4, %v17077_v5 }
 0x3a8   : > { %5481 = vmatpush.msra.mxu3 %v10723_v13  ;;  %v17079_v7 = vld [vmem:[#allocation45_spill] sm:$0xff]  ;;  %602 = vst.msk [vmem:[#allocation3 + $0xa8] sm:$0xff] %vm579_vm4, %v17077_v5 }
 0x3a9   : > { %v14110_v61 = vadd.f32 %v4561_v38, %v4451_v32  ;;  %10643 = vmatmul.msk.f32.gmra.mxu2 %vm523_vm2, %v13809_v24  ;;  %10671 = vmatmul.msk.f32.gmra.mxu0 %vm523_vm2, %v14106_v2  ;;  %v10744_v24 = vld [vmem:[%s16882_s4 + $0xa8] sm:$0xff]  ;;  %v3860_v8 = vadd.f32 %v13965_v46, %v17079_v7  ;;  %603 = vst.msk [vmem:[#allocation3 + $0xb0] sm:$0xff] %vm579_vm4, %v17077_v5 }
 0x3aa   : > { %10659 = vmatmul.msk.f32.gmra.mxu3 %vm523_vm2, %v14114_v31  ;;  %10691 = vmatmul.msk.f32.gmra.mxu1 %vm523_vm2, %v14108_v55  ;;  %v14188_v32 = vld [vmem:[#allocation2 + $0x109] sm:$0xff]  ;;  %605 = vst.msk [vmem:[#allocation3 + $0xc0] sm:$0xff] %vm579_vm4, %v17077_v5 }
 0x3ab   : > { %5629 = vmatpush.msra.mxu0 %v10744_v24  ;;  %v14200_v46 = vld [vmem:[#allocation2 + $0x10a] sm:$0xff]  ;;  %606 = vst.msk [vmem:[#allocation3 + $0xc8] sm:$0xff] %vm579_vm4, %v17077_v5  ;;  %v14270_v7 = vld [vmem:[#allocation2 + $0x122] sm:$0xff] }
 0x3ac   : > { %v4134_v3 = vpop.f32.mrf.mxu2  ;;  %608 = vst.msk [vmem:[#allocation3 + $0xd8] sm:$0xff] %vm579_vm4, %v17077_v5 }
 0x3ad   : > { %v4158_v19 = vadd.f32 %v4134_v3, %v4008_v63  ;;  %v4284_v29 = vpop.f32.mrf.mxu3  ;;  %609 = vst.msk [vmem:[#allocation3 + $0xe0] sm:$0xff] %vm579_vm4, %v17077_v5  ;;  %v3861_v3 = vadd.f32 %v13986_v47, %v13841_v51  ;;  %v14238_v51 = vld [vmem:[#allocation2 + $0x112] sm:$0xff] }
 0x3ae   : > { %v4414_v30 = vpop.f32.mrf.mxu0  ;;  %611 = vst.msk [vmem:[#allocation3 + $0xf0] sm:$0xff] %vm579_vm4, %v17077_v5 }
 0x3af   : > { %v14145_v23 = vadd.f32 %v4284_v29, %v4158_v19  ;;  %v4452_v10 = vadd.f32 %v4414_v30, %v13969_v58  ;;  %v4564_v25 = vpop.f32.mrf.mxu1  ;;  %v14226_v30 = vld [vmem:[#allocation2 + $0x111] sm:$0xff]  ;;  %612 = vst.msk [vmem:[#allocation3 + $0xf8] sm:$0xff] %vm579_vm4, %v17077_v5  ;;  %v4011_v47 = vadd.f32 %v13992_v16, %v3861_v3 }
 0x3b0   : > { %614 = vst.msk [vmem:[#allocation3 + $0x108] sm:$0xff] %vm579_vm4, %v17077_v5 }
 0x3b1   : > { %v14154_v6 = vadd.f32 %v4564_v25, %v4452_v10  ;;  %10644 = vmatmul.msk.f32.gmra.mxu2 %vm523_vm2, %v13828_v43  ;;  %10672 = vmatmul.msk.f32.gmra.mxu0 %vm523_vm2, %v14150_v27  ;;  %v4009_v43 = vadd.f32 %v13952_v1, %v3859_v12  ;;  %v14234_v12 = vld [vmem:[#allocation2 + $0x170] sm:$0xff]  ;;  %615 = vst.msk [vmem:[#allocation3 + $0x110] sm:$0xff] %vm579_vm4, %v17077_v5 }
 0x3b2   : > { %10660 = vmatmul.msk.f32.gmra.mxu3 %vm523_vm2, %v14158_v4  ;;  %10692 = vmatmul.msk.f32.gmra.mxu1 %vm523_vm2, %v14162_v11  ;;  %617 = vst.msk [vmem:[#allocation3 + $0x120] sm:$0xff] %vm579_vm4, %v17077_v5 }
 0x3b3   : > { %618 = vst.msk [vmem:[#allocation3 + $0x128] sm:$0xff] %vm579_vm4, %v17077_v5 }
 0x3b4   : > { %v4137_v58 = vpop.f32.mrf.mxu2  ;;  %620 = vst.msk [vmem:[#allocation3 + $0x138] sm:$0xff] %vm579_vm4, %v17077_v5 }
 0x3b5   : > { %v4159_v28 = vadd.f32 %v4137_v58, %v4009_v43  ;;  %v4287_v41 = vpop.f32.mrf.mxu3  ;;  %621 = vst.msk [vmem:[#allocation3 + $0x140] sm:$0xff] %vm579_vm4, %v17077_v5 }
 0x3b6   : > { %v4417_v0 = vpop.f32.mrf.mxu0  ;;  %623 = vst.msk [vmem:[#allocation3 + $0x150] sm:$0xff] %vm579_vm4, %v17077_v5 }
 0x3b7   : > { %v14183_v1 = vadd.f32 %v4287_v41, %v4159_v28  ;;  %v4453_v35 = vadd.f32 %v4417_v0, %v13990_v21  ;;  %v4567_v18 = vpop.f32.mrf.mxu1  ;;  %v4010_v21 = vadd.f32 %v13971_v59, %v3860_v8  ;;  %v14262_v41 = vld [vmem:[#allocation2 + $0x121] sm:$0xff]  ;;  %624 = vst.msk [vmem:[#allocation3 + $0x158] sm:$0xff] %vm579_vm4, %v17077_v5 }
 0x3b8   : > { %626 = vst.msk [vmem:[#allocation3 + $0x168] sm:$0xff] %vm579_vm4, %v17077_v5 }
 0x3b9   : > { %v14192_v38 = vadd.f32 %v4567_v18, %v4453_v35  ;;  %10645 = vmatmul.msk.f32.gmra.mxu2 %vm523_vm2, %v14068_v15  ;;  %10673 = vmatmul.msk.f32.gmra.mxu0 %vm523_vm2, %v14188_v32  ;;  %627 = vst.msk [vmem:[#allocation3 + $0x170] sm:$0xff] %vm579_vm4, %v17077_v5 }
 0x3ba   : > { %10661 = vmatmul.msk.f32.gmra.mxu3 %vm523_vm2, %v14196_v42  ;;  %10693 = vmatmul.msk.f32.gmra.mxu1 %vm523_vm2, %v14200_v46  ;;  %629 = vst.msk [vmem:[#allocation3 + $0x180] sm:$0xff] %vm579_vm4, %v17077_v5 }
 0x3bb   : > { %630 = vst.msk [vmem:[#allocation3 + $0x188] sm:$0xff] %vm579_vm4, %v17077_v5 }
 0x3bc   : > { %v4140_v13 = vpop.f32.mrf.mxu2  ;;  %632 = vst.msk [vmem:[#allocation3 + $0x198] sm:$0xff] %vm579_vm4, %v17077_v5 }
 0x3bd   : > { %v4160_v24 = vadd.f32 %v4140_v13, %v4010_v21  ;;  %v4290_v14 = vpop.f32.mrf.mxu3  ;;  %633 = vst.msk [vmem:[#allocation3 + $0x1a0] sm:$0xff] %vm579_vm4, %v17077_v5 }
 0x3be   : > { %v4420_v63 = vpop.f32.mrf.mxu0  ;;  %586 = vst.msk [vmem:[#allocation3 + $0x28] sm:$0x3] %vm582_vm5, %v17077_v5 }
 0x3bf   : > { %v14221_v59 = vadd.f32 %v4290_v14, %v4160_v24  ;;  %v4454_v19 = vadd.f32 %v4420_v63, %v14015_v20  ;;  %v4570_v29 = vpop.f32.mrf.mxu1  ;;  %v14302_v14 = vld [vmem:[#allocation2 + $0x129] sm:$0xff]  ;;  %583 = vst.msk [vmem:[#allocation3 + $0x10] sm:$0x3] %vm582_vm5, %v17077_v5 }
 0x3c0   : > { %v14311_v63 = vld [vmem:[#allocation2 + $0x12a] sm:$0xff]  ;;  %589 = vst.msk [vmem:[#allocation3 + $0x40] sm:$0x3] %vm582_vm5, %v17077_v5 }
 0x3c1   : > { %v14230_v39 = vadd.f32 %v4570_v29, %v4454_v19  ;;  %10646 = vmatmul.msk.f32.gmra.mxu2 %vm523_vm2, %v14088_v45  ;;  %10674 = vmatmul.msk.f32.gmra.mxu0 %vm523_vm2, %v14226_v30  ;;  %592 = vst.msk [vmem:[#allocation3 + $0x58] sm:$0x3] %vm582_vm5, %v17077_v5 }
 0x3c2   : > { %10662 = vmatmul.msk.f32.gmra.mxu3 %vm523_vm2, %v14234_v12  ;;  %10694 = vmatmul.msk.f32.gmra.mxu1 %vm523_vm2, %v14238_v51  ;;  %595 = vst.msk [vmem:[#allocation3 + $0x70] sm:$0x3] %vm582_vm5, %v17077_v5 }
 0x3c3   : > { %598 = vst.msk [vmem:[#allocation3 + $0x88] sm:$0x3] %vm582_vm5, %v17077_v5 }
 0x3c4   : > { %v4143_v20 = vpop.f32.mrf.mxu2  ;;  %601 = vst.msk [vmem:[#allocation3 + $0xa0] sm:$0x3] %vm582_vm5, %v17077_v5 }
 0x3c5   : > { %v4161_v10 = vadd.f32 %v4143_v20, %v4011_v47  ;;  %v4293_v25 = vpop.f32.mrf.mxu3  ;;  %604 = vst.msk [vmem:[#allocation3 + $0xb8] sm:$0x3] %vm582_vm5, %v17077_v5 }
 0x3c6   : > { %v4423_v43 = vpop.f32.mrf.mxu0  ;;  %607 = vst.msk [vmem:[#allocation3 + $0xd0] sm:$0x3] %vm582_vm5, %v17077_v5 }
 0x3c7   : > { %v14257_v58 = vadd.f32 %v4293_v25, %v4161_v10  ;;  %v4455_v16 = vadd.f32 %v4423_v43, %v14039_v22  ;;  %v4573_v28 = vpop.f32.mrf.mxu1  ;;  %v10743_v22 = vld [vmem:[%s16882_s4 + $0xa0] sm:$0xff]  ;;  %610 = vst.msk [vmem:[#allocation3 + $0xe8] sm:$0x3] %vm582_vm5, %v17077_v5 }
 0x3c8   : > { %5630 = vmatpush.msra.mxu0 %v10743_v22  ;;  %v14344_v10 = vld [vmem:[#allocation2 + $0x13a] sm:$0xff]  ;;  %613 = vst.msk [vmem:[#allocation3 + $0x100] sm:$0x3] %vm582_vm5, %v17077_v5 }
 0x3c9   : > { %v14266_v0 = vadd.f32 %v4573_v28, %v4455_v16  ;;  %10675 = vmatmul.msk.f32.gmra.mxu0 %vm523_vm2, %v14262_v41  ;;  %10707 = vmatmul.msk.f32.vlgmr.msra.gmra.mxu2 %vm523_vm2, %v13889_v48  ;;  %v10763_v48 = vld [vmem:[%s16882_s4 + $0xc0] sm:$0xff]  ;;  %616 = vst.msk [vmem:[#allocation3 + $0x118] sm:$0x3] %vm582_vm5, %v17077_v5 }
 0x3ca   : > { %10695 = vmatmul.msk.f32.gmra.mxu1 %vm523_vm2, %v14270_v7  ;;  %10727 = vmatmul.msk.f32.vlgmr.msra.gmra.mxu3 %vm523_vm2, %v13975_v50  ;;  %619 = vst.msk [vmem:[#allocation3 + $0x130] sm:$0x3] %vm582_vm5, %v17077_v5 }
 0x3cb   : > { %5780 = vmatpush.msra.mxu1 %v10763_v48  ;;  %622 = vst.msk [vmem:[#allocation3 + $0x148] sm:$0x3] %vm582_vm5, %v17077_v5 }
 0x3cc   : > { %v4699_v8 = vpop.f32.mrf.mxu2  ;;  %625 = vst.msk [vmem:[#allocation3 + $0x160] sm:$0x3] %vm582_vm5, %v17077_v5 }
 0x3cd   : > { %v4747_v50 = vadd.f32 %v4699_v8, %v14018_v37  ;;  %v14295_v35 = vpop.f32.mrf.mxu3  ;;  %628 = vst.msk [vmem:[#allocation3 + $0x178] sm:$0x3] %vm582_vm5, %v17077_v5  ;;  %v14370_v8 = vld [vmem:[#allocation2 + $0x141] sm:$0xff] }
 0x3ce   : > { %v4426_v18 = vpop.f32.mrf.mxu0  ;;  %631 = vst.msk [vmem:[#allocation3 + $0x190] sm:$0x3] %vm582_vm5, %v17077_v5 }
 0x3cf   : > { %v4763_v21 = vmax.f32 %v4747_v50, 0.0  ;;  %v4456_v13 = vadd.f32 %v4426_v18, %v14057_v34  ;;  %v4576_v24 = vpop.f32.mrf.mxu1  ;;  %v14378_v50 = vld [vmem:[#allocation2 + $0x142] sm:$0xff]  ;;  %634 = vst.msk [vmem:[#allocation3 + $0x1a8] sm:$0x3] %vm582_vm5, %v17077_v5  ;;  %v10806_v18 = vld [vmem:[%s16882_s4 + $0x118] sm:$0xff] }
 0x3d0   : > { %6075 = vmatpush.msrb.mxu3 %v10806_v18  ;;  %v14424_v18 = vld [vmem:[#allocation2 + $0x159] sm:$0xff] }
 0x3d1   : > { %4780 = vst.msk [vmem:[#allocation3 + $0x19] sm:$0xff] %vm579_vm4, %v4763_v21  ;;  %v14307_v37 = vadd.f32 %v4576_v24, %v4456_v13  ;;  %10676 = vmatmul.msk.f32.gmra.mxu0 %vm523_vm2, %v14302_v14  ;;  %10708 = vmatmul.msk.f32.gmra.mxu2 %vm523_vm2, %v13908_v17 }
 0x3d2   : > { %10696 = vmatmul.msk.f32.gmra.mxu1 %vm523_vm2, %v14311_v63  ;;  %10728 = vmatmul.msk.f32.gmra.mxu3 %vm523_vm2, %v13996_v9  ;;  %17080 = vst [vmem:[#allocation46_spill] sm:$0xff] %v14424_v18 }
 0x3d4   : > { %v4702_v34 = vpop.f32.mrf.mxu2 }
 0x3d5   : > { %v4748_v3 = vadd.f32 %v4702_v34, %v14042_v54  ;;  %v14328_v17 = vpop.f32.mrf.mxu3  ;;  %v14337_v54 = vld [vmem:[#allocation2 + $0x139] sm:$0xff] }
 0x3d6   : > { %v4429_v9 = vpop.f32.mrf.mxu0 }
 0x3d7   : > { %v4764_v19 = vmax.f32 %v4748_v3, 0.0  ;;  %v4457_v29 = vadd.f32 %v4429_v9, %v14077_v44  ;;  %v4579_v47 = vpop.f32.mrf.mxu1 }
 0x3d9   : > { %4781 = vst.msk [vmem:[#allocation3 + $0x21] sm:$0xff] %vm579_vm4, %v4764_v19  ;;  %v14340_v20 = vadd.f32 %v4579_v47, %v4457_v29  ;;  %10677 = vmatmul.msk.f32.gmra.mxu0 %vm523_vm2, %v14337_v54  ;;  %10709 = vmatmul.msk.f32.gmra.mxu2 %vm523_vm2, %v13933_v49  ;;  %v14399_v19 = vld [vmem:[#allocation2 + $0x151] sm:$0xff] }
 0x3da   : > { %10697 = vmatmul.msk.f32.gmra.mxu1 %vm523_vm2, %v14344_v10  ;;  %10729 = vmatmul.msk.f32.gmra.mxu3 %vm523_vm2, %v14106_v2  ;;  %v14406_v47 = vld [vmem:[#allocation2 + $0x152] sm:$0xff] }
 0x3dc   : > { %v4705_v44 = vpop.f32.mrf.mxu2 }
 0x3dd   : > { %v4749_v25 = vadd.f32 %v4705_v44, %v14060_v52  ;;  %v14361_v43 = vpop.f32.mrf.mxu3 }
 0x3de   : > { %v4432_v16 = vpop.f32.mrf.mxu0 }
 0x3df   : > { %v4765_v28 = vmax.f32 %v4749_v25, 0.0  ;;  %v4458_v22 = vadd.f32 %v4432_v16, %v14103_v33  ;;  %v4582_v48 = vpop.f32.mrf.mxu1  ;;  %v10786_v33 = vld [vmem:[%s16882_s4 + $0xf8] sm:$0xff] }
 0x3e0   : > { %5926 = vmatpush.msrb.mxu2 %v10786_v33 }
 0x3e1   : > { %v14374_v52 = vadd.f32 %v4582_v48, %v4458_v22  ;;  %10678 = vmatmul.msk.f32.gmra.mxu0 %vm523_vm2, %v14370_v8  ;;  %10710 = vmatmul.msk.f32.gmra.mxu2 %vm523_vm2, %v13958_v57  ;;  %4782 = vst.msk [vmem:[#allocation3 + $0x31] sm:$0xff] %vm579_vm4, %v4765_v28 }
 0x3e2   : > { %10698 = vmatmul.msk.f32.gmra.mxu1 %vm523_vm2, %v14378_v50  ;;  %10730 = vmatmul.msk.f32.gmra.mxu3 %vm523_vm2, %v14150_v27 }
 0x3e4   : > { %v4708_v21 = vpop.f32.mrf.mxu2 }
 0x3e5   : > { %v4750_v13 = vadd.f32 %v4708_v21, %v14080_v60  ;;  %v14396_v24 = vpop.f32.mrf.mxu3  ;;  %v6205_v60 = vld [vmem:[%s16884_s6 + $0x38] sm:$0xff] }
 0x3e6   : > { %v4435_v5 = vpop.f32.mrf.mxu0  ;;  %6262 = vmatpush.msrb.mxu0 %v6205_v60 }
 0x3e7   : > { %v4766_v34 = vmax.f32 %v4750_v13, 0.0  ;;  %v4459_v3 = vadd.f32 %v4435_v5, %v14145_v23  ;;  %v4585_v9 = vpop.f32.mrf.mxu1  ;;  %v10846_v23 = vld [vmem:[%s16884_s6 + $0x78] sm:$0xff] }
 0x3e8   : > { %6416 = vmatpush.msrb.mxu1 %v10846_v23  ;;  %v14431_v13 = vld [vmem:[#allocation2 + $0x15a] sm:$0xff]  ;;  %v14443_v23 = vld [vmem:[#allocation2 + $0x169] sm:$0xff] }
 0x3e9   : > { %4783 = vst.msk [vmem:[#allocation3 + $0x39] sm:$0xff] %vm579_vm4, %v4766_v34  ;;  %v14402_v29 = vadd.f32 %v4585_v9, %v4459_v3  ;;  %10679 = vmatmul.msk.f32.gmra.mxu0 %vm523_vm2, %v14399_v19  ;;  %10711 = vmatmul.msk.f32.gmra.mxu2 %vm523_vm2, %v13979_v53 }
 0x3ea   : > { %10699 = vmatmul.msk.f32.gmra.mxu1 %vm523_vm2, %v14406_v47  ;;  %10731 = vmatmul.msk.f32.gmra.mxu3 %vm523_vm2, %v14188_v32  ;;  %17081 = vst [vmem:[#allocation25_spill] sm:$0xff] %v14443_v23 }
 0x3ec   : > { %v4711_v44 = vpop.f32.mrf.mxu2 }
 0x3ed   : > { %v4751_v25 = vadd.f32 %v4711_v44, %v14110_v61  ;;  %v14421_v16 = vpop.f32.mrf.mxu3 }
 0x3ee   : > { %v4438_v28 = vpop.f32.mrf.mxu0 }
 0x3ef   : > { %v4767_v22 = vmax.f32 %v4751_v25, 0.0  ;;  %v4460_v48 = vadd.f32 %v4438_v28, %v14183_v1  ;;  %v4588_v33 = vpop.f32.mrf.mxu1  ;;  %v14450_v25 = vld [vmem:[#allocation2 + $0x16a] sm:$0xff] }
 0x3f1   : > { %4784 = vst.msk [vmem:[#allocation3 + $0x49] sm:$0xff] %vm579_vm4, %v4767_v22  ;;  %v14427_v21 = vadd.f32 %v4588_v33, %v4460_v48  ;;  %10680 = vmatmul.msk.f32.gmra.mxu0 %vm523_vm2, %v14424_v18  ;;  %10712 = vmatmul.msk.f32.gmra.mxu2 %vm523_vm2, %v14000_v56 }
 0x3f2   : > { %10700 = vmatmul.msk.f32.gmra.mxu1 %vm523_vm2, %v14431_v13  ;;  %10732 = vmatmul.msk.f32.gmra.mxu3 %vm523_vm2, %v14226_v30 }
 0x3f4   : > { %v4714_v61 = vpop.f32.mrf.mxu2 }
 0x3f5   : > { %v4752_v1 = vadd.f32 %v4714_v61, %v14154_v6  ;;  %v14440_v5 = vpop.f32.mrf.mxu3  ;;  %v6204_v6 = vld [vmem:[%s16884_s6 + $0x30] sm:$0xff] }
 0x3f6   : > { %v4441_v34 = vpop.f32.mrf.mxu0  ;;  %6263 = vmatpush.msrb.mxu0 %v6204_v6 }
 0x3f7   : > { %v4768_v3 = vmax.f32 %v4752_v1, 0.0  ;;  %v4461_v9 = vadd.f32 %v4441_v34, %v14221_v59  ;;  %v4591_v60 = vpop.f32.mrf.mxu1  ;;  %v10845_v59 = vld [vmem:[%s16884_s6 + $0x70] sm:$0xff] }
 0x3f8   : > { %6417 = vmatpush.msrb.mxu1 %v10845_v59 }
 0x3f9   : > { %4785 = vst.msk [vmem:[#allocation3 + $0x51] sm:$0xff] %vm579_vm4, %v4768_v3  ;;  %v14446_v44 = vadd.f32 %v4591_v60, %v4461_v9  ;;  %10681 = vmatmul.msk.f32.gmra.mxu0 %vm523_vm2, %v14443_v23  ;;  %10713 = vmatmul.msk.f32.gmra.mxu2 %vm523_vm2, %v14022_v26  ;;  %v14468_v3 = vld [vmem:[#allocation2 + $0x171] sm:$0xff] }
 0x3fa   : > { %10701 = vmatmul.msk.f32.gmra.mxu1 %vm523_vm2, %v14450_v25  ;;  %10733 = vmatmul.msk.f32.gmra.mxu3 %vm523_vm2, %v14262_v41  ;;  %17082 = vst [vmem:[#allocation43_spill] sm:$0xff] %v14468_v3  ;;  %v14475_v60 = vld [vmem:[#allocation2 + $0x172] sm:$0xff] }
 0x3fc   : > { %v4717_v28 = vpop.f32.mrf.mxu2 }
 0x3fd   : > { %v4753_v22 = vadd.f32 %v4717_v28, %v14192_v38  ;;  %v14465_v48 = vpop.f32.mrf.mxu3  ;;  %v10785_v38 = vld [vmem:[%s16882_s4 + $0xf0] sm:$0xff] }
 0x3fe   : > { %v4444_v33 = vpop.f32.mrf.mxu0  ;;  %5927 = vmatpush.msrb.mxu2 %v10785_v38 }
 0x3ff   : > { %v4769_v61 = vmax.f32 %v4753_v22, 0.0  ;;  %v4462_v1 = vadd.f32 %v4444_v33, %v14257_v58  ;;  %v4594_v34 = vpop.f32.mrf.mxu1  ;;  %v10805_v58 = vld [vmem:[%s16882_s4 + $0x110] sm:$0xff] }
 0x400   : > { %6076 = vmatpush.msrb.mxu3 %v10805_v58 }
 0x401   : > { %4786 = vst.msk [vmem:[#allocation3 + $0x61] sm:$0xff] %vm579_vm4, %v4769_v61  ;;  %v14471_v9 = vadd.f32 %v4594_v34, %v4462_v1  ;;  %10682 = vmatmul.msk.f32.gmra.mxu0 %vm523_vm2, %v14468_v3  ;;  %10714 = vmatmul.msk.f32.gmra.mxu2 %vm523_vm2, %v14046_v62  ;;  %v10844_v1 = vld [vmem:[%s16884_s6 + $0x68] sm:$0xff] }
 0x402   : > { %10702 = vmatmul.msk.f32.gmra.mxu1 %vm523_vm2, %v14475_v60  ;;  %10734 = vmatmul.msk.f32.gmra.mxu3 %vm523_vm2, %v14302_v14 }
 0x403   : > { %6418 = vmatpush.msrb.mxu1 %v10844_v1 }
 0x404   : > { %v4720_v6 = vpop.f32.mrf.mxu2 }
 0x405   : > { %v4754_v59 = vadd.f32 %v4720_v6, %v14230_v39  ;;  %v14490_v28 = vpop.f32.mrf.mxu3  ;;  %v6203_v39 = vld [vmem:[%s16884_s6 + $0x28] sm:$0xff] }
 0x406   : > { %v14492_v22 = vpop.f32.mrf.mxu0  ;;  %6264 = vmatpush.msrb.mxu0 %v6203_v39 }
 0x407   : > { %v4770_v33 = vmax.f32 %v4754_v59, 0.0  ;;  %v14494_v61 = vpop.f32.mrf.mxu1 }
 0x409   : > { %4787 = vst.msk [vmem:[#allocation3 + $0x69] sm:$0xff] %vm579_vm4, %v4770_v33  ;;  %10715 = vmatmul.msk.f32.gmra.mxu2 %vm523_vm2, %v14064_v40  ;;  %10747 = vmatmul.msk.f32.vlgmr.msra.gmra.mxu0 %vm523_vm2, %v14068_v15 }
 0x40a   : > { %10735 = vmatmul.msk.f32.gmra.mxu3 %vm523_vm2, %v14337_v54  ;;  %10767 = vmatmul.msk.f32.vlgmr.msra.gmra.mxu1 %vm523_vm2, %v13933_v49 }
 0x40c   : > { %v4723_v34 = vpop.f32.mrf.mxu2 }
 0x40d   : > { %v4755_v38 = vadd.f32 %v4723_v34, %v14266_v0  ;;  %v14512_v15 = vpop.f32.mrf.mxu3 }
 0x40e   : > { %v14514_v58 = vpop.f32.mrf.mxu0 }
 0x40f   : > { %v4771_v6 = vmax.f32 %v4755_v38, 0.0  ;;  %v14516_v59 = vpop.f32.mrf.mxu1 }
 0x411   : > { %4788 = vst.msk [vmem:[#allocation3 + $0x79] sm:$0xff] %vm579_vm4, %v4771_v6  ;;  %10716 = vmatmul.msk.f32.gmra.mxu2 %vm523_vm2, %v14084_v36  ;;  %10748 = vmatmul.msk.f32.gmra.mxu0 %vm523_vm2, %v14088_v45  ;;  %v10843_v45 = vld [vmem:[%s16884_s6 + $0x60] sm:$0xff] }
 0x412   : > { %10736 = vmatmul.msk.f32.gmra.mxu3 %vm523_vm2, %v14370_v8  ;;  %10768 = vmatmul.msk.f32.gmra.mxu1 %vm523_vm2, %v13958_v57  ;;  %v6202_v57 = vld [vmem:[%s16884_s6 + $0x20] sm:$0xff] }
 0x413   : > { %6265 = vmatpush.msrb.mxu0 %v6202_v57  ;;  %6419 = vmatpush.msrb.mxu1 %v10843_v45 }
 0x414   : > { %v4726_v49 = vpop.f32.mrf.mxu2 }
 0x415   : > { %v4756_v0 = vadd.f32 %v4726_v49, %v14307_v37  ;;  %v14528_v33 = vpop.f32.mrf.mxu3 }
 0x416   : > { %17083 = vst [vmem:[#allocation44_spill] sm:$0xff] %v14528_v33  ;;  %v14530_v39 = vpop.f32.mrf.mxu0 }
 0x417   : > { %v4772_v1 = vmax.f32 %v4756_v0, 0.0  ;;  %v14532_v34 = vpop.f32.mrf.mxu1 }
 0x419   : > { %4789 = vst.msk [vmem:[#allocation3 + $0x81] sm:$0xff] %vm579_vm4, %v4772_v1  ;;  %10717 = vmatmul.msk.f32.gmra.mxu2 %vm523_vm2, %v14114_v31  ;;  %10749 = vmatmul.msk.f32.gmra.mxu0 %vm523_vm2, %v14108_v55 }
 0x41a   : > { %10737 = vmatmul.msk.f32.gmra.mxu3 %vm523_vm2, %v14399_v19  ;;  %10769 = vmatmul.msk.f32.gmra.mxu1 %vm523_vm2, %v13979_v53  ;;  %v10784_v53 = vld [vmem:[%s16882_s4 + $0xe8] sm:$0xff] }
 0x41b   : > { %5928 = vmatpush.msrb.mxu2 %v10784_v53  ;;  %v6201_v53 = vld [vmem:[%s16884_s6 + $0x18] sm:$0xff] }
 0x41c   : > { %v4729_v37 = vpop.f32.mrf.mxu2  ;;  %6266 = vmatpush.msrb.mxu0 %v6201_v53 }
 0x41d   : > { %v4757_v38 = vadd.f32 %v4729_v37, %v14340_v20  ;;  %v14550_v6 = vpop.f32.mrf.mxu3  ;;  %v10804_v20 = vld [vmem:[%s16882_s4 + $0x108] sm:$0xff] }
 0x41e   : > { %17084 = vst [vmem:[#allocation49_spill] sm:$0xff] %v14550_v6  ;;  %v14552_v49 = vpop.f32.mrf.mxu0  ;;  %6077 = vmatpush.msrb.mxu3 %v10804_v20  ;;  %v10842_v20 = vld [vmem:[%s16884_s6 + $0x58] sm:$0xff] }
 0x41f   : > { %v4773_v0 = vmax.f32 %v4757_v38, 0.0  ;;  %v14554_v1 = vpop.f32.mrf.mxu1  ;;  %6420 = vmatpush.msrb.mxu1 %v10842_v20 }
 0x421   : > { %4790 = vst.msk [vmem:[#allocation3 + $0x91] sm:$0xff] %vm579_vm4, %v4773_v0  ;;  %10718 = vmatmul.msk.f32.gmra.mxu2 %vm523_vm2, %v14158_v4  ;;  %10750 = vmatmul.msk.f32.gmra.mxu0 %vm523_vm2, %v14162_v11 }
 0x422   : > { %10738 = vmatmul.msk.f32.gmra.mxu3 %vm523_vm2, %v14424_v18  ;;  %10770 = vmatmul.msk.f32.gmra.mxu1 %vm523_vm2, %v14000_v56  ;;  %v10783_v56 = vld [vmem:[%s16882_s4 + $0xe0] sm:$0xff] }
 0x423   : > { %5929 = vmatpush.msrb.mxu2 %v10783_v56 }
 0x424   : > { %v4732_v57 = vpop.f32.mrf.mxu2 }
 0x425   : > { %v4758_v45 = vadd.f32 %v4732_v57, %v14374_v52  ;;  %v14572_v37 = vpop.f32.mrf.mxu3  ;;  %v10803_v52 = vld [vmem:[%s16882_s4 + $0x100] sm:$0xff] }
 0x426   : > { %17085 = vst [vmem:[#allocation50_spill] sm:$0xff] %v14572_v37  ;;  %v14574_v38 = vpop.f32.mrf.mxu0  ;;  %6078 = vmatpush.msrb.mxu3 %v10803_v52 }
 0x427   : > { %v4774_v0 = vmax.f32 %v4758_v45, 0.0  ;;  %v14576_v6 = vpop.f32.mrf.mxu1 }
 0x429   : > { %4791 = vst.msk [vmem:[#allocation3 + $0x99] sm:$0xff] %vm579_vm4, %v4774_v0  ;;  %10719 = vmatmul.msk.f32.gmra.mxu2 %vm523_vm2, %v14196_v42  ;;  %10751 = vmatmul.msk.f32.gmra.mxu0 %vm523_vm2, %v14200_v46 }
 0x42a   : > { %10739 = vmatmul.msk.f32.gmra.mxu3 %vm523_vm2, %v14443_v23  ;;  %10771 = vmatmul.msk.f32.gmra.mxu1 %vm523_vm2, %v14022_v26 }
 0x42c   : > { %v4735_v57 = vpop.f32.mrf.mxu2 }
 0x42d   : > { %v4759_v45 = vadd.f32 %v4735_v57, %v14402_v29  ;;  %v14600_v0 = vpop.f32.mrf.mxu3 }
 0x42e   : > { %17086 = vst [vmem:[#allocation26_spill] sm:$0xff] %v14600_v0  ;;  %v14602_v37 = vpop.f32.mrf.mxu0 }
 0x42f   : > { %v4775_v26 = vmax.f32 %v4759_v45, 0.0  ;;  %v14604_v23 = vpop.f32.mrf.mxu1  ;;  %v14622_v45 = vld [vmem:[#allocation2 + $0x180] sm:$0xff] }
 0x431   : > { %4792 = vst.msk [vmem:[#allocation3 + $0xa9] sm:$0xff] %vm579_vm4, %v4775_v26  ;;  %10720 = vmatmul.msk.f32.gmra.mxu2 %vm523_vm2, %v14234_v12  ;;  %10752 = vmatmul.msk.f32.gmra.mxu0 %vm523_vm2, %v14238_v51  ;;  %v14627_v26 = vld [vmem:[#allocation2 + $0x181] sm:$0xff] }
 0x432   : > { %10740 = vmatmul.msk.f32.gmra.mxu3 %vm523_vm2, %v14468_v3  ;;  %10772 = vmatmul.msk.f32.gmra.mxu1 %vm523_vm2, %v14046_v62  ;;  %17088 = vst [vmem:[#allocation48_spill] sm:$0xff] %v14627_v26  ;;  %v6200_v62 = vld [vmem:[%s16884_s6 + $0x10] sm:$0xff]  ;;  %v14653_v3 = vld [vmem:[%s16883_s5] ss:$0 sm:$0xff] }
 0x433   : > { %6267 = vmatpush.msrb.mxu0 %v6200_v62 }
 0x434   : > { %v4738_v29 = vpop.f32.mrf.mxu2 }
 0x435   : > { %v4760_v56 = vadd.f32 %v4738_v29, %v14427_v21  ;;  %v14616_v52 = vpop.f32.mrf.mxu3  ;;  %v10841_v21 = vld [vmem:[%s16884_s6 + $0x50] sm:$0xff] }
 0x436   : > { %17087 = vst [vmem:[#allocation47_spill] sm:$0xff] %v14616_v52  ;;  %v14618_v53 = vpop.f32.mrf.mxu0  ;;  %6421 = vmatpush.msrb.mxu1 %v10841_v21  ;;  %v4935_v21 = vadd.f32 %v14653_v3, %v14295_v35  ;;  %v10840_v35 = vld [vmem:[%s16884_s6 + $0x48] sm:$0xff] }
 0x437   : > { %v4776_v20 = vmax.f32 %v4760_v56, 0.0  ;;  %v14620_v57 = vpop.f32.mrf.mxu1 }
 0x438   : > { %6422 = vmatpush.msrb.mxu1 %v10840_v35 }
 0x439   : > { %4793 = vst.msk [vmem:[#allocation3 + $0xb1] sm:$0xff] %vm579_vm4, %v4776_v20  ;;  %10721 = vmatmul.msk.f32.gmra.mxu2 %vm523_vm2, %v14622_v45  ;;  %10753 = vmatmul.msk.f32.gmra.mxu0 %vm523_vm2, %v14270_v7 }
 0x43a   : > { %10741 = vmatmul.msk.f32.gmra.mxu3 %vm523_vm2, %v14627_v26  ;;  %10773 = vmatmul.msk.f32.gmra.mxu1 %vm523_vm2, %v14064_v40  ;;  %v14648_v40 = vld [vmem:[#allocation2 + $0x188] sm:$0xff] }
 0x43c   : > { %v4741_v29 = vpop.f32.mrf.mxu2 }
 0x43d   : > { %v4761_v56 = vadd.f32 %v4741_v29, %v14446_v44  ;;  %v14642_v20 = vpop.f32.mrf.mxu3  ;;  %v14658_v44 = vld [vmem:[#allocation2 + $0x189] sm:$0xff] }
 0x43e   : > { %17089 = vst [vmem:[#allocation51_spill] sm:$0xff] %v14642_v20  ;;  %v14644_v52 = vpop.f32.mrf.mxu0  ;;  %v5084_v20 = vadd.f32 %v14492_v22, %v4935_v21 }
 0x43f   : > { %v4777_v26 = vmax.f32 %v4761_v56, 0.0  ;;  %v14646_v0 = vpop.f32.mrf.mxu1 }
 0x441   : > { %4794 = vst.msk [vmem:[#allocation3 + $0xc1] sm:$0xff] %vm579_vm4, %v4777_v26  ;;  %10722 = vmatmul.msk.f32.gmra.mxu2 %vm523_vm2, %v14648_v40  ;;  %10754 = vmatmul.msk.f32.gmra.mxu0 %vm523_vm2, %v14311_v63 }
 0x442   : > { %10742 = vmatmul.msk.f32.gmra.mxu3 %vm523_vm2, %v14658_v44  ;;  %10774 = vmatmul.msk.f32.gmra.mxu1 %vm523_vm2, %v14084_v36  ;;  %v6199_v36 = vld [vmem:[%s16884_s6 + $0x8] sm:$0xff] }
 0x443   : > { %6268 = vmatpush.msrb.mxu0 %v6199_v36 }
 0x444   : > { %v4744_v62 = vpop.f32.mrf.mxu2 }
 0x445   : > { %v4762_v26 = vadd.f32 %v4744_v62, %v14471_v9  ;;  %v14669_v29 = vpop.f32.mrf.mxu3 }
 0x446   : > { %v14671_v56 = vpop.f32.mrf.mxu0 }
 0x447   : > { %v4778_v18 = vmax.f32 %v4762_v26, 0.0  ;;  %v14674_v33 = vpop.f32.mrf.mxu1 }
 0x449   : > { %4795 = vst.msk [vmem:[#allocation3 + $0xc9] sm:$0xff] %vm579_vm4, %v4778_v18  ;;  %10755 = vmatmul.msk.f32.gmra.mxu0 %vm523_vm2, %v14344_v10  ;;  %10787 = vmatmul.msk.f32.vlgmr.msrb.gmra.mxu2 %vm523_vm2, %v14106_v2  ;;  %v5233_v18 = vadd.f32 %v14494_v61, %v5084_v20  ;;  %v4936_v2 = vadd.f32 %v14653_v3, %v14328_v17 }
 0x44a   : > { %10775 = vmatmul.msk.f32.gmra.mxu1 %vm523_vm2, %v14114_v31  ;;  %10807 = vmatmul.msk.f32.vlgmr.msrb.gmra.mxu3 %vm523_vm2, %v14108_v55 }
 0x44b   : > { %v5085_v55 = vadd.f32 %v14514_v58, %v4936_v2  ;;  %v4937_v58 = vadd.f32 %v14653_v3, %v14361_v43 }
 0x44c   : > { %v5334_v9 = vpop.f32.mrf.mxu2 }
 0x44d   : > { %v5382_v31 = vadd.f32 %v5334_v9, %v5233_v18  ;;  %v5483_v22 = vpop.f32.mrf.mxu3  ;;  %v5234_v17 = vadd.f32 %v14516_v59, %v5085_v55  ;;  %v5086_v18 = vadd.f32 %v14530_v39, %v4937_v58 }
 0x44e   : > { %v14694_v62 = vpop.f32.mrf.mxu0 }
 0x44f   : > { %v14697_v21 = vadd.f32 %v5483_v22, %v5382_v31  ;;  %v14699_v26 = vpop.f32.mrf.mxu1  ;;  %v5235_v43 = vadd.f32 %v14532_v34, %v5086_v18  ;;  %v10894_v34 = vld [vmem:[%s16884_s6 + $0xf8] sm:$0xff] }
 0x450   : > { %6724 = vmatpush.msra.mxu3 %v10894_v34  ;;  %v14815_v34 = vld [vmem:[#allocation2 + $0x182] sm:$0xff] }
 0x451   : > { %10756 = vmatmul.msk.f32.gmra.mxu0 %vm523_vm2, %v14378_v50  ;;  %10788 = vmatmul.msk.f32.gmra.mxu2 %vm523_vm2, %v14150_v27 }
 0x452   : > { %10776 = vmatmul.msk.f32.gmra.mxu1 %vm523_vm2, %v14158_v4  ;;  %10808 = vmatmul.msk.f32.gmra.mxu3 %vm523_vm2, %v14162_v11  ;;  %v6198_v4 = vld [vmem:[%s16884_s6] sm:$0xff] }
 0x453   : > { %v10839_v11 = vld [vmem:[%s16884_s6 + $0x40] sm:$0xff]  ;;  %6269 = vmatpush.msrb.mxu0 %v6198_v4 }
 0x454   : > { %v5337_v61 = vpop.f32.mrf.mxu2  ;;  %6423 = vmatpush.msrb.mxu1 %v10839_v11 }
 0x455   : > { %v5383_v20 = vadd.f32 %v5337_v61, %v5234_v17  ;;  %v5486_v36 = vpop.f32.mrf.mxu3 }
 0x456   : > { %v14712_v35 = vpop.f32.mrf.mxu0 }
 0x457   : > { %v14715_v9 = vadd.f32 %v5486_v36, %v5383_v20  ;;  %v14717_v27 = vpop.f32.mrf.mxu1 }
 0x459   : > { %10757 = vmatmul.msk.f32.gmra.mxu0 %vm523_vm2, %v14406_v47  ;;  %10789 = vmatmul.msk.f32.gmra.mxu2 %vm523_vm2, %v14188_v32  ;;  %v4938_v32 = vadd.f32 %v14653_v3, %v14396_v24  ;;  %v10870_v24 = vld [vmem:[%s16884_s6 + $0xb8] sm:$0xff] }
 0x45a   : > { %10777 = vmatmul.msk.f32.gmra.mxu1 %vm523_vm2, %v14196_v42  ;;  %10809 = vmatmul.msk.f32.gmra.mxu3 %vm523_vm2, %v14200_v46 }
 0x45b   : > { %v5087_v46 = vadd.f32 %v14552_v49, %v4938_v32  ;;  %6570 = vmatpush.msra.mxu2 %v10870_v24  ;;  %v5711_v24 = vld [vmem:[#allocation2 + $0x198] sm:$0xff] }
 0x45c   : > { %v5340_v59 = vpop.f32.mrf.mxu2 }
 0x45d   : > { %v5384_v42 = vadd.f32 %v5340_v59, %v5235_v43  ;;  %v5489_v39 = vpop.f32.mrf.mxu3  ;;  %v5236_v49 = vadd.f32 %v14554_v1, %v5087_v46 }
 0x45e   : > { %v14736_v2 = vpop.f32.mrf.mxu0 }
 0x45f   : > { %v14739_v31 = vadd.f32 %v5489_v39, %v5384_v42  ;;  %v14741_v22 = vpop.f32.mrf.mxu1 }
 0x461   : > { %10758 = vmatmul.msk.f32.gmra.mxu0 %vm523_vm2, %v14431_v13  ;;  %10790 = vmatmul.msk.f32.gmra.mxu2 %vm523_vm2, %v14226_v30  ;;  %v4939_v30 = vadd.f32 %v14653_v3, %v14421_v16  ;;  %v10918_v16 = vld [vmem:[%s16884_s6 + $0x138] sm:$0xff] }
 0x462   : > { %10778 = vmatmul.msk.f32.gmra.mxu1 %vm523_vm2, %v14234_v12  ;;  %10810 = vmatmul.msk.f32.gmra.mxu3 %vm523_vm2, %v14238_v51 }
 0x463   : > { %v5088_v12 = vadd.f32 %v14574_v38, %v4939_v30  ;;  %6878 = vmatpush.msra.mxu0 %v10918_v16  ;;  %v10942_v38 = vld [vmem:[%s16884_s6 + $0x178] sm:$0xff]  ;;  %v5712_v16 = vld [vmem:[#allocation2 + $0x1a0] sm:$0xff] }
 0x464   : > { %v5343_v55 = vpop.f32.mrf.mxu2  ;;  %7032 = vmatpush.msra.mxu1 %v10942_v38 }
 0x465   : > { %v5385_v17 = vadd.f32 %v5343_v55, %v5236_v49  ;;  %v5492_v61 = vpop.f32.mrf.mxu3  ;;  %v5237_v1 = vadd.f32 %v14576_v6, %v5088_v12  ;;  %v10893_v6 = vld [vmem:[%s16884_s6 + $0xf0] sm:$0xff] }
 0x466   : > { %v14760_v58 = vpop.f32.mrf.mxu0  ;;  %6725 = vmatpush.msra.mxu3 %v10893_v6 }
 0x467   : > { %v14763_v20 = vadd.f32 %v5492_v61, %v5385_v17  ;;  %v14765_v51 = vpop.f32.mrf.mxu1 }
 0x469   : > { %10759 = vmatmul.msk.f32.gmra.mxu0 %vm523_vm2, %v14450_v25  ;;  %10791 = vmatmul.msk.f32.gmra.mxu2 %vm523_vm2, %v14262_v41  ;;  %v4940_v41 = vadd.f32 %v14653_v3, %v14440_v5  ;;  %v10869_v5 = vld [vmem:[%s16884_s6 + $0xb0] sm:$0xff] }
 0x46a   : > { %10779 = vmatmul.msk.f32.gmra.mxu1 %vm523_vm2, %v14622_v45  ;;  %10811 = vmatmul.msk.f32.gmra.mxu3 %vm523_vm2, %v14270_v7 }
 0x46b   : > { %v5089_v7 = vadd.f32 %v14602_v37, %v4940_v41  ;;  %6571 = vmatpush.msra.mxu2 %v10869_v5 }
 0x46c   : > { %v5346_v36 = vpop.f32.mrf.mxu2 }
 0x46d   : > { %v5386_v45 = vadd.f32 %v5346_v36, %v5237_v1  ;;  %v5495_v18 = vpop.f32.mrf.mxu3  ;;  %v5238_v37 = vadd.f32 %v14604_v23, %v5089_v7  ;;  %v10917_v23 = vld [vmem:[%s16884_s6 + $0x130] sm:$0xff] }
 0x46e   : > { %v14784_v4 = vpop.f32.mrf.mxu0  ;;  %6879 = vmatpush.msra.mxu0 %v10917_v23  ;;  %v14840_v1 = vld [vmem:[#allocation2 + $0x18a] sm:$0xff] }
 0x46f   : > { %v14787_v11 = vadd.f32 %v5495_v18, %v5386_v45  ;;  %v14789_v43 = vpop.f32.mrf.mxu1  ;;  %v6182_v18 = vld [vmem:[#allocation3] sm:$0xff] }
 0x471   : > { %10760 = vmatmul.msk.f32.gmra.mxu0 %vm523_vm2, %v14475_v60  ;;  %10792 = vmatmul.msk.f32.gmra.mxu2 %vm523_vm2, %v14302_v14  ;;  %v4941_v14 = vadd.f32 %v14653_v3, %v14465_v48  ;;  %v10941_v48 = vld [vmem:[%s16884_s6 + $0x170] sm:$0xff] }
 0x472   : > { %10780 = vmatmul.msk.f32.gmra.mxu1 %vm523_vm2, %v14648_v40  ;;  %10812 = vmatmul.msk.f32.gmra.mxu3 %vm523_vm2, %v14311_v63 }
 0x473   : > { %v5090_v40 = vadd.f32 %v14618_v53, %v4941_v14  ;;  %7033 = vmatpush.msra.mxu1 %v10941_v48 }
 0x474   : > { %v5349_v59 = vpop.f32.mrf.mxu2 }
 0x475   : > { %v5387_v32 = vadd.f32 %v5349_v59, %v5238_v37  ;;  %v5498_v42 = vpop.f32.mrf.mxu3  ;;  %v5239_v53 = vadd.f32 %v14620_v57, %v5090_v40  ;;  %v6335_v37 = vld [vmem:[#allocation3 + $0x1] sm:$0xff] }
 0x476   : > { %v14808_v39 = vpop.f32.mrf.mxu0  ;;  %v6183_v40 = vld [vmem:[#allocation3 + $0x8] sm:$0xff] }
 0x477   : > { %v14811_v46 = vadd.f32 %v5498_v42, %v5387_v32  ;;  %v14813_v63 = vpop.f32.mrf.mxu1 }
 0x479   : > { %10761 = vmatmul.msk.f32.gmra.mxu0 %vm523_vm2, %v14815_v34  ;;  %10793 = vmatmul.msk.f32.gmra.mxu2 %vm523_vm2, %v14337_v54  ;;  %v4942_v54 = vadd.f32 %v14653_v3, %v14490_v28  ;;  %v10868_v28 = vld [vmem:[%s16884_s6 + $0xa8] sm:$0xff] }
 0x47a   : > { %10781 = vmatmul.msk.f32.gmra.mxu1 %vm523_vm2, %v5711_v24  ;;  %10813 = vmatmul.msk.f32.gmra.mxu3 %vm523_vm2, %v14344_v10 }
 0x47b   : > { %v5091_v10 = vadd.f32 %v14644_v52, %v4942_v54  ;;  %v10892_v52 = vld [vmem:[%s16884_s6 + $0xe8] sm:$0xff]  ;;  %6572 = vmatpush.msra.mxu2 %v10868_v28 }
 0x47c   : > { %v5352_v49 = vpop.f32.mrf.mxu2  ;;  %6726 = vmatpush.msra.mxu3 %v10892_v52 }
 0x47d   : > { %v5388_v55 = vadd.f32 %v5352_v49, %v5239_v53  ;;  %v5501_v30 = vpop.f32.mrf.mxu3  ;;  %v5240_v57 = vadd.f32 %v14646_v0, %v5091_v10  ;;  %v10940_v0 = vld [vmem:[%s16884_s6 + $0x168] sm:$0xff]  ;;  %v6336_v49 = vld [vmem:[#allocation3 + $0x9] sm:$0xff] }
 0x47e   : > { %v14833_v17 = vpop.f32.mrf.mxu0  ;;  %7034 = vmatpush.msra.mxu1 %v10940_v0  ;;  %v17092_v10 = vld [vmem:[#allocation49_spill] sm:$0xff] }
 0x47f   : > { %v14836_v61 = vadd.f32 %v5501_v30, %v5388_v55  ;;  %v14838_v12 = vpop.f32.mrf.mxu1  ;;  %v10867_v55 = vld [vmem:[%s16884_s6 + $0xa0] sm:$0xff] }
 0x480   : > { %6573 = vmatpush.msra.mxu2 %v10867_v55 }
 0x481   : > { %10762 = vmatmul.msk.f32.gmra.mxu0 %vm523_vm2, %v14840_v1  ;;  %10794 = vmatmul.msk.f32.gmra.mxu2 %vm523_vm2, %v14370_v8  ;;  %v4943_v8 = vadd.f32 %v14653_v3, %v14512_v15  ;;  %v10916_v15 = vld [vmem:[%s16884_s6 + $0x128] sm:$0xff] }
 0x482   : > { %10782 = vmatmul.msk.f32.gmra.mxu1 %vm523_vm2, %v5712_v16  ;;  %10814 = vmatmul.msk.f32.gmra.mxu3 %vm523_vm2, %v14378_v50  ;;  %v4945_v16 = vadd.f32 %v14653_v3, %v17092_v10  ;;  %v10889_v10 = vld [vmem:[%s16884_s6 + $0xd0] sm:$0xff] }
 0x483   : > { %v5092_v7 = vadd.f32 %v14671_v56, %v4943_v8  ;;  %6880 = vmatpush.msra.mxu0 %v10916_v15 }
 0x484   : > { %v5355_v38 = vpop.f32.mrf.mxu2 }
 0x485   : > { %v5389_v36 = vadd.f32 %v5355_v38, %v5240_v57  ;;  %v5504_v41 = vpop.f32.mrf.mxu3  ;;  %v5241_v56 = vadd.f32 %v14674_v33, %v5092_v7  ;;  %v17091_v33 = vld [vmem:[#allocation46_spill] sm:$0xff]  ;;  %v5094_v38 = vadd.f32 %v14712_v35, %v4945_v16  ;;  %v10915_v35 = vld [vmem:[%s16884_s6 + $0x120] sm:$0xff] }
 0x486   : > { %v5632_v45 = vpop.f32.mrf.mxu0  ;;  %6881 = vmatpush.msra.mxu0 %v10915_v35  ;;  %v14964_v16 = vld [vmem:[#allocation3 + $0x30] sm:$0xff] }
 0x487   : > { %v14859_v5 = vadd.f32 %v5504_v41, %v5389_v36  ;;  %v5680_v50 = vadd.f32 %v5632_v45, %v14697_v21  ;;  %v5782_v6 = vpop.f32.mrf.mxu1  ;;  %v17090_v21 = vld [vmem:[#allocation44_spill] sm:$0xff]  ;;  %v14904_v41 = vld [vmem:[#allocation3 + $0x18] sm:$0xff]  ;;  %v5243_v7 = vadd.f32 %v14717_v27, %v5094_v38  ;;  %v17095_v27 = vld [vmem:[#allocation43_spill] sm:$0xff] }
 0x488   : > { %v4944_v14 = vadd.f32 %v14653_v3, %v17090_v21  ;;  %v10863_v38 = vld [vmem:[%s16884_s6 + $0x80] sm:$0xff] }
 0x489   : > { %v14862_v59 = vadd.f32 %v5782_v6, %v5680_v50  ;;  %10795 = vmatmul.msk.f32.gmra.mxu2 %vm523_vm2, %v14399_v19  ;;  %10823 = vmatmul.msk.f32.vlgmr.msrb.gmra.mxu0 %vm579_vm4, %v6182_v18  ;;  %v14912_v18 = vld [vmem:[#allocation3 + $0x19] sm:$0xff] }
 0x48a   : > { %10815 = vmatmul.msk.f32.gmra.mxu3 %vm523_vm2, %v14406_v47  ;;  %10847 = vmatmul.msk.f32.vlgmr.msrb.gmra.mxu1 %vm579_vm4, %v6335_v37  ;;  %v5093_v24 = vadd.f32 %v14694_v62, %v4944_v14  ;;  %v10891_v62 = vld [vmem:[%s16884_s6 + $0xe0] sm:$0xff]  ;;  %v17094_v6 = vld [vmem:[#allocation50_spill] sm:$0xff] }
 0x48b   : > { %6727 = vmatpush.msra.mxu3 %v10891_v62  ;;  %v4946_v37 = vadd.f32 %v14653_v3, %v17094_v6 }
 0x48c   : > { %v5358_v19 = vpop.f32.mrf.mxu2 }
 0x48d   : > { %v5390_v32 = vadd.f32 %v5358_v19, %v5241_v56  ;;  %v5507_v47 = vpop.f32.mrf.mxu3  ;;  %v5095_v56 = vadd.f32 %v14736_v2, %v4946_v37  ;;  %v10866_v2 = vld [vmem:[%s16884_s6 + $0x98] sm:$0xff] }
 0x48e   : > { %v5635_v42 = vpop.f32.mrf.mxu0  ;;  %6574 = vmatpush.msra.mxu2 %v10866_v2 }
 0x48f   : > { %v14880_v23 = vadd.f32 %v5507_v47, %v5390_v32  ;;  %v5681_v48 = vadd.f32 %v5635_v42, %v14715_v9  ;;  %v5785_v53 = vpop.f32.mrf.mxu1  ;;  %v5242_v9 = vadd.f32 %v14699_v26, %v5093_v24  ;;  %v17093_v26 = vld [vmem:[#allocation25_spill] sm:$0xff]  ;;  %v14931_v32 = vld [vmem:[#allocation3 + $0x20] sm:$0xff] }
 0x490   : > { %v14939_v42 = vld [vmem:[#allocation3 + $0x21] sm:$0xff] }
 0x491   : > { %v14883_v54 = vadd.f32 %v5785_v53, %v5681_v48  ;;  %10796 = vmatmul.msk.f32.gmra.mxu2 %vm523_vm2, %v17091_v33  ;;  %10824 = vmatmul.msk.f32.gmra.mxu0 %vm579_vm4, %v6183_v40  ;;  %v5244_v40 = vadd.f32 %v14741_v22, %v5095_v56  ;;  %v17096_v48 = vld [vmem:[#allocation26_spill] sm:$0xff]  ;;  %v10865_v22 = vld [vmem:[%s16884_s6 + $0x90] sm:$0xff] }
 0x492   : > { %10816 = vmatmul.msk.f32.gmra.mxu3 %vm523_vm2, %v14431_v13  ;;  %10848 = vmatmul.msk.f32.gmra.mxu1 %vm579_vm4, %v6336_v49  ;;  %v4947_v53 = vadd.f32 %v14653_v3, %v17096_v48  ;;  %v15003_v56 = vld [vmem:[#allocation3 + $0x38] sm:$0xff] }
 0x493   : > { %6575 = vmatpush.msra.mxu2 %v10865_v22  ;;  %v4950_v22 = vadd.f32 %v14653_v3, %v14669_v29 }
 0x494   : > { %v5361_v30 = vpop.f32.mrf.mxu2 }
 0x495   : > { %v5391_v28 = vadd.f32 %v5361_v30, %v5242_v9  ;;  %v5510_v52 = vpop.f32.mrf.mxu3 }
 0x496   : > { %v5638_v57 = vpop.f32.mrf.mxu0 }
 0x497   : > { %v14901_v13 = vadd.f32 %v5510_v52, %v5391_v28  ;;  %v5682_v8 = vadd.f32 %v5638_v57, %v14739_v31  ;;  %v5788_v36 = vpop.f32.mrf.mxu1  ;;  %v10939_v31 = vld [vmem:[%s16884_s6 + $0x160] sm:$0xff]  ;;  %v10864_v52 = vld [vmem:[%s16884_s6 + $0x88] sm:$0xff] }
 0x498   : > { %7035 = vmatpush.msra.mxu1 %v10939_v31  ;;  %v10888_v57 = vld [vmem:[%s16884_s6 + $0xc8] sm:$0xff]  ;;  %6576 = vmatpush.msra.mxu2 %v10864_v52  ;;  %v17098_v31 = vld [vmem:[#allocation47_spill] sm:$0xff] }
 0x499   : > { %v14906_v45 = vadd.f32 %v5788_v36, %v5682_v8  ;;  %10797 = vmatmul.msk.f32.gmra.mxu2 %vm523_vm2, %v17093_v26  ;;  %10825 = vmatmul.msk.f32.gmra.mxu0 %vm579_vm4, %v14904_v41  ;;  %v10887_v8 = vld [vmem:[%s16884_s6 + $0xc0] sm:$0xff]  ;;  %v10914_v36 = vld [vmem:[%s16884_s6 + $0x118] sm:$0xff] }
 0x49a   : > { %10817 = vmatmul.msk.f32.gmra.mxu3 %vm523_vm2, %v14450_v25  ;;  %10849 = vmatmul.msk.f32.gmra.mxu1 %vm579_vm4, %v14912_v18 }
 0x49b   : > { %6882 = vmatpush.msra.mxu0 %v10914_v36  ;;  %6577 = vmatpush.msra.mxu2 %v10863_v38 }
 0x49c   : > { %v5364_v50 = vpop.f32.mrf.mxu2 }
 0x49d   : > { %v5392_v25 = vadd.f32 %v5364_v50, %v5243_v7  ;;  %v5513_v15 = vpop.f32.mrf.mxu3  ;;  %v4948_v7 = vadd.f32 %v14653_v3, %v17098_v31 }
 0x49e   : > { %v5641_v0 = vpop.f32.mrf.mxu0 }
 0x49f   : > { %v14928_v19 = vadd.f32 %v5513_v15, %v5392_v25  ;;  %v5683_v21 = vadd.f32 %v5641_v0, %v14763_v20  ;;  %v5791_v14 = vpop.f32.mrf.mxu1  ;;  %v10890_v20 = vld [vmem:[%s16884_s6 + $0xd8] sm:$0xff]  ;;  %v5097_v25 = vadd.f32 %v14784_v4, %v4948_v7 }
 0x4a0   : > { %6728 = vmatpush.msra.mxu3 %v10890_v20 }
 0x4a1   : > { %v14933_v47 = vadd.f32 %v5791_v14, %v5683_v21  ;;  %10798 = vmatmul.msk.f32.gmra.mxu2 %vm523_vm2, %v17095_v27  ;;  %10826 = vmatmul.msk.f32.gmra.mxu0 %vm579_vm4, %v14931_v32  ;;  %v15011_v14 = vld [vmem:[#allocation3 + $0x39] sm:$0xff]  ;;  %v5246_v4 = vadd.f32 %v14789_v43, %v5097_v25  ;;  %v15031_v43 = vld [vmem:[#allocation3 + $0x49] sm:$0xff] }
 0x4a2   : > { %10818 = vmatmul.msk.f32.gmra.mxu3 %vm523_vm2, %v14475_v60  ;;  %10850 = vmatmul.msk.f32.gmra.mxu1 %vm579_vm4, %v14939_v42  ;;  %v5096_v60 = vadd.f32 %v14760_v58, %v4947_v53  ;;  %v17097_v58 = vld [vmem:[#allocation48_spill] sm:$0xff]  ;;  %v17099_v27 = vld [vmem:[#allocation51_spill] sm:$0xff] }
 0x4a3   : > { %6729 = vmatpush.msra.mxu3 %v10889_v10  ;;  %v4949_v2 = vadd.f32 %v14653_v3, %v17099_v27  ;;  %v15056_v3 = vld [vmem:[#allocation3 + $0x51] sm:$0xff] }
 0x4a4   : > { %v5367_v24 = vpop.f32.mrf.mxu2  ;;  %v5245_v26 = vadd.f32 %v14765_v51, %v5096_v60 }
 0x4a5   : > { %v5393_v49 = vadd.f32 %v5367_v24, %v5244_v40  ;;  %v5516_v33 = vpop.f32.mrf.mxu3  ;;  %6730 = vmatpush.msra.mxu3 %v10888_v57  ;;  %v5860_v24 = vld [vmem:[#allocation2 + $0x199] sm:$0xff]  ;;  %v5098_v48 = vadd.f32 %v14808_v39, %v4949_v2  ;;  %v5861_v57 = vld [vmem:[#allocation2 + $0x1a1] sm:$0xff] }
 0x4a6   : > { %v5644_v55 = vpop.f32.mrf.mxu0 }
 0x4a7   : > { %v14955_v62 = vadd.f32 %v5516_v33, %v5393_v49  ;;  %v5684_v9 = vadd.f32 %v5644_v55, %v14787_v11  ;;  %v5794_v30 = vpop.f32.mrf.mxu1  ;;  %v14972_v11 = vld [vmem:[#allocation3 + $0x31] sm:$0xff]  ;;  %6731 = vmatpush.msra.mxu3 %v10887_v8  ;;  %v15024_v55 = vld [vmem:[#allocation3 + $0x48] sm:$0xff]  ;;  %v5247_v39 = vadd.f32 %v14813_v63, %v5098_v48  ;;  %v5099_v63 = vadd.f32 %v14833_v17, %v4950_v22 }
 0x4a8   : > { %v6009_v33 = vld [vmem:[#allocation2 + $0x19a] sm:$0xff] }
 0x4a9   : > { %v14966_v28 = vadd.f32 %v5794_v30, %v5684_v9  ;;  %10799 = vmatmul.msk.f32.gmra.mxu2 %vm523_vm2, %v17097_v58  ;;  %10827 = vmatmul.msk.f32.gmra.mxu0 %vm579_vm4, %v14964_v16  ;;  %v10937_v9 = vld [vmem:[%s16884_s6 + $0x150] sm:$0xff]  ;;  %v5248_v29 = vadd.f32 %v14838_v12, %v5099_v63  ;;  %v10912_v12 = vld [vmem:[%s16884_s6 + $0x108] sm:$0xff]  ;;  %v15086_v48 = vld [vmem:[#allocation3 + $0x68] sm:$0xff] }
 0x4aa   : > { %10819 = vmatmul.msk.f32.gmra.mxu3 %vm523_vm2, %v14815_v34  ;;  %10851 = vmatmul.msk.f32.gmra.mxu1 %vm579_vm4, %v14972_v11  ;;  %v10938_v34 = vld [vmem:[%s16884_s6 + $0x158] sm:$0xff] }
 0x4ab   : > { %7036 = vmatpush.msra.mxu1 %v10938_v34  ;;  %v15049_v34 = vld [vmem:[#allocation3 + $0x50] sm:$0xff] }
 0x4ac   : > { %v5370_v35 = vpop.f32.mrf.mxu2 }
 0x4ad   : > { %v5394_v50 = vadd.f32 %v5370_v35, %v5245_v26  ;;  %v5519_v6 = vpop.f32.mrf.mxu3  ;;  %7037 = vmatpush.msra.mxu1 %v10937_v9  ;;  %v6010_v26 = vld [vmem:[#allocation2 + $0x1a2] sm:$0xff] }
 0x4ae   : > { %v5647_v37 = vpop.f32.mrf.mxu0 }
 0x4af   : > { %v15000_v51 = vadd.f32 %v5519_v6, %v5394_v50  ;;  %v5685_v15 = vadd.f32 %v5647_v37, %v14811_v46  ;;  %v5797_v0 = vpop.f32.mrf.mxu1  ;;  %v6489_v50 = vld [vmem:[#allocation3 + $0x2] sm:$0xff] }
 0x4b1   : > { %v15005_v21 = vadd.f32 %v5797_v0, %v5685_v15  ;;  %10800 = vmatmul.msk.f32.gmra.mxu2 %vm523_vm2, %v14658_v44  ;;  %10828 = vmatmul.msk.f32.gmra.mxu0 %vm579_vm4, %v15003_v56  ;;  %v15065_v15 = vld [vmem:[#allocation3 + $0x60] sm:$0xff] }
 0x4b2   : > { %10820 = vmatmul.msk.f32.gmra.mxu3 %vm523_vm2, %v14840_v1  ;;  %10852 = vmatmul.msk.f32.gmra.mxu1 %vm579_vm4, %v15011_v14 }
 0x4b4   : > { %v5373_v46 = vpop.f32.mrf.mxu2 }
 0x4b5   : > { %v5395_v20 = vadd.f32 %v5373_v46, %v5246_v4  ;;  %v5522_v40 = vpop.f32.mrf.mxu3  ;;  %v15071_v4 = vld [vmem:[#allocation3 + $0x61] sm:$0xff] }
 0x4b6   : > { %v5650_v44 = vpop.f32.mrf.mxu0 }
 0x4b7   : > { %v15021_v53 = vadd.f32 %v5522_v40, %v5395_v20  ;;  %v5686_v49 = vadd.f32 %v5650_v44, %v14836_v61  ;;  %v5800_v1 = vpop.f32.mrf.mxu1  ;;  %v10913_v61 = vld [vmem:[%s16884_s6 + $0x110] sm:$0xff]  ;;  %v6490_v40 = vld [vmem:[#allocation3 + $0xa] sm:$0xff] }
 0x4b8   : > { %6883 = vmatpush.msra.mxu0 %v10913_v61 }
 0x4b9   : > { %v15026_v60 = vadd.f32 %v5800_v1, %v5686_v49  ;;  %10801 = vmatmul.msk.f32.gmra.mxu2 %vm523_vm2, %v5860_v24  ;;  %10829 = vmatmul.msk.f32.gmra.mxu0 %vm579_vm4, %v15024_v55 }
 0x4ba   : > { %10821 = vmatmul.msk.f32.gmra.mxu3 %vm523_vm2, %v6009_v33  ;;  %10853 = vmatmul.msk.f32.gmra.mxu1 %vm579_vm4, %v15031_v43  ;;  %v15092_v33 = vld [vmem:[#allocation3 + $0x69] sm:$0xff] }
 0x4bb   : > { %6884 = vmatpush.msra.mxu0 %v10912_v12 }
 0x4bc   : > { %v5376_v30 = vpop.f32.mrf.mxu2 }
 0x4bd   : > { %v5396_v10 = vadd.f32 %v5376_v30, %v5247_v39  ;;  %v5525_v58 = vpop.f32.mrf.mxu3 }
 0x4be   : > { %v5653_v52 = vpop.f32.mrf.mxu0 }
 0x4bf   : > { %v15046_v38 = vadd.f32 %v5525_v58, %v5396_v10  ;;  %v5687_v8 = vadd.f32 %v5653_v52, %v14859_v5  ;;  %v5803_v36 = vpop.f32.mrf.mxu1  ;;  %v15102_v10 = vld [vmem:[#allocation3 + $0x78] sm:$0xff] }
 0x4c0   : > { %v15104_v58 = vld [vmem:[#allocation3 + $0x1a] sm:$0xff] }
 0x4c1   : > { %v15051_v35 = vadd.f32 %v5803_v36, %v5687_v8  ;;  %10802 = vmatmul.msk.f32.gmra.mxu2 %vm523_vm2, %v5861_v57  ;;  %10830 = vmatmul.msk.f32.gmra.mxu0 %vm579_vm4, %v15049_v34 }
 0x4c2   : > { %10822 = vmatmul.msk.f32.gmra.mxu3 %vm523_vm2, %v6010_v26  ;;  %10854 = vmatmul.msk.f32.gmra.mxu1 %vm579_vm4, %v15056_v3 }
 0x4c4   : > { %v5379_v17 = vpop.f32.mrf.mxu2 }
 0x4c5   : > { %v5397_v5 = vadd.f32 %v5379_v17, %v5248_v29  ;;  %v5528_v31 = vpop.f32.mrf.mxu3 }
 0x4c6   : > { %v5656_v7 = vpop.f32.mrf.mxu0 }
 0x4c7   : > { %v15062_v6 = vadd.f32 %v5528_v31, %v5397_v5  ;;  %v5688_v37 = vadd.f32 %v5656_v7, %v14880_v23  ;;  %v5806_v25 = vpop.f32.mrf.mxu1  ;;  %v10936_v23 = vld [vmem:[%s16884_s6 + $0x148] sm:$0xff]  ;;  %v15127_v31 = vld [vmem:[#allocation3 + $0x80] sm:$0xff] }
 0x4c8   : > { %7038 = vmatpush.msra.mxu1 %v10936_v23  ;;  %v15129_v7 = vld [vmem:[#allocation3 + $0x22] sm:$0xff] }
 0x4c9   : > { %v15067_v0 = vadd.f32 %v5806_v25, %v5688_v37  ;;  %10831 = vmatmul.msk.f32.gmra.mxu0 %vm579_vm4, %v15065_v15  ;;  %10871 = vmatmul.msk.f32.vlgmr.msra.gmra.mxu2 %vm579_vm4, %v6489_v50  ;;  %v15135_v25 = vld [vmem:[#allocation3 + $0x81] sm:$0xff] }
 0x4ca   : > { %10855 = vmatmul.msk.f32.gmra.mxu1 %vm579_vm4, %v15071_v4  ;;  %10895 = vmatmul.msk.f32.vlgmr.msra.gmra.mxu3 %vm579_vm4, %v14904_v41 }
 0x4cc   : > { %v5931_v46 = vpop.f32.mrf.mxu2 }
 0x4cd   : > { %v5979_v27 = vadd.f32 %v5931_v46, %v14862_v59  ;;  %v6080_v2 = vpop.f32.mrf.mxu3 }
 0x4ce   : > { %v5659_v20 = vpop.f32.mrf.mxu0 }
 0x4cf   : > { %v6128_v44 = vadd.f32 %v6080_v2, %v5979_v27  ;;  %v5689_v24 = vadd.f32 %v5659_v20, %v14901_v13  ;;  %v5809_v41 = vpop.f32.mrf.mxu1 }
 0x4d1   : > { %v6144_v49 = vmax.f32 %v6128_v44, 0.0  ;;  %v15088_v1 = vadd.f32 %v5809_v41, %v5689_v24  ;;  %10832 = vmatmul.msk.f32.gmra.mxu0 %vm579_vm4, %v15086_v48  ;;  %10872 = vmatmul.msk.f32.gmra.mxu2 %vm579_vm4, %v6490_v40  ;;  %v15152_v44 = vld [vmem:[#allocation3 + $0x90] sm:$0xff] }
 0x4d2   : > { %10856 = vmatmul.msk.f32.gmra.mxu1 %vm579_vm4, %v15092_v33  ;;  %10896 = vmatmul.msk.f32.gmra.mxu3 %vm579_vm4, %v14931_v32  ;;  %v15110_v32 = vld [vmem:[#allocation3 + $0x79] sm:$0xff] }
 0x4d3   : > { %6161 = vst.msk [vmem:[#allocation3 + $0xd9] sm:$0xff] %vm579_vm4, %v6144_v49  ;;  %v15154_v24 = vld [vmem:[#allocation3 + $0x32] sm:$0xff] }
 0x4d4   : > { %v5934_v59 = vpop.f32.mrf.mxu2 }
 0x4d5   : > { %v5980_v13 = vadd.f32 %v5934_v59, %v14883_v54  ;;  %v6083_v39 = vpop.f32.mrf.mxu3  ;;  %v10911_v54 = vld [vmem:[%s16884_s6 + $0x100] sm:$0xff] }
 0x4d6   : > { %v5662_v61 = vpop.f32.mrf.mxu0  ;;  %6885 = vmatpush.msra.mxu0 %v10911_v54  ;;  %v15160_v59 = vld [vmem:[#allocation3 + $0x91] sm:$0xff] }
 0x4d7   : > { %v6129_v9 = vadd.f32 %v6083_v39, %v5980_v13  ;;  %v5690_v30 = vadd.f32 %v5662_v61, %v14928_v19  ;;  %v5812_v22 = vpop.f32.mrf.mxu1  ;;  %v10935_v19 = vld [vmem:[%s16884_s6 + $0x140] sm:$0xff]  ;;  %v15177_v54 = vld [vmem:[#allocation3 + $0x98] sm:$0xff] }
 0x4d8   : > { %7039 = vmatpush.msra.mxu1 %v10935_v19  ;;  %v15179_v19 = vld [vmem:[#allocation3 + $0x3a] sm:$0xff] }
 0x4d9   : > { %v6145_v52 = vmax.f32 %v6129_v9, 0.0  ;;  %v15106_v57 = vadd.f32 %v5812_v22, %v5690_v30  ;;  %10833 = vmatmul.msk.f32.gmra.mxu0 %vm579_vm4, %v15102_v10  ;;  %10873 = vmatmul.msk.f32.gmra.mxu2 %vm579_vm4, %v15104_v58 }
 0x4da   : > { %10857 = vmatmul.msk.f32.gmra.mxu1 %vm579_vm4, %v15110_v32  ;;  %10897 = vmatmul.msk.f32.gmra.mxu3 %vm579_vm4, %v14964_v16 }
 0x4db   : > { %6162 = vst.msk [vmem:[#allocation3 + $0xe1] sm:$0xff] %vm579_vm4, %v6145_v52 }
 0x4dc   : > { %v5937_v63 = vpop.f32.mrf.mxu2 }
 0x4dd   : > { %v5981_v8 = vadd.f32 %v5937_v63, %v14906_v45  ;;  %v6086_v36 = vpop.f32.mrf.mxu3  ;;  %v10966_v45 = vld [vmem:[%s16884_s6 + $0x1b8] sm:$0xff] }
 0x4de   : > { %v5665_v26 = vpop.f32.mrf.mxu0  ;;  %7187 = vmatpush.msrb.mxu2 %v10966_v45 }
 0x4df   : > { %v6130_v29 = vadd.f32 %v6086_v36, %v5981_v8  ;;  %v5691_v17 = vadd.f32 %v5665_v26, %v14955_v62  ;;  %v5815_v5 = vpop.f32.mrf.mxu1  ;;  %v10990_v62 = vld [vmem:[%s16884_s6 + $0x1f8] sm:$0xff]  ;;  %v15185_v36 = vld [vmem:[#allocation3 + $0x99] sm:$0xff] }
 0x4e0   : > { %7341 = vmatpush.msrb.mxu3 %v10990_v62 }
 0x4e1   : > { %v6146_v50 = vmax.f32 %v6130_v29, 0.0  ;;  %v15131_v37 = vadd.f32 %v5815_v5, %v5691_v17  ;;  %10834 = vmatmul.msk.f32.gmra.mxu0 %vm579_vm4, %v15127_v31  ;;  %10874 = vmatmul.msk.f32.gmra.mxu2 %vm579_vm4, %v15129_v7 }
 0x4e2   : > { %10858 = vmatmul.msk.f32.gmra.mxu1 %vm579_vm4, %v15135_v25  ;;  %10898 = vmatmul.msk.f32.gmra.mxu3 %vm579_vm4, %v15003_v56 }
 0x4e3   : > { %6163 = vst.msk [vmem:[#allocation3 + $0xf1] sm:$0xff] %vm579_vm4, %v6146_v50 }
 0x4e4   : > { %v5940_v12 = vpop.f32.mrf.mxu2 }
 0x4e5   : > { %v5982_v23 = vadd.f32 %v5940_v12, %v14933_v47  ;;  %v6089_v46 = vpop.f32.mrf.mxu3  ;;  %v11014_v47 = vld [vmem:[%s16884_s6 + $0x238] sm:$0xff] }
 0x4e6   : > { %v5668_v27 = vpop.f32.mrf.mxu0  ;;  %7495 = vmatpush.msrb.mxu0 %v11014_v47  ;;  %v15202_v12 = vld [vmem:[#allocation3 + $0xa8] sm:$0xff] }
 0x4e7   : > { %v6131_v2 = vadd.f32 %v6089_v46, %v5982_v23  ;;  %v5692_v20 = vadd.f32 %v5668_v27, %v15000_v51  ;;  %v5818_v40 = vpop.f32.mrf.mxu1  ;;  %v7629_v51 = vld [vmem:[%s16884_s6 + $0x38] sm:$0xff] }
 0x4e8   : > { %7686 = vmatpush.msrb.mxu1 %v7629_v51  ;;  %v15204_v23 = vld [vmem:[#allocation3 + $0x4a] sm:$0xff] }
 0x4e9   : > { %v6147_v41 = vmax.f32 %v6131_v2, 0.0  ;;  %v15156_v49 = vadd.f32 %v5818_v40, %v5692_v20  ;;  %10835 = vmatmul.msk.f32.gmra.mxu0 %vm579_vm4, %v15152_v44  ;;  %10875 = vmatmul.msk.f32.gmra.mxu2 %vm579_vm4, %v15154_v24  ;;  %v15210_v2 = vld [vmem:[#allocation3 + $0xa9] sm:$0xff] }
 0x4ea   : > { %10859 = vmatmul.msk.f32.gmra.mxu1 %vm579_vm4, %v15160_v59  ;;  %10899 = vmatmul.msk.f32.gmra.mxu3 %vm579_vm4, %v15024_v55 }
 0x4eb   : > { %6164 = vst.msk [vmem:[#allocation3 + $0xf9] sm:$0xff] %vm579_vm4, %v6147_v41 }
 0x4ec   : > { %v5943_v13 = vpop.f32.mrf.mxu2 }
 0x4ed   : > { %v5983_v39 = vadd.f32 %v5943_v13, %v14966_v28  ;;  %v6092_v61 = vpop.f32.mrf.mxu3  ;;  %v10965_v28 = vld [vmem:[%s16884_s6 + $0x1b0] sm:$0xff] }
 0x4ee   : > { %v5671_v9 = vpop.f32.mrf.mxu0  ;;  %7188 = vmatpush.msrb.mxu2 %v10965_v28 }
 0x4ef   : > { %v6132_v30 = vadd.f32 %v6092_v61, %v5983_v39  ;;  %v5693_v22 = vadd.f32 %v5671_v9, %v15021_v53  ;;  %v5821_v52 = vpop.f32.mrf.mxu1  ;;  %v10989_v53 = vld [vmem:[%s16884_s6 + $0x1f0] sm:$0xff]  ;;  %v15227_v61 = vld [vmem:[#allocation3 + $0xb0] sm:$0xff] }
 0x4f0   : > { %7342 = vmatpush.msrb.mxu3 %v10989_v53  ;;  %v15229_v9 = vld [vmem:[#allocation3 + $0x52] sm:$0xff] }
 0x4f1   : > { %v6148_v63 = vmax.f32 %v6132_v30, 0.0  ;;  %v15181_v8 = vadd.f32 %v5821_v52, %v5693_v22  ;;  %10836 = vmatmul.msk.f32.gmra.mxu0 %vm579_vm4, %v15177_v54  ;;  %10876 = vmatmul.msk.f32.gmra.mxu2 %vm579_vm4, %v15179_v19  ;;  %v15235_v52 = vld [vmem:[#allocation3 + $0xb1] sm:$0xff] }
 0x4f2   : > { %10860 = vmatmul.msk.f32.gmra.mxu1 %vm579_vm4, %v15185_v36  ;;  %10900 = vmatmul.msk.f32.gmra.mxu3 %vm579_vm4, %v15049_v34 }
 0x4f3   : > { %6165 = vst.msk [vmem:[#allocation3 + $0x109] sm:$0xff] %vm579_vm4, %v6148_v63 }
 0x4f4   : > { %v5946_v26 = vpop.f32.mrf.mxu2 }
 0x4f5   : > { %v5984_v29 = vadd.f32 %v5946_v26, %v15005_v21  ;;  %v6095_v17 = vpop.f32.mrf.mxu3  ;;  %v11013_v21 = vld [vmem:[%s16884_s6 + $0x230] sm:$0xff] }
 0x4f6   : > { %v5674_v5 = vpop.f32.mrf.mxu0  ;;  %7496 = vmatpush.msrb.mxu0 %v11013_v21 }
 0x4f7   : > { %v6133_v50 = vadd.f32 %v6095_v17, %v5984_v29  ;;  %v5694_v45 = vadd.f32 %v5674_v5, %v15046_v38  ;;  %v5824_v62 = vpop.f32.mrf.mxu1  ;;  %v7628_v38 = vld [vmem:[%s16884_s6 + $0x30] sm:$0xff] }
 0x4f8   : > { %7687 = vmatpush.msrb.mxu1 %v7628_v38  ;;  %v15255_v5 = vld [vmem:[#allocation3 + $0x62] sm:$0xff] }
 0x4f9   : > { %v6149_v46 = vmax.f32 %v6133_v50, 0.0  ;;  %v15206_v27 = vadd.f32 %v5824_v62, %v5694_v45  ;;  %10837 = vmatmul.msk.f32.gmra.mxu0 %vm579_vm4, %v15202_v12  ;;  %10877 = vmatmul.msk.f32.gmra.mxu2 %vm579_vm4, %v15204_v23  ;;  %v7627_v45 = vld [vmem:[%s16884_s6 + $0x28] sm:$0xff] }
 0x4fa   : > { %10861 = vmatmul.msk.f32.gmra.mxu1 %vm579_vm4, %v15210_v2  ;;  %10901 = vmatmul.msk.f32.gmra.mxu3 %vm579_vm4, %v15065_v15 }
 0x4fb   : > { %6166 = vst.msk [vmem:[#allocation3 + $0x111] sm:$0xff] %vm579_vm4, %v6149_v46  ;;  %7688 = vmatpush.msrb.mxu1 %v7627_v45  ;;  %v15321_v45 = vld [vmem:[#allocation3 + $0x82] sm:$0xff] }
 0x4fc   : > { %v5949_v20 = vpop.f32.mrf.mxu2 }
 0x4fd   : > { %v5985_v40 = vadd.f32 %v5949_v20, %v15026_v60  ;;  %v6098_v41 = vpop.f32.mrf.mxu3  ;;  %v10964_v60 = vld [vmem:[%s16884_s6 + $0x1a8] sm:$0xff]  ;;  %v15277_v20 = vld [vmem:[#allocation3 + $0x6a] sm:$0xff] }
 0x4fe   : > { %v5677_v47 = vpop.f32.mrf.mxu0  ;;  %7189 = vmatpush.msrb.mxu2 %v10964_v60  ;;  %17100 = vst [vmem:[#allocation52_spill] sm:$0xff] %v15277_v20 }
 0x4ff   : > { %v6134_v51 = vadd.f32 %v6098_v41, %v5985_v40  ;;  %v5695_v13 = vadd.f32 %v5677_v47, %v15062_v6  ;;  %v5827_v39 = vpop.f32.mrf.mxu1  ;;  %v10988_v6 = vld [vmem:[%s16884_s6 + $0x1e8] sm:$0xff]  ;;  %v10987_v41 = vld [vmem:[%s16884_s6 + $0x1e0] sm:$0xff] }
 0x500   : > { %7343 = vmatpush.msrb.mxu3 %v10988_v6  ;;  %v7626_v6 = vld [vmem:[%s16884_s6 + $0x20] sm:$0xff] }
 0x501   : > { %v6150_v30 = vmax.f32 %v6134_v51, 0.0  ;;  %v15231_v22 = vadd.f32 %v5827_v39, %v5695_v13  ;;  %10838 = vmatmul.msk.f32.gmra.mxu0 %vm579_vm4, %v15227_v61  ;;  %10878 = vmatmul.msk.f32.gmra.mxu2 %vm579_vm4, %v15229_v9 }
 0x502   : > { %10862 = vmatmul.msk.f32.gmra.mxu1 %vm579_vm4, %v15235_v52  ;;  %10902 = vmatmul.msk.f32.gmra.mxu3 %vm579_vm4, %v15086_v48 }
 0x503   : > { %6167 = vst.msk [vmem:[#allocation3 + $0x121] sm:$0xff] %vm579_vm4, %v6150_v30  ;;  %7344 = vmatpush.msrb.mxu3 %v10987_v41  ;;  %v15299_v30 = vld [vmem:[#allocation3 + $0x7a] sm:$0xff]  ;;  %7689 = vmatpush.msrb.mxu1 %v7626_v6  ;;  %v11010_v6 = vld [vmem:[%s16884_s6 + $0x218] sm:$0xff] }
 0x504   : > { %v5952_v63 = vpop.f32.mrf.mxu2  ;;  %17101 = vst [vmem:[#allocation28_spill] sm:$0xff] %v15299_v30 }
 0x505   : > { %v5986_v28 = vadd.f32 %v5952_v63, %v15051_v35  ;;  %v6101_v53 = vpop.f32.mrf.mxu3  ;;  %v11012_v35 = vld [vmem:[%s16884_s6 + $0x228] sm:$0xff] }
 0x506   : > { %v15251_v26 = vpop.f32.mrf.mxu0  ;;  %7497 = vmatpush.msrb.mxu0 %v11012_v35 }
 0x507   : > { %v6135_v29 = vadd.f32 %v6101_v53, %v5986_v28  ;;  %v15253_v17 = vpop.f32.mrf.mxu1 }
 0x509   : > { %v6151_v50 = vmax.f32 %v6135_v29, 0.0  ;;  %10879 = vmatmul.msk.f32.gmra.mxu2 %vm579_vm4, %v15255_v5  ;;  %10919 = vmatmul.msk.f32.vlgmr.msra.gmra.mxu0 %vm579_vm4, %v14912_v18 }
 0x50a   : > { %10903 = vmatmul.msk.f32.gmra.mxu3 %vm579_vm4, %v15102_v10  ;;  %10943 = vmatmul.msk.f32.vlgmr.msra.gmra.mxu1 %vm579_vm4, %v15104_v58 }
 0x50b   : > { %6168 = vst.msk [vmem:[#allocation3 + $0x129] sm:$0xff] %vm579_vm4, %v6151_v50 }
 0x50c   : > { %v5955_v62 = vpop.f32.mrf.mxu2 }
 0x50d   : > { %v5987_v18 = vadd.f32 %v5955_v62, %v15067_v0  ;;  %v6104_v46 = vpop.f32.mrf.mxu3  ;;  %v10963_v0 = vld [vmem:[%s16884_s6 + $0x1a0] sm:$0xff] }
 0x50e   : > { %v15273_v21 = vpop.f32.mrf.mxu0  ;;  %7190 = vmatpush.msrb.mxu2 %v10963_v0 }
 0x50f   : > { %v6136_v38 = vadd.f32 %v6104_v46, %v5987_v18  ;;  %v15275_v58 = vpop.f32.mrf.mxu1  ;;  %v10986_v18 = vld [vmem:[%s16884_s6 + $0x1d8] sm:$0xff] }
 0x510   : > { %7345 = vmatpush.msrb.mxu3 %v10986_v18 }
 0x511   : > { %v6152_v40 = vmax.f32 %v6136_v38, 0.0  ;;  %10880 = vmatmul.msk.f32.gmra.mxu2 %vm579_vm4, %v15277_v20  ;;  %10920 = vmatmul.msk.f32.gmra.mxu0 %vm579_vm4, %v14939_v42 }
 0x512   : > { %10904 = vmatmul.msk.f32.gmra.mxu3 %vm579_vm4, %v15127_v31  ;;  %10944 = vmatmul.msk.f32.gmra.mxu1 %vm579_vm4, %v15129_v7 }
 0x513   : > { %6169 = vst.msk [vmem:[#allocation3 + $0x139] sm:$0xff] %vm579_vm4, %v6152_v40 }
 0x514   : > { %v5958_v47 = vpop.f32.mrf.mxu2 }
 0x515   : > { %v5988_v42 = vadd.f32 %v5958_v47, %v15088_v1  ;;  %v6107_v51 = vpop.f32.mrf.mxu3  ;;  %v11011_v1 = vld [vmem:[%s16884_s6 + $0x220] sm:$0xff] }
 0x516   : > { %v15295_v13 = vpop.f32.mrf.mxu0  ;;  %7498 = vmatpush.msrb.mxu0 %v11011_v1  ;;  %v10984_v1 = vld [vmem:[%s16884_s6 + $0x1c8] sm:$0xff] }
 0x517   : > { %v6137_v39 = vadd.f32 %v6107_v51, %v5988_v42  ;;  %v15297_v7 = vpop.f32.mrf.mxu1  ;;  %v15343_v42 = vld [vmem:[#allocation3 + $0x92] sm:$0xff]  ;;  %v10961_v51 = vld [vmem:[%s16884_s6 + $0x190] sm:$0xff] }
 0x518   : > { %7499 = vmatpush.msrb.mxu0 %v11010_v6  ;;  %v15399_v6 = vld [vmem:[#allocation3 + $0xaa] sm:$0xff] }
 0x519   : > { %v6153_v60 = vmax.f32 %v6137_v39, 0.0  ;;  %10881 = vmatmul.msk.f32.gmra.mxu2 %vm579_vm4, %v15299_v30  ;;  %10921 = vmatmul.msk.f32.gmra.mxu0 %vm579_vm4, %v14972_v11  ;;  %v10985_v39 = vld [vmem:[%s16884_s6 + $0x1d0] sm:$0xff] }
 0x51a   : > { %10905 = vmatmul.msk.f32.gmra.mxu3 %vm579_vm4, %v15152_v44  ;;  %10945 = vmatmul.msk.f32.gmra.mxu1 %vm579_vm4, %v15154_v24 }
 0x51b   : > { %6170 = vst.msk [vmem:[#allocation3 + $0x141] sm:$0xff] %vm579_vm4, %v6153_v60  ;;  %7346 = vmatpush.msrb.mxu3 %v10985_v39 }
 0x51c   : > { %v5961_v63 = vpop.f32.mrf.mxu2 }
 0x51d   : > { %v5989_v28 = vadd.f32 %v5961_v63, %v15106_v57  ;;  %v6110_v53 = vpop.f32.mrf.mxu3  ;;  %v10962_v57 = vld [vmem:[%s16884_s6 + $0x198] sm:$0xff]  ;;  %7347 = vmatpush.msrb.mxu3 %v10984_v1 }
 0x51e   : > { %v15317_v29 = vpop.f32.mrf.mxu0  ;;  %7191 = vmatpush.msrb.mxu2 %v10962_v57 }
 0x51f   : > { %v6138_v50 = vadd.f32 %v6110_v53, %v5989_v28  ;;  %v15319_v35 = vpop.f32.mrf.mxu1  ;;  %v10959_v28 = vld [vmem:[%s16884_s6 + $0x180] sm:$0xff] }
 0x520   : > { %7192 = vmatpush.msrb.mxu2 %v10961_v51  ;;  %v10983_v53 = vld [vmem:[%s16884_s6 + $0x1c0] sm:$0xff] }
 0x521   : > { %v6154_v62 = vmax.f32 %v6138_v50, 0.0  ;;  %10882 = vmatmul.msk.f32.gmra.mxu2 %vm579_vm4, %v15321_v45  ;;  %10922 = vmatmul.msk.f32.gmra.mxu0 %vm579_vm4, %v15011_v14  ;;  %v7625_v50 = vld [vmem:[%s16884_s6 + $0x18] sm:$0xff] }
 0x522   : > { %10906 = vmatmul.msk.f32.gmra.mxu3 %vm579_vm4, %v15177_v54  ;;  %10946 = vmatmul.msk.f32.gmra.mxu1 %vm579_vm4, %v15179_v19 }
 0x523   : > { %6171 = vst.msk [vmem:[#allocation3 + $0x151] sm:$0xff] %vm579_vm4, %v6154_v62  ;;  %7690 = vmatpush.msrb.mxu1 %v7625_v50  ;;  %7348 = vmatpush.msrb.mxu3 %v10983_v53  ;;  %v7624_v53 = vld [vmem:[%s16884_s6 + $0x10] sm:$0xff] }
 0x524   : > { %v5964_v46 = vpop.f32.mrf.mxu2 }
 0x525   : > { %v5990_v38 = vadd.f32 %v5964_v46, %v15131_v37  ;;  %v6113_v40 = vpop.f32.mrf.mxu3  ;;  %v10960_v37 = vld [vmem:[%s16884_s6 + $0x188] sm:$0xff]  ;;  %7691 = vmatpush.msrb.mxu1 %v7624_v53 }
 0x526   : > { %v15339_v0 = vpop.f32.mrf.mxu0  ;;  %7193 = vmatpush.msrb.mxu2 %v10960_v37 }
 0x527   : > { %v6139_v41 = vadd.f32 %v6113_v40, %v5990_v38  ;;  %v15341_v47 = vpop.f32.mrf.mxu1  ;;  %v15383_v40 = vld [vmem:[#allocation3 + $0x9a] sm:$0xff] }
 0x528   : > { %7194 = vmatpush.msrb.mxu2 %v10959_v28  ;;  %v15403_v28 = vld [vmem:[#allocation3 + $0xc0] sm:$0xff] }
 0x529   : > { %v6155_v60 = vmax.f32 %v6139_v41, 0.0  ;;  %10883 = vmatmul.msk.f32.gmra.mxu2 %vm579_vm4, %v15343_v42  ;;  %10923 = vmatmul.msk.f32.gmra.mxu0 %vm579_vm4, %v15031_v43 }
 0x52a   : > { %10907 = vmatmul.msk.f32.gmra.mxu3 %vm579_vm4, %v15202_v12  ;;  %10947 = vmatmul.msk.f32.gmra.mxu1 %vm579_vm4, %v15204_v23 }
 0x52b   : > { %6172 = vst.msk [vmem:[#allocation3 + $0x159] sm:$0xff] %vm579_vm4, %v6155_v60 }
 0x52c   : > { %v5967_v63 = vpop.f32.mrf.mxu2 }
 0x52d   : > { %v5991_v62 = vadd.f32 %v5967_v63, %v15156_v49  ;;  %v6116_v57 = vpop.f32.mrf.mxu3 }
 0x52e   : > { %v15379_v18 = vpop.f32.mrf.mxu0 }
 0x52f   : > { %v6140_v46 = vadd.f32 %v6116_v57, %v5991_v62  ;;  %v15381_v38 = vpop.f32.mrf.mxu1 }
 0x531   : > { %v6156_v41 = vmax.f32 %v6140_v46, 0.0  ;;  %10884 = vmatmul.msk.f32.gmra.mxu2 %vm579_vm4, %v15383_v40  ;;  %10924 = vmatmul.msk.f32.gmra.mxu0 %vm579_vm4, %v15056_v3 }
 0x532   : > { %10908 = vmatmul.msk.f32.gmra.mxu3 %vm579_vm4, %v15227_v61  ;;  %10948 = vmatmul.msk.f32.gmra.mxu1 %vm579_vm4, %v15229_v9 }
 0x533   : > { %6173 = vst.msk [vmem:[#allocation3 + $0x169] sm:$0xff] %vm579_vm4, %v6156_v41 }
 0x534   : > { %v5970_v49 = vpop.f32.mrf.mxu2 }
 0x535   : > { %v5992_v51 = vadd.f32 %v5970_v49, %v15181_v8  ;;  %v6119_v39 = vpop.f32.mrf.mxu3  ;;  %v11009_v8 = vld [vmem:[%s16884_s6 + $0x210] sm:$0xff] }
 0x536   : > { %v15395_v60 = vpop.f32.mrf.mxu0  ;;  %7500 = vmatpush.msrb.mxu0 %v11009_v8 }
 0x537   : > { %v6141_v37 = vadd.f32 %v6119_v39, %v5992_v51  ;;  %v15397_v1 = vpop.f32.mrf.mxu1  ;;  %v15423_v51 = vld [vmem:[#allocation3 + $0xb2] sm:$0xff] }
 0x539   : > { %v6157_v63 = vmax.f32 %v6141_v37, 0.0  ;;  %10885 = vmatmul.msk.f32.gmra.mxu2 %vm579_vm4, %v15399_v6  ;;  %10925 = vmatmul.msk.f32.gmra.mxu0 %vm579_vm4, %v15071_v4  ;;  %v15427_v37 = vld [vmem:[#allocation3 + $0xc8] sm:$0xff] }
 0x53a   : > { %10909 = vmatmul.msk.f32.gmra.mxu3 %vm579_vm4, %v15403_v28  ;;  %10949 = vmatmul.msk.f32.gmra.mxu1 %vm579_vm4, %v15255_v5 }
 0x53b   : > { %6174 = vst.msk [vmem:[#allocation3 + $0x171] sm:$0xff] %vm579_vm4, %v6157_v63 }
 0x53c   : > { %v5973_v50 = vpop.f32.mrf.mxu2 }
 0x53d   : > { %v5993_v62 = vadd.f32 %v5973_v50, %v15206_v27  ;;  %v6122_v57 = vpop.f32.mrf.mxu3  ;;  %v15438_v27 = vld [vmem:[%s16885_s7] ss:$0 sm:$0xff] }
 0x53e   : > { %v15419_v46 = vpop.f32.mrf.mxu0 }
 0x53f   : > { %v6142_v41 = vadd.f32 %v6122_v57, %v5993_v62  ;;  %v15421_v49 = vpop.f32.mrf.mxu1  ;;  %v6319_v62 = vadd.f32 %v15438_v27, %v15251_v26  ;;  %v7623_v26 = vld [vmem:[%s16884_s6 + $0x8] sm:$0xff] }
 0x540   : > { %7692 = vmatpush.msrb.mxu1 %v7623_v26  ;;  %v6321_v26 = vadd.f32 %v15438_v27, %v15295_v13 }
 0x541   : > { %v6158_v39 = vmax.f32 %v6142_v41, 0.0  ;;  %10886 = vmatmul.msk.f32.gmra.mxu2 %vm579_vm4, %v15423_v51  ;;  %10926 = vmatmul.msk.f32.gmra.mxu0 %vm579_vm4, %v15092_v33 }
 0x542   : > { %10910 = vmatmul.msk.f32.gmra.mxu3 %vm579_vm4, %v15427_v37  ;;  %10950 = vmatmul.msk.f32.gmra.mxu1 %vm579_vm4, %v15277_v20 }
 0x543   : > { %6175 = vst.msk [vmem:[#allocation3 + $0x181] sm:$0xff] %vm579_vm4, %v6158_v39  ;;  %v6473_v39 = vadd.f32 %v15253_v17, %v6319_v62 }
 0x544   : > { %v5976_v63 = vpop.f32.mrf.mxu2 }
 0x545   : > { %v5994_v8 = vadd.f32 %v5976_v63, %v15231_v22  ;;  %v6125_v53 = vpop.f32.mrf.mxu3  ;;  %v11008_v22 = vld [vmem:[%s16884_s6 + $0x208] sm:$0xff] }
 0x546   : > { %v15442_v50 = vpop.f32.mrf.mxu0  ;;  %7501 = vmatpush.msrb.mxu0 %v11008_v22 }
 0x547   : > { %v6143_v57 = vadd.f32 %v6125_v53, %v5994_v8  ;;  %v15446_v41 = vpop.f32.mrf.mxu1 }
 0x549   : > { %v6159_v20 = vmax.f32 %v6143_v57, 0.0  ;;  %10927 = vmatmul.msk.f32.gmra.mxu0 %vm579_vm4, %v15110_v32  ;;  %10967 = vmatmul.msk.f32.vlgmr.msrb.gmra.mxu2 %vm579_vm4, %v14964_v16 }
 0x54a   : > { %10951 = vmatmul.msk.f32.gmra.mxu1 %vm579_vm4, %v15299_v30  ;;  %10991 = vmatmul.msk.f32.vlgmr.msrb.gmra.mxu3 %vm579_vm4, %v14972_v11  ;;  %v6320_v11 = vadd.f32 %v15438_v27, %v15273_v21 }
 0x54b   : > { %6176 = vst.msk [vmem:[#allocation3 + $0x189] sm:$0xff] %vm579_vm4, %v6159_v20 }
 0x54c   : > { %v6579_v16 = vpop.f32.mrf.mxu2  ;;  %v6474_v17 = vadd.f32 %v15275_v58, %v6320_v11  ;;  %v6475_v58 = vadd.f32 %v15297_v7, %v6321_v26  ;;  %v11054_v7 = vld [vmem:[%s16884_s6 + $0x78] sm:$0xff] }
 0x54d   : > { %v6627_v63 = vadd.f32 %v6579_v16, %v6473_v39  ;;  %v6733_v8 = vpop.f32.mrf.mxu3  ;;  %7839 = vmatpush.msra.mxu2 %v11054_v7 }
 0x54e   : > { %v15464_v53 = vpop.f32.mrf.mxu0 }
 0x54f   : > { %v15468_v57 = vadd.f32 %v6733_v8, %v6627_v63  ;;  %v15470_v30 = vpop.f32.mrf.mxu1 }
 0x551   : > { %10928 = vmatmul.msk.f32.gmra.mxu0 %vm579_vm4, %v15135_v25  ;;  %10968 = vmatmul.msk.f32.gmra.mxu2 %vm579_vm4, %v15003_v56  ;;  %v11007_v56 = vld [vmem:[%s16884_s6 + $0x200] sm:$0xff] }
 0x552   : > { %10952 = vmatmul.msk.f32.gmra.mxu1 %vm579_vm4, %v15321_v45  ;;  %10992 = vmatmul.msk.f32.gmra.mxu3 %vm579_vm4, %v15011_v14  ;;  %v7622_v14 = vld [vmem:[%s16884_s6] sm:$0xff] }
 0x553   : > { %7502 = vmatpush.msrb.mxu0 %v11007_v56  ;;  %7693 = vmatpush.msrb.mxu1 %v7622_v14  ;;  %v6323_v56 = vadd.f32 %v15438_v27, %v15339_v0 }
 0x554   : > { %v6582_v20 = vpop.f32.mrf.mxu2 }
 0x555   : > { %v6628_v21 = vadd.f32 %v6582_v20, %v6474_v17  ;;  %v6736_v62 = vpop.f32.mrf.mxu3  ;;  %v6477_v0 = vadd.f32 %v15341_v47, %v6323_v56  ;;  %v11053_v47 = vld [vmem:[%s16884_s6 + $0x70] sm:$0xff] }
 0x556   : > { %v15481_v22 = vpop.f32.mrf.mxu0  ;;  %7840 = vmatpush.msra.mxu2 %v11053_v47 }
 0x557   : > { %v15485_v39 = vadd.f32 %v6736_v62, %v6628_v21  ;;  %v15487_v16 = vpop.f32.mrf.mxu1 }
 0x559   : > { %10929 = vmatmul.msk.f32.gmra.mxu0 %vm579_vm4, %v15160_v59  ;;  %10969 = vmatmul.msk.f32.gmra.mxu2 %vm579_vm4, %v15024_v55 }
 0x55a   : > { %10953 = vmatmul.msk.f32.gmra.mxu1 %vm579_vm4, %v15343_v42  ;;  %10993 = vmatmul.msk.f32.gmra.mxu3 %vm579_vm4, %v15031_v43  ;;  %v6322_v43 = vadd.f32 %v15438_v27, %v15317_v29  ;;  %v11078_v29 = vld [vmem:[%s16884_s6 + $0xb8] sm:$0xff] }
 0x55b   : > { %7992 = vmatpush.msra.mxu3 %v11078_v29 }
 0x55c   : > { %v6585_v13 = vpop.f32.mrf.mxu2  ;;  %v6476_v20 = vadd.f32 %v15319_v35, %v6322_v43  ;;  %v11126_v35 = vld [vmem:[%s16884_s6 + $0x138] sm:$0xff] }
 0x55d   : > { %v6629_v55 = vadd.f32 %v6585_v13, %v6475_v58  ;;  %v6739_v63 = vpop.f32.mrf.mxu3  ;;  %8298 = vmatpush.msra.mxu1 %v11126_v35  ;;  %v11125_v35 = vld [vmem:[%s16884_s6 + $0x130] sm:$0xff] }
 0x55e   : > { %v15504_v8 = vpop.f32.mrf.mxu0 }
 0x55f   : > { %v15508_v11 = vadd.f32 %v6739_v63, %v6629_v55  ;;  %v15510_v17 = vpop.f32.mrf.mxu1  ;;  %8299 = vmatpush.msra.mxu1 %v11125_v35 }
 0x561   : > { %10930 = vmatmul.msk.f32.gmra.mxu0 %vm579_vm4, %v15185_v36  ;;  %10970 = vmatmul.msk.f32.gmra.mxu2 %vm579_vm4, %v15049_v34 }
 0x562   : > { %10954 = vmatmul.msk.f32.gmra.mxu1 %vm579_vm4, %v15383_v40  ;;  %10994 = vmatmul.msk.f32.gmra.mxu3 %vm579_vm4, %v15056_v3  ;;  %v11102_v3 = vld [vmem:[%s16884_s6 + $0xf8] sm:$0xff] }
 0x563   : > { %8145 = vmatpush.msra.mxu0 %v11102_v3 }
 0x564   : > { %v6588_v21 = vpop.f32.mrf.mxu2 }
 0x565   : > { %v6630_v34 = vadd.f32 %v6588_v21, %v6476_v20  ;;  %v6742_v62 = vpop.f32.mrf.mxu3 }
 0x566   : > { %v15527_v26 = vpop.f32.mrf.mxu0 }
 0x567   : > { %v15531_v14 = vadd.f32 %v6742_v62, %v6630_v34  ;;  %v15533_v58 = vpop.f32.mrf.mxu1  ;;  %v6325_v62 = vadd.f32 %v15438_v27, %v15395_v60  ;;  %v11101_v60 = vld [vmem:[%s16884_s6 + $0xf0] sm:$0xff] }
 0x568   : > { %8146 = vmatpush.msra.mxu0 %v11101_v60  ;;  %v6327_v60 = vadd.f32 %v15438_v27, %v15442_v50 }
 0x569   : > { %10931 = vmatmul.msk.f32.gmra.mxu0 %vm579_vm4, %v15210_v2  ;;  %10971 = vmatmul.msk.f32.gmra.mxu2 %vm579_vm4, %v15065_v15 }
 0x56a   : > { %10955 = vmatmul.msk.f32.gmra.mxu1 %vm579_vm4, %v15399_v6  ;;  %10995 = vmatmul.msk.f32.gmra.mxu3 %vm579_vm4, %v15071_v4  ;;  %v6324_v4 = vadd.f32 %v15438_v27, %v15379_v18  ;;  %v11077_v18 = vld [vmem:[%s16884_s6 + $0xb0] sm:$0xff]  ;;  %v6481_v50 = vadd.f32 %v15446_v41, %v6327_v60  ;;  %v11051_v41 = vld [vmem:[%s16884_s6 + $0x60] sm:$0xff] }
 0x56b   : > { %7993 = vmatpush.msra.mxu3 %v11077_v18  ;;  %v15608_v18 = vld [vmem:[#allocation3 + $0xc9] sm:$0xff] }
 0x56c   : > { %v6591_v13 = vpop.f32.mrf.mxu2  ;;  %v6478_v29 = vadd.f32 %v15381_v38, %v6324_v4  ;;  %v15585_v38 = vld [vmem:[#allocation3 + $0xc2] sm:$0xff] }
 0x56d   : > { %v6631_v15 = vadd.f32 %v6591_v13, %v6477_v0  ;;  %v6745_v55 = vpop.f32.mrf.mxu3  ;;  %v6479_v0 = vadd.f32 %v15397_v1, %v6325_v62  ;;  %v15612_v1 = vld [vmem:[#allocation3 + $0xca] sm:$0xff] }
 0x56e   : > { %v15550_v63 = vpop.f32.mrf.mxu0 }
 0x56f   : > { %v15554_v43 = vadd.f32 %v6745_v55, %v6631_v15  ;;  %v15556_v7 = vpop.f32.mrf.mxu1 }
 0x571   : > { %10932 = vmatmul.msk.f32.gmra.mxu0 %vm579_vm4, %v15235_v52  ;;  %10972 = vmatmul.msk.f32.gmra.mxu2 %vm579_vm4, %v15086_v48 }
 0x572   : > { %10956 = vmatmul.msk.f32.gmra.mxu1 %vm579_vm4, %v15423_v51  ;;  %10996 = vmatmul.msk.f32.gmra.mxu3 %vm579_vm4, %v15092_v33  ;;  %v15581_v33 = vld [vmem:[#allocation3 + $0xc1] sm:$0xff] }
 0x574   : > { %v6594_v20 = vpop.f32.mrf.mxu2 }
 0x575   : > { %v6632_v48 = vadd.f32 %v6594_v20, %v6478_v29  ;;  %v6748_v21 = vpop.f32.mrf.mxu3  ;;  %v11052_v29 = vld [vmem:[%s16884_s6 + $0x68] sm:$0xff] }
 0x576   : > { %v15573_v34 = vpop.f32.mrf.mxu0  ;;  %7841 = vmatpush.msra.mxu2 %v11052_v29 }
 0x577   : > { %v15577_v56 = vadd.f32 %v6748_v21, %v6632_v48  ;;  %v15579_v3 = vpop.f32.mrf.mxu1 }
 0x578   : > { %7842 = vmatpush.msra.mxu2 %v11051_v41 }
 0x579   : > { %10933 = vmatmul.msk.f32.gmra.mxu0 %vm579_vm4, %v15581_v33  ;;  %10973 = vmatmul.msk.f32.gmra.mxu2 %vm579_vm4, %v15102_v10 }
 0x57a   : > { %10957 = vmatmul.msk.f32.gmra.mxu1 %vm579_vm4, %v15585_v38  ;;  %10997 = vmatmul.msk.f32.gmra.mxu3 %vm579_vm4, %v15110_v32  ;;  %v6326_v32 = vadd.f32 %v15438_v27, %v15419_v46  ;;  %v11076_v46 = vld [vmem:[%s16884_s6 + $0xa8] sm:$0xff] }
 0x57b   : > { %7994 = vmatpush.msra.mxu3 %v11076_v46 }
 0x57c   : > { %v6597_v13 = vpop.f32.mrf.mxu2  ;;  %v6480_v20 = vadd.f32 %v15421_v49, %v6326_v32  ;;  %v11124_v49 = vld [vmem:[%s16884_s6 + $0x128] sm:$0xff] }
 0x57d   : > { %v6633_v10 = vadd.f32 %v6597_v13, %v6479_v0  ;;  %v6751_v15 = vpop.f32.mrf.mxu3  ;;  %8300 = vmatpush.msra.mxu1 %v11124_v49 }
 0x57e   : > { %v15600_v55 = vpop.f32.mrf.mxu0 }
 0x57f   : > { %v15604_v4 = vadd.f32 %v6751_v15, %v6633_v10  ;;  %v15606_v47 = vpop.f32.mrf.mxu1 }
 0x581   : > { %10934 = vmatmul.msk.f32.gmra.mxu0 %vm579_vm4, %v15608_v18  ;;  %10974 = vmatmul.msk.f32.gmra.mxu2 %vm579_vm4, %v15127_v31 }
 0x582   : > { %10958 = vmatmul.msk.f32.gmra.mxu1 %vm579_vm4, %v15612_v1  ;;  %10998 = vmatmul.msk.f32.gmra.mxu3 %vm579_vm4, %v15135_v25  ;;  %v11100_v25 = vld [vmem:[%s16884_s6 + $0xe8] sm:$0xff] }
 0x583   : > { %8147 = vmatpush.msra.mxu0 %v11100_v25 }
 0x584   : > { %v6600_v48 = vpop.f32.mrf.mxu2 }
 0x585   : > { %v6634_v31 = vadd.f32 %v6600_v48, %v6480_v20  ;;  %v6754_v21 = vpop.f32.mrf.mxu3  ;;  %v6329_v48 = vadd.f32 %v15438_v27, %v15481_v22  ;;  %v11099_v22 = vld [vmem:[%s16884_s6 + $0xe0] sm:$0xff] }
 0x586   : > { %v15627_v62 = vpop.f32.mrf.mxu0  ;;  %8148 = vmatpush.msra.mxu0 %v11099_v22  ;;  %v11122_v22 = vld [vmem:[%s16884_s6 + $0x118] sm:$0xff] }
 0x587   : > { %v15631_v35 = vadd.f32 %v6754_v21, %v6634_v31  ;;  %v15633_v0 = vpop.f32.mrf.mxu1  ;;  %v11123_v21 = vld [vmem:[%s16884_s6 + $0x120] sm:$0xff] }
 0x588   : > { %8301 = vmatpush.msra.mxu1 %v11123_v21 }
 0x589   : > { %10975 = vmatmul.msk.f32.gmra.mxu2 %vm579_vm4, %v15152_v44  ;;  %11015 = vmatmul.msk.f32.vlgmr.msrb.gmra.mxu0 %vm579_vm4, %v15154_v24 }
 0x58a   : > { %10999 = vmatmul.msk.f32.gmra.mxu3 %vm579_vm4, %v15160_v59  ;;  %11031 = vmatmul.msk.f32.vlgmr.msrb.gmra.mxu1 %vm579_vm4, %v15403_v28  ;;  %v6328_v59 = vadd.f32 %v15438_v27, %v15464_v53  ;;  %v11075_v53 = vld [vmem:[%s16884_s6 + $0xa0] sm:$0xff] }
 0x58b   : > { %7995 = vmatpush.msra.mxu3 %v11075_v53  ;;  %v6331_v53 = vadd.f32 %v15438_v27, %v15527_v26  ;;  %v11048_v26 = vld [vmem:[%s16884_s6 + $0x48] sm:$0xff]  ;;  %8302 = vmatpush.msra.mxu1 %v11122_v22 }
 0x58c   : > { %v6603_v44 = vpop.f32.mrf.mxu2  ;;  %v6482_v29 = vadd.f32 %v15470_v30, %v6328_v59  ;;  %v15685_v30 = vld [vmem:[#allocation3 + $0xd8] sm:$0xff] }
 0x58d   : > { %v6635_v24 = vadd.f32 %v6603_v44, %v6481_v50  ;;  %v6757_v13 = vpop.f32.mrf.mxu3  ;;  %v6485_v21 = vadd.f32 %v15533_v58, %v6331_v53  ;;  %v17107_v58 = vld [vmem:[#allocation52_spill] sm:$0xff] }
 0x58e   : > { %v15650_v10 = vpop.f32.mrf.mxu0 }
 0x58f   : > { %v15654_v15 = vadd.f32 %v6757_v13, %v6635_v24  ;;  %v15656_v32 = vpop.f32.mrf.mxu1  ;;  %v11050_v24 = vld [vmem:[%s16884_s6 + $0x58] sm:$0xff] }
 0x590   : > { %7843 = vmatpush.msra.mxu2 %v11050_v24 }
 0x591   : > { %17102 = vst [vmem:[#allocation33_spill] sm:$0xff] %v15654_v15  ;;  %10976 = vmatmul.msk.f32.gmra.mxu2 %vm579_vm4, %v15177_v54  ;;  %11016 = vmatmul.msk.f32.gmra.mxu0 %vm579_vm4, %v15179_v19  ;;  %v16062_v15 = vld [vmem:[#allocation3 + $0x129] sm:$0xff] }
 0x592   : > { %11000 = vmatmul.msk.f32.gmra.mxu3 %vm579_vm4, %v15185_v36  ;;  %11032 = vmatmul.msk.f32.gmra.mxu1 %vm579_vm4, %v15427_v37 }
 0x594   : > { %v6606_v54 = vpop.f32.mrf.mxu2 }
 0x595   : > { %v6636_v19 = vadd.f32 %v6606_v54, %v6482_v29  ;;  %v6760_v46 = vpop.f32.mrf.mxu3  ;;  %v11049_v54 = vld [vmem:[%s16884_s6 + $0x50] sm:$0xff] }
 0x596   : > { %v15673_v20 = vpop.f32.mrf.mxu0  ;;  %7844 = vmatpush.msra.mxu2 %v11049_v54 }
 0x597   : > { %v15677_v36 = vadd.f32 %v6760_v46, %v6636_v19  ;;  %v15679_v31 = vpop.f32.mrf.mxu1  ;;  %v15737_v19 = vld [vmem:[#allocation3 + $0xf0] sm:$0xff]  ;;  %v11072_v46 = vld [vmem:[%s16884_s6 + $0x88] sm:$0xff] }
 0x598   : > { %7845 = vmatpush.msra.mxu2 %v11048_v26  ;;  %v15795_v26 = vld [vmem:[#allocation3 + $0xd9] sm:$0xff] }
 0x599   : > { %17103 = vst [vmem:[#allocation31_spill] sm:$0xff] %v15677_v36  ;;  %10977 = vmatmul.msk.f32.gmra.mxu2 %vm579_vm4, %v15202_v12  ;;  %11017 = vmatmul.msk.f32.gmra.mxu0 %vm579_vm4, %v15204_v23  ;;  %v6483_v12 = vadd.f32 %v15487_v16, %v6329_v48  ;;  %v15710_v16 = vld [vmem:[#allocation3 + $0xe0] sm:$0xff]  ;;  %v11047_v48 = vld [vmem:[%s16884_s6 + $0x40] sm:$0xff] }
 0x59a   : > { %11001 = vmatmul.msk.f32.gmra.mxu3 %vm579_vm4, %v15210_v2  ;;  %11033 = vmatmul.msk.f32.gmra.mxu1 %vm579_vm4, %v15685_v30  ;;  %v6330_v2 = vadd.f32 %v15438_v27, %v15504_v8  ;;  %v11074_v8 = vld [vmem:[%s16884_s6 + $0x98] sm:$0xff] }
 0x59b   : > { %7996 = vmatpush.msra.mxu3 %v11074_v8  ;;  %7846 = vmatpush.msra.mxu2 %v11047_v48  ;;  %v11121_v48 = vld [vmem:[%s16884_s6 + $0x110] sm:$0xff]  ;;  %v15989_v36 = vld [vmem:[#allocation3 + $0x109] sm:$0xff] }
 0x59c   : > { %v6609_v23 = vpop.f32.mrf.mxu2  ;;  %8303 = vmatpush.msra.mxu1 %v11121_v48 }
 0x59d   : > { %v6637_v60 = vadd.f32 %v6609_v23, %v6483_v12  ;;  %v6763_v25 = vpop.f32.mrf.mxu3 }
 0x59e   : > { %v15698_v49 = vpop.f32.mrf.mxu0 }
 0x59f   : > { %v15702_v50 = vadd.f32 %v6763_v25, %v6637_v60  ;;  %v15704_v44 = vpop.f32.mrf.mxu1 }
 0x5a1   : > { %17104 = vst [vmem:[#allocation29_spill] sm:$0xff] %v15702_v50  ;;  %10978 = vmatmul.msk.f32.gmra.mxu2 %vm579_vm4, %v15227_v61  ;;  %11018 = vmatmul.msk.f32.gmra.mxu0 %vm579_vm4, %v15229_v9  ;;  %v6484_v61 = vadd.f32 %v15510_v17, %v6330_v2  ;;  %v11073_v17 = vld [vmem:[%s16884_s6 + $0x90] sm:$0xff]  ;;  %v6332_v2 = vadd.f32 %v15438_v27, %v15550_v63 }
 0x5a2   : > { %11002 = vmatmul.msk.f32.gmra.mxu3 %vm579_vm4, %v15235_v52  ;;  %11034 = vmatmul.msk.f32.gmra.mxu1 %vm579_vm4, %v15710_v16  ;;  %v6935_v50 = vadd.f32 %v15627_v62, %v15468_v57  ;;  %v11221_v57 = vld [vmem:[%s16884_s6 + $0x230] sm:$0xff]  ;;  %v6937_v62 = vadd.f32 %v15673_v20, %v15508_v11  ;;  %v6936_v11 = vadd.f32 %v15650_v10, %v15485_v39  ;;  %v11148_v10 = vld [vmem:[%s16884_s6 + $0x168] sm:$0xff] }
 0x5a3   : > { %7997 = vmatpush.msra.mxu3 %v11073_v17  ;;  %v6486_v63 = vadd.f32 %v15556_v7, %v6332_v2  ;;  %v15799_v7 = vld [vmem:[#allocation3 + $0x108] sm:$0xff] }
 0x5a4   : > { %v6612_v9 = vpop.f32.mrf.mxu2 }
 0x5a5   : > { %v6638_v13 = vadd.f32 %v6612_v9, %v6484_v61  ;;  %v6766_v59 = vpop.f32.mrf.mxu3  ;;  %7998 = vmatpush.msra.mxu3 %v11072_v46  ;;  %v15778_v61 = vld [vmem:[#allocation3 + $0xf8] sm:$0xff]  ;;  %v17109_v46 = vld [vmem:[#allocation28_spill] sm:$0xff] }
 0x5a6   : > { %v15723_v41 = vpop.f32.mrf.mxu0 }
 0x5a7   : > { %v15727_v52 = vadd.f32 %v6766_v59, %v6638_v13  ;;  %v15729_v29 = vpop.f32.mrf.mxu1 }
 0x5a9   : > { %17105 = vst [vmem:[#allocation34_spill] sm:$0xff] %v15727_v52  ;;  %10979 = vmatmul.msk.f32.gmra.mxu2 %vm579_vm4, %v15403_v28  ;;  %11019 = vmatmul.msk.f32.gmra.mxu0 %vm579_vm4, %v15255_v5  ;;  %v11071_v5 = vld [vmem:[%s16884_s6 + $0x80] sm:$0xff]  ;;  %v11098_v28 = vld [vmem:[%s16884_s6 + $0xd8] sm:$0xff]  ;;  %v15961_v52 = vld [vmem:[#allocation3 + $0xf9] sm:$0xff] }
 0x5aa   : > { %11003 = vmatmul.msk.f32.gmra.mxu3 %vm579_vm4, %v15581_v33  ;;  %11035 = vmatmul.msk.f32.gmra.mxu1 %vm579_vm4, %v15737_v19 }
 0x5ab   : > { %8149 = vmatpush.msra.mxu0 %v11098_v28  ;;  %7999 = vmatpush.msra.mxu3 %v11071_v5 }
 0x5ac   : > { %v6615_v12 = vpop.f32.mrf.mxu2 }
 0x5ad   : > { %v6639_v23 = vadd.f32 %v6615_v12, %v6485_v21  ;;  %v6769_v60 = vpop.f32.mrf.mxu3 }
 0x5ae   : > { %v15766_v25 = vpop.f32.mrf.mxu0 }
 0x5af   : > { %v15770_v24 = vadd.f32 %v6769_v60, %v6639_v23  ;;  %v15772_v8 = vpop.f32.mrf.mxu1  ;;  %v6334_v23 = vadd.f32 %v15438_v27, %v15600_v55 }
 0x5b1   : > { %17106 = vst [vmem:[#allocation22_spill] sm:$0xff] %v15770_v24  ;;  %10980 = vmatmul.msk.f32.gmra.mxu2 %vm579_vm4, %v15427_v37  ;;  %11020 = vmatmul.msk.f32.gmra.mxu0 %vm579_vm4, %v17107_v58  ;;  %v6333_v37 = vadd.f32 %v15438_v27, %v15573_v34  ;;  %v11097_v34 = vld [vmem:[%s16884_s6 + $0xd0] sm:$0xff]  ;;  %v6488_v27 = vadd.f32 %v15606_v47, %v6334_v23  ;;  %v11096_v47 = vld [vmem:[%s16884_s6 + $0xc8] sm:$0xff] }
 0x5b2   : > { %11004 = vmatmul.msk.f32.gmra.mxu3 %vm579_vm4, %v15608_v18  ;;  %11036 = vmatmul.msk.f32.gmra.mxu1 %vm579_vm4, %v15778_v61  ;;  %v15822_v58 = vld [vmem:[#allocation3 + $0xe1] sm:$0xff] }
 0x5b3   : > { %v6487_v5 = vadd.f32 %v15579_v3, %v6333_v37  ;;  %8150 = vmatpush.msra.mxu0 %v11097_v34  ;;  %v15826_v3 = vld [vmem:[#allocation3 + $0x110] sm:$0xff] }
 0x5b4   : > { %v6618_v9 = vpop.f32.mrf.mxu2 }
 0x5b5   : > { %v6640_v13 = vadd.f32 %v6618_v9, %v6486_v63  ;;  %v6772_v59 = vpop.f32.mrf.mxu3  ;;  %8151 = vmatpush.msra.mxu0 %v11096_v47 }
 0x5b6   : > { %v15785_v53 = vpop.f32.mrf.mxu0 }
 0x5b7   : > { %v15789_v54 = vadd.f32 %v6772_v59, %v6640_v13  ;;  %v15791_v17 = vpop.f32.mrf.mxu1 }
 0x5b9   : > { %17108 = vst [vmem:[#allocation38_spill] sm:$0xff] %v15789_v54  ;;  %10981 = vmatmul.msk.f32.gmra.mxu2 %vm579_vm4, %v15685_v30  ;;  %11021 = vmatmul.msk.f32.gmra.mxu0 %vm579_vm4, %v17109_v46  ;;  %v11120_v46 = vld [vmem:[%s16884_s6 + $0x108] sm:$0xff] }
 0x5ba   : > { %11005 = vmatmul.msk.f32.gmra.mxu3 %vm579_vm4, %v15795_v26  ;;  %11037 = vmatmul.msk.f32.gmra.mxu1 %vm579_vm4, %v15799_v7 }
 0x5bb   : > { %8304 = vmatpush.msra.mxu1 %v11120_v46  ;;  %v15909_v46 = vld [vmem:[#allocation3 + $0x140] sm:$0xff] }
 0x5bc   : > { %v6621_v28 = vpop.f32.mrf.mxu2  ;;  %17122 = vst [vmem:[#allocation40_spill] sm:$0xff] %v15909_v46 }
 0x5bd   : > { %v6641_v22 = vadd.f32 %v6621_v28, %v6487_v5  ;;  %v6775_v21 = vpop.f32.mrf.mxu3  ;;  %v15865_v5 = vld [vmem:[#allocation3 + $0x128] sm:$0xff] }
 0x5be   : > { %v15812_v12 = vpop.f32.mrf.mxu0 }
 0x5bf   : > { %v15816_v60 = vadd.f32 %v6775_v21, %v6641_v22  ;;  %v15818_v2 = vpop.f32.mrf.mxu1 }
 0x5c1   : > { %17110 = vst [vmem:[#allocation30_spill] sm:$0xff] %v15816_v60  ;;  %10982 = vmatmul.msk.f32.gmra.mxu2 %vm579_vm4, %v15710_v16  ;;  %11022 = vmatmul.msk.f32.gmra.mxu0 %vm579_vm4, %v15321_v45  ;;  %v15841_v45 = vld [vmem:[#allocation3 + $0x120] sm:$0xff] }
 0x5c2   : > { %11006 = vmatmul.msk.f32.gmra.mxu3 %vm579_vm4, %v15822_v58  ;;  %11038 = vmatmul.msk.f32.gmra.mxu1 %vm579_vm4, %v15826_v3 }
 0x5c4   : > { %v6624_v55 = vpop.f32.mrf.mxu2 }
 0x5c5   : > { %v6642_v63 = vadd.f32 %v6624_v55, %v6488_v27  ;;  %v6778_v9 = vpop.f32.mrf.mxu3  ;;  %v11095_v27 = vld [vmem:[%s16884_s6 + $0xc0] sm:$0xff] }
 0x5c6   : > { %v15833_v13 = vpop.f32.mrf.mxu0  ;;  %8152 = vmatpush.msra.mxu0 %v11095_v27  ;;  %v11150_v27 = vld [vmem:[%s16884_s6 + $0x178] sm:$0xff] }
 0x5c7   : > { %17111 = vst [vmem:[#allocation32_spill] sm:$0xff] %v15833_v13  ;;  %v15835_v59 = vadd.f32 %v6778_v9, %v6642_v63  ;;  %v15837_v37 = vpop.f32.mrf.mxu1  ;;  %8451 = vmatpush.msrb.mxu2 %v11150_v27  ;;  %v15941_v27 = vld [vmem:[#allocation3 + $0xf2] sm:$0xff] }
 0x5c8   : > { %17113 = vst [vmem:[#allocation36_spill] sm:$0xff] %v15837_v37  ;;  %v16015_v37 = vld [vmem:[#allocation3 + $0x170] sm:$0xff] }
 0x5c9   : > { %17112 = vst [vmem:[#allocation37_spill] sm:$0xff] %v15835_v59  ;;  %11023 = vmatmul.msk.f32.gmra.mxu0 %vm579_vm4, %v15343_v42  ;;  %11055 = vmatmul.msk.f32.vlgmr.msra.gmra.mxu2 %vm579_vm4, %v15581_v33  ;;  %v15913_v59 = vld [vmem:[#allocation3 + $0xe2] sm:$0xff] }
 0x5ca   : > { %11039 = vmatmul.msk.f32.gmra.mxu1 %vm579_vm4, %v15841_v45  ;;  %11079 = vmatmul.msk.f32.vlgmr.msra.gmra.mxu3 %vm579_vm4, %v15585_v38  ;;  %17123 = vst [vmem:[#allocation45_spill] sm:$0xff] %v15913_v59 }
 0x5cb   : > { %17128 = vst [vmem:[#allocation50_spill] sm:$0xff] %v15941_v27 }
 0x5cc   : > { %v15855_v42 = vpop.f32.mrf.mxu2  ;;  %17139 = vst [vmem:[#allocation56_spill] sm:$0xff] %v16015_v37 }
 0x5cd   : > { %v15857_v34 = vpop.f32.mrf.mxu3 }
 0x5ce   : > { %v15859_v33 = vpop.f32.mrf.mxu0 }
 0x5cf   : > { %17114 = vst [vmem:[#allocation21_spill] sm:$0xff] %v15859_v33  ;;  %v15861_v48 = vpop.f32.mrf.mxu1 }
 0x5d0   : > { %17115 = vst [vmem:[#allocation23_spill] sm:$0xff] %v15861_v48  ;;  %v15937_v48 = vld [vmem:[#allocation3 + $0x150] sm:$0xff] }
 0x5d1   : > { %11024 = vmatmul.msk.f32.gmra.mxu0 %vm579_vm4, %v15383_v40  ;;  %11056 = vmatmul.msk.f32.gmra.mxu2 %vm579_vm4, %v15608_v18  ;;  %v15883_v40 = vld [vmem:[#allocation3 + $0x138] sm:$0xff]  ;;  %17127 = vst [vmem:[#allocation25_spill] sm:$0xff] %v15937_v48 }
 0x5d2   : > { %11040 = vmatmul.msk.f32.gmra.mxu1 %vm579_vm4, %v15865_v5  ;;  %11080 = vmatmul.msk.f32.gmra.mxu3 %vm579_vm4, %v15612_v1  ;;  %17118 = vst [vmem:[#allocation27_spill] sm:$0xff] %v15883_v40  ;;  %v15887_v18 = vld [vmem:[#allocation3 + $0xda] sm:$0xff] }
 0x5d3   : > { %17119 = vst [vmem:[#allocation41_spill] sm:$0xff] %v15887_v18 }
 0x5d4   : > { %v15873_v28 = vpop.f32.mrf.mxu2 }
 0x5d5   : > { %v15875_v22 = vpop.f32.mrf.mxu3 }
 0x5d6   : > { %v15877_v21 = vpop.f32.mrf.mxu0 }
 0x5d7   : > { %17116 = vst [vmem:[#allocation35_spill] sm:$0xff] %v15877_v21  ;;  %v15879_v23 = vpop.f32.mrf.mxu1 }
 0x5d8   : > { %17117 = vst [vmem:[#allocation24_spill] sm:$0xff] %v15879_v23  ;;  %v16011_v23 = vld [vmem:[#allocation3 + $0x111] sm:$0xff] }
 0x5d9   : > { %11025 = vmatmul.msk.f32.gmra.mxu0 %vm579_vm4, %v15399_v6  ;;  %11057 = vmatmul.msk.f32.gmra.mxu2 %vm579_vm4, %v15795_v26  ;;  %v11119_v6 = vld [vmem:[%s16884_s6 + $0x100] sm:$0xff] }
 0x5da   : > { %11041 = vmatmul.msk.f32.gmra.mxu1 %vm579_vm4, %v15883_v40  ;;  %11081 = vmatmul.msk.f32.gmra.mxu3 %vm579_vm4, %v15887_v18 }
 0x5db   : > { %8305 = vmatpush.msra.mxu1 %v11119_v6 }
 0x5dc   : > { %v15899_v55 = vpop.f32.mrf.mxu2 }
 0x5dd   : > { %v15901_v63 = vpop.f32.mrf.mxu3 }
 0x5de   : > { %v15903_v9 = vpop.f32.mrf.mxu0 }
 0x5df   : > { %17120 = vst [vmem:[#allocation42_spill] sm:$0xff] %v15903_v9  ;;  %v15905_v47 = vpop.f32.mrf.mxu1 }
 0x5e0   : > { %17121 = vst [vmem:[#allocation39_spill] sm:$0xff] %v15905_v47  ;;  %v15933_v47 = vld [vmem:[#allocation3 + $0xf1] sm:$0xff] }
 0x5e1   : > { %11026 = vmatmul.msk.f32.gmra.mxu0 %vm579_vm4, %v15423_v51  ;;  %11058 = vmatmul.msk.f32.gmra.mxu2 %vm579_vm4, %v15822_v58  ;;  %v11174_v51 = vld [vmem:[%s16884_s6 + $0x1b8] sm:$0xff]  ;;  %17126 = vst [vmem:[#allocation49_spill] sm:$0xff] %v15933_v47 }
 0x5e2   : > { %11042 = vmatmul.msk.f32.gmra.mxu1 %vm579_vm4, %v15909_v46  ;;  %11082 = vmatmul.msk.f32.gmra.mxu3 %vm579_vm4, %v15913_v59 }
 0x5e3   : > { %8605 = vmatpush.msrb.mxu3 %v11174_v51  ;;  %v11198_v51 = vld [vmem:[%s16884_s6 + $0x1f8] sm:$0xff] }
 0x5e4   : > { %v15925_v6 = vpop.f32.mrf.mxu2  ;;  %8758 = vmatpush.msrb.mxu0 %v11198_v51  ;;  %v15969_v51 = vld [vmem:[#allocation3 + $0xfa] sm:$0xff] }
 0x5e5   : > { %v15927_v54 = vpop.f32.mrf.mxu3  ;;  %17132 = vst [vmem:[#allocation47_spill] sm:$0xff] %v15969_v51 }
 0x5e6   : > { %v15929_v60 = vpop.f32.mrf.mxu0 }
 0x5e7   : > { %17124 = vst [vmem:[#allocation44_spill] sm:$0xff] %v15929_v60  ;;  %v15931_v24 = vpop.f32.mrf.mxu1 }
 0x5e8   : > { %17125 = vst [vmem:[#allocation46_spill] sm:$0xff] %v15931_v24 }
 0x5e9   : > { %11027 = vmatmul.msk.f32.gmra.mxu0 %vm579_vm4, %v15585_v38  ;;  %11059 = vmatmul.msk.f32.gmra.mxu2 %vm579_vm4, %v15933_v47  ;;  %v11222_v38 = vld [vmem:[%s16884_s6 + $0x238] sm:$0xff] }
 0x5ea   : > { %11043 = vmatmul.msk.f32.gmra.mxu1 %vm579_vm4, %v15937_v48  ;;  %11083 = vmatmul.msk.f32.gmra.mxu3 %vm579_vm4, %v15941_v27  ;;  %v15965_v27 = vld [vmem:[#allocation3 + $0x158] sm:$0xff] }
 0x5eb   : > { %8911 = vmatpush.msrb.mxu1 %v11222_v38  ;;  %17131 = vst [vmem:[#allocation48_spill] sm:$0xff] %v15965_v27  ;;  %v11149_v38 = vld [vmem:[%s16884_s6 + $0x170] sm:$0xff] }
 0x5ec   : > { %v15953_v24 = vpop.f32.mrf.mxu2  ;;  %8452 = vmatpush.msrb.mxu2 %v11149_v38  ;;  %v15997_v38 = vld [vmem:[#allocation3 + $0x10a] sm:$0xff] }
 0x5ed   : > { %v15955_v60 = vpop.f32.mrf.mxu3  ;;  %17136 = vst [vmem:[#allocation53_spill] sm:$0xff] %v15997_v38  ;;  %8912 = vmatpush.msrb.mxu1 %v11221_v57 }
 0x5ee   : > { %v15957_v9 = vpop.f32.mrf.mxu0  ;;  %8453 = vmatpush.msrb.mxu2 %v11148_v10 }
 0x5ef   : > { %17129 = vst [vmem:[#allocation43_spill] sm:$0xff] %v15957_v9  ;;  %v15959_v48 = vpop.f32.mrf.mxu1 }
 0x5f0   : > { %17130 = vst [vmem:[#allocation26_spill] sm:$0xff] %v15959_v48 }
 0x5f1   : > { %11028 = vmatmul.msk.f32.gmra.mxu0 %vm579_vm4, %v15612_v1  ;;  %11060 = vmatmul.msk.f32.gmra.mxu2 %vm579_vm4, %v15961_v52  ;;  %v11173_v1 = vld [vmem:[%s16884_s6 + $0x1b0] sm:$0xff] }
 0x5f2   : > { %11044 = vmatmul.msk.f32.gmra.mxu1 %vm579_vm4, %v15965_v27  ;;  %11084 = vmatmul.msk.f32.gmra.mxu3 %vm579_vm4, %v15969_v51  ;;  %v15993_v51 = vld [vmem:[#allocation3 + $0x168] sm:$0xff] }
 0x5f3   : > { %8606 = vmatpush.msrb.mxu3 %v11173_v1  ;;  %17135 = vst [vmem:[#allocation28_spill] sm:$0xff] %v15993_v51 }
 0x5f4   : > { %v15981_v48 = vpop.f32.mrf.mxu2 }
 0x5f5   : > { %v15983_v9 = vpop.f32.mrf.mxu3 }
 0x5f6   : > { %v15985_v46 = vpop.f32.mrf.mxu0 }
 0x5f7   : > { %17133 = vst [vmem:[#allocation51_spill] sm:$0xff] %v15985_v46  ;;  %v15987_v33 = vpop.f32.mrf.mxu1 }
 0x5f8   : > { %17134 = vst [vmem:[#allocation52_spill] sm:$0xff] %v15987_v33 }
 0x5f9   : > { %11029 = vmatmul.msk.f32.gmra.mxu0 %vm579_vm4, %v15887_v18  ;;  %11061 = vmatmul.msk.f32.gmra.mxu2 %vm579_vm4, %v15989_v36  ;;  %v16037_v18 = vld [vmem:[#allocation3 + $0x122] sm:$0xff] }
 0x5fa   : > { %11045 = vmatmul.msk.f32.gmra.mxu1 %vm579_vm4, %v15993_v51  ;;  %11085 = vmatmul.msk.f32.gmra.mxu3 %vm579_vm4, %v15997_v38  ;;  %v16019_v51 = vld [vmem:[#allocation3 + $0x112] sm:$0xff]  ;;  %17142 = vst [vmem:[#allocation59_spill] sm:$0xff] %v16037_v18 }
 0x5fb   : > { %17140 = vst [vmem:[#allocation57_spill] sm:$0xff] %v16019_v51 }
 0x5fc   : > { %v16003_v1 = vpop.f32.mrf.mxu2 }
 0x5fd   : > { %v16005_v33 = vpop.f32.mrf.mxu3 }
 0x5fe   : > { %v16007_v46 = vpop.f32.mrf.mxu0 }
 0x5ff   : > { %17137 = vst [vmem:[#allocation54_spill] sm:$0xff] %v16007_v46  ;;  %v16009_v27 = vpop.f32.mrf.mxu1 }
 0x600   : > { %17138 = vst [vmem:[#allocation55_spill] sm:$0xff] %v16009_v27 }
 0x601   : > { %11030 = vmatmul.msk.f32.gmra.mxu0 %vm579_vm4, %v15913_v59  ;;  %11062 = vmatmul.msk.f32.gmra.mxu2 %vm579_vm4, %v16011_v23  ;;  %v16031_v59 = vld [vmem:[#allocation3 + $0x121] sm:$0xff] }
 0x602   : > { %11046 = vmatmul.msk.f32.gmra.mxu1 %vm579_vm4, %v16015_v37  ;;  %11086 = vmatmul.msk.f32.gmra.mxu3 %vm579_vm4, %v16019_v51  ;;  %v11197_v51 = vld [vmem:[%s16884_s6 + $0x1f0] sm:$0xff] }
 0x603   : > { %8759 = vmatpush.msrb.mxu0 %v11197_v51 }
 0x604   : > { %v16025_v46 = vpop.f32.mrf.mxu2 }
 0x605   : > { %v16027_v27 = vpop.f32.mrf.mxu3 }
 0x606   : > { %v7504_v38 = vpop.f32.mrf.mxu0 }
 0x607   : > { %v16029_v21 = vpop.f32.mrf.mxu1 }
 0x608   : > { %17141 = vst [vmem:[#allocation58_spill] sm:$0xff] %v16029_v21  ;;  %v7091_v21 = vadd.f32 %v15679_v31, %v6937_v62  ;;  %v6938_v31 = vadd.f32 %v15698_v49, %v15531_v14  ;;  %v11220_v14 = vld [vmem:[%s16884_s6 + $0x228] sm:$0xff]  ;;  %v11147_v49 = vld [vmem:[%s16884_s6 + $0x160] sm:$0xff] }
 0x609   : > { %11063 = vmatmul.msk.f32.gmra.mxu2 %vm579_vm4, %v16031_v59  ;;  %11103 = vmatmul.msk.f32.vlgmr.msra.gmra.mxu0 %vm579_vm4, %v15685_v30 }
 0x60a   : > { %11087 = vmatmul.msk.f32.gmra.mxu3 %vm579_vm4, %v16037_v18  ;;  %11127 = vmatmul.msk.f32.vlgmr.msra.gmra.mxu1 %vm579_vm4, %v15795_v26  ;;  %v7089_v18 = vadd.f32 %v15633_v0, %v6935_v50  ;;  %v7246_v20 = vadd.f32 %v15899_v55, %v7091_v21  ;;  %v16069_v0 = vld [vmem:[#allocation3 + $0x12a] sm:$0xff]  ;;  %v11172_v50 = vld [vmem:[%s16884_s6 + $0x1a8] sm:$0xff]  ;;  %v7092_v51 = vadd.f32 %v15704_v44, %v6938_v31 }
 0x60b   : > { %17143 = vst [vmem:[#allocation60_spill] sm:$0xff] %v16069_v0  ;;  %8607 = vmatpush.msrb.mxu3 %v11172_v50  ;;  %8913 = vmatpush.msrb.mxu1 %v11220_v14  ;;  %v16108_v50 = vld [vmem:[#allocation3 + $0x139] sm:$0xff]  ;;  %v11219_v14 = vld [vmem:[%s16884_s6 + $0x220] sm:$0xff] }
 0x60c   : > { %v16053_v30 = vpop.f32.mrf.mxu2  ;;  %v7244_v40 = vadd.f32 %v15855_v42, %v7089_v18  ;;  %v7400_v21 = vadd.f32 %v15901_v63, %v7246_v20  ;;  %8454 = vmatpush.msrb.mxu2 %v11147_v49 }
 0x60d   : > { %v16056_v37 = vpop.f32.mrf.mxu3  ;;  %8914 = vmatpush.msrb.mxu1 %v11219_v14 }
 0x60e   : > { %v7507_v26 = vpop.f32.mrf.mxu0  ;;  %v7398_v39 = vadd.f32 %v15857_v34, %v7244_v40  ;;  %v7090_v34 = vadd.f32 %v15656_v32, %v6936_v11  ;;  %v7247_v32 = vadd.f32 %v15925_v6, %v7092_v51  ;;  %v16113_v11 = vld [vmem:[#allocation3 + $0x13a] sm:$0xff] }
 0x60f   : > { %v16060_v13 = vpop.f32.mrf.mxu1  ;;  %17144 = vst [vmem:[#allocation61_spill] sm:$0xff] %v16113_v11 }
 0x610   : > { %v7552_v40 = vadd.f32 %v7504_v38, %v7398_v39  ;;  %v7245_v57 = vadd.f32 %v15873_v28, %v7090_v34  ;;  %v7401_v20 = vadd.f32 %v15927_v54, %v7247_v32  ;;  %v16135_v34 = vld [vmem:[#allocation3 + $0x141] sm:$0xff] }
 0x611   : > { %11064 = vmatmul.msk.f32.gmra.mxu2 %vm579_vm4, %v16062_v15  ;;  %11104 = vmatmul.msk.f32.gmra.mxu0 %vm579_vm4, %v15710_v16  ;;  %v11196_v16 = vld [vmem:[%s16884_s6 + $0x1e8] sm:$0xff] }
 0x612   : > { %11088 = vmatmul.msk.f32.gmra.mxu3 %vm579_vm4, %v16069_v0  ;;  %11128 = vmatmul.msk.f32.gmra.mxu1 %vm579_vm4, %v15822_v58  ;;  %v11171_v58 = vld [vmem:[%s16884_s6 + $0x1a0] sm:$0xff]  ;;  %v7568_v63 = vmax.f32 %v7552_v40, 0.0  ;;  %v7399_v44 = vadd.f32 %v15875_v22, %v7245_v57 }
 0x613   : > { %8760 = vmatpush.msrb.mxu0 %v11196_v16  ;;  %8608 = vmatpush.msrb.mxu3 %v11171_v58  ;;  %v11195_v16 = vld [vmem:[%s16884_s6 + $0x1e0] sm:$0xff] }
 0x614   : > { %v16089_v42 = vpop.f32.mrf.mxu2  ;;  %v7553_v31 = vadd.f32 %v7507_v26, %v7399_v44 }
 0x615   : > { %v16102_v18 = vpop.f32.mrf.mxu3  ;;  %8761 = vmatpush.msrb.mxu0 %v11195_v16 }
 0x616   : > { %v7510_v55 = vpop.f32.mrf.mxu0  ;;  %v7569_v54 = vmax.f32 %v7553_v31, 0.0 }
 0x617   : > { %v7554_v62 = vadd.f32 %v7510_v55, %v7400_v21  ;;  %v16106_v10 = vpop.f32.mrf.mxu1  ;;  %v16139_v21 = vld [vmem:[#allocation3 + $0x142] sm:$0xff] }
 0x618   : > { %17145 = vst [vmem:[#allocation62_spill] sm:$0xff] %v16139_v21 }
 0x619   : > { %v7570_v38 = vmax.f32 %v7554_v62, 0.0  ;;  %11065 = vmatmul.msk.f32.gmra.mxu2 %vm579_vm4, %v16108_v50  ;;  %11105 = vmatmul.msk.f32.gmra.mxu0 %vm579_vm4, %v15737_v19 }
 0x61a   : > { %11089 = vmatmul.msk.f32.gmra.mxu3 %vm579_vm4, %v16113_v11  ;;  %11129 = vmatmul.msk.f32.gmra.mxu1 %vm579_vm4, %v15933_v47 }
 0x61b   : > { %v9022_v28 = vmax.f32 %v7568_v63, %v7570_v38 }
 0x61c   : > { %v16122_v6 = vpop.f32.mrf.mxu2 }
 0x61d   : > { %9024 = vst [vmem:[#allocation5] sm:$0xff] %v9022_v28  ;;  %v16125_v39 = vpop.f32.mrf.mxu3 }
 0x61e   : > { %v7513_v49 = vpop.f32.mrf.mxu0 }
 0x61f   : > { %v7555_v22 = vadd.f32 %v7513_v49, %v7401_v20  ;;  %v16133_v58 = vpop.f32.mrf.mxu1 }
 0x621   : > { %v7571_v26 = vmax.f32 %v7555_v22, 0.0  ;;  %11066 = vmatmul.msk.f32.gmra.mxu2 %vm579_vm4, %v16135_v34  ;;  %11106 = vmatmul.msk.f32.gmra.mxu0 %vm579_vm4, %v15778_v61 }
 0x622   : > { %11090 = vmatmul.msk.f32.gmra.mxu3 %vm579_vm4, %v16139_v21  ;;  %11130 = vmatmul.msk.f32.gmra.mxu1 %vm579_vm4, %v15961_v52  ;;  %v11146_v52 = vld [vmem:[%s16884_s6 + $0x158] sm:$0xff] }
 0x623   : > { %v9023_v40 = vmax.f32 %v7569_v54, %v7571_v26  ;;  %8455 = vmatpush.msrb.mxu2 %v11146_v52  ;;  %v11170_v26 = vld [vmem:[%s16884_s6 + $0x198] sm:$0xff] }
 0x624   : > { %v9102_v55 = vld [vmem:[#allocation5] sm:$0x1]  ;;  %v9110_v51 = vld [vmem:[#allocation5 + $0x1] sm:$0x1]  ;;  %v9134_v57 = vld [vmem:[#allocation5 + $0x2] sm:$0x1]  ;;  %v16147_v62 = vpop.f32.mrf.mxu2  ;;  %8609 = vmatpush.msrb.mxu3 %v11170_v26 }
 0x625   : > { %v9118_v32 = vmax.f32 %v9102_v55, %v9110_v51  ;;  %v9142_v63 = vld [vmem:[#allocation5 + $0x3] sm:$0x1]  ;;  %v9166_v38 = vld [vmem:[#allocation5 + $0x4] sm:$0x1]  ;;  %v9174_v44 = vld [vmem:[#allocation5 + $0x5] sm:$0x1]  ;;  %v16149_v28 = vpop.f32.mrf.mxu3 }
 0x626   : > { %v9150_v20 = vmax.f32 %v9134_v57, %v9142_v63  ;;  %v9182_v31 = vmax.f32 %v9166_v38, %v9174_v44  ;;  %v9198_v16 = vld [vmem:[#allocation5 + $0x6] sm:$0x1]  ;;  %v9206_v14 = vld [vmem:[#allocation5 + $0x7] sm:$0x1]  ;;  %9025 = vst [vmem:[#allocation5 + $0x8] sm:$0xff] %v9023_v40  ;;  %v16151_v49 = vpop.f32.mrf.mxu0  ;;  %v11145_v40 = vld [vmem:[%s16884_s6 + $0x150] sm:$0xff]  ;;  %v6939_v57 = vadd.f32 %v15723_v41, %v15554_v43  ;;  %v6941_v44 = vadd.f32 %v15785_v53, %v15604_v4 }
 0x627   : > { %v9214_v22 = vmax.f32 %v9198_v16, %v9206_v14  ;;  %9126 = vst [vmem:[#allocation6] sm:$0x1] %v9118_v32  ;;  %v16156_v54 = vpop.f32.mrf.mxu1  ;;  %v16161_v55 = vld [vmem:[#allocation3 + $0x151] sm:$0xff]  ;;  %v11169_v51 = vld [vmem:[%s16884_s6 + $0x190] sm:$0xff]  ;;  %v11194_v41 = vld [vmem:[%s16884_s6 + $0x1d8] sm:$0xff]  ;;  %8456 = vmatpush.msrb.mxu2 %v11145_v40 }
 0x628   : > { %9158 = vst [vmem:[#allocation6 + $0x1] sm:$0x1] %v9150_v20  ;;  %v16173_v32 = vld [vmem:[#allocation3 + $0x152] sm:$0xff]  ;;  %v11218_v38 = vld [vmem:[%s16884_s6 + $0x218] sm:$0xff]  ;;  %8610 = vmatpush.msrb.mxu3 %v11169_v51  ;;  %8762 = vmatpush.msrb.mxu0 %v11194_v41  ;;  %v7093_v16 = vadd.f32 %v15729_v29, %v6939_v57  ;;  %v7095_v21 = vadd.f32 %v15791_v17, %v6941_v44 }
 0x629   : > { %9190 = vst [vmem:[#allocation6 + $0x2] sm:$0x1] %v9182_v31  ;;  %11067 = vmatmul.msk.f32.gmra.mxu2 %vm579_vm4, %v16161_v55  ;;  %11107 = vmatmul.msk.f32.gmra.mxu0 %vm579_vm4, %v15799_v7  ;;  %v11144_v63 = vld [vmem:[%s16884_s6 + $0x148] sm:$0xff]  ;;  %v11167_v31 = vld [vmem:[%s16884_s6 + $0x180] sm:$0xff] }
 0x62a   : > { %17146 = vst [vmem:[#allocation63_spill] sm:$0xff] %v16173_v32  ;;  %11091 = vmatmul.msk.f32.gmra.mxu3 %vm579_vm4, %v16173_v32  ;;  %11131 = vmatmul.msk.f32.gmra.mxu1 %vm579_vm4, %v15989_v36  ;;  %v11168_v43 = vld [vmem:[%s16884_s6 + $0x188] sm:$0xff]  ;;  %v11143_v36 = vld [vmem:[%s16884_s6 + $0x140] sm:$0xff]  ;;  %v7248_v47 = vadd.f32 %v15953_v24, %v7093_v16 }
 0x62b   : > { %9222 = vst [vmem:[#allocation6 + $0x3] sm:$0x1] %v9214_v22  ;;  %8915 = vmatpush.msrb.mxu1 %v11218_v38  ;;  %8457 = vmatpush.msrb.mxu2 %v11144_v63  ;;  %v16210_v63 = vld [vmem:[#allocation3 + $0x159] sm:$0xff] }
 0x62c   : > { %v16195_v20 = vpop.f32.mrf.mxu2  ;;  %8611 = vmatpush.msrb.mxu3 %v11168_v43  ;;  %v6940_v43 = vadd.f32 %v15766_v25, %v15577_v56  ;;  %v16217_v24 = vld [vmem:[#allocation3 + $0x15a] sm:$0xff]  ;;  %v6942_v56 = vadd.f32 %v15812_v12, %v15631_v35  ;;  %v7402_v25 = vadd.f32 %v15955_v60, %v7248_v47  ;;  %v16239_v12 = vld [vmem:[#allocation3 + $0x169] sm:$0xff] }
 0x62d   : > { %v9230_v14 = vld [vmem:[#allocation5 + $0x8] sm:$0x1]  ;;  %v9238_v52 = vld [vmem:[#allocation5 + $0x9] sm:$0x1]  ;;  %v9262_v22 = vld [vmem:[#allocation5 + $0xa] sm:$0x1]  ;;  %v16204_v4 = vpop.f32.mrf.mxu3  ;;  %8458 = vmatpush.msrb.mxu2 %v11143_v36 }
 0x62e   : > { %v9246_v53 = vmax.f32 %v9230_v14, %v9238_v52  ;;  %v9270_v26 = vld [vmem:[#allocation5 + $0xb] sm:$0x1]  ;;  %v9294_v40 = vld [vmem:[#allocation5 + $0xc] sm:$0x1]  ;;  %v9302_v51 = vld [vmem:[#allocation5 + $0xd] sm:$0x1]  ;;  %v7519_v32 = vpop.f32.mrf.mxu0  ;;  %8612 = vmatpush.msrb.mxu3 %v11167_v31  ;;  %v7250_v14 = vadd.f32 %v16003_v1, %v7095_v21  ;;  %v7094_v1 = vadd.f32 %v15772_v8, %v6940_v43  ;;  %v7556_v21 = vadd.f32 %v16151_v49, %v7402_v25 }
 0x62f   : > { %v9278_v41 = vmax.f32 %v9262_v22, %v9270_v26  ;;  %v9310_v38 = vmax.f32 %v9294_v40, %v9302_v51  ;;  %v9326_v11 = vld [vmem:[#allocation5 + $0xe] sm:$0x1]  ;;  %v9334_v29 = vld [vmem:[#allocation5 + $0xf] sm:$0x1]  ;;  %v16208_v57 = vpop.f32.mrf.mxu1  ;;  %v7096_v31 = vadd.f32 %v15818_v2, %v6942_v56  ;;  %v11193_v22 = vld [vmem:[%s16884_s6 + $0x1d0] sm:$0xff] }
 0x630   : > { %v9342_v0 = vmax.f32 %v9326_v11, %v9334_v29  ;;  %9254 = vst [vmem:[#allocation6 + $0x4] sm:$0x1] %v9246_v53  ;;  %v7404_v11 = vadd.f32 %v16005_v33, %v7250_v14  ;;  %v7572_v47 = vmax.f32 %v7556_v21, 0.0  ;;  %v16244_v33 = vld [vmem:[#allocation3 + $0x16a] sm:$0xff]  ;;  %v11217_v53 = vld [vmem:[%s16884_s6 + $0x210] sm:$0xff]  ;;  %8763 = vmatpush.msrb.mxu0 %v11193_v22  ;;  %v16270_v51 = vld [vmem:[#allocation3 + $0x172] sm:$0xff] }
 0x631   : > { %9286 = vst [vmem:[#allocation6 + $0x5] sm:$0x1] %v9278_v41  ;;  %11068 = vmatmul.msk.f32.gmra.mxu2 %vm579_vm4, %v16210_v63  ;;  %11108 = vmatmul.msk.f32.gmra.mxu0 %vm579_vm4, %v15826_v3  ;;  %v7251_v60 = vadd.f32 %v16025_v46, %v7096_v31  ;;  %v16266_v40 = vld [vmem:[#allocation3 + $0x171] sm:$0xff] }
 0x632   : > { %9318 = vst [vmem:[#allocation6 + $0x6] sm:$0x1] %v9310_v38  ;;  %11092 = vmatmul.msk.f32.gmra.mxu3 %vm579_vm4, %v16217_v24  ;;  %11132 = vmatmul.msk.f32.gmra.mxu1 %vm579_vm4, %v16011_v23  ;;  %v7249_v23 = vadd.f32 %v15981_v48, %v7094_v1  ;;  %v17151_v22 = vld [vmem:[#allocation41_spill] sm:$0xff] }
 0x633   : > { %9350 = vst [vmem:[#allocation6 + $0x7] sm:$0x1] %v9342_v0  ;;  %v7405_v0 = vadd.f32 %v16027_v27, %v7251_v60  ;;  %8916 = vmatpush.msrb.mxu1 %v11217_v53  ;;  %v11192_v53 = vld [vmem:[%s16884_s6 + $0x1c8] sm:$0xff] }
 0x634   : > { %v16228_v17 = vpop.f32.mrf.mxu2  ;;  %v7403_v2 = vadd.f32 %v15983_v9, %v7249_v23  ;;  %17147 = vst [vmem:[#allocation64_spill] sm:$0xff] %v16270_v51  ;;  %8764 = vmatpush.msrb.mxu0 %v11192_v53 }
 0x635   : > { %v16233_v44 = vpop.f32.mrf.mxu3 }
 0x636   : > { %v7522_v36 = vpop.f32.mrf.mxu0  ;;  %v7557_v49 = vadd.f32 %v7519_v32, %v7403_v2  ;;  %v17148_v2 = vld [vmem:[#allocation33_spill] sm:$0xff] }
 0x637   : > { %v7558_v16 = vadd.f32 %v7522_v36, %v7404_v11  ;;  %v16237_v35 = vpop.f32.mrf.mxu1 }
 0x638   : > { %v7573_v27 = vmax.f32 %v7557_v49, 0.0  ;;  %v17150_v49 = vld [vmem:[#allocation27_spill] sm:$0xff] }
 0x639   : > { %v7574_v8 = vmax.f32 %v7558_v16, 0.0  ;;  %11069 = vmatmul.msk.f32.gmra.mxu2 %vm579_vm4, %v16239_v12  ;;  %11109 = vmatmul.msk.f32.gmra.mxu0 %vm579_vm4, %v15841_v45 }
 0x63a   : > { %11093 = vmatmul.msk.f32.gmra.mxu3 %vm579_vm4, %v16244_v33  ;;  %11133 = vmatmul.msk.f32.gmra.mxu1 %vm579_vm4, %v16031_v59 }
 0x63b   : > { %v9032_v48 = vmax.f32 %v7572_v47, %v7574_v8 }
 0x63c   : > { %v16253_v46 = vpop.f32.mrf.mxu2 }
 0x63d   : > { %9035 = vst [vmem:[#allocation5 + $0x10] sm:$0xff] %v9032_v48  ;;  %v16256_v52 = vpop.f32.mrf.mxu3  ;;  %v17149_v48 = vld [vmem:[#allocation32_spill] sm:$0xff] }
 0x63e   : > { %v7525_v59 = vpop.f32.mrf.mxu0 }
 0x63f   : > { %v7559_v9 = vadd.f32 %v7525_v59, %v7405_v0  ;;  %v16264_v26 = vpop.f32.mrf.mxu1  ;;  %v6943_v0 = vadd.f32 %v17149_v48, %v17148_v2  ;;  %v11216_v59 = vld [vmem:[%s16884_s6 + $0x208] sm:$0xff] }
 0x640   : > { %8917 = vmatpush.msrb.mxu1 %v11216_v59 }
 0x641   : > { %v7575_v32 = vmax.f32 %v7559_v9, 0.0  ;;  %11070 = vmatmul.msk.f32.gmra.mxu2 %vm579_vm4, %v16266_v40  ;;  %11110 = vmatmul.msk.f32.gmra.mxu0 %vm579_vm4, %v15865_v5  ;;  %v17152_v9 = vld [vmem:[#allocation29_spill] sm:$0xff] }
 0x642   : > { %11094 = vmatmul.msk.f32.gmra.mxu3 %vm579_vm4, %v16270_v51  ;;  %11134 = vmatmul.msk.f32.gmra.mxu1 %vm579_vm4, %v16062_v15  ;;  %v16285_v15 = vld [vmem:[%s16885_s7] ss:$0 sm:$0xff] }
 0x643   : > { %v9033_v41 = vmax.f32 %v7573_v27, %v7575_v32  ;;  %v17153_v27 = vld [vmem:[#allocation35_spill] sm:$0xff] }
 0x644   : > { %v16278_v38 = vpop.f32.mrf.mxu2  ;;  %v9103_v29 = vld [vmem:[#allocation5 + $0x10] sm:$0x1]  ;;  %v9111_v43 = vld [vmem:[#allocation5 + $0x11] sm:$0x1]  ;;  %v9135_v14 = vld [vmem:[#allocation5 + $0x12] sm:$0x1]  ;;  %v6945_v32 = vadd.f32 %v17153_v27, %v17152_v9 }
 0x645   : > { %9036 = vst [vmem:[#allocation5 + $0x18] sm:$0xff] %v9033_v41  ;;  %v16280_v56 = vpop.f32.mrf.mxu3  ;;  %v9119_v25 = vmax.f32 %v9103_v29, %v9111_v43  ;;  %v9143_v1 = vld [vmem:[#allocation5 + $0x13] sm:$0x1]  ;;  %v9167_v11 = vld [vmem:[#allocation5 + $0x14] sm:$0x1]  ;;  %v17154_v41 = vld [vmem:[#allocation58_spill] sm:$0xff] }
 0x646   : > { %v7528_v21 = vpop.f32.mrf.mxu0  ;;  %v9151_v36 = vmax.f32 %v9135_v14, %v9143_v1  ;;  %v9175_v31 = vld [vmem:[#allocation5 + $0x15] sm:$0x1]  ;;  %v9199_v23 = vld [vmem:[#allocation5 + $0x16] sm:$0x1]  ;;  %v9207_v16 = vld [vmem:[#allocation5 + $0x17] sm:$0x1]  ;;  %v7743_v29 = vadd.f32 %v16285_v15, %v17154_v41 }
 0x647   : > { %v16287_v60 = vpop.f32.mrf.mxu1  ;;  %9127 = vst [vmem:[#allocation6 + $0x8] sm:$0x1] %v9119_v25  ;;  %v9183_v47 = vmax.f32 %v9167_v11, %v9175_v31  ;;  %v9215_v8 = vmax.f32 %v9199_v23, %v9207_v16  ;;  %v17155_v25 = vld [vmem:[#allocation36_spill] sm:$0xff] }
 0x648   : > { %9159 = vst [vmem:[#allocation6 + $0x9] sm:$0x1] %v9151_v36  ;;  %v7097_v1 = vadd.f32 %v17155_v25, %v6943_v0  ;;  %v17156_v27 = vld [vmem:[#allocation24_spill] sm:$0xff]  ;;  %v17160_v25 = vld [vmem:[#allocation45_spill] sm:$0xff] }
 0x649   : > { %11111 = vmatmul.msk.f32.gmra.mxu0 %vm579_vm4, %v17150_v49  ;;  %11151 = vmatmul.msk.f32.vlgmr.msrb.gmra.mxu2 %vm579_vm4, %v17151_v22  ;;  %9191 = vst [vmem:[#allocation6 + $0xa] sm:$0x1] %v9183_v47  ;;  %v7099_v53 = vadd.f32 %v17156_v27, %v6945_v32  ;;  %v17162_v32 = vld [vmem:[#allocation42_spill] sm:$0xff] }
 0x64a   : > { %11135 = vmatmul.msk.f32.gmra.mxu1 %vm579_vm4, %v16108_v50  ;;  %11175 = vmatmul.msk.f32.vlgmr.msrb.gmra.mxu3 %vm579_vm4, %v15737_v19  ;;  %9223 = vst [vmem:[#allocation6 + $0xb] sm:$0x1] %v9215_v8  ;;  %v7252_v59 = vadd.f32 %v16053_v30, %v7097_v1  ;;  %v17161_v30 = vld [vmem:[#allocation34_spill] sm:$0xff] }
 0x64b   : > { %v6946_v1 = vadd.f32 %v17162_v32, %v17161_v30  ;;  %v11191_v32 = vld [vmem:[%s16884_s6 + $0x1c0] sm:$0xff] }
 0x64c   : > { %v7848_v50 = vpop.f32.mrf.mxu2  ;;  %v9231_v43 = vld [vmem:[#allocation5 + $0x18] sm:$0x1]  ;;  %v9239_v19 = vld [vmem:[#allocation5 + $0x19] sm:$0x1]  ;;  %v9263_v14 = vld [vmem:[#allocation5 + $0x1a] sm:$0x1]  ;;  %8765 = vmatpush.msrb.mxu0 %v11191_v32 }
 0x64d   : > { %v7896_v11 = vadd.f32 %v7848_v50, %v7743_v29  ;;  %v8001_v36 = vpop.f32.mrf.mxu3  ;;  %v9247_v31 = vmax.f32 %v9231_v43, %v9239_v19  ;;  %v9271_v23 = vld [vmem:[#allocation5 + $0x1b] sm:$0x1]  ;;  %v9295_v16 = vld [vmem:[#allocation5 + $0x1c] sm:$0x1]  ;;  %v9303_v47 = vld [vmem:[#allocation5 + $0x1d] sm:$0x1]  ;;  %v7254_v19 = vadd.f32 %v16122_v6, %v7099_v53  ;;  %v7744_v6 = vadd.f32 %v16285_v15, %v16060_v13 }
 0x64e   : > { %v7531_v8 = vpop.f32.mrf.mxu0  ;;  %v9279_v2 = vmax.f32 %v9263_v14, %v9271_v23  ;;  %v9311_v48 = vmax.f32 %v9295_v16, %v9303_v47  ;;  %v9327_v22 = vld [vmem:[#allocation5 + $0x1e] sm:$0x1]  ;;  %v9335_v9 = vld [vmem:[#allocation5 + $0x1f] sm:$0x1]  ;;  %v17157_v29 = vld [vmem:[#allocation31_spill] sm:$0xff] }
 0x64f   : > { %v16312_v41 = vadd.f32 %v8001_v36, %v7896_v11  ;;  %v16314_v51 = vpop.f32.mrf.mxu1  ;;  %9255 = vst [vmem:[#allocation6 + $0xc] sm:$0x1] %v9247_v31  ;;  %v9343_v0 = vmax.f32 %v9327_v22, %v9335_v9  ;;  %v17158_v50 = vld [vmem:[#allocation21_spill] sm:$0xff]  ;;  %v17159_v14 = vld [vmem:[#allocation40_spill] sm:$0xff]  ;;  %v7406_v11 = vadd.f32 %v16056_v37, %v7252_v59  ;;  %v17163_v31 = vld [vmem:[#allocation23_spill] sm:$0xff]  ;;  %v7408_v16 = vadd.f32 %v16125_v39, %v7254_v19 }
 0x650   : > { %9287 = vst [vmem:[#allocation6 + $0xd] sm:$0x1] %v9279_v2  ;;  %v6944_v43 = vadd.f32 %v17158_v50, %v17157_v29  ;;  %v17164_v22 = vld [vmem:[#allocation39_spill] sm:$0xff]  ;;  %v17165_v29 = vld [vmem:[#allocation25_spill] sm:$0xff]  ;;  %v17166_v39 = vld [vmem:[#allocation50_spill] sm:$0xff] }
 0x651   : > { %11112 = vmatmul.msk.f32.gmra.mxu0 %vm579_vm4, %v17159_v14  ;;  %11152 = vmatmul.msk.f32.gmra.mxu2 %vm579_vm4, %v17160_v25  ;;  %9319 = vst [vmem:[#allocation6 + $0xe] sm:$0x1] %v9311_v48  ;;  %v7560_v47 = vadd.f32 %v7528_v21, %v7406_v11  ;;  %v7745_v21 = vadd.f32 %v16285_v15, %v16106_v10  ;;  %v17172_v32 = vld [vmem:[#allocation53_spill] sm:$0xff] }
 0x652   : > { %11136 = vmatmul.msk.f32.gmra.mxu1 %vm579_vm4, %v16135_v34  ;;  %11176 = vmatmul.msk.f32.gmra.mxu3 %vm579_vm4, %v15778_v61  ;;  %9351 = vst [vmem:[#allocation6 + $0xf] sm:$0x1] %v9343_v0  ;;  %v7098_v23 = vadd.f32 %v17163_v31, %v6944_v43  ;;  %v7100_v61 = vadd.f32 %v17164_v22, %v6946_v1 }
 0x653   : > { %v7576_v59 = vmax.f32 %v7560_v47, 0.0  ;;  %v7746_v31 = vadd.f32 %v16285_v15, %v16133_v58 }
 0x654   : > { %v7851_v36 = vpop.f32.mrf.mxu2  ;;  %v7253_v9 = vadd.f32 %v16089_v42, %v7098_v23  ;;  %v7255_v13 = vadd.f32 %v16147_v62, %v7100_v61 }
 0x655   : > { %v7897_v2 = vadd.f32 %v7851_v36, %v7744_v6  ;;  %v8004_v34 = vpop.f32.mrf.mxu3  ;;  %v17167_v6 = vld [vmem:[#allocation48_spill] sm:$0xff]  ;;  %v17168_v36 = vld [vmem:[#allocation47_spill] sm:$0xff] }
 0x656   : > { %v7534_v48 = vpop.f32.mrf.mxu0  ;;  %v7407_v42 = vadd.f32 %v16102_v18, %v7253_v9  ;;  %v7409_v43 = vadd.f32 %v16149_v28, %v7255_v13 }
 0x657   : > { %v16336_v27 = vadd.f32 %v8004_v34, %v7897_v2  ;;  %v7562_v53 = vadd.f32 %v7534_v48, %v7408_v16  ;;  %v16338_v37 = vpop.f32.mrf.mxu1 }
 0x658   : > { %v7561_v19 = vadd.f32 %v7531_v8, %v7407_v42 }
 0x659   : > { %v7578_v0 = vmax.f32 %v7562_v53, 0.0  ;;  %11113 = vmatmul.msk.f32.gmra.mxu0 %vm579_vm4, %v17165_v29  ;;  %11153 = vmatmul.msk.f32.gmra.mxu2 %vm579_vm4, %v17166_v39 }
 0x65a   : > { %11137 = vmatmul.msk.f32.gmra.mxu1 %vm579_vm4, %v16161_v55  ;;  %11177 = vmatmul.msk.f32.gmra.mxu3 %vm579_vm4, %v15799_v7  ;;  %v11215_v7 = vld [vmem:[%s16884_s6 + $0x200] sm:$0xff]  ;;  %v7577_v28 = vmax.f32 %v7561_v19, 0.0  ;;  %v17170_v19 = vld [vmem:[#allocation44_spill] sm:$0xff] }
 0x65b   : > { %v9043_v62 = vmax.f32 %v7576_v59, %v7578_v0  ;;  %8918 = vmatpush.msrb.mxu1 %v11215_v7  ;;  %v17173_v7 = vld [vmem:[#allocation30_spill] sm:$0xff] }
 0x65c   : > { %v7854_v50 = vpop.f32.mrf.mxu2 }
 0x65d   : > { %9046 = vst [vmem:[#allocation5 + $0x20] sm:$0xff] %v9043_v62  ;;  %v7898_v25 = vadd.f32 %v7854_v50, %v7745_v21  ;;  %v8007_v30 = vpop.f32.mrf.mxu3 }
 0x65e   : > { %v7537_v18 = vpop.f32.mrf.mxu0 }
 0x65f   : > { %v16359_v10 = vadd.f32 %v8007_v30, %v7898_v25  ;;  %v7563_v1 = vadd.f32 %v7537_v18, %v7409_v43  ;;  %v16361_v11 = vpop.f32.mrf.mxu1  ;;  %v17169_v43 = vld [vmem:[#allocation22_spill] sm:$0xff]  ;;  %v17171_v30 = vld [vmem:[#allocation28_spill] sm:$0xff]  ;;  %v17174_v18 = vld [vmem:[#allocation51_spill] sm:$0xff] }
 0x660   : > { %v6947_v25 = vadd.f32 %v17170_v19, %v17169_v43  ;;  %v17178_v19 = vld [vmem:[#allocation38_spill] sm:$0xff] }
 0x661   : > { %v7579_v8 = vmax.f32 %v7563_v1, 0.0  ;;  %11114 = vmatmul.msk.f32.gmra.mxu0 %vm579_vm4, %v17167_v6  ;;  %11154 = vmatmul.msk.f32.gmra.mxu2 %vm579_vm4, %v17168_v36  ;;  %v6949_v1 = vadd.f32 %v17174_v18, %v17173_v7  ;;  %v17180_v7 = vld [vmem:[#allocation56_spill] sm:$0xff]  ;;  %v17181_v18 = vld [vmem:[#allocation57_spill] sm:$0xff] }
 0x662   : > { %11138 = vmatmul.msk.f32.gmra.mxu1 %vm579_vm4, %v16210_v63  ;;  %11178 = vmatmul.msk.f32.gmra.mxu3 %vm579_vm4, %v15826_v3 }
 0x663   : > { %v9044_v23 = vmax.f32 %v7577_v28, %v7579_v8  ;;  %v7747_v28 = vadd.f32 %v16285_v15, %v16156_v54 }
 0x664   : > { %v7857_v16 = vpop.f32.mrf.mxu2  ;;  %v9104_v47 = vld [vmem:[#allocation5 + $0x20] sm:$0x1]  ;;  %v9112_v2 = vld [vmem:[#allocation5 + $0x21] sm:$0x1]  ;;  %v9136_v34 = vld [vmem:[#allocation5 + $0x22] sm:$0x1] }
 0x665   : > { %9047 = vst [vmem:[#allocation5 + $0x28] sm:$0xff] %v9044_v23  ;;  %v7899_v48 = vadd.f32 %v7857_v16, %v7746_v31  ;;  %v8010_v22 = vpop.f32.mrf.mxu3  ;;  %v9120_v61 = vmax.f32 %v9104_v47, %v9112_v2  ;;  %v9144_v9 = vld [vmem:[#allocation5 + $0x23] sm:$0x1]  ;;  %v9168_v53 = vld [vmem:[#allocation5 + $0x24] sm:$0x1]  ;;  %v17175_v23 = vld [vmem:[#allocation46_spill] sm:$0xff] }
 0x666   : > { %v7540_v13 = vpop.f32.mrf.mxu0  ;;  %v9152_v59 = vmax.f32 %v9136_v34, %v9144_v9  ;;  %v9176_v0 = vld [vmem:[#allocation5 + $0x25] sm:$0x1]  ;;  %v9200_v42 = vld [vmem:[#allocation5 + $0x26] sm:$0x1]  ;;  %v9208_v21 = vld [vmem:[#allocation5 + $0x27] sm:$0x1]  ;;  %v7101_v16 = vadd.f32 %v17175_v23, %v6947_v25 }
 0x667   : > { %v16373_v3 = vadd.f32 %v8010_v22, %v7899_v48  ;;  %v16375_v62 = vpop.f32.mrf.mxu1  ;;  %9128 = vst [vmem:[#allocation6 + $0x10] sm:$0x1] %v9120_v61  ;;  %v9184_v58 = vmax.f32 %v9168_v53, %v9176_v0  ;;  %v9216_v50 = vmax.f32 %v9200_v42, %v9208_v21  ;;  %v17176_v42 = vld [vmem:[#allocation52_spill] sm:$0xff]  ;;  %v17179_v25 = vld [vmem:[#allocation43_spill] sm:$0xff] }
 0x668   : > { %9160 = vst [vmem:[#allocation6 + $0x11] sm:$0x1] %v9152_v59  ;;  %v7103_v21 = vadd.f32 %v17176_v42, %v6949_v1  ;;  %v7256_v54 = vadd.f32 %v16195_v20, %v7101_v16  ;;  %v17182_v20 = vld [vmem:[#allocation37_spill] sm:$0xff]  ;;  %v17183_v1 = vld [vmem:[#allocation54_spill] sm:$0xff] }
 0x669   : > { %11115 = vmatmul.msk.f32.gmra.mxu0 %vm579_vm4, %v17171_v30  ;;  %11155 = vmatmul.msk.f32.gmra.mxu2 %vm579_vm4, %v17172_v32  ;;  %9192 = vst [vmem:[#allocation6 + $0x12] sm:$0x1] %v9184_v58  ;;  %v6948_v30 = vadd.f32 %v17179_v25, %v17178_v19 }
 0x66a   : > { %11139 = vmatmul.msk.f32.gmra.mxu1 %vm579_vm4, %v16239_v12  ;;  %11179 = vmatmul.msk.f32.gmra.mxu3 %vm579_vm4, %v15841_v45  ;;  %9224 = vst [vmem:[#allocation6 + $0x13] sm:$0x1] %v9216_v50  ;;  %v7258_v32 = vadd.f32 %v16253_v46, %v7103_v21  ;;  %v7748_v46 = vadd.f32 %v16285_v15, %v16208_v57 }
 0x66c   : > { %v7860_v8 = vpop.f32.mrf.mxu2  ;;  %v9232_v6 = vld [vmem:[#allocation5 + $0x28] sm:$0x1]  ;;  %v9240_v36 = vld [vmem:[#allocation5 + $0x29] sm:$0x1]  ;;  %v9264_v31 = vld [vmem:[#allocation5 + $0x2a] sm:$0x1]  ;;  %v7412_v23 = vadd.f32 %v16256_v52, %v7258_v32 }
 0x66d   : > { %v7900_v47 = vadd.f32 %v7860_v8, %v7747_v28  ;;  %v8013_v2 = vpop.f32.mrf.mxu3  ;;  %v9248_v34 = vmax.f32 %v9232_v6, %v9240_v36  ;;  %v9272_v48 = vld [vmem:[#allocation5 + $0x2b] sm:$0x1]  ;;  %v9296_v22 = vld [vmem:[#allocation5 + $0x2c] sm:$0x1]  ;;  %v9304_v61 = vld [vmem:[#allocation5 + $0x2d] sm:$0x1]  ;;  %v6950_v28 = vadd.f32 %v17183_v1, %v17182_v20  ;;  %v7410_v8 = vadd.f32 %v16204_v4, %v7256_v54 }
 0x66e   : > { %v7543_v45 = vpop.f32.mrf.mxu0  ;;  %v9280_v9 = vmax.f32 %v9264_v31, %v9272_v48  ;;  %v9312_v53 = vmax.f32 %v9296_v22, %v9304_v61  ;;  %v9328_v59 = vld [vmem:[#allocation5 + $0x2e] sm:$0x1]  ;;  %v9336_v0 = vld [vmem:[#allocation5 + $0x2f] sm:$0x1]  ;;  %v17185_v48 = vld [vmem:[#allocation55_spill] sm:$0xff] }
 0x66f   : > { %v16394_v58 = vadd.f32 %v8013_v2, %v7900_v47  ;;  %v16396_v50 = vpop.f32.mrf.mxu1  ;;  %9256 = vst [vmem:[#allocation6 + $0x14] sm:$0x1] %v9248_v34  ;;  %v9344_v43 = vmax.f32 %v9328_v59, %v9336_v0  ;;  %v17184_v36 = vld [vmem:[#allocation26_spill] sm:$0xff]  ;;  %v7564_v16 = vadd.f32 %v7540_v13, %v7410_v8  ;;  %v16427_v52 = vld [vmem:[#allocation3 + $0x181] sm:$0xff] }
 0x670   : > { %17177 = vst [vmem:[#allocation33_spill] sm:$0xff] %v16396_v50  ;;  %v7102_v31 = vadd.f32 %v17184_v36, %v6948_v30  ;;  %v17186_v13 = vld [vmem:[#allocation59_spill] sm:$0xff] }
 0x671   : > { %9288 = vst [vmem:[#allocation6 + $0x15] sm:$0x1] %v9280_v9  ;;  %11116 = vmatmul.msk.f32.gmra.mxu0 %vm579_vm4, %v17180_v7  ;;  %11156 = vmatmul.msk.f32.gmra.mxu2 %vm579_vm4, %v17181_v18  ;;  %v7580_v59 = vmax.f32 %v7564_v16, 0.0 }
 0x672   : > { %9320 = vst [vmem:[#allocation6 + $0x16] sm:$0x1] %v9312_v53  ;;  %11140 = vmatmul.msk.f32.gmra.mxu1 %vm579_vm4, %v16266_v40  ;;  %11180 = vmatmul.msk.f32.gmra.mxu3 %vm579_vm4, %v15865_v5  ;;  %v7104_v5 = vadd.f32 %v17185_v48, %v6950_v28  ;;  %v7257_v22 = vadd.f32 %v16228_v17, %v7102_v31  ;;  %v16422_v53 = vld [vmem:[#allocation3 + $0x180] sm:$0xff] }
 0x673   : > { %9352 = vst [vmem:[#allocation6 + $0x17] sm:$0x1] %v9344_v43 }
 0x674   : > { %v7863_v6 = vpop.f32.mrf.mxu2  ;;  %v7259_v57 = vadd.f32 %v16278_v38, %v7104_v5  ;;  %v7411_v17 = vadd.f32 %v16233_v44, %v7257_v22  ;;  %v7749_v38 = vadd.f32 %v16285_v15, %v16237_v35  ;;  %v16447_v35 = vld [vmem:[#allocation3 + $0x189] sm:$0xff] }
 0x675   : > { %v7901_v47 = vadd.f32 %v7863_v6, %v7748_v46  ;;  %v8016_v2 = vpop.f32.mrf.mxu3 }
 0x676   : > { %v7546_v34 = vpop.f32.mrf.mxu0  ;;  %v7413_v54 = vadd.f32 %v16280_v56, %v7259_v57  ;;  %v7565_v43 = vadd.f32 %v7543_v45, %v7411_v17  ;;  %v17188_v56 = vld [vmem:[#allocation60_spill] sm:$0xff]  ;;  %v7750_v45 = vadd.f32 %v16285_v15, %v16264_v26 }
 0x677   : > { %v16418_v61 = vadd.f32 %v8016_v2, %v7901_v47  ;;  %v7566_v9 = vadd.f32 %v7546_v34, %v7412_v23  ;;  %v16420_v4 = vpop.f32.mrf.mxu1  ;;  %v9397_v17 = vld [vmem:[#allocation7 + $0xf8] sm:$0xff] }
 0x678   : > { %v7581_v44 = vmax.f32 %v7565_v43, 0.0  ;;  %9445 = vmatpush.msra.mxu3 %v9397_v17 }
 0x679   : > { %v7582_v0 = vmax.f32 %v7566_v9, 0.0  ;;  %11117 = vmatmul.msk.f32.gmra.mxu0 %vm579_vm4, %v16422_v53  ;;  %11157 = vmatmul.msk.f32.gmra.mxu2 %vm579_vm4, %v17186_v13  ;;  %v9396_v13 = vld [vmem:[#allocation7 + $0xf0] sm:$0xff] }
 0x67a   : > { %11141 = vmatmul.msk.f32.gmra.mxu1 %vm579_vm4, %v16427_v52  ;;  %11181 = vmatmul.msk.f32.gmra.mxu3 %vm579_vm4, %v17150_v49  ;;  %v16443_v49 = vld [vmem:[#allocation3 + $0x188] sm:$0xff] }
 0x67b   : > { %v9054_v42 = vmax.f32 %v7580_v59, %v7582_v0  ;;  %v17189_v59 = vld [vmem:[#allocation61_spill] sm:$0xff]  ;;  %9404 = vmatpush.msra.mxu2 %v9396_v13 }
 0x67c   : > { %v7866_v21 = vpop.f32.mrf.mxu2  ;;  %v17190_v0 = vld [vmem:[#allocation49_spill] sm:$0xff] }
 0x67d   : > { %9057 = vst [vmem:[#allocation5 + $0x30] sm:$0xff] %v9054_v42  ;;  %v7902_v19 = vadd.f32 %v7866_v21, %v7749_v38  ;;  %v8019_v25 = vpop.f32.mrf.mxu3  ;;  %v7751_v38 = vadd.f32 %v16285_v15, %v16287_v60 }
 0x67e   : > { %v7549_v30 = vpop.f32.mrf.mxu0 }
 0x67f   : > { %v16439_v32 = vadd.f32 %v8019_v25, %v7902_v19  ;;  %v7567_v7 = vadd.f32 %v7549_v30, %v7413_v54  ;;  %v16441_v18 = vpop.f32.mrf.mxu1 }
 0x680   : > { %17187 = vst [vmem:[#allocation32_spill] sm:$0xff] %v16441_v18 }
 0x681   : > { %v7583_v20 = vmax.f32 %v7567_v7, 0.0  ;;  %11118 = vmatmul.msk.f32.gmra.mxu0 %vm579_vm4, %v16443_v49  ;;  %11158 = vmatmul.msk.f32.gmra.mxu2 %vm579_vm4, %v17188_v56 }
 0x682   : > { %11142 = vmatmul.msk.f32.gmra.mxu1 %vm579_vm4, %v16447_v35  ;;  %11182 = vmatmul.msk.f32.gmra.mxu3 %vm579_vm4, %v17159_v14 }
 0x683   : > { %v9055_v1 = vmax.f32 %v7581_v44, %v7583_v20 }
 0x684   : > { %v7869_v28 = vpop.f32.mrf.mxu2  ;;  %v9105_v8 = vld [vmem:[#allocation5 + $0x30] sm:$0x1]  ;;  %v9113_v46 = vld [vmem:[#allocation5 + $0x31] sm:$0x1]  ;;  %v9137_v6 = vld [vmem:[#allocation5 + $0x32] sm:$0x1] }
 0x685   : > { %9058 = vst [vmem:[#allocation5 + $0x38] sm:$0xff] %v9055_v1  ;;  %v7903_v36 = vadd.f32 %v7869_v28, %v7750_v45  ;;  %v8022_v31 = vpop.f32.mrf.mxu3  ;;  %v9121_v23 = vmax.f32 %v9105_v8, %v9113_v46  ;;  %v9145_v16 = vld [vmem:[#allocation5 + $0x33] sm:$0x1]  ;;  %v9169_v47 = vld [vmem:[#allocation5 + $0x34] sm:$0x1]  ;;  %v9394_v8 = vld [vmem:[#allocation7 + $0xe0] sm:$0xff] }
 0x686   : > { %v16457_v2 = vpop.f32.mrf.mxu0  ;;  %v9153_v34 = vmax.f32 %v9137_v6, %v9145_v16  ;;  %v9177_v48 = vld [vmem:[#allocation5 + $0x35] sm:$0x1]  ;;  %v9201_v5 = vld [vmem:[#allocation5 + $0x36] sm:$0x1]  ;;  %v9209_v14 = vld [vmem:[#allocation5 + $0x37] sm:$0x1]  ;;  %9405 = vmatpush.msra.mxu2 %v9394_v8 }
 0x687   : > { %v16459_v22 = vadd.f32 %v8022_v31, %v7903_v36  ;;  %v16461_v26 = vpop.f32.mrf.mxu1  ;;  %9129 = vst [vmem:[#allocation6 + $0x18] sm:$0x1] %v9121_v23  ;;  %v9185_v9 = vmax.f32 %v9169_v47, %v9177_v48  ;;  %v9217_v57 = vmax.f32 %v9201_v5, %v9209_v14  ;;  %v9395_v46 = vld [vmem:[#allocation7 + $0xe8] sm:$0xff]  ;;  %v9392_v23 = vld [vmem:[#allocation7 + $0xd0] sm:$0xff]  ;;  %v9393_v16 = vld [vmem:[#allocation7 + $0xd8] sm:$0xff]  ;;  %v7752_v14 = vadd.f32 %v16285_v15, %v16314_v51 }
 0x688   : > { %9161 = vst [vmem:[#allocation6 + $0x19] sm:$0x1] %v9153_v34  ;;  %9446 = vmatpush.msra.mxu3 %v9395_v46  ;;  %v17191_v36 = vld [vmem:[#allocation62_spill] sm:$0xff]  ;;  %v9390_v48 = vld [vmem:[#allocation7 + $0xc0] sm:$0xff]  ;;  %9406 = vmatpush.msra.mxu2 %v9392_v23  ;;  %v17192_v51 = vld [vmem:[#allocation63_spill] sm:$0xff] }
 0x689   : > { %11159 = vmatmul.msk.f32.gmra.mxu2 %vm579_vm4, %v17189_v59  ;;  %11199 = vmatmul.msk.f32.vlgmr.msrb.gmra.mxu0 %vm579_vm4, %v17190_v0  ;;  %9193 = vst [vmem:[#allocation6 + $0x1a] sm:$0x1] %v9185_v9  ;;  %v11338_v31 = vld [vmem:[#allocation3 + $0xf9] sm:$0xff]  ;;  %v9389_v59 = vld [vmem:[#allocation7 + $0xb8] sm:$0xff]  ;;  %v11345_v23 = vld [vmem:[#allocation3 + $0x170] sm:$0xff] }
 0x68a   : > { %11183 = vmatmul.msk.f32.gmra.mxu3 %vm579_vm4, %v17165_v29  ;;  %11223 = vmatmul.msk.f32.vlgmr.msrb.gmra.mxu1 %vm579_vm4, %v17166_v39  ;;  %9225 = vst [vmem:[#allocation6 + $0x1b] sm:$0x1] %v9217_v57  ;;  %v11339_v47 = vld [vmem:[#allocation3 + $0x158] sm:$0xff]  ;;  %v9388_v57 = vld [vmem:[#allocation7 + $0xb0] sm:$0xff] }
 0x68b   : > { %v11340_v34 = vld [vmem:[#allocation3 + $0xfa] sm:$0xff]  ;;  %9447 = vmatpush.msra.mxu3 %v9393_v16  ;;  %9407 = vmatpush.msra.mxu2 %v9390_v48  ;;  %v11346_v16 = vld [vmem:[#allocation3 + $0x112] sm:$0xff]  ;;  %v7754_v48 = vadd.f32 %v16285_v15, %v16361_v11  ;;  %v11348_v11 = vld [vmem:[#allocation3 + $0x122] sm:$0xff] }
 0x68c   : > { %v7872_v42 = vpop.f32.mrf.mxu2  ;;  %v9233_v21 = vld [vmem:[#allocation5 + $0x38] sm:$0x1]  ;;  %v9241_v54 = vld [vmem:[#allocation5 + $0x39] sm:$0x1]  ;;  %v9265_v43 = vld [vmem:[#allocation5 + $0x3a] sm:$0x1] }
 0x68d   : > { %v7904_v19 = vadd.f32 %v7872_v42, %v7751_v38  ;;  %v8025_v25 = vpop.f32.mrf.mxu3  ;;  %v9249_v30 = vmax.f32 %v9233_v21, %v9241_v54  ;;  %v9273_v7 = vld [vmem:[#allocation5 + $0x3b] sm:$0x1]  ;;  %v9297_v29 = vld [vmem:[#allocation5 + $0x3c] sm:$0x1]  ;;  %v9305_v44 = vld [vmem:[#allocation5 + $0x3d] sm:$0x1]  ;;  %9408 = vmatpush.msra.mxu2 %v9388_v57 }
 0x68e   : > { %v16473_v20 = vpop.f32.mrf.mxu0  ;;  %v9281_v39 = vmax.f32 %v9265_v43, %v9273_v7  ;;  %v9313_v56 = vmax.f32 %v9297_v29, %v9305_v44  ;;  %v9329_v45 = vld [vmem:[#allocation5 + $0x3e] sm:$0x1]  ;;  %v9337_v1 = vld [vmem:[#allocation5 + $0x3f] sm:$0x1]  ;;  %v9391_v5 = vld [vmem:[#allocation7 + $0xc8] sm:$0xff]  ;;  %v7753_v29 = vadd.f32 %v16285_v15, %v16338_v37 }
 0x68f   : > { %v16475_v28 = vadd.f32 %v8025_v25, %v7904_v19  ;;  %v16477_v60 = vpop.f32.mrf.mxu1  ;;  %9257 = vst [vmem:[#allocation6 + $0x1c] sm:$0x1] %v9249_v30  ;;  %v9345_v6 = vmax.f32 %v9329_v45, %v9337_v1  ;;  %9448 = vmatpush.msra.mxu3 %v9391_v5  ;;  %v9386_v21 = vld [vmem:[#allocation7 + $0xa0] sm:$0xff]  ;;  %v9387_v54 = vld [vmem:[#allocation7 + $0xa8] sm:$0xff]  ;;  %v11342_v19 = vld [vmem:[#allocation3 + $0x168] sm:$0xff] }
 0x690   : > { %9289 = vst [vmem:[#allocation6 + $0x1d] sm:$0x1] %v9281_v39  ;;  %v11341_v43 = vld [vmem:[#allocation3 + $0x109] sm:$0xff]  ;;  %v9384_v30 = vld [vmem:[#allocation7 + $0x90] sm:$0xff]  ;;  %9409 = vmatpush.msra.mxu2 %v9386_v21  ;;  %v11344_v37 = vld [vmem:[#allocation3 + $0x111] sm:$0xff] }
 0x691   : > { %11160 = vmatmul.msk.f32.gmra.mxu2 %vm579_vm4, %v17191_v36  ;;  %11200 = vmatmul.msk.f32.gmra.mxu0 %vm579_vm4, %v11338_v31  ;;  %9321 = vst [vmem:[#allocation6 + $0x1e] sm:$0x1] %v9313_v56  ;;  %v11343_v25 = vld [vmem:[#allocation3 + $0x10a] sm:$0xff]  ;;  %v9383_v56 = vld [vmem:[#allocation7 + $0x88] sm:$0xff]  ;;  %v9380_v36 = vld [vmem:[#allocation7 + $0x70] sm:$0xff] }
 0x692   : > { %11184 = vmatmul.msk.f32.gmra.mxu3 %vm579_vm4, %v11339_v47  ;;  %11224 = vmatmul.msk.f32.gmra.mxu1 %vm579_vm4, %v11340_v34  ;;  %9353 = vst [vmem:[#allocation6 + $0x1f] sm:$0x1] %v9345_v6  ;;  %v9385_v7 = vld [vmem:[#allocation7 + $0x98] sm:$0xff]  ;;  %v9382_v39 = vld [vmem:[#allocation7 + $0x80] sm:$0xff]  ;;  %v9379_v34 = vld [vmem:[#allocation7 + $0x68] sm:$0xff] }
 0x693   : > { %9449 = vmatpush.msra.mxu3 %v9389_v59  ;;  %9410 = vmatpush.msra.mxu2 %v9384_v30  ;;  %v9381_v31 = vld [vmem:[#allocation7 + $0x78] sm:$0xff]  ;;  %v9378_v47 = vld [vmem:[#allocation7 + $0x60] sm:$0xff] }
 0x694   : > { %v7875_v9 = vpop.f32.mrf.mxu2  ;;  %v11347_v15 = vld [vmem:[#allocation3 + $0x121] sm:$0xff]  ;;  %v9370_v30 = vld [vmem:[#allocation7 + $0x20] sm:$0xff] }
 0x695   : > { %v7905_v0 = vadd.f32 %v7875_v9, %v7752_v14  ;;  %v8028_v13 = vpop.f32.mrf.mxu3  ;;  %9450 = vmatpush.msra.mxu3 %v9387_v54  ;;  %9411 = vmatpush.msra.mxu2 %v9382_v39  ;;  %v9376_v14 = vld [vmem:[#allocation7 + $0x50] sm:$0xff]  ;;  %v9377_v9 = vld [vmem:[#allocation7 + $0x58] sm:$0xff]  ;;  %v9374_v54 = vld [vmem:[#allocation7 + $0x40] sm:$0xff] }
 0x696   : > { %v16486_v17 = vpop.f32.mrf.mxu0  ;;  %v9368_v39 = vld [vmem:[#allocation7 + $0x10] sm:$0xff] }
 0x697   : > { %v16488_v38 = vadd.f32 %v8028_v13, %v7905_v0  ;;  %v16490_v42 = vpop.f32.mrf.mxu1  ;;  %9451 = vmatpush.msra.mxu3 %v9385_v7  ;;  %9412 = vmatpush.msra.mxu2 %v9380_v36  ;;  %v9371_v7 = vld [vmem:[#allocation7 + $0x28] sm:$0xff]  ;;  %v9366_v36 = vld [vmem:[#allocation7] sm:$0xff] }
 0x699   : > { %11161 = vmatmul.msk.f32.gmra.mxu2 %vm579_vm4, %v17192_v51  ;;  %11201 = vmatmul.msk.f32.gmra.mxu0 %vm579_vm4, %v11341_v43  ;;  %v9375_v43 = vld [vmem:[#allocation7 + $0x48] sm:$0xff] }
 0x69a   : > { %11185 = vmatmul.msk.f32.gmra.mxu3 %vm579_vm4, %v11342_v19  ;;  %11225 = vmatmul.msk.f32.gmra.mxu1 %vm579_vm4, %v11343_v25  ;;  %v9372_v19 = vld [vmem:[#allocation7 + $0x30] sm:$0xff]  ;;  %v9373_v25 = vld [vmem:[#allocation7 + $0x38] sm:$0xff] }
 0x69b   : > { %9452 = vmatpush.msra.mxu3 %v9383_v56  ;;  %9413 = vmatpush.msra.mxu2 %v9378_v47  ;;  %v9369_v56 = vld [vmem:[#allocation7 + $0x18] sm:$0xff] }
 0x69c   : > { %v7878_v44 = vpop.f32.mrf.mxu2 }
 0x69d   : > { %v7906_v45 = vadd.f32 %v7878_v44, %v7753_v29  ;;  %v8031_v1 = vpop.f32.mrf.mxu3  ;;  %9453 = vmatpush.msra.mxu3 %v9381_v31  ;;  %9414 = vmatpush.msra.mxu2 %v9376_v14  ;;  %v9367_v31 = vld [vmem:[#allocation7 + $0x8] sm:$0xff] }
 0x69e   : > { %v16499_v8 = vpop.f32.mrf.mxu0 }
 0x69f   : > { %v16501_v46 = vadd.f32 %v8031_v1, %v7906_v45  ;;  %v16503_v6 = vpop.f32.mrf.mxu1  ;;  %9454 = vmatpush.msra.mxu3 %v9379_v34  ;;  %9415 = vmatpush.msra.mxu2 %v9374_v54  ;;  %v11349_v45 = vld [vmem:[#allocation3 + $0x129] sm:$0xff]  ;;  %v11353_v54 = vld [vmem:[#allocation3 + $0x141] sm:$0xff] }
 0x6a0   : > { %v11350_v1 = vld [vmem:[#allocation3 + $0x12a] sm:$0xff]  ;;  %v8385_v34 = vld [vmem:[#allocation3 + $0x182] sm:$0xff] }
 0x6a1   : > { %11162 = vmatmul.msk.f32.gmra.mxu2 %vm579_vm4, %v16217_v24  ;;  %11202 = vmatmul.msk.f32.gmra.mxu0 %vm579_vm4, %v11344_v37 }
 0x6a2   : > { %11186 = vmatmul.msk.f32.gmra.mxu3 %vm579_vm4, %v11345_v23  ;;  %11226 = vmatmul.msk.f32.gmra.mxu1 %vm579_vm4, %v11346_v16  ;;  %v8539_v16 = vld [vmem:[#allocation3 + $0x198] sm:$0xff] }
 0x6a3   : > { %9455 = vmatpush.msra.mxu3 %v9377_v9  ;;  %9416 = vmatpush.msra.mxu2 %v9372_v19 }
 0x6a4   : > { %v7881_v5 = vpop.f32.mrf.mxu2 }
 0x6a5   : > { %v7907_v57 = vadd.f32 %v7881_v5, %v7754_v48  ;;  %v8034_v59 = vpop.f32.mrf.mxu3  ;;  %9456 = vmatpush.msra.mxu3 %v9375_v43  ;;  %9417 = vmatpush.msra.mxu2 %v9370_v30  ;;  %v11352_v48 = vld [vmem:[#allocation3 + $0x13a] sm:$0xff]  ;;  %v9358_v30 = vld [vmem:[#allocation6] sm:$0xff] }
 0x6a6   : > { %v16512_v0 = vpop.f32.mrf.mxu0 }
 0x6a7   : > { %v16514_v13 = vadd.f32 %v8034_v59, %v7907_v57  ;;  %v16516_v21 = vpop.f32.mrf.mxu1  ;;  %9457 = vmatpush.msra.mxu3 %v9373_v25  ;;  %9418 = vmatpush.msra.mxu2 %v9368_v39  ;;  %v8540_v57 = vld [vmem:[#allocation3 + $0x1a0] sm:$0xff]  ;;  %v8386_v59 = vld [vmem:[#allocation3 + $0x18a] sm:$0xff] }
 0x6a9   : > { %11163 = vmatmul.msk.f32.gmra.mxu2 %vm579_vm4, %v16244_v33  ;;  %11203 = vmatmul.msk.f32.gmra.mxu0 %vm579_vm4, %v11347_v15  ;;  %v11354_v15 = vld [vmem:[#allocation3 + $0x142] sm:$0xff] }
 0x6aa   : > { %11187 = vmatmul.msk.f32.gmra.mxu3 %vm579_vm4, %v16422_v53  ;;  %11227 = vmatmul.msk.f32.gmra.mxu1 %vm579_vm4, %v11348_v11  ;;  %v17193_v53 = vld [vmem:[#allocation64_spill] sm:$0xff] }
 0x6ab   : > { %9458 = vmatpush.msra.mxu3 %v9371_v7  ;;  %9419 = vmatpush.msra.mxu2 %v9366_v36 }
 0x6ac   : > { %v16538_v47 = vpop.f32.mrf.mxu2 }
 0x6ad   : > { %9459 = vmatpush.msra.mxu3 %v9369_v56  ;;  %v16544_v5 = vpop.f32.mrf.mxu3 }
 0x6ae   : > { %v16524_v29 = vpop.f32.mrf.mxu0 }
 0x6af   : > { %v16526_v44 = vpop.f32.mrf.mxu1  ;;  %9460 = vmatpush.msra.mxu3 %v9367_v31  ;;  %v9360_v31 = vld [vmem:[#allocation6 + $0x10] sm:$0xff] }
 0x6b1   : > { %11164 = vmatmul.msk.f32.gmra.mxu2 %vm579_vm4, %v17193_v53  ;;  %11204 = vmatmul.msk.f32.gmra.mxu0 %vm579_vm4, %v11349_v45  ;;  %v9359_v45 = vld [vmem:[#allocation6 + $0x8] sm:$0xff] }
 0x6b2   : > { %11188 = vmatmul.msk.f32.gmra.mxu3 %vm579_vm4, %v16443_v49  ;;  %11228 = vmatmul.msk.f32.gmra.mxu1 %vm579_vm4, %v11350_v1  ;;  %v11351_v49 = vld [vmem:[#allocation3 + $0x139] sm:$0xff] }
 0x6b4   : > { %v16552_v43 = vpop.f32.mrf.mxu2 }
 0x6b5   : > { %17194 = vst [vmem:[#allocation27_spill] sm:$0xff] %v16552_v43  ;;  %v16560_v25 = vpop.f32.mrf.mxu3 }
 0x6b6   : > { %v16534_v37 = vpop.f32.mrf.mxu0  ;;  %17195 = vst [vmem:[#allocation41_spill] sm:$0xff] %v16560_v25 }
 0x6b7   : > { %v16536_v23 = vpop.f32.mrf.mxu1 }
 0x6b9   : > { %11165 = vmatmul.msk.f32.gmra.mxu2 %vm579_vm4, %v8385_v34  ;;  %11205 = vmatmul.msk.f32.gmra.mxu0 %vm579_vm4, %v11351_v49 }
 0x6ba   : > { %11189 = vmatmul.msk.f32.gmra.mxu3 %vm579_vm4, %v8539_v16  ;;  %11229 = vmatmul.msk.f32.gmra.mxu1 %vm579_vm4, %v11352_v48  ;;  %v9361_v48 = vld [vmem:[#allocation6 + $0x18] sm:$0xff] }
 0x6bc   : > { %v16566_v7 = vpop.f32.mrf.mxu2 }
 0x6bd   : > { %17196 = vst [vmem:[#allocation29_spill] sm:$0xff] %v16566_v7  ;;  %v16574_v1 = vpop.f32.mrf.mxu3 }
 0x6be   : > { %v16546_v14 = vpop.f32.mrf.mxu0  ;;  %17197 = vst [vmem:[#allocation35_spill] sm:$0xff] %v16574_v1 }
 0x6bf   : > { %v16548_v9 = vpop.f32.mrf.mxu1 }
 0x6c1   : > { %11166 = vmatmul.msk.f32.gmra.mxu2 %vm579_vm4, %v8386_v59  ;;  %11206 = vmatmul.msk.f32.gmra.mxu0 %vm579_vm4, %v11353_v54 }
 0x6c2   : > { %11190 = vmatmul.msk.f32.gmra.mxu3 %vm579_vm4, %v8540_v57  ;;  %11230 = vmatmul.msk.f32.gmra.mxu1 %vm579_vm4, %v11354_v15 }
 0x6c6   : > { %v16556_v11 = vpop.f32.mrf.mxu0 }
 0x6c7   : > { %v16558_v19 = vpop.f32.mrf.mxu1 }
 0x6c9   : > { %11207 = vmatmul.msk.f32.gmra.mxu0 %vm579_vm4, %v16161_v55  ;;  %9420 = vmatmul.f32.vlgmr.msra.gmra.mxu2 %v9358_v30  ;;  %v16578_v55 = vpop.f32.mrf.mxu2 }
 0x6ca   : > { %11231 = vmatmul.msk.f32.gmra.mxu1 %vm579_vm4, %v17192_v51  ;;  %9461 = vmatmul.f32.vlgmr.msra.gmra.mxu3 %v9358_v30  ;;  %17198 = vst [vmem:[#allocation58_spill] sm:$0xff] %v16578_v55 }
 0x6ce   : > { %v16568_v39 = vpop.f32.mrf.mxu0 }
 0x6cf   : > { %v16570_v56 = vpop.f32.mrf.mxu1 }
 0x6d1   : > { %11208 = vmatmul.msk.f32.gmra.mxu0 %vm579_vm4, %v16210_v63  ;;  %9423 = vmatmul.f32.gmra.mxu2 %v9359_v45  ;;  %v16588_v63 = vpop.f32.mrf.mxu3  ;;  %v8460_v49 = vpop.f32.mrf.mxu2 }
 0x6d2   : > { %11232 = vmatmul.msk.f32.gmra.mxu1 %vm579_vm4, %v16217_v24  ;;  %9464 = vmatmul.f32.gmra.mxu3 %v9359_v45  ;;  %17199 = vst [vmem:[#allocation36_spill] sm:$0xff] %v16588_v63 }
 0x6d6   : > { %v16580_v51 = vpop.f32.mrf.mxu0 }
 0x6d7   : > { %v16582_v36 = vpop.f32.mrf.mxu1 }
 0x6d9   : > { %11209 = vmatmul.msk.f32.gmra.mxu0 %vm579_vm4, %v16239_v12  ;;  %9426 = vmatmul.f32.gmra.mxu2 %v9360_v31  ;;  %v8614_v12 = vpop.f32.mrf.mxu3  ;;  %v8463_v54 = vpop.f32.mrf.mxu2 }
 0x6da   : > { %11233 = vmatmul.msk.f32.gmra.mxu1 %vm579_vm4, %v16244_v33  ;;  %9467 = vmatmul.f32.gmra.mxu3 %v9360_v31  ;;  %v8692_v31 = vld [vmem:[#allocation3 + $0x199] sm:$0xff] }
 0x6de   : > { %v16590_v16 = vpop.f32.mrf.mxu0 }
 0x6df   : > { %v16592_v24 = vpop.f32.mrf.mxu1 }
 0x6e1   : > { %11210 = vmatmul.msk.f32.gmra.mxu0 %vm579_vm4, %v16266_v40  ;;  %9429 = vmatmul.f32.gmra.mxu2 %v9361_v48  ;;  %v8617_v40 = vpop.f32.mrf.mxu3 }
 0x6e2   : > { %11234 = vmatmul.msk.f32.gmra.mxu1 %vm579_vm4, %v17193_v53  ;;  %9470 = vmatmul.f32.gmra.mxu3 %v9361_v48  ;;  %v8466_v53 = vpop.f32.mrf.mxu2 }
 0x6e6   : > { %v16598_v57 = vpop.f32.mrf.mxu0 }
 0x6e7   : > { %17200 = vst [vmem:[#allocation24_spill] sm:$0xff] %v16598_v57  ;;  %v16600_v33 = vpop.f32.mrf.mxu1 }
 0x6e8   : > { %17201 = vst [vmem:[#allocation31_spill] sm:$0xff] %v16600_v33 }
 0x6e9   : > { %11211 = vmatmul.msk.f32.gmra.mxu0 %vm579_vm4, %v16427_v52  ;;  %v8845_v52 = vld [vmem:[#allocation3 + $0x19a] sm:$0xff] }
 0x6ea   : > { %11235 = vmatmul.msk.f32.gmra.mxu1 %vm579_vm4, %v8385_v34  ;;  %v8620_v34 = vpop.f32.mrf.mxu3  ;;  %v8469_v63 = vpop.f32.mrf.mxu2 }
 0x6ee   : > { %v16605_v15 = vpop.f32.mrf.mxu0 }
 0x6ef   : > { %17202 = vst [vmem:[#allocation21_spill] sm:$0xff] %v16605_v15  ;;  %v16607_v30 = vpop.f32.mrf.mxu1  ;;  %v8693_v15 = vld [vmem:[#allocation3 + $0x1a1] sm:$0xff] }
 0x6f0   : > { %17203 = vst [vmem:[#allocation40_spill] sm:$0xff] %v16607_v30 }
 0x6f1   : > { %11212 = vmatmul.msk.f32.gmra.mxu0 %vm579_vm4, %v16447_v35  ;;  %v8846_v35 = vld [vmem:[#allocation3 + $0x1a2] sm:$0xff] }
 0x6f2   : > { %11236 = vmatmul.msk.f32.gmra.mxu1 %vm579_vm4, %v8386_v59  ;;  %v8623_v59 = vpop.f32.mrf.mxu3 }
 0x6f6   : > { %v16612_v45 = vpop.f32.mrf.mxu0 }
 0x6f7   : > { %17204 = vst [vmem:[#allocation45_spill] sm:$0xff] %v16612_v45  ;;  %v16614_v48 = vpop.f32.mrf.mxu1  ;;  %v16626_v45 = vpop.f32.mrf.mxu2 }
 0x6f8   : > { %17205 = vst [vmem:[#allocation34_spill] sm:$0xff] %v16614_v48  ;;  %v8202_v48 = vadd.f32 %v16457_v2, %v16312_v41 }
 0x6f9   : > { %11213 = vmatmul.msk.f32.gmra.mxu0 %vm579_vm4, %v8692_v31 }
 0x6fa   : > { %11237 = vmatmul.msk.f32.gmra.mxu1 %vm579_vm4, %v8845_v52  ;;  %v8355_v52 = vadd.f32 %v16461_v26, %v8202_v48  ;;  %v8205_v26 = vadd.f32 %v16499_v8, %v16373_v3 }
 0x6fc   : > { %v8508_v33 = vadd.f32 %v8460_v49, %v8355_v52  ;;  %v8358_v52 = vadd.f32 %v16503_v6, %v8205_v26 }
 0x6fe   : > { %v16618_v30 = vpop.f32.mrf.mxu0  ;;  %v8662_v43 = vadd.f32 %v8614_v12, %v8508_v33  ;;  %v8511_v33 = vadd.f32 %v8469_v63, %v8358_v52 }
 0x6ff   : > { %17206 = vst [vmem:[#allocation42_spill] sm:$0xff] %v16618_v30  ;;  %v16620_v55 = vpop.f32.mrf.mxu1  ;;  %v8204_v30 = vadd.f32 %v16486_v17, %v16359_v10  ;;  %v16636_v2 = vpop.f32.mrf.mxu2 }
 0x700   : > { %17207 = vst [vmem:[#allocation23_spill] sm:$0xff] %v16620_v55  ;;  %v16631_v55 = vpop.f32.mrf.mxu3  ;;  %v8665_v7 = vadd.f32 %v8623_v59, %v8511_v33 }
 0x701   : > { %11214 = vmatmul.msk.f32.gmra.mxu0 %vm579_vm4, %v8693_v15  ;;  %v8203_v15 = vadd.f32 %v16473_v20, %v16336_v27 }
 0x702   : > { %11238 = vmatmul.msk.f32.gmra.mxu1 %vm579_vm4, %v8846_v35  ;;  %v8357_v35 = vadd.f32 %v16490_v42, %v8204_v30 }
 0x703   : > { %v8356_v57 = vadd.f32 %v16477_v60, %v8203_v15 }
 0x704   : > { %v8510_v41 = vadd.f32 %v8466_v53, %v8357_v35 }
 0x705   : > { %v8509_v17 = vadd.f32 %v8463_v54, %v8356_v57 }
 0x706   : > { %v8767_v25 = vpop.f32.mrf.mxu0  ;;  %v8664_v49 = vadd.f32 %v8620_v34, %v8510_v41 }
 0x707   : > { %v8920_v31 = vpop.f32.mrf.mxu1  ;;  %v8815_v10 = vadd.f32 %v8767_v25, %v8662_v43  ;;  %v8663_v12 = vadd.f32 %v8617_v40, %v8509_v17  ;;  %v8478_v15 = vpop.f32.mrf.mxu2 }
 0x708   : > { %v16642_v42 = vpop.f32.mrf.mxu3 }
 0x709   : > { %v8968_v50 = vadd.f32 %v8920_v31, %v8815_v10 }
 0x70b   : > { %v8984_v53 = vmax.f32 %v8968_v50, 0.0 }
 0x70e   : > { %v8770_v18 = vpop.f32.mrf.mxu0 }
 0x70f   : > { %v8923_v1 = vpop.f32.mrf.mxu1  ;;  %v8816_v35 = vadd.f32 %v8770_v18, %v8663_v12  ;;  %v8481_v26 = vpop.f32.mrf.mxu2  ;;  %v8206_v18 = vadd.f32 %v16512_v0, %v16394_v58 }
 0x710   : > { %v8632_v54 = vpop.f32.mrf.mxu3 }
 0x711   : > { %v8969_v43 = vadd.f32 %v8923_v1, %v8816_v35  ;;  %v8359_v33 = vadd.f32 %v16516_v21, %v8206_v18 }
 0x713   : > { %v8985_v34 = vmax.f32 %v8969_v43, 0.0  ;;  %v8512_v0 = vadd.f32 %v16626_v45, %v8359_v33 }
 0x716   : > { %v8773_v48 = vpop.f32.mrf.mxu0 }
 0x717   : > { %v8817_v27 = vadd.f32 %v8773_v48, %v8664_v49  ;;  %v8926_v20 = vpop.f32.mrf.mxu1 }
 0x718   : > { %v8635_v58 = vpop.f32.mrf.mxu3 }
 0x719   : > { %v8970_v30 = vadd.f32 %v8926_v20, %v8817_v27 }
 0x71b   : > { %v8986_v60 = vmax.f32 %v8970_v30, 0.0  ;;  %v8208_v30 = vadd.f32 %v16534_v37, %v16439_v32  ;;  %v16653_v32 = vpop.f32.mrf.mxu2 }
 0x71d   : > { %v9064_v3 = vmax.f32 %v8984_v53, %v8986_v60  ;;  %v8361_v43 = vadd.f32 %v16536_v23, %v8208_v30 }
 0x71e   : > { %v8776_v8 = vpop.f32.mrf.mxu0 }
 0x71f   : > { %9067 = vst [vmem:[#allocation5 + $0x40] sm:$0xff] %v9064_v3  ;;  %v8818_v25 = vadd.f32 %v8776_v8, %v8665_v7  ;;  %v8929_v57 = vpop.f32.mrf.mxu1  ;;  %v8207_v8 = vadd.f32 %v16524_v29, %v16418_v61  ;;  %v8209_v29 = vadd.f32 %v16546_v14, %v16459_v22 }
 0x721   : > { %v8971_v6 = vadd.f32 %v8929_v57, %v8818_v25  ;;  %v8360_v61 = vadd.f32 %v16526_v44, %v8207_v8 }
 0x723   : > { %v8987_v31 = vmax.f32 %v8971_v6, 0.0  ;;  %v8513_v18 = vadd.f32 %v16636_v2, %v8360_v61 }
 0x725   : > { %v9065_v41 = vmax.f32 %v8985_v34, %v8987_v31 }
 0x726   : > { %v8779_v40 = vpop.f32.mrf.mxu0  ;;  %v9106_v63 = vld [vmem:[#allocation5 + $0x40] sm:$0x1]  ;;  %v9114_v10 = vld [vmem:[#allocation5 + $0x41] sm:$0x1]  ;;  %v9138_v50 = vld [vmem:[#allocation5 + $0x42] sm:$0x1] }
 0x727   : > { %9068 = vst [vmem:[#allocation5 + $0x48] sm:$0xff] %v9065_v41  ;;  %v8932_v59 = vpop.f32.mrf.mxu1  ;;  %v9122_v17 = vmax.f32 %v9106_v63, %v9114_v10  ;;  %v9146_v1 = vld [vmem:[#allocation5 + $0x43] sm:$0x1]  ;;  %v9170_v49 = vld [vmem:[#allocation5 + $0x44] sm:$0x1]  ;;  %v8666_v63 = vadd.f32 %v16631_v55, %v8512_v0  ;;  %v8514_v10 = vadd.f32 %v8478_v15, %v8361_v43  ;;  %v8362_v55 = vadd.f32 %v16548_v9, %v8209_v29 }
 0x728   : > { %v9154_v7 = vmax.f32 %v9138_v50, %v9146_v1  ;;  %v9178_v48 = vld [vmem:[#allocation5 + $0x45] sm:$0x1]  ;;  %v9202_v52 = vld [vmem:[#allocation5 + $0x46] sm:$0x1]  ;;  %v9210_v27 = vld [vmem:[#allocation5 + $0x47] sm:$0x1]  ;;  %v16660_v1 = vpop.f32.mrf.mxu3  ;;  %v8212_v29 = vadd.f32 %v16580_v51, %v16501_v46 }
 0x729   : > { %9130 = vst [vmem:[#allocation6 + $0x20] sm:$0x1] %v9122_v17  ;;  %v9186_v20 = vmax.f32 %v9170_v49, %v9178_v48  ;;  %v9218_v12 = vmax.f32 %v9202_v52, %v9210_v27  ;;  %v8819_v23 = vadd.f32 %v8779_v40, %v8666_v63  ;;  %v8668_v17 = vadd.f32 %v8632_v54, %v8514_v10 }
 0x72a   : > { %9162 = vst [vmem:[#allocation6 + $0x21] sm:$0x1] %v9154_v7  ;;  %v8667_v52 = vadd.f32 %v16642_v42, %v8513_v18  ;;  %v8515_v44 = vadd.f32 %v8481_v26, %v8362_v55 }
 0x72b   : > { %9194 = vst [vmem:[#allocation6 + $0x22] sm:$0x1] %v9186_v20  ;;  %v8972_v15 = vadd.f32 %v8932_v59, %v8819_v23  ;;  %v16664_v20 = vpop.f32.mrf.mxu2 }
 0x72c   : > { %9226 = vst [vmem:[#allocation6 + $0x23] sm:$0x1] %v9218_v12  ;;  %v8669_v2 = vadd.f32 %v8635_v58, %v8515_v44  ;;  %v8210_v58 = vadd.f32 %v16556_v11, %v16475_v28  ;;  %v9513_v28 = vld [vmem:[%s16888_s10 + $0x18] sm:$0xff] }
 0x72d   : > { %v8988_v22 = vmax.f32 %v8972_v15, 0.0  ;;  %9600 = vmatpush.msrb.mxu3 %v9513_v28 }
 0x72e   : > { %v8782_v53 = vpop.f32.mrf.mxu0  ;;  %v9234_v35 = vld [vmem:[#allocation5 + $0x48] sm:$0x1]  ;;  %v9242_v60 = vld [vmem:[#allocation5 + $0x49] sm:$0x1]  ;;  %v9266_v3 = vld [vmem:[#allocation5 + $0x4a] sm:$0x1]  ;;  %v8363_v61 = vadd.f32 %v16558_v19, %v8210_v58 }
 0x72f   : > { %v8935_v25 = vpop.f32.mrf.mxu1  ;;  %v9250_v57 = vmax.f32 %v9234_v35, %v9242_v60  ;;  %v9274_v21 = vld [vmem:[#allocation5 + $0x4b] sm:$0x1]  ;;  %v9298_v6 = vld [vmem:[#allocation5 + $0x4c] sm:$0x1]  ;;  %v9306_v34 = vld [vmem:[#allocation5 + $0x4d] sm:$0x1]  ;;  %v8820_v14 = vadd.f32 %v8782_v53, %v8667_v52 }
 0x730   : > { %v9282_v37 = vmax.f32 %v9266_v3, %v9274_v21  ;;  %v9314_v31 = vmax.f32 %v9298_v6, %v9306_v34  ;;  %v9330_v41 = vld [vmem:[#allocation5 + $0x4e] sm:$0x1]  ;;  %v9338_v45 = vld [vmem:[#allocation5 + $0x4f] sm:$0x1]  ;;  %v16666_v0 = vpop.f32.mrf.mxu3  ;;  %v8516_v23 = vadd.f32 %v16653_v32, %v8363_v61  ;;  %v11355_v58 = vld [vmem:[%s16885_s7] ss:$0 sm:$0xff] }
 0x731   : > { %9258 = vst [vmem:[#allocation6 + $0x24] sm:$0x1] %v9250_v57  ;;  %v9346_v50 = vmax.f32 %v9330_v41, %v9338_v45  ;;  %v8973_v30 = vadd.f32 %v8935_v25, %v8820_v14 }
 0x732   : > { %9290 = vst [vmem:[#allocation6 + $0x25] sm:$0x1] %v9282_v37  ;;  %v9512_v37 = vld [vmem:[%s16888_s10 + $0x10] sm:$0xff]  ;;  %v8670_v14 = vadd.f32 %v16660_v1, %v8516_v23 }
 0x733   : > { %9322 = vst [vmem:[#allocation6 + $0x26] sm:$0x1] %v9314_v31  ;;  %v8989_v26 = vmax.f32 %v8973_v30, 0.0  ;;  %v8490_v60 = vpop.f32.mrf.mxu2  ;;  %9559 = vmatpush.msrb.mxu2 %v9512_v37 }
 0x734   : > { %9354 = vst [vmem:[#allocation6 + $0x27] sm:$0x1] %v9346_v50 }
 0x736   : > { %v8785_v49 = vpop.f32.mrf.mxu0 }
 0x737   : > { %v8821_v7 = vadd.f32 %v8785_v49, %v8668_v17  ;;  %v8938_v48 = vpop.f32.mrf.mxu1 }
 0x738   : > { %v8644_v11 = vpop.f32.mrf.mxu3 }
 0x739   : > { %v8974_v27 = vadd.f32 %v8938_v48, %v8821_v7  ;;  %v8211_v7 = vadd.f32 %v16568_v39, %v16488_v38  ;;  %v8365_v48 = vadd.f32 %v16582_v36, %v8212_v29  ;;  %v8213_v38 = vadd.f32 %v16590_v16, %v16514_v13 }
 0x73b   : > { %v8990_v40 = vmax.f32 %v8974_v27, 0.0  ;;  %v9362_v12 = vld [vmem:[#allocation6 + $0x20] sm:$0xff]  ;;  %v8493_v18 = vpop.f32.mrf.mxu2  ;;  %v8518_v32 = vadd.f32 %v8490_v60, %v8365_v48  ;;  %v8366_v1 = vadd.f32 %v16592_v24, %v8213_v38  ;;  %v17214_v38 = vld [vmem:[#allocation31_spill] sm:$0xff] }
 0x73c   : > { %9432 = vmatmul.f32.gmra.mxu2 %v9362_v12  ;;  %9473 = vmatmul.f32.gmra.mxu3 %v9362_v12 }
 0x73d   : > { %v9075_v54 = vmax.f32 %v8988_v22, %v8990_v40  ;;  %v8672_v30 = vadd.f32 %v8644_v11, %v8518_v32  ;;  %v8519_v60 = vadd.f32 %v8493_v18, %v8366_v1  ;;  %v17209_v18 = vld [vmem:[#allocation33_spill] sm:$0xff] }
 0x73e   : > { %v8788_v33 = vpop.f32.mrf.mxu0 }
 0x73f   : > { %9078 = vst [vmem:[#allocation5 + $0x50] sm:$0xff] %v9075_v54  ;;  %v8822_v9 = vadd.f32 %v8788_v33, %v8669_v2  ;;  %v8941_v59 = vpop.f32.mrf.mxu1  ;;  %v8364_v54 = vadd.f32 %v16570_v56, %v8211_v7 }
 0x740   : > { %v8647_v36 = vpop.f32.mrf.mxu3 }
 0x741   : > { %v8975_v42 = vadd.f32 %v8941_v59, %v8822_v9  ;;  %v8517_v33 = vadd.f32 %v16664_v20, %v8364_v54  ;;  %v8673_v20 = vadd.f32 %v8647_v36, %v8519_v60  ;;  %v17215_v36 = vld [vmem:[#allocation45_spill] sm:$0xff] }
 0x743   : > { %v8991_v35 = vmax.f32 %v8975_v42, 0.0  ;;  %v8671_v56 = vadd.f32 %v16666_v0, %v8517_v33 }
 0x745   : > { %v9076_v3 = vmax.f32 %v8989_v26, %v8991_v35  ;;  %v16689_v35 = vpop.f32.mrf.mxu2 }
 0x746   : > { %v8791_v8 = vpop.f32.mrf.mxu0  ;;  %v9107_v53 = vld [vmem:[#allocation5 + $0x50] sm:$0x1]  ;;  %v9115_v43 = vld [vmem:[#allocation5 + $0x51] sm:$0x1]  ;;  %v9139_v57 = vld [vmem:[#allocation5 + $0x52] sm:$0x1] }
 0x747   : > { %9079 = vst [vmem:[#allocation5 + $0x58] sm:$0xff] %v9076_v3  ;;  %v8944_v21 = vpop.f32.mrf.mxu1  ;;  %v9123_v25 = vmax.f32 %v9107_v53, %v9115_v43  ;;  %v9147_v6 = vld [vmem:[#allocation5 + $0x53] sm:$0x1]  ;;  %v9171_v34 = vld [vmem:[#allocation5 + $0x54] sm:$0x1]  ;;  %v8823_v39 = vadd.f32 %v8791_v8, %v8670_v14 }
 0x748   : > { %v9155_v31 = vmax.f32 %v9139_v57, %v9147_v6  ;;  %v9179_v41 = vld [vmem:[#allocation5 + $0x55] sm:$0x1]  ;;  %v9203_v45 = vld [vmem:[#allocation5 + $0x56] sm:$0x1]  ;;  %v9211_v63 = vld [vmem:[#allocation5 + $0x57] sm:$0x1]  ;;  %v16692_v57 = vpop.f32.mrf.mxu3 }
 0x749   : > { %9131 = vst [vmem:[#allocation6 + $0x28] sm:$0x1] %v9123_v25  ;;  %v9187_v10 = vmax.f32 %v9171_v34, %v9179_v41  ;;  %v9219_v50 = vmax.f32 %v9203_v45, %v9211_v63  ;;  %v8976_v59 = vadd.f32 %v8944_v21, %v8823_v39  ;;  %v7755_v21 = vadd.f32 %v11355_v58, %v16375_v62 }
 0x74a   : > { %9163 = vst [vmem:[#allocation6 + $0x29] sm:$0x1] %v9155_v31  ;;  %v7757_v41 = vadd.f32 %v11355_v58, %v16420_v4 }
 0x74b   : > { %9195 = vst [vmem:[#allocation6 + $0x2a] sm:$0x1] %v9187_v10  ;;  %v8992_v13 = vmax.f32 %v8976_v59, 0.0  ;;  %v7908_v34 = vadd.f32 %v16538_v47, %v7755_v21  ;;  %v17217_v59 = vld [vmem:[#allocation58_spill] sm:$0xff] }
 0x74c   : > { %9227 = vst [vmem:[#allocation6 + $0x2b] sm:$0x1] %v9219_v50  ;;  %v17208_v50 = vld [vmem:[#allocation29_spill] sm:$0xff] }
 0x74d   : > { %v16699_v31 = vpop.f32.mrf.mxu2  ;;  %v8061_v10 = vadd.f32 %v16544_v5, %v7908_v34  ;;  %v7910_v28 = vadd.f32 %v17208_v50, %v7757_v41  ;;  %v17220_v41 = vld [vmem:[#allocation36_spill] sm:$0xff] }
 0x74e   : > { %v8794_v17 = vpop.f32.mrf.mxu0  ;;  %v9235_v49 = vld [vmem:[#allocation5 + $0x58] sm:$0x1]  ;;  %v9243_v55 = vld [vmem:[#allocation5 + $0x59] sm:$0x1]  ;;  %v9267_v15 = vld [vmem:[#allocation5 + $0x5a] sm:$0x1] }
 0x74f   : > { %v8947_v52 = vpop.f32.mrf.mxu1  ;;  %v9251_v44 = vmax.f32 %v9235_v49, %v9243_v55  ;;  %v9275_v19 = vld [vmem:[#allocation5 + $0x5b] sm:$0x1]  ;;  %v9299_v27 = vld [vmem:[#allocation5 + $0x5c] sm:$0x1]  ;;  %v9307_v46 = vld [vmem:[#allocation5 + $0x5d] sm:$0x1]  ;;  %v8824_v16 = vadd.f32 %v8794_v17, %v8671_v56  ;;  %v7756_v17 = vadd.f32 %v11355_v58, %v17209_v18 }
 0x750   : > { %v9283_v22 = vmax.f32 %v9267_v15, %v9275_v19  ;;  %v9331_v51 = vld [vmem:[#allocation5 + $0x5e] sm:$0x1]  ;;  %v9315_v40 = vmax.f32 %v9299_v27, %v9307_v46  ;;  %v9339_v12 = vld [vmem:[#allocation5 + $0x5f] sm:$0x1]  ;;  %v8653_v48 = vpop.f32.mrf.mxu3  ;;  %v9510_v19 = vld [vmem:[%s16888_s10] sm:$0xff] }
 0x751   : > { %9259 = vst [vmem:[#allocation6 + $0x2c] sm:$0x1] %v9251_v44  ;;  %v9347_v2 = vmax.f32 %v9331_v51, %v9339_v12  ;;  %v8977_v0 = vadd.f32 %v8947_v52, %v8824_v16  ;;  %v17210_v49 = vld [vmem:[#allocation24_spill] sm:$0xff]  ;;  %v17211_v27 = vld [vmem:[#allocation27_spill] sm:$0xff]  ;;  %9560 = vmatpush.msrb.mxu2 %v9510_v19  ;;  %v17218_v16 = vld [vmem:[#allocation21_spill] sm:$0xff] }
 0x752   : > { %9291 = vst [vmem:[#allocation6 + $0x2d] sm:$0x1] %v9283_v22  ;;  %v8214_v47 = vadd.f32 %v17210_v49, %v8061_v10  ;;  %v7909_v22 = vadd.f32 %v17211_v27, %v7756_v17  ;;  %v17212_v46 = vld [vmem:[#allocation35_spill] sm:$0xff] }
 0x753   : > { %9323 = vst [vmem:[#allocation6 + $0x2e] sm:$0x1] %v9315_v40  ;;  %v8993_v45 = vmax.f32 %v8977_v0, 0.0  ;;  %v8063_v51 = vadd.f32 %v17212_v46, %v7910_v28  ;;  %v9511_v40 = vld [vmem:[%s16888_s10 + $0x8] sm:$0xff]  ;;  %v17221_v28 = vld [vmem:[#allocation40_spill] sm:$0xff] }
 0x754   : > { %9355 = vst [vmem:[#allocation6 + $0x2f] sm:$0x1] %v9347_v2  ;;  %9601 = vmatpush.msrb.mxu3 %v9511_v40  ;;  %v17213_v2 = vld [vmem:[#allocation32_spill] sm:$0xff]  ;;  %v8367_v39 = vadd.f32 %v17214_v38, %v8214_v47 }
 0x755   : > { %v7758_v54 = vadd.f32 %v11355_v58, %v17213_v2  ;;  %v8216_v33 = vadd.f32 %v17215_v36, %v8063_v51 }
 0x756   : > { %v8797_v9 = vpop.f32.mrf.mxu0 }
 0x757   : > { %v8825_v42 = vadd.f32 %v8797_v9, %v8672_v30  ;;  %v8950_v26 = vpop.f32.mrf.mxu1  ;;  %v8502_v30 = vpop.f32.mrf.mxu2  ;;  %v17216_v9 = vld [vmem:[#allocation41_spill] sm:$0xff] }
 0x758   : > { %v8062_v1 = vadd.f32 %v17216_v9, %v7909_v22  ;;  %v8656_v50 = vpop.f32.mrf.mxu3 }
 0x759   : > { %v8978_v3 = vadd.f32 %v8950_v26, %v8825_v42  ;;  %v7911_v42 = vadd.f32 %v17217_v59, %v7758_v54  ;;  %v8520_v26 = vadd.f32 %v16689_v35, %v8367_v39 }
 0x75b   : > { %v8994_v8 = vmax.f32 %v8978_v3, 0.0  ;;  %v9363_v53 = vld [vmem:[#allocation6 + $0x28] sm:$0xff]  ;;  %v8674_v35 = vadd.f32 %v16692_v57, %v8520_v26 }
 0x75c   : > { %9435 = vmatmul.f32.gmra.mxu2 %v9363_v53  ;;  %9476 = vmatmul.f32.gmra.mxu3 %v9363_v53  ;;  %v17219_v53 = vld [vmem:[#allocation34_spill] sm:$0xff] }
 0x75d   : > { %v9086_v43 = vmax.f32 %v8992_v13, %v8994_v8  ;;  %v8215_v8 = vadd.f32 %v17218_v16, %v8062_v1  ;;  %v9690_v16 = vld [vmem:[#allocation10 + $0xf8] sm:$0xff] }
 0x75e   : > { %v8800_v24 = vpop.f32.mrf.mxu0  ;;  %9736 = vmatpush.msra.mxu1 %v9690_v16 }
 0x75f   : > { %9089 = vst [vmem:[#allocation5 + $0x60] sm:$0xff] %v9086_v43  ;;  %v8826_v25 = vadd.f32 %v8800_v24, %v8673_v20  ;;  %v8953_v6 = vpop.f32.mrf.mxu1  ;;  %v8369_v20 = vadd.f32 %v17219_v53, %v8216_v33  ;;  %v8505_v49 = vpop.f32.mrf.mxu2 }
 0x761   : > { %v8979_v37 = vadd.f32 %v8953_v6, %v8826_v25 }
 0x763   : > { %v8995_v63 = vmax.f32 %v8979_v37, 0.0 }
 0x765   : > { %v9087_v11 = vmax.f32 %v8993_v45, %v8995_v63  ;;  %v8064_v45 = vadd.f32 %v17220_v41, %v7911_v42  ;;  %v8522_v63 = vadd.f32 %v8502_v30, %v8369_v20  ;;  %v9673_v41 = vld [vmem:[#allocation10 + $0x70] sm:$0xff] }
 0x766   : > { %v8803_v61 = vpop.f32.mrf.mxu0  ;;  %v9108_v62 = vld [vmem:[#allocation5 + $0x60] sm:$0x1]  ;;  %v9116_v29 = vld [vmem:[#allocation5 + $0x61] sm:$0x1]  ;;  %v9140_v23 = vld [vmem:[#allocation5 + $0x62] sm:$0x1] }
 0x767   : > { %9090 = vst [vmem:[#allocation5 + $0x68] sm:$0xff] %v9087_v11  ;;  %v8956_v55 = vpop.f32.mrf.mxu1  ;;  %v9124_v15 = vmax.f32 %v9108_v62, %v9116_v29  ;;  %v9148_v7 = vld [vmem:[#allocation5 + $0x63] sm:$0x1]  ;;  %v9172_v4 = vld [vmem:[#allocation5 + $0x64] sm:$0x1]  ;;  %v8368_v11 = vadd.f32 %v17221_v28, %v8215_v8  ;;  %v17222_v62 = vld [vmem:[#allocation42_spill] sm:$0xff]  ;;  %v8676_v17 = vadd.f32 %v8656_v50, %v8522_v63 }
 0x768   : > { %v9156_v52 = vmax.f32 %v9140_v23, %v9148_v7  ;;  %v9180_v44 = vld [vmem:[#allocation5 + $0x65] sm:$0x1]  ;;  %v9204_v5 = vld [vmem:[#allocation5 + $0x66] sm:$0x1]  ;;  %v9212_v32 = vld [vmem:[#allocation5 + $0x67] sm:$0x1]  ;;  %v8217_v29 = vadd.f32 %v17222_v62, %v8064_v45  ;;  %v8827_v23 = vadd.f32 %v8803_v61, %v8674_v35  ;;  %v8659_v61 = vpop.f32.mrf.mxu3 }
 0x769   : > { %9132 = vst [vmem:[#allocation6 + $0x30] sm:$0x1] %v9124_v15  ;;  %v9188_v14 = vmax.f32 %v9172_v4, %v9180_v44  ;;  %v9220_v12 = vmax.f32 %v9204_v5, %v9212_v32  ;;  %v8521_v18 = vadd.f32 %v16699_v31, %v8368_v11  ;;  %v17223_v15 = vld [vmem:[#allocation23_spill] sm:$0xff]  ;;  %v9672_v63 = vld [vmem:[#allocation10 + $0x68] sm:$0xff]  ;;  %v9671_v28 = vld [vmem:[#allocation10 + $0x60] sm:$0xff] }
 0x76a   : > { %9164 = vst [vmem:[#allocation6 + $0x31] sm:$0x1] %v9156_v52  ;;  %v8370_v7 = vadd.f32 %v17223_v15, %v8217_v29  ;;  %v8980_v57 = vadd.f32 %v8956_v55, %v8827_v23  ;;  %v9689_v45 = vld [vmem:[#allocation10 + $0xf0] sm:$0xff]  ;;  %v9688_v50 = vld [vmem:[#allocation10 + $0xe8] sm:$0xff]  ;;  %v9687_v11 = vld [vmem:[#allocation10 + $0xe0] sm:$0xff] }
 0x76b   : > { %9196 = vst [vmem:[#allocation6 + $0x32] sm:$0x1] %v9188_v14  ;;  %v8675_v44 = vadd.f32 %v8653_v48, %v8521_v18  ;;  %9737 = vmatpush.msra.mxu1 %v9689_v45  ;;  %v9503_v62 = vld [vmem:[%s16732_s26 + $0x8] sm:$0xff]  ;;  %v9670_v29 = vld [vmem:[#allocation10 + $0x58] sm:$0xff]  ;;  %v9504_v18 = vld [vmem:[%s16732_s26 + $0x10] sm:$0xff] }
 0x76c   : > { %9228 = vst [vmem:[#allocation6 + $0x33] sm:$0x1] %v9220_v12  ;;  %v8523_v5 = vadd.f32 %v8505_v49, %v8370_v7  ;;  %v8996_v27 = vmax.f32 %v8980_v57, 0.0  ;;  %v9686_v23 = vld [vmem:[#allocation10 + $0xd8] sm:$0xff]  ;;  %v9685_v49 = vld [vmem:[#allocation10 + $0xd0] sm:$0xff]  ;;  %v9668_v15 = vld [vmem:[#allocation10 + $0x48] sm:$0xff] }
 0x76d   : > { %9738 = vmatpush.msra.mxu1 %v9688_v50  ;;  %v9506_v7 = vld [vmem:[%s16732_s26 + $0x20] sm:$0xff]  ;;  %v9684_v57 = vld [vmem:[#allocation10 + $0xc8] sm:$0xff] }
 0x76e   : > { %v8806_v56 = vpop.f32.mrf.mxu0  ;;  %v9236_v60 = vld [vmem:[#allocation5 + $0x68] sm:$0x1]  ;;  %v9244_v3 = vld [vmem:[#allocation5 + $0x69] sm:$0x1]  ;;  %v9268_v13 = vld [vmem:[#allocation5 + $0x6a] sm:$0x1]  ;;  %v8677_v14 = vadd.f32 %v8659_v61, %v8523_v5 }
 0x76f   : > { %v8959_v43 = vpop.f32.mrf.mxu1  ;;  %v9252_v24 = vmax.f32 %v9236_v60, %v9244_v3  ;;  %v9276_v58 = vld [vmem:[#allocation5 + $0x6b] sm:$0x1]  ;;  %v9300_v21 = vld [vmem:[#allocation5 + $0x6c] sm:$0x1]  ;;  %v9308_v0 = vld [vmem:[#allocation5 + $0x6d] sm:$0x1]  ;;  %v8828_v22 = vadd.f32 %v8806_v56, %v8675_v44  ;;  %9739 = vmatpush.msra.mxu1 %v9687_v11 }
 0x770   : > { %v9284_v25 = vmax.f32 %v9268_v13, %v9276_v58  ;;  %v9316_v6 = vmax.f32 %v9300_v21, %v9308_v0  ;;  %v9332_v34 = vld [vmem:[#allocation5 + $0x6e] sm:$0x1]  ;;  %v9340_v37 = vld [vmem:[#allocation5 + $0x6f] sm:$0x1]  ;;  %v9674_v13 = vld [vmem:[#allocation10 + $0x78] sm:$0xff] }
 0x771   : > { %9260 = vst [vmem:[#allocation6 + $0x34] sm:$0x1] %v9252_v24  ;;  %v9348_v10 = vmax.f32 %v9332_v34, %v9340_v37  ;;  %v8981_v40 = vadd.f32 %v8959_v43, %v8828_v22  ;;  %9695 = vmatpush.msra.mxu0 %v9674_v13  ;;  %9740 = vmatpush.msra.mxu1 %v9686_v23  ;;  %v9666_v44 = vld [vmem:[#allocation10 + $0x38] sm:$0xff]  ;;  %v9664_v22 = vld [vmem:[#allocation10 + $0x28] sm:$0xff] }
 0x772   : > { %9292 = vst [vmem:[#allocation6 + $0x35] sm:$0x1] %v9284_v25  ;;  %v9682_v5 = vld [vmem:[#allocation10 + $0xb8] sm:$0xff] }
 0x773   : > { %9324 = vst [vmem:[#allocation6 + $0x36] sm:$0x1] %v9316_v6  ;;  %v8997_v54 = vmax.f32 %v8981_v40, 0.0  ;;  %9696 = vmatpush.msra.mxu0 %v9673_v41  ;;  %9741 = vmatpush.msra.mxu1 %v9685_v49  ;;  %v9509_v61 = vld [vmem:[%s16732_s26 + $0x38] sm:$0xff]  ;;  %v9663_v40 = vld [vmem:[#allocation10 + $0x20] sm:$0xff] }
 0x774   : > { %9356 = vst [vmem:[#allocation6 + $0x37] sm:$0x1] %v9348_v10  ;;  %v9502_v10 = vld [vmem:[%s16732_s26] sm:$0xff] }
 0x775   : > { %9697 = vmatpush.msra.mxu0 %v9672_v63  ;;  %9742 = vmatpush.msra.mxu1 %v9684_v57 }
 0x776   : > { %v8809_v47 = vpop.f32.mrf.mxu0 }
 0x777   : > { %v8829_v4 = vadd.f32 %v8809_v47, %v8676_v17  ;;  %v8962_v52 = vpop.f32.mrf.mxu1  ;;  %9698 = vmatpush.msra.mxu0 %v9671_v28  ;;  %v9669_v17 = vld [vmem:[#allocation10 + $0x50] sm:$0xff]  ;;  %v9505_v47 = vld [vmem:[%s16732_s26 + $0x18] sm:$0xff] }
 0x779   : > { %v8982_v19 = vadd.f32 %v8962_v52, %v8829_v4  ;;  %9699 = vmatpush.msra.mxu0 %v9670_v29  ;;  %v9667_v4 = vld [vmem:[#allocation10 + $0x40] sm:$0xff] }
 0x77a   : > { %v9683_v52 = vld [vmem:[#allocation10 + $0xc0] sm:$0xff] }
 0x77b   : > { %v8998_v46 = vmax.f32 %v8982_v19, 0.0  ;;  %v9364_v51 = vld [vmem:[#allocation6 + $0x30] sm:$0xff]  ;;  %9700 = vmatpush.msra.mxu0 %v9669_v17  ;;  %9743 = vmatpush.msra.mxu1 %v9683_v52 }
 0x77c   : > { %9438 = vmatmul.f32.gmra.mxu2 %v9364_v51  ;;  %9479 = vmatmul.f32.gmra.mxu3 %v9364_v51  ;;  %v9665_v19 = vld [vmem:[#allocation10 + $0x30] sm:$0xff] }
 0x77d   : > { %v9097_v31 = vmax.f32 %v8996_v27, %v8998_v46  ;;  %9701 = vmatpush.msra.mxu0 %v9668_v15  ;;  %v9681_v27 = vld [vmem:[#allocation10 + $0xb0] sm:$0xff]  ;;  %9744 = vmatpush.msra.mxu1 %v9682_v5  ;;  %v9507_v46 = vld [vmem:[%s16732_s26 + $0x28] sm:$0xff] }
 0x77e   : > { %v8812_v32 = vpop.f32.mrf.mxu0  ;;  %v9508_v51 = vld [vmem:[%s16732_s26 + $0x30] sm:$0xff]  ;;  %s9797_s26 = scalar_lea.hbm %s16892_s14, %s11260_s18 }
 0x77f   : > { %9100 = vst [vmem:[#allocation5 + $0x70] sm:$0xff] %v9097_v31  ;;  %v8830_v12 = vadd.f32 %v8812_v32, %v8677_v14  ;;  %v8965_v2 = vpop.f32.mrf.mxu1  ;;  %9702 = vmatpush.msra.mxu0 %v9667_v4  ;;  %9745 = vmatpush.msra.mxu1 %v9681_v27  ;;  %v9421_v14 = vpop.f32.mrf.mxu2  ;;  %v9680_v32 = vld [vmem:[#allocation10 + $0xa8] sm:$0xff]  ;;  %s9800_s22 = sshll.u32 %s9797_s26, 4  ;;  %s9801_s22 = int_to_ptr.hbm [resolvable:$true] %s9800_s22 }
 0x780   : > { %v9462_v31 = vpop.f32.mrf.mxu3  ;;  %s11430_s8 = sshra.s32 %s9801_s22, 4  ;;  %s11431_s8 = int_to_ptr.hbm [resolvable:$true] %s11430_s8 }
 0x781   : > { %v8983_v55 = vadd.f32 %v8965_v2, %v8830_v12  ;;  %9703 = vmatpush.msra.mxu0 %v9666_v44  ;;  %v9679_v12 = vld [vmem:[#allocation10 + $0xa0] sm:$0xff]  ;;  %9746 = vmatpush.msra.mxu1 %v9680_v32  ;;  %v9662_v2 = vld [vmem:[#allocation10 + $0x18] sm:$0xff]  ;;  %s11432_s17 = scalar_lea.hbm %s11431_s8, 64  ;;  %p11437_p4 = scmp.lt.s32.totalorder %s11431_s8, %s16892_s14 }
 0x782   : > { %p11433_p1 = scmp.ne.s32.totalorder %s11431_s8, %s11432_s17  ;;  %p11438_p7 = scmp.lt.s32.totalorder %s11436_s25, %s11432_s17 }
 0x783   : > { %v8999_v38 = vmax.f32 %v8983_v55, 0.0  ;;  %9704 = vmatpush.msra.mxu0 %v9665_v19  ;;  %v9678_v55 = vld [vmem:[#allocation10 + $0x98] sm:$0xff]  ;;  %9747 = vmatpush.msra.mxu1 %v9679_v12 }
 0x784   : > { %p11434_p2 = pnand %p11433_p1, %p11610_p5  ;;  %p11439_p8 = por %p11438_p7, %p11437_p4 }
 0x785   : > { %v9098_v48 = vmax.f32 %v8997_v54, %v8999_v38  ;;  %9705 = vmatpush.msra.mxu0 %v9664_v22  ;;  %v9661_v54 = vld [vmem:[#allocation10 + $0x10] sm:$0xff]  ;;  %9748 = vmatpush.msra.mxu1 %v9678_v55 }
 0x786   : > { %v9109_v39 = vld [vmem:[#allocation5 + $0x70] sm:$0x1]  ;;  %v9117_v36 = vld [vmem:[#allocation5 + $0x71] sm:$0x1]  ;;  %v9141_v33 = vld [vmem:[#allocation5 + $0x72] sm:$0x1]  ;;  %p11435_p3 = pneg %p11434_p2 }
 0x787   : > { %9101 = vst [vmem:[#allocation5 + $0x78] sm:$0xff] %v9098_v48  ;;  %v9125_v30 = vmax.f32 %v9109_v39, %v9117_v36  ;;  %v9149_v9 = vld [vmem:[#allocation5 + $0x73] sm:$0x1]  ;;  %v9173_v1 = vld [vmem:[#allocation5 + $0x74] sm:$0x1]  ;;  %9706 = vmatpush.msra.mxu0 %v9663_v40  ;;  %v9660_v48 = vld [vmem:[#allocation10 + $0x8] sm:$0xff]  ;;  %v9424_v39 = vpop.f32.mrf.mxu2 }
 0x788   : > { %v9157_v59 = vmax.f32 %v9141_v33, %v9149_v9  ;;  %v9181_v42 = vld [vmem:[#allocation5 + $0x75] sm:$0x1]  ;;  %v9205_v26 = vld [vmem:[#allocation5 + $0x76] sm:$0x1]  ;;  %v9213_v56 = vld [vmem:[#allocation5 + $0x77] sm:$0x1]  ;;  %v9465_v36 = vpop.f32.mrf.mxu3  ;;  %p11440_p9 = pnand %p11439_p8, %p11435_p3 }
 0x789   : > { %9133 = vst [vmem:[#allocation6 + $0x38] sm:$0x1] %v9125_v30  ;;  %v9189_v60 = vmax.f32 %v9173_v1, %v9181_v42  ;;  %v9221_v3 = vmax.f32 %v9205_v26, %v9213_v56  ;;  %9707 = vmatpush.msra.mxu0 %v9662_v2  ;;  %v9677_v38 = vld [vmem:[#allocation10 + $0x90] sm:$0xff]  ;;  %v9659_v42 = vld [vmem:[#allocation10] sm:$0xff] }
 0x78a   : > { %9165 = vst [vmem:[#allocation6 + $0x39] sm:$0x1] %v9157_v59  ;;  %9749 = vmatpush.msra.mxu1 %v9677_v38  ;;  %v9676_v59 = vld [vmem:[#allocation10 + $0x88] sm:$0xff] }
 0x78b   : > { %9197 = vst [vmem:[#allocation6 + $0x3a] sm:$0x1] %v9189_v60  ;;  %9708 = vmatpush.msra.mxu0 %v9661_v54  ;;  %v9675_v60 = vld [vmem:[#allocation10 + $0x80] sm:$0xff] }
 0x78c   : > { %9229 = vst [vmem:[#allocation6 + $0x3b] sm:$0x1] %v9221_v3  ;;  %9750 = vmatpush.msra.mxu1 %v9676_v59 }
 0x78d   : > { %9709 = vmatpush.msra.mxu0 %v9660_v48 }
 0x78e   : > { %v9237_v8 = vld [vmem:[#allocation5 + $0x78] sm:$0x1]  ;;  %v9245_v53 = vld [vmem:[#allocation5 + $0x79] sm:$0x1]  ;;  %v9269_v20 = vld [vmem:[#allocation5 + $0x7a] sm:$0x1]  ;;  %9751 = vmatpush.msra.mxu1 %v9675_v60 }
 0x78f   : > { %v9253_v43 = vmax.f32 %v9237_v8, %v9245_v53  ;;  %v9277_v24 = vld [vmem:[#allocation5 + $0x7b] sm:$0x1]  ;;  %v9301_v58 = vld [vmem:[#allocation5 + $0x7c] sm:$0x1]  ;;  %v9309_v21 = vld [vmem:[#allocation5 + $0x7d] sm:$0x1]  ;;  %v9427_v33 = vpop.f32.mrf.mxu2  ;;  %9710 = vmatpush.msra.mxu0 %v9659_v42 }
 0x790   : > { %v9285_v0 = vmax.f32 %v9269_v20, %v9277_v24  ;;  %v9317_v25 = vmax.f32 %v9301_v58, %v9309_v21  ;;  %v9333_v6 = vld [vmem:[#allocation5 + $0x7e] sm:$0x1]  ;;  %v9341_v34 = vld [vmem:[#allocation5 + $0x7f] sm:$0x1]  ;;  %v9468_v30 = vpop.f32.mrf.mxu3  ;;  %v9398_v53 = vld [vmem:[%s16887_s9] sm:$0x3] }
 0x791   : > { %9261 = vst [vmem:[#allocation6 + $0x3c] sm:$0x1] %v9253_v43  ;;  %v9349_v37 = vmax.f32 %v9333_v6, %v9341_v34  ;;  %v9514_v24 = vld [vmem:[%s16889_s11] sm:$0x3]  ;;  %v16780_v58 = vperm.slane %v9398_v53, 0  ;;  %v16782_v21 = vperm.slane %v9398_v53, 1 }
 0x792   : > { %9293 = vst [vmem:[#allocation6 + $0x3d] sm:$0x1] %v9285_v0  ;;  %v16784_v0 = vperm.slane %v9514_v24, 0 }
 0x793   : > { %9325 = vst [vmem:[#allocation6 + $0x3e] sm:$0x1] %v9317_v25  ;;  %v16786_v25 = vperm.slane %v9514_v24, 1  ;;  %v9422_v6 = vadd.f32 %v9421_v14, %v16780_v58  ;;  %v9463_v34 = vadd.f32 %v9462_v31, %v16782_v21  ;;  %v9425_v29 = vadd.f32 %v9424_v39, %v16780_v58 }
 0x794   : > { %9357 = vst [vmem:[#allocation6 + $0x3f] sm:$0x1] %v9349_v37  ;;  %v9466_v23 = vadd.f32 %v9465_v36, %v16782_v21  ;;  %v9428_v5 = vadd.f32 %v9427_v33, %v16780_v58  ;;  %v9469_v19 = vadd.f32 %v9468_v30, %v16782_v21 }
 0x795   : > { %v9486_v63 = vmax.f32 %v9422_v6, 0.0  ;;  %v9488_v15 = vmax.f32 %v9425_v29, 0.0 }
 0x796   : > { %v9491_v14 = vmax.f32 %v9469_v19, 0.0 }
 0x797   : > { %v9430_v9 = vpop.f32.mrf.mxu2 }
 0x798   : > { %v9471_v1 = vpop.f32.mrf.mxu3  ;;  %v9431_v2 = vadd.f32 %v9430_v9, %v16780_v58 }
 0x799   : > { %v9472_v55 = vadd.f32 %v9471_v1, %v16782_v21 }
 0x79a   : > { %v9492_v36 = vmax.f32 %v9431_v2, 0.0 }
 0x79b   : > { %v9365_v35 = vld [vmem:[#allocation6 + $0x38] sm:$0xff]  ;;  %v9493_v33 = vmax.f32 %v9472_v55, 0.0 }
 0x79c   : > { %9441 = vmatmul.f32.gmra.mxu2 %v9365_v35  ;;  %9482 = vmatmul.f32.gmra.mxu3 %v9365_v35 }
 0x7a4   : > { %11239 = vmatmul.msk.f32.vlgmr.msrb.gmra.mxu2 %vm9520_vm6, %v9502_v10  ;;  %11247 = vmatmul.msk.f32.vlgmr.msrb.gmra.mxu3 %vm9520_vm6, %v9502_v10  ;;  %v9487_v10 = vmax.f32 %v9463_v34, 0.0 }
 0x7ac   : > { %11240 = vmatmul.msk.f32.gmra.mxu2 %vm9520_vm6, %v9503_v62  ;;  %11248 = vmatmul.msk.f32.gmra.mxu3 %vm9520_vm6, %v9503_v62 }
 0x7b4   : > { %11241 = vmatmul.msk.f32.gmra.mxu2 %vm9520_vm6, %v9504_v18  ;;  %11249 = vmatmul.msk.f32.gmra.mxu3 %vm9520_vm6, %v9504_v18 }
 0x7bc   : > { %11242 = vmatmul.msk.f32.gmra.mxu2 %vm9520_vm6, %v9505_v47  ;;  %11250 = vmatmul.msk.f32.gmra.mxu3 %vm9520_vm6, %v9505_v47 }
 0x7bf   : > { %v16758_v26 = vpop.f32.mrf.mxu2  ;;  %v16760_v56 = vpop.f32.mrf.mxu3 }
 0x7c0   : > { %v9434_v53 = vadd.f32 %v16758_v26, %v16780_v58  ;;  %v9475_v9 = vadd.f32 %v16760_v56, %v16782_v21 }
 0x7c4   : > { %11243 = vmatmul.msk.f32.gmra.mxu2 %vm9520_vm6, %v9506_v7  ;;  %11251 = vmatmul.msk.f32.gmra.mxu3 %vm9520_vm6, %v9506_v7  ;;  %v9489_v7 = vmax.f32 %v9466_v23, 0.0 }
 0x7cc   : > { %11244 = vmatmul.msk.f32.gmra.mxu2 %vm9520_vm6, %v9507_v46  ;;  %11252 = vmatmul.msk.f32.gmra.mxu3 %vm9520_vm6, %v9507_v46 }
 0x7d4   : > { %11245 = vmatmul.msk.f32.gmra.mxu2 %vm9520_vm6, %v9508_v51  ;;  %11253 = vmatmul.msk.f32.gmra.mxu3 %vm9520_vm6, %v9508_v51 }
 0x7dc   : > { %11246 = vmatmul.msk.f32.gmra.mxu2 %vm9520_vm6, %v9509_v61  ;;  %11254 = vmatmul.msk.f32.gmra.mxu3 %vm9520_vm6, %v9509_v61  ;;  %v9490_v61 = vmax.f32 %v9428_v5, 0.0 }
 0x7df   : > { %v16762_v3 = vpop.f32.mrf.mxu2  ;;  %v16764_v13 = vpop.f32.mrf.mxu3 }
 0x7e0   : > { %v9437_v26 = vadd.f32 %v16762_v3, %v16780_v58  ;;  %v9478_v56 = vadd.f32 %v16764_v13, %v16782_v21 }
 0x7e2   : > { %v9496_v29 = vmax.f32 %v9437_v26, 0.0  ;;  %v9497_v23 = vmax.f32 %v9478_v56, 0.0 }
 0x7ff   : > { %v16766_v16 = vpop.f32.mrf.mxu2  ;;  %v16768_v8 = vpop.f32.mrf.mxu3 }
 0x800   : > { %v9440_v3 = vadd.f32 %v16766_v16, %v16780_v58  ;;  %v9481_v13 = vadd.f32 %v16768_v8, %v16782_v21 }
 0x81f   : > { %v16773_v20 = vpop.f32.mrf.mxu2  ;;  %v16775_v43 = vpop.f32.mrf.mxu3 }
 0x820   : > { %v9443_v16 = vadd.f32 %v16773_v20, %v16780_v58  ;;  %v9484_v8 = vadd.f32 %v16775_v43, %v16782_v21  ;;  %v11337_v20 = vld [vmem:[%s16891_s13] ss:$0 sm:$0xff] }
 0x827   : > { %v9562_v37 = vpop.f32.mrf.mxu2  ;;  %v9603_v41 = vpop.f32.mrf.mxu3 }
 0x828   : > { %v9563_v45 = vadd.f32 %v9562_v37, %v16784_v0  ;;  %v9604_v35 = vadd.f32 %v9603_v41, %v16786_v25  ;;  %v9494_v37 = vmax.f32 %v9434_v53, 0.0  ;;  %v9495_v41 = vmax.f32 %v9475_v9, 0.0 }
 0x82a   : > { %v9627_v50 = vmax.f32 %v9563_v45, 0.0  ;;  %v9628_v28 = vmax.f32 %v9604_v35, 0.0 }
 0x82c   : > { %v9643_v11 = vadd.f32 %v9627_v50, %v9486_v63  ;;  %v9644_v62 = vadd.f32 %v9628_v28, %v9487_v10 }
 0x82e   : > { %9711 = vmatmul.f32.vlgmr.msra.gmra.mxu0 %v9643_v11  ;;  %9752 = vmatmul.f32.vlgmr.msra.gmra.mxu1 %v9644_v62 }
 0x82f   : > { %v9565_v18 = vpop.f32.mrf.mxu2  ;;  %v9606_v17 = vpop.f32.mrf.mxu3 }
 0x830   : > { %v9566_v49 = vadd.f32 %v9565_v18, %v16784_v0  ;;  %v9607_v47 = vadd.f32 %v9606_v17, %v16786_v25 }
 0x832   : > { %v9629_v57 = vmax.f32 %v9566_v49, 0.0  ;;  %v9630_v4 = vmax.f32 %v9607_v47, 0.0 }
 0x834   : > { %v9645_v52 = vadd.f32 %v9629_v57, %v9488_v15  ;;  %v9646_v44 = vadd.f32 %v9630_v4, %v9489_v7 }
 0x836   : > { %9714 = vmatmul.f32.gmra.mxu0 %v9645_v52  ;;  %9755 = vmatmul.f32.gmra.mxu1 %v9646_v44  ;;  %v9498_v52 = vmax.f32 %v9440_v3, 0.0  ;;  %v9499_v44 = vmax.f32 %v9481_v13, 0.0 }
 0x837   : > { %v9568_v27 = vpop.f32.mrf.mxu2  ;;  %v9609_v22 = vpop.f32.mrf.mxu3 }
 0x838   : > { %v9569_v46 = vadd.f32 %v9568_v27, %v16784_v0  ;;  %v9610_v51 = vadd.f32 %v9609_v22, %v16786_v25 }
 0x83a   : > { %v9631_v31 = vmax.f32 %v9569_v46, 0.0  ;;  %v9632_v32 = vmax.f32 %v9610_v51, 0.0 }
 0x83c   : > { %v9647_v40 = vadd.f32 %v9631_v31, %v9490_v61  ;;  %v9648_v12 = vadd.f32 %v9632_v32, %v9491_v14  ;;  %v9500_v31 = vmax.f32 %v9443_v16, 0.0  ;;  %v9501_v32 = vmax.f32 %v9484_v8, 0.0 }
 0x83e   : > { %9717 = vmatmul.f32.gmra.mxu0 %v9647_v40  ;;  %9758 = vmatmul.f32.gmra.mxu1 %v9648_v12 }
 0x83f   : > { %v9571_v54 = vpop.f32.mrf.mxu2  ;;  %v9612_v38 = vpop.f32.mrf.mxu3 }
 0x840   : > { %v9572_v48 = vadd.f32 %v9571_v54, %v16784_v0  ;;  %v9613_v39 = vadd.f32 %v9612_v38, %v16786_v25 }
 0x842   : > { %v9633_v30 = vmax.f32 %v9572_v48, 0.0  ;;  %v9634_v59 = vmax.f32 %v9613_v39, 0.0 }
 0x844   : > { %v9649_v42 = vadd.f32 %v9633_v30, %v9492_v36  ;;  %v9650_v60 = vadd.f32 %v9634_v59, %v9493_v33 }
 0x846   : > { %9720 = vmatmul.f32.gmra.mxu0 %v9649_v42  ;;  %9761 = vmatmul.f32.gmra.mxu1 %v9650_v60 }
 0x847   : > { %v9574_v1 = vpop.f32.mrf.mxu2  ;;  %v9615_v24 = vpop.f32.mrf.mxu3 }
 0x848   : > { %v9575_v6 = vadd.f32 %v9574_v1, %v16784_v0  ;;  %v9616_v34 = vadd.f32 %v9615_v24, %v16786_v25 }
 0x84a   : > { %v9635_v45 = vmax.f32 %v9575_v6, 0.0  ;;  %v9636_v35 = vmax.f32 %v9616_v34, 0.0 }
 0x84c   : > { %v9651_v63 = vadd.f32 %v9635_v45, %v9494_v37  ;;  %v9652_v10 = vadd.f32 %v9636_v35, %v9495_v41 }
 0x84e   : > { %9723 = vmatmul.f32.gmra.mxu0 %v9651_v63  ;;  %9764 = vmatmul.f32.gmra.mxu1 %v9652_v10 }
 0x84f   : > { %v9577_v50 = vpop.f32.mrf.mxu2  ;;  %v9618_v28 = vpop.f32.mrf.mxu3 }
 0x850   : > { %v9578_v11 = vadd.f32 %v9577_v50, %v16784_v0  ;;  %v9619_v62 = vadd.f32 %v9618_v28, %v16786_v25 }
 0x852   : > { %v9637_v18 = vmax.f32 %v9578_v11, 0.0  ;;  %v9638_v17 = vmax.f32 %v9619_v62, 0.0 }
 0x854   : > { %v9653_v49 = vadd.f32 %v9637_v18, %v9496_v29  ;;  %v9654_v47 = vadd.f32 %v9638_v17, %v9497_v23 }
 0x856   : > { %9726 = vmatmul.f32.gmra.mxu0 %v9653_v49  ;;  %9767 = vmatmul.f32.gmra.mxu1 %v9654_v47 }
 0x857   : > { %v9580_v15 = vpop.f32.mrf.mxu2  ;;  %v9621_v7 = vpop.f32.mrf.mxu3 }
 0x858   : > { %v9581_v57 = vadd.f32 %v9580_v15, %v16784_v0  ;;  %v9622_v4 = vadd.f32 %v9621_v7, %v16786_v25 }
 0x85a   : > { %v9639_v5 = vmax.f32 %v9581_v57, 0.0  ;;  %v9640_v19 = vmax.f32 %v9622_v4, 0.0 }
 0x85c   : > { %v9655_v27 = vadd.f32 %v9639_v5, %v9498_v52  ;;  %v9656_v22 = vadd.f32 %v9640_v19, %v9499_v44 }
 0x85e   : > { %9729 = vmatmul.f32.gmra.mxu0 %v9655_v27  ;;  %9770 = vmatmul.f32.gmra.mxu1 %v9656_v22 }
 0x85f   : > { %v9583_v46 = vpop.f32.mrf.mxu2  ;;  %v9624_v51 = vpop.f32.mrf.mxu3 }
 0x860   : > { %v9584_v61 = vadd.f32 %v9583_v46, %v16784_v0  ;;  %v9625_v14 = vadd.f32 %v9624_v51, %v16786_v25 }
 0x862   : > { %v9641_v40 = vmax.f32 %v9584_v61, 0.0  ;;  %v9642_v12 = vmax.f32 %v9625_v14, 0.0 }
 0x864   : > { %v9657_v2 = vadd.f32 %v9641_v40, %v9500_v31  ;;  %v9658_v55 = vadd.f32 %v9642_v12, %v9501_v32 }
 0x866   : > { %9732 = vmatmul.f32.gmra.mxu0 %v9657_v2  ;;  %9773 = vmatmul.f32.gmra.mxu1 %v9658_v55 }
 0x8ab   : > { %v9712_v43 = vpop.f32.mrf.mxu0  ;;  %v9753_v58 = vpop.f32.mrf.mxu1 }
 0x8ac   : > { %v9713_v21 = vadd.f32 %v11337_v20, %v9712_v43 }
 0x8ae   : > { %v9754_v0 = vadd.f32 %v9753_v58, %v9713_v21 }
 0x8b0   : > { %9777 = vst [vmem:[%s16834_s28] sm:$0xff] %v9754_v0 }
 0x8b3   : > { %v9715_v25 = vpop.f32.mrf.mxu0  ;;  %v9756_v54 = vpop.f32.mrf.mxu1 }
 0x8b4   : > { %v9716_v38 = vadd.f32 %v11337_v20, %v9715_v25 }
 0x8b6   : > { %v9757_v48 = vadd.f32 %v9756_v54, %v9716_v38 }
 0x8b8   : > { %9778 = vst [vmem:[%s16834_s28 + $0x8] sm:$0xff] %v9757_v48 }
 0x8bb   : > { %v9718_v39 = vpop.f32.mrf.mxu0  ;;  %v9759_v36 = vpop.f32.mrf.mxu1 }
 0x8bc   : > { %v9719_v33 = vadd.f32 %v11337_v20, %v9718_v39 }
 0x8be   : > { %v9760_v30 = vadd.f32 %v9759_v36, %v9719_v33 }
 0x8c0   : > { %9779 = vst [vmem:[%s16834_s28 + $0x10] sm:$0xff] %v9760_v30 }
 0x8c3   : > { %v9721_v59 = vpop.f32.mrf.mxu0  ;;  %v9762_v42 = vpop.f32.mrf.mxu1 }
 0x8c4   : > { %v9722_v60 = vadd.f32 %v11337_v20, %v9721_v59 }
 0x8c6   : > { %v9763_v53 = vadd.f32 %v9762_v42, %v9722_v60 }
 0x8c8   : > { %9780 = vst [vmem:[%s16834_s28 + $0x18] sm:$0xff] %v9763_v53 }
 0x8cb   : > { %v9724_v9 = vpop.f32.mrf.mxu0  ;;  %v9765_v1 = vpop.f32.mrf.mxu1 }
 0x8cc   : > { %v9725_v24 = vadd.f32 %v11337_v20, %v9724_v9 }
 0x8ce   : > { %v9766_v6 = vadd.f32 %v9765_v1, %v9725_v24 }
 0x8d0   : > { %9781 = vst [vmem:[%s16834_s28 + $0x20] sm:$0xff] %v9766_v6 }
 0x8d3   : > { %v9727_v34 = vpop.f32.mrf.mxu0  ;;  %v9768_v37 = vpop.f32.mrf.mxu1 }
 0x8d4   : > { %v9728_v41 = vadd.f32 %v11337_v20, %v9727_v34 }
 0x8d6   : > { %v9769_v45 = vadd.f32 %v9768_v37, %v9728_v41 }
 0x8d8   : > { %9782 = vst [vmem:[%s16834_s28 + $0x28] sm:$0xff] %v9769_v45 }
 0x8db   : > { %v9730_v35 = vpop.f32.mrf.mxu0  ;;  %v9771_v63 = vpop.f32.mrf.mxu1 }
 0x8dc   : > { %v9731_v10 = vadd.f32 %v11337_v20, %v9730_v35 }
 0x8de   : > { %v9772_v26 = vadd.f32 %v9771_v63, %v9731_v10 }
 0x8e0   : > { %9783 = vst [vmem:[%s16834_s28 + $0x30] sm:$0xff] %v9772_v26 }
 0x8e3   : > { %v9733_v56 = vpop.f32.mrf.mxu0  ;;  %v9774_v28 = vpop.f32.mrf.mxu1 }
 0x8e4   : > { %v9734_v50 = vadd.f32 %v11337_v20, %v9733_v56 }
 0x8e6   : > { %v9775_v11 = vadd.f32 %v9774_v28, %v9734_v50 }
 0x8e8   : > { %9784 = vst [vmem:[%s16834_s28 + $0x38] sm:$0xff] %v9775_v11 }
 0x8e9   : > { %11443 = shalt.err (!%p11440_p9)
}
 0x8ea   : > { %s11495_s15 = smov 128   ;;  %s11496_s28 = smov 8  }
 0x8eb   : > { %11272 = dma.vmem_to_hbm [thread:$0]  (%p11610_p5), %s9799_s27, 1024, %s9801_s22, %s9786_s29, %s11495_s15, %s11495_s15, %s11496_s28  }
 0x8ec PF: > { %s17224_s21 = sld [smem:[#allocation16_spill]]  ;;  %p11289_p10 = scmp.ge.s32.totalorder %s11486_s16, 2 }
 0x8ee   : > { %p11282_p11 = pnand %p11289_p10, %p11614_p6 }
 0x8f0   : > { %p11283_p12 = pneg %p11282_p11 }
 0x8f2   : > { %s9815_s19 = sand.u32 1, %s17224_s21  }
 0x8f3   : > { %s9816_s24 = scalar_lea.sflag [#allocation9], %s9815_s19 }
 0x8f4   : > { %11469 = dma.done.wait (%p11283_p12), %s9816_s24, 1024  }
 0x8f5   : > { %11471 = vsyncadd (%p11283_p12), %s9816_s24, 4294966272  ;;  %s17226_s16 = sld [smem:[#allocation18_spill]]  ;;  %s17229_s29 = smov %s11478_s30 }
 0x8f6   : > { %s17227_s8 = sld [smem:[#allocation17_spill]] }
 0x8f7   : > { %s17228_s15 = sld [smem:[#allocation19_spill]] }
 0x8fb   : > { %p26_p13 = scmp.ge.s32.totalorder %s17226_s16, 4  }
 0x8fc   : > { %s17230_s30 = smov %s17227_s8 }
 0x8fd   :  { %28 = sbr.rel (!%p26_p13) target bundleno = 7 (0x7), region = 184 }
 0x902   :  { %9822 = vsyncpa [#allocation8], 1 }
 0x903   :  { %9824 = vsyncpa [#allocation8 + $0x1], 1 }
 0x904   :  { %9825 = vsyncpa [#allocation11], 1 }
 0x905   :  { %9826 = vsyncpa [#allocation9], 1 }
 0x906   :  { %9828 = vsyncpa [#allocation9 + $0x1], 1 }

</bundles_post_ra>
